<compile_context>
chip_gen: v7x
topology: tpu7x:2x2x1
jax: 0.10.0
libtpu: 0.0.40
codegen_flags: <defaults>
</compile_context>

<pallas_src>
import functools
import math

import jax
import jax.numpy as jnp
from jax.experimental import pallas as pl
from jax.experimental.pallas import tpu as pltpu

# ----------------------------- config ---------------------------------------
STATE_DIM = 6
ACTION_DIM = 4
DIN = STATE_DIM + ACTION_DIM          # fused encoder input width
N_EMBD = 32
N_HEAD = 4
N_LAYER = 2
BLOCK_SIZE = 16
NUM_ACTIONS = 7                       # t
SEQ_LEN = 1 + NUM_ACTIONS             # T = 1 + t
USE_LAYER_NORM = True
RELATIVE_POS = False
LN_EPS = 1e-5
HEAD_DIM = N_EMBD // N_HEAD

# vec_c row layout (all C-wide f32 vectors packed into one array)
#   per layer l : base = 6*l : [ln1_w, ln1_b, ln2_w, ln2_b, b_proj, b_fc2]
#   row 6L = lnf_w ; row 6L+1 = lnf_b ; row 6L+2 = w_out (as a row vector)
_N_VEC = 6 * N_LAYER + 3


# ----------------------------- in-kernel helpers ------------------------------
def _erf_poly(z):
    # Abramowitz & Stegun 7.1.26, |err| <= 1.5e-7.  Uses only exp / mul / add /
    # div / where, so it never depends on an erf lowering inside Mosaic.
    a1, a2, a3, a4, a5 = (0.254829592, -0.284496736, 1.421413741,
                          -1.453152027, 1.061405429)
    p = 0.3275911
    az = jnp.abs(z)
    t = 1.0 / (1.0 + p * az)
    poly = ((((a5 * t + a4) * t + a3) * t + a2) * t + a1) * t
    e = 1.0 - poly * jnp.exp(-az * az)
    return jnp.where(z >= 0, e, -e)


def _gelu_exact(x):
    # nn.GELU() default = exact erf GELU.
    return 0.5 * x * (1.0 + _erf_poly(x * (1.0 / math.sqrt(2.0))))


# ----------------------------- kernel ---------------------------------------
def gpt_kernel(bt,
               tok_ref, pos_ref, bias_ref,
               w_enc_ref, vec_ref,
               w_qkv_ref, b_qkv_ref, w_proj_ref,
               w_fc_ref, b_fc_ref, w_fc2_ref,
               out_ref):
    C, H, hd, T, L = N_EMBD, N_HEAD, HEAD_DIM, SEQ_LEN, N_LAYER
    M = bt * T
    f32, bf16 = jnp.float32, jnp.bfloat16

    def layer_norm(x, w, b):
        mu = jnp.mean(x, axis=-1, keepdims=True)
        var = jnp.mean((x - mu) ** 2, axis=-1, keepdims=True)
        return (x - mu) * jax.lax.rsqrt(var + LN_EPS) * w + b

    # --- fused state/action encoder: one (M, DIN) x (DIN, C) bf16 matmul ---
    tok = tok_ref[...].reshape(M, DIN).astype(bf16)
    x = jnp.dot(tok, w_enc_ref[...], preferred_element_type=f32)
    x = x + pos_ref[...].reshape(M, C)             # + pos emb (dropout = identity)

    inv_sqrt_hd = 1.0 / math.sqrt(hd)

    for l in range(L):                             # static unroll over layers
        # ---------------- causal self-attention ----------------
        h_in = layer_norm(x, vec_ref[6 * l + 0], vec_ref[6 * l + 1]) if USE_LAYER_NORM else x
        # fused QKV projection for ALL heads: (M, C) x (C, 3C), bf16 -> f32 acc
        qkv = jnp.dot(h_in.astype(bf16), w_qkv_ref[l],
                      preferred_element_type=f32) + b_qkv_ref[l]

        heads = []
        for hh in range(H):                        # static unroll over heads (H=4)
            qh = qkv[:, 0 * C + hh * hd: 0 * C + (hh + 1) * hd] * inv_sqrt_hd
            kh = qkv[:, 1 * C + hh * hd: 1 * C + (hh + 1) * hd]
            vh = qkv[:, 2 * C + hh * hd: 2 * C + (hh + 1) * hd].astype(bf16)
            # (M, M) score matmul (K=8, kept f32 for accuracy).  Block-diagonal
            # (same batch element) + causal masking via a precomputed ADDITIVE
            # f32 bias streamed from VMEM at each use (no live bool mask).
            s = jnp.einsum('md,nd->mn', qh, kh,
                           preferred_element_type=f32) + bias_ref[...]
            s = s - jnp.max(s, axis=-1, keepdims=True)
            p = jnp.exp(s)
            p = p * pl.reciprocal(jnp.sum(p, axis=-1, keepdims=True), approx=True)
            heads.append(jnp.dot(p.astype(bf16), vh, preferred_element_type=f32))

        # fold all heads through a single c_proj matmul
        y = jnp.concatenate(heads, axis=-1)        # (M, C)
        attn = jnp.dot(y.astype(bf16), w_proj_ref[l],
                       preferred_element_type=f32) + vec_ref[6 * l + 4]
        x = x + attn

        # ---------------- MLP ----------------
        h2 = layer_norm(x, vec_ref[6 * l + 2], vec_ref[6 * l + 3]) if USE_LAYER_NORM else x
        m = jnp.dot(h2.astype(bf16), w_fc_ref[l],
                    preferred_element_type=f32) + b_fc_ref[l]
        m = _gelu_exact(m)
        m = jnp.dot(m.astype(bf16), w_fc2_ref[l],
                    preferred_element_type=f32) + vec_ref[6 * l + 5]
        x = x + m

    if USE_LAYER_NORM:
        x = layer_norm(x, vec_ref[6 * L + 0], vec_ref[6 * L + 1])

    # --- output head: (1, C) x (M, C)^T matmul -> lane-dense (1, M) row ---
    w_out_row = vec_ref[6 * L + 2: 6 * L + 3, :]                    # (1, C)
    q_row = jax.lax.dot_general(w_out_row, x,
                                dimension_numbers=(((1,), (1,)), ((), ())),
                                preferred_element_type=f32)         # (1, M)
    out_ref[...] = q_row.reshape(1, 1, M)


# ----------------------------- wrapper ---------------------------------------
def _full_spec(shape):
    nd = len(shape)
    return pl.BlockSpec(shape, lambda g, _z=(0,) * nd: _z)


def _pick_batch_tile(batch):
    """Per-generation batch tile: 16 (M=128) default / v5e; 32 on v6e/v7x when
    the batch is big enough; on v7x only if that still yields >=2 grid steps so
    dimension_semantics=('parallel',) keeps both TensorCores busy."""
    kind = ""
    try:
        kind = jax.devices()[0].device_kind.lower()
    except Exception:  # pragma: no cover - defensive
        pass
    bt = 16
    if ("v6" in kind or "v7" in kind) and batch > 16:
        bt = 32
        if "v7" in kind and (batch + 31) // 32 < 2:
            bt = 16
    return bt


def _pack_params(params):
    """Re-layout natural (torch-like) params into the packed kernel layout.
    Matmul weights are pre-cast to bf16 (MXU operands); biases / LN params stay f32."""
    bf16, f32 = jnp.bfloat16, jnp.float32
    w_enc = jnp.concatenate([params["w_se"], params["w_ae"]], axis=0).astype(bf16)   # (DIN, C)

    vec_rows = []
    for l in range(N_LAYER):
        vec_rows += [params["ln1_w"][l], params["ln1_b"][l],
                     params["ln2_w"][l], params["ln2_b"][l],
                     params["b_proj"][l], params["b_fc2"][l]]
    vec_rows += [params["lnf_w"], params["lnf_b"], params["w_out"][:, 0]]
    vec_c = jnp.stack(vec_rows, axis=0).astype(f32)                                  # (6L+3, C)

    return dict(
        w_enc=w_enc,
        vec_c=vec_c,
        w_qkv=params["w_qkv"].astype(bf16),        # (L, C, 3C)  fused q|k|v
        b_qkv=params["b_qkv"].astype(f32),         # (L, 3C)
        w_proj=params["w_proj"].astype(bf16),      # (L, C, C)
        w_fc=params["w_fc"].astype(bf16),          # (L, C, 4C)
        b_fc=params["b_fc"].astype(f32),           # (L, 4C)
        w_fc2=params["w_fc2"].astype(bf16),        # (L, 4C, C)
    )


def trajectory_q_forward(params, d_state, c_state, actions, idx_d, idx_c, idx_a):
    """Mirrors TrajectoryQfunctionGPT.forward (eval mode). d_state / idx_d are
    accepted but unused, exactly as in the PyTorch forward."""
    del d_state, idx_d
    B = c_state.shape[0]
    t = actions.shape[-2]
    T = 1 + t
    assert T == SEQ_LEN and t + 2 <= BLOCK_SIZE
    C = N_EMBD

    # --- glue: positional indices + nn.Embedding gather (wrapper side) ---
    seq_pos = jnp.concatenate([idx_c[..., None], idx_a], axis=-1).astype(jnp.int32)  # (B, T)
    if RELATIVE_POS:
        seq_pos = jnp.broadcast_to(jnp.arange(T, dtype=jnp.int32)[None], (B, T))
    # TODO(synk): nn.Embedding raises on out-of-range indices; here they are clamped.
    seq_pos = jnp.clip(seq_pos, 0, BLOCK_SIZE - 1)
    pos_emb = jnp.take(params["pos_table"], seq_pos, axis=0)                         # (B, T, C)

    # --- fused encoder token tensor: row0=[c_state|0], rows 1..t=[0|action] ---
    row0 = jnp.concatenate([c_state[:, None, :].astype(jnp.float32),
                            jnp.zeros((B, 1, ACTION_DIM), jnp.float32)], axis=-1)
    rows = jnp.concatenate([jnp.zeros((B, t, STATE_DIM), jnp.float32),
                            actions.astype(jnp.float32)], axis=-1)
    tok = jnp.concatenate([row0, rows], axis=1)                                      # (B, T, DIN)

    BT = _pick_batch_tile(B)
    G = (B + BT - 1) // BT
    Bp = G * BT
    M = BT * T
    if Bp != B:
        tok = jnp.pad(tok, ((0, Bp - B), (0, 0), (0, 0)))
        pos_emb = jnp.pad(pos_emb, ((0, Bp - B), (0, 0), (0, 0)))

    # --- additive attention bias: 0 inside same-sample causal block, -1e30 outside ---
    r = jnp.arange(M, dtype=jnp.int32)
    same_sample = (r[:, None] // T) == (r[None, :] // T)
    causal = (r[:, None] % T) >= (r[None, :] % T)
    attn_bias = jnp.where(same_sample & causal, 0.0, -1e30).astype(jnp.float32)      # (M, M)

    p = _pack_params(params)
    kernel = functools.partial(gpt_kernel, BT)

    out = pl.pallas_call(
        kernel,
        out_shape=jax.ShapeDtypeStruct((G, 1, M), jnp.float32),
        grid=(G,),
        in_specs=[
            pl.BlockSpec((BT, T, DIN), lambda g: (g, 0, 0)),
            pl.BlockSpec((BT, T, C), lambda g: (g, 0, 0)),
            _full_spec((M, M)),
            _full_spec(p["w_enc"].shape),
            _full_spec(p["vec_c"].shape),
            _full_spec(p["w_qkv"].shape),
            _full_spec(p["b_qkv"].shape),
            _full_spec(p["w_proj"].shape),
            _full_spec(p["w_fc"].shape),
            _full_spec(p["b_fc"].shape),
            _full_spec(p["w_fc2"].shape),
        ],
        out_specs=pl.BlockSpec((1, 1, M), lambda g: (g, 0, 0)),
        compiler_params=pltpu.CompilerParams(dimension_semantics=("parallel",)),
    )(
        tok, pos_emb, attn_bias,
        p["w_enc"], p["vec_c"], p["w_qkv"], p["b_qkv"], p["w_proj"],
        p["w_fc"], p["b_fc"], p["w_fc2"],
    )
    return out.reshape(Bp, T)[:B]                                                    # (B, T)


# ----------------------------- params ----------------------------------------
def init_params(key):
    """Deterministic synthetic init mirroring _init_weights:
    Linear/Embedding weights ~ N(0, 0.02), biases 0, LayerNorm w=1 b=0,
    every *.c_proj.weight ~ N(0, 0.02/sqrt(2*n_layer)).  Stored in x @ W layout."""
    C, L = N_EMBD, N_LAYER
    std = 0.02
    std_proj = 0.02 / math.sqrt(2 * L)
    ks = jax.random.split(key, 8)
    n = lambda k, shp, s: s * jax.random.normal(k, shp, jnp.float32)
    return dict(
        w_se=n(ks[0], (STATE_DIM, C), std),
        w_ae=n(ks[1], (ACTION_DIM, C), std),
        pos_table=n(ks[2], (BLOCK_SIZE, C), std),
        ln1_w=jnp.ones((L, C), jnp.float32),
        ln1_b=jnp.zeros((L, C), jnp.float32),
        w_qkv=n(ks[3], (L, C, 3 * C), std),
        b_qkv=jnp.zeros((L, 3 * C), jnp.float32),
        w_proj=n(ks[4], (L, C, C), std_proj),        # attn.c_proj
        b_proj=jnp.zeros((L, C), jnp.float32),
        ln2_w=jnp.ones((L, C), jnp.float32),
        ln2_b=jnp.zeros((L, C), jnp.float32),
        w_fc=n(ks[5], (L, C, 4 * C), std),
        b_fc=jnp.zeros((L, 4 * C), jnp.float32),
        w_fc2=n(ks[6], (L, 4 * C, C), std_proj),     # mlp.c_proj
        b_fc2=jnp.zeros((L, C), jnp.float32),
        lnf_w=jnp.ones((C,), jnp.float32),
        lnf_b=jnp.zeros((C,), jnp.float32),
        w_out=n(ks[7], (C, 1), std),
    )


# ----------------------------- pure-JAX reference -----------------------------
def reference_forward(params, c_state, actions, idx_c, idx_a, mxu_bf16=True):
    """Natural (per-sample) reference.  With mxu_bf16=True the matmul operands
    are cast to bf16 exactly as in the kernel (f32 accumulation, f32 elsewhere)."""
    B = c_state.shape[0]
    t = actions.shape[-2]
    T = 1 + t
    C, H, hd = N_EMBD, N_HEAD, HEAD_DIM
    f32 = jnp.float32
    cast = (lambda a: a.astype(jnp.bfloat16)) if mxu_bf16 else (lambda a: a)

    def mm(a, b):
        return jnp.einsum('...k,kd->...d', cast(a), cast(b), preferred_element_type=f32)

    def ln(x, w, b):
        mu = x.mean(-1, keepdims=True)
        var = ((x - mu) ** 2).mean(-1, keepdims=True)
        return (x - mu) * jax.lax.rsqrt(var + LN_EPS) * w + b

    state_emd = mm(c_state, params["w_se"])
    action_emd = mm(actions, params["w_ae"])
    x = jnp.concatenate([state_emd[:, None], action_emd], axis=1)
    seq_pos = jnp.clip(jnp.concatenate([idx_c[:, None], idx_a], axis=-1), 0, BLOCK_SIZE - 1)
    x = x + jnp.take(params["pos_table"], seq_pos, axis=0)

    causal = jnp.tril(jnp.ones((T, T), bool))
    for l in range(N_LAYER):
        h = ln(x, params["ln1_w"][l], params["ln1_b"][l])
        qkv = mm(h, params["w_qkv"][l]) + params["b_qkv"][l]
        q, k, v = jnp.split(qkv, 3, axis=-1)
        q = q.reshape(B, T, H, hd).transpose(0, 2, 1, 3) / math.sqrt(hd)
        k = k.reshape(B, T, H, hd).transpose(0, 2, 1, 3)
        v = v.reshape(B, T, H, hd).transpose(0, 2, 1, 3)
        s = jnp.einsum('bhqd,bhkd->bhqk', q, k, preferred_element_type=f32)   # score in f32 (as kernel)
        s = jnp.where(causal, s, -jnp.inf)
        p = jax.nn.softmax(s, axis=-1)
        y = jnp.einsum('bhqk,bhkd->bhqd', cast(p), cast(v), preferred_element_type=f32)
        y = y.transpose(0, 2, 1, 3).reshape(B, T, C)
        y = mm(y, params["w_proj"][l]) + params["b_proj"][l]
        x = x + y
        h2 = ln(x, params["ln2_w"][l], params["ln2_b"][l])
        m = mm(h2, params["w_fc"][l]) + params["b_fc"][l]
        m = jax.nn.gelu(m, approximate=False)
        m = mm(m, params["w_fc2"][l]) + params["b_fc2"][l]
        x = x + m
    if USE_LAYER_NORM:
        x = ln(x, params["lnf_w"], params["lnf_b"])
    return jnp.einsum('btc,co->bto', x, params["w_out"])[..., 0]


# ----------------------------- main -------------------------------------------
if __name__ == "__main__":
    key = jax.random.PRNGKey(0)
    kp, k1, k2, k3 = jax.random.split(key, 4)
    params = init_params(kp)

    B = 2
    d_state = jax.random.normal(k1, (B, STATE_DIM), jnp.float32)     # unused in forward
    c_state = jax.random.normal(k2, (B, STATE_DIM), jnp.float32)
    actions = jax.random.normal(k3, (B, NUM_ACTIONS, ACTION_DIM), jnp.float32)
    idx_d = jnp.array([2, 4], jnp.int32)                             # unused in forward
    idx_c = jnp.array([3, 5], jnp.int32)
    idx_a = idx_c[:, None] + 1 + jnp.arange(NUM_ACTIONS, dtype=jnp.int32)[None, :]

    q = trajectory_q_forward(params, d_state, c_state, actions, idx_d, idx_c, idx_a)
    q = jax.block_until_ready(q)

    assert q.shape == (B, SEQ_LEN), q.shape
    assert bool(jnp.all(jnp.isfinite(q)))

    # same bf16 cast points as the kernel -> tight tolerance
    q_ref_bf16 = reference_forward(params, c_state, actions, idx_c, idx_a, mxu_bf16=True)
    assert bool(jnp.allclose(q, q_ref_bf16, atol=3e-3, rtol=3e-3)), \
        float(jnp.max(jnp.abs(q - q_ref_bf16)))

    # loose sanity check against the full-f32 reference
    q_ref_f32 = reference_forward(params, c_state, actions, idx_c, idx_a, mxu_bf16=False)
    assert bool(jnp.allclose(q, q_ref_f32, atol=3e-2, rtol=3e-2)), \
        float(jnp.max(jnp.abs(q - q_ref_f32)))

    print("KERNEL_OK")
</pallas_src>

<mosaic_0001>
module attributes {stable_mosaic.version = 11 : i64} {
  func.func @gpt_kernel(%arg0: i32, %arg1: memref<16x8x10xf32, #tpu.memory_space<vmem>>, %arg2: memref<16x8x32xf32, #tpu.memory_space<vmem>>, %arg3: memref<128x128xf32, #tpu.memory_space<vmem>>, %arg4: memref<10x32xbf16, #tpu.memory_space<vmem>>, %arg5: memref<15x32xf32, #tpu.memory_space<vmem>>, %arg6: memref<2x32x96xbf16, #tpu.memory_space<vmem>>, %arg7: memref<2x96xf32, #tpu.memory_space<vmem>>, %arg8: memref<2x32x32xbf16, #tpu.memory_space<vmem>>, %arg9: memref<2x32x128xbf16, #tpu.memory_space<vmem>>, %arg10: memref<2x128xf32, #tpu.memory_space<vmem>>, %arg11: memref<2x128x32xbf16, #tpu.memory_space<vmem>>, %arg12: memref<1x1x128xf32, #tpu.memory_space<vmem>>) attributes {dimension_semantics = [#tpu.dimension_semantics<parallel>], iteration_bounds = array<i64: 1>, scalar_prefetch = 0 : i64, scratch_operands = 0 : i64, tpu.core_type = #tpu.core_type<tc>, window_params = [{transform_indices = @transform_0, window_bounds = array<i64: 16, 8, 10>}, {transform_indices = @transform_1, window_bounds = array<i64: 16, 8, 32>}, {pipeline_mode = #tpu.pipeline_mode<synchronous>, transform_indices = @transform_2, window_bounds = array<i64: 128, 128>}, {pipeline_mode = #tpu.pipeline_mode<synchronous>, transform_indices = @transform_3, window_bounds = array<i64: 10, 32>}, {pipeline_mode = #tpu.pipeline_mode<synchronous>, transform_indices = @transform_4, window_bounds = array<i64: 15, 32>}, {pipeline_mode = #tpu.pipeline_mode<synchronous>, transform_indices = @transform_5, window_bounds = array<i64: 2, 32, 96>}, {pipeline_mode = #tpu.pipeline_mode<synchronous>, transform_indices = @transform_6, window_bounds = array<i64: 2, 96>}, {pipeline_mode = #tpu.pipeline_mode<synchronous>, transform_indices = @transform_7, window_bounds = array<i64: 2, 32, 32>}, {pipeline_mode = #tpu.pipeline_mode<synchronous>, transform_indices = @transform_8, window_bounds = array<i64: 2, 32, 128>}, {pipeline_mode = #tpu.pipeline_mode<synchronous>, transform_indices = @transform_9, window_bounds = array<i64: 2, 128>}, {pipeline_mode = #tpu.pipeline_mode<synchronous>, transform_indices = @transform_10, window_bounds = array<i64: 2, 128, 32>}, {transform_indices = @transform_11, window_bounds = array<i64: 1, 1, 128>}]} {
    %c0 = arith.constant 0 : index
    %c0_0 = arith.constant 0 : index
    %c0_1 = arith.constant 0 : index
    %0 = vector.load %arg1[%c0, %c0_0, %c0_1] : memref<16x8x10xf32, #tpu.memory_space<vmem>>, vector<16x8x10xf32>
    %1 = vector.shape_cast %0 : vector<16x8x10xf32> to vector<128x10xf32>
    %2 = arith.truncf %1 : vector<128x10xf32> to vector<128x10xbf16>
    %c0_2 = arith.constant 0 : index
    %c0_3 = arith.constant 0 : index
    %3 = vector.load %arg4[%c0_2, %c0_3] : memref<10x32xbf16, #tpu.memory_space<vmem>>, vector<10x32xbf16>
    %cst = arith.constant dense<0.000000e+00> : vector<128x32xf32>
    %4 = tpu.matmul %2, %3, %cst {dimension_numbers = #tpu.dot_dimension_numbers<[1], [0], [0], [1], [0, 0, 1, 1], [], []>} : vector<128x10xbf16>, vector<10x32xbf16>, vector<128x32xf32> -> vector<128x32xf32>
    %c0_4 = arith.constant 0 : index
    %c0_5 = arith.constant 0 : index
    %c0_6 = arith.constant 0 : index
    %5 = vector.load %arg2[%c0_4, %c0_5, %c0_6] : memref<16x8x32xf32, #tpu.memory_space<vmem>>, vector<16x8x32xf32>
    %6 = vector.shape_cast %5 : vector<16x8x32xf32> to vector<128x32xf32>
    %7 = arith.addf %4, %6 : vector<128x32xf32>
    %c0_7 = arith.constant 0 : index
    %c0_8 = arith.constant 0 : index
    %8 = vector.load %arg5[%c0_7, %c0_8] : memref<15x32xf32, #tpu.memory_space<vmem>>, vector<1x32xf32>
    %9 = vector.shape_cast %8 : vector<1x32xf32> to vector<32xf32>
    %c1 = arith.constant 1 : index
    %c0_9 = arith.constant 0 : index
    %10 = vector.load %arg5[%c1, %c0_9] : memref<15x32xf32, #tpu.memory_space<vmem>>, vector<1x32xf32>
    %11 = vector.shape_cast %10 : vector<1x32xf32> to vector<32xf32>
    %cst_10 = arith.constant dense<0.000000e+00> : vector<128xf32>
    %12 = vector.multi_reduction <add>, %7, %cst_10 [1] : vector<128x32xf32> to vector<128xf32>
    %13 = vector.shape_cast %12 : vector<128xf32> to vector<128x1xf32>
    %cst_11 = arith.constant 3.200000e+01 : f32
    %14 = vector.broadcast %cst_11 : f32 to vector<128x1xf32>
    %15 = arith.divf %13, %14 : vector<128x1xf32>
    %16 = vector.broadcast %15 : vector<128x1xf32> to vector<128x32xf32>
    %17 = arith.subf %7, %16 : vector<128x32xf32>
    %18 = arith.mulf %17, %17 : vector<128x32xf32>
    %cst_12 = arith.constant dense<0.000000e+00> : vector<128xf32>
    %19 = vector.multi_reduction <add>, %18, %cst_12 [1] : vector<128x32xf32> to vector<128xf32>
    %20 = vector.shape_cast %19 : vector<128xf32> to vector<128x1xf32>
    %cst_13 = arith.constant 3.200000e+01 : f32
    %21 = vector.broadcast %cst_13 : f32 to vector<128x1xf32>
    %22 = arith.divf %20, %21 : vector<128x1xf32>
    %23 = vector.broadcast %15 : vector<128x1xf32> to vector<128x32xf32>
    %24 = arith.subf %7, %23 : vector<128x32xf32>
    %cst_14 = arith.constant 9.99999974E-6 : f32
    %25 = vector.broadcast %cst_14 : f32 to vector<128x1xf32>
    %26 = arith.addf %22, %25 : vector<128x1xf32>
    %27 = math.rsqrt %26 : vector<128x1xf32>
    %28 = vector.broadcast %27 : vector<128x1xf32> to vector<128x32xf32>
    %29 = arith.mulf %24, %28 : vector<128x32xf32>
    %30 = vector.shape_cast %9 : vector<32xf32> to vector<1x32xf32>
    %31 = vector.broadcast %30 : vector<1x32xf32> to vector<128x32xf32>
    %32 = arith.mulf %29, %31 : vector<128x32xf32>
    %33 = vector.shape_cast %11 : vector<32xf32> to vector<1x32xf32>
    %34 = vector.broadcast %33 : vector<1x32xf32> to vector<128x32xf32>
    %35 = arith.addf %32, %34 : vector<128x32xf32>
    %36 = arith.truncf %35 : vector<128x32xf32> to vector<128x32xbf16>
    %c0_15 = arith.constant 0 : index
    %c0_16 = arith.constant 0 : index
    %c0_17 = arith.constant 0 : index
    %37 = vector.load %arg6[%c0_15, %c0_16, %c0_17] : memref<2x32x96xbf16, #tpu.memory_space<vmem>>, vector<1x32x96xbf16>
    %38 = vector.shape_cast %37 : vector<1x32x96xbf16> to vector<32x96xbf16>
    %cst_18 = arith.constant dense<0.000000e+00> : vector<128x96xf32>
    %39 = tpu.matmul %36, %38, %cst_18 {dimension_numbers = #tpu.dot_dimension_numbers<[1], [0], [0], [1], [0, 0, 1, 1], [], []>} : vector<128x32xbf16>, vector<32x96xbf16>, vector<128x96xf32> -> vector<128x96xf32>
    %c0_19 = arith.constant 0 : index
    %c0_20 = arith.constant 0 : index
    %40 = vector.load %arg7[%c0_19, %c0_20] : memref<2x96xf32, #tpu.memory_space<vmem>>, vector<1x96xf32>
    %41 = vector.shape_cast %40 : vector<1x96xf32> to vector<96xf32>
    %42 = vector.shape_cast %41 : vector<96xf32> to vector<1x96xf32>
    %43 = vector.broadcast %42 : vector<1x96xf32> to vector<128x96xf32>
    %44 = arith.addf %39, %43 : vector<128x96xf32>
    %45 = vector.extract_strided_slice %44 {offsets = [0, 0], sizes = [128, 8], strides = [1, 1]} : vector<128x96xf32> to vector<128x8xf32>
    %cst_21 = arith.constant 0.353553385 : f32
    %46 = vector.broadcast %cst_21 : f32 to vector<128x8xf32>
    %47 = arith.mulf %45, %46 : vector<128x8xf32>
    %48 = vector.extract_strided_slice %44 {offsets = [0, 32], sizes = [128, 8], strides = [1, 1]} : vector<128x96xf32> to vector<128x8xf32>
    %49 = vector.extract_strided_slice %44 {offsets = [0, 64], sizes = [128, 8], strides = [1, 1]} : vector<128x96xf32> to vector<128x8xf32>
    %50 = arith.truncf %49 : vector<128x8xf32> to vector<128x8xbf16>
    "tpu.trace_start"() <{level = 10 : i32, message = "md,nd->mn"}> : () -> ()
    %cst_22 = arith.constant dense<0.000000e+00> : vector<128x128xf32>
    %51 = tpu.matmul %47, %48, %cst_22 {dimension_numbers = #tpu.dot_dimension_numbers<[1], [1], [0], [0], [0, 0, 1, 0], [], []>} : vector<128x8xf32>, vector<128x8xf32>, vector<128x128xf32> -> vector<128x128xf32>
    "tpu.trace_stop"() : () -> ()
    %c0_23 = arith.constant 0 : index
    %c0_24 = arith.constant 0 : index
    %52 = vector.load %arg3[%c0_23, %c0_24] : memref<128x128xf32, #tpu.memory_space<vmem>>, vector<128x128xf32>
    %53 = arith.addf %51, %52 : vector<128x128xf32>
    %cst_25 = arith.constant dense<0xFF800000> : vector<128xf32>
    %54 = vector.multi_reduction <maximumf>, %53, %cst_25 [1] : vector<128x128xf32> to vector<128xf32>
    %55 = vector.shape_cast %54 : vector<128xf32> to vector<128x1xf32>
    %56 = vector.broadcast %55 : vector<128x1xf32> to vector<128x128xf32>
    %57 = arith.subf %53, %56 : vector<128x128xf32>
    %58 = math.exp %57 : vector<128x128xf32>
    %cst_26 = arith.constant dense<0.000000e+00> : vector<128xf32>
    %59 = vector.multi_reduction <add>, %58, %cst_26 [1] : vector<128x128xf32> to vector<128xf32>
    %60 = vector.shape_cast %59 : vector<128xf32> to vector<128x1xf32>
    %61 = tpu.reciprocal %60 {approx = true} : vector<128x1xf32> -> vector<128x1xf32>
    %62 = vector.broadcast %61 : vector<128x1xf32> to vector<128x128xf32>
    %63 = arith.mulf %58, %62 : vector<128x128xf32>
    %64 = arith.truncf %63 : vector<128x128xf32> to vector<128x128xbf16>
    %cst_27 = arith.constant dense<0.000000e+00> : vector<128x8xf32>
    %65 = tpu.matmul %64, %50, %cst_27 {dimension_numbers = #tpu.dot_dimension_numbers<[1], [0], [0], [1], [0, 0, 1, 1], [], []>} : vector<128x128xbf16>, vector<128x8xbf16>, vector<128x8xf32> -> vector<128x8xf32>
    %66 = vector.extract_strided_slice %44 {offsets = [0, 8], sizes = [128, 8], strides = [1, 1]} : vector<128x96xf32> to vector<128x8xf32>
    %cst_28 = arith.constant 0.353553385 : f32
    %67 = vector.broadcast %cst_28 : f32 to vector<128x8xf32>
    %68 = arith.mulf %66, %67 : vector<128x8xf32>
    %69 = vector.extract_strided_slice %44 {offsets = [0, 40], sizes = [128, 8], strides = [1, 1]} : vector<128x96xf32> to vector<128x8xf32>
    %70 = vector.extract_strided_slice %44 {offsets = [0, 72], sizes = [128, 8], strides = [1, 1]} : vector<128x96xf32> to vector<128x8xf32>
    %71 = arith.truncf %70 : vector<128x8xf32> to vector<128x8xbf16>
    "tpu.trace_start"() <{level = 10 : i32, message = "md,nd->mn"}> : () -> ()
    %cst_29 = arith.constant dense<0.000000e+00> : vector<128x128xf32>
    %72 = tpu.matmul %68, %69, %cst_29 {dimension_numbers = #tpu.dot_dimension_numbers<[1], [1], [0], [0], [0, 0, 1, 0], [], []>} : vector<128x8xf32>, vector<128x8xf32>, vector<128x128xf32> -> vector<128x128xf32>
    "tpu.trace_stop"() : () -> ()
    %c0_30 = arith.constant 0 : index
    %c0_31 = arith.constant 0 : index
    %73 = vector.load %arg3[%c0_30, %c0_31] : memref<128x128xf32, #tpu.memory_space<vmem>>, vector<128x128xf32>
    %74 = arith.addf %72, %73 : vector<128x128xf32>
    %cst_32 = arith.constant dense<0xFF800000> : vector<128xf32>
    %75 = vector.multi_reduction <maximumf>, %74, %cst_32 [1] : vector<128x128xf32> to vector<128xf32>
    %76 = vector.shape_cast %75 : vector<128xf32> to vector<128x1xf32>
    %77 = vector.broadcast %76 : vector<128x1xf32> to vector<128x128xf32>
    %78 = arith.subf %74, %77 : vector<128x128xf32>
    %79 = math.exp %78 : vector<128x128xf32>
    %cst_33 = arith.constant dense<0.000000e+00> : vector<128xf32>
    %80 = vector.multi_reduction <add>, %79, %cst_33 [1] : vector<128x128xf32> to vector<128xf32>
    %81 = vector.shape_cast %80 : vector<128xf32> to vector<128x1xf32>
    %82 = tpu.reciprocal %81 {approx = true} : vector<128x1xf32> -> vector<128x1xf32>
    %83 = vector.broadcast %82 : vector<128x1xf32> to vector<128x128xf32>
    %84 = arith.mulf %79, %83 : vector<128x128xf32>
    %85 = arith.truncf %84 : vector<128x128xf32> to vector<128x128xbf16>
    %cst_34 = arith.constant dense<0.000000e+00> : vector<128x8xf32>
    %86 = tpu.matmul %85, %71, %cst_34 {dimension_numbers = #tpu.dot_dimension_numbers<[1], [0], [0], [1], [0, 0, 1, 1], [], []>} : vector<128x128xbf16>, vector<128x8xbf16>, vector<128x8xf32> -> vector<128x8xf32>
    %87 = vector.extract_strided_slice %44 {offsets = [0, 16], sizes = [128, 8], strides = [1, 1]} : vector<128x96xf32> to vector<128x8xf32>
    %cst_35 = arith.constant 0.353553385 : f32
    %88 = vector.broadcast %cst_35 : f32 to vector<128x8xf32>
    %89 = arith.mulf %87, %88 : vector<128x8xf32>
    %90 = vector.extract_strided_slice %44 {offsets = [0, 48], sizes = [128, 8], strides = [1, 1]} : vector<128x96xf32> to vector<128x8xf32>
    %91 = vector.extract_strided_slice %44 {offsets = [0, 80], sizes = [128, 8], strides = [1, 1]} : vector<128x96xf32> to vector<128x8xf32>
    %92 = arith.truncf %91 : vector<128x8xf32> to vector<128x8xbf16>
    "tpu.trace_start"() <{level = 10 : i32, message = "md,nd->mn"}> : () -> ()
    %cst_36 = arith.constant dense<0.000000e+00> : vector<128x128xf32>
    %93 = tpu.matmul %89, %90, %cst_36 {dimension_numbers = #tpu.dot_dimension_numbers<[1], [1], [0], [0], [0, 0, 1, 0], [], []>} : vector<128x8xf32>, vector<128x8xf32>, vector<128x128xf32> -> vector<128x128xf32>
    "tpu.trace_stop"() : () -> ()
    %c0_37 = arith.constant 0 : index
    %c0_38 = arith.constant 0 : index
    %94 = vector.load %arg3[%c0_37, %c0_38] : memref<128x128xf32, #tpu.memory_space<vmem>>, vector<128x128xf32>
    %95 = arith.addf %93, %94 : vector<128x128xf32>
    %cst_39 = arith.constant dense<0xFF800000> : vector<128xf32>
    %96 = vector.multi_reduction <maximumf>, %95, %cst_39 [1] : vector<128x128xf32> to vector<128xf32>
    %97 = vector.shape_cast %96 : vector<128xf32> to vector<128x1xf32>
    %98 = vector.broadcast %97 : vector<128x1xf32> to vector<128x128xf32>
    %99 = arith.subf %95, %98 : vector<128x128xf32>
    %100 = math.exp %99 : vector<128x128xf32>
    %cst_40 = arith.constant dense<0.000000e+00> : vector<128xf32>
    %101 = vector.multi_reduction <add>, %100, %cst_40 [1] : vector<128x128xf32> to vector<128xf32>
    %102 = vector.shape_cast %101 : vector<128xf32> to vector<128x1xf32>
    %103 = tpu.reciprocal %102 {approx = true} : vector<128x1xf32> -> vector<128x1xf32>
    %104 = vector.broadcast %103 : vector<128x1xf32> to vector<128x128xf32>
    %105 = arith.mulf %100, %104 : vector<128x128xf32>
    %106 = arith.truncf %105 : vector<128x128xf32> to vector<128x128xbf16>
    %cst_41 = arith.constant dense<0.000000e+00> : vector<128x8xf32>
    %107 = tpu.matmul %106, %92, %cst_41 {dimension_numbers = #tpu.dot_dimension_numbers<[1], [0], [0], [1], [0, 0, 1, 1], [], []>} : vector<128x128xbf16>, vector<128x8xbf16>, vector<128x8xf32> -> vector<128x8xf32>
    %108 = vector.extract_strided_slice %44 {offsets = [0, 24], sizes = [128, 8], strides = [1, 1]} : vector<128x96xf32> to vector<128x8xf32>
    %cst_42 = arith.constant 0.353553385 : f32
    %109 = vector.broadcast %cst_42 : f32 to vector<128x8xf32>
    %110 = arith.mulf %108, %109 : vector<128x8xf32>
    %111 = vector.extract_strided_slice %44 {offsets = [0, 56], sizes = [128, 8], strides = [1, 1]} : vector<128x96xf32> to vector<128x8xf32>
    %112 = vector.extract_strided_slice %44 {offsets = [0, 88], sizes = [128, 8], strides = [1, 1]} : vector<128x96xf32> to vector<128x8xf32>
    %113 = arith.truncf %112 : vector<128x8xf32> to vector<128x8xbf16>
    "tpu.trace_start"() <{level = 10 : i32, message = "md,nd->mn"}> : () -> ()
    %cst_43 = arith.constant dense<0.000000e+00> : vector<128x128xf32>
    %114 = tpu.matmul %110, %111, %cst_43 {dimension_numbers = #tpu.dot_dimension_numbers<[1], [1], [0], [0], [0, 0, 1, 0], [], []>} : vector<128x8xf32>, vector<128x8xf32>, vector<128x128xf32> -> vector<128x128xf32>
    "tpu.trace_stop"() : () -> ()
    %c0_44 = arith.constant 0 : index
    %c0_45 = arith.constant 0 : index
    %115 = vector.load %arg3[%c0_44, %c0_45] : memref<128x128xf32, #tpu.memory_space<vmem>>, vector<128x128xf32>
    %116 = arith.addf %114, %115 : vector<128x128xf32>
    %cst_46 = arith.constant dense<0xFF800000> : vector<128xf32>
    %117 = vector.multi_reduction <maximumf>, %116, %cst_46 [1] : vector<128x128xf32> to vector<128xf32>
    %118 = vector.shape_cast %117 : vector<128xf32> to vector<128x1xf32>
    %119 = vector.broadcast %118 : vector<128x1xf32> to vector<128x128xf32>
    %120 = arith.subf %116, %119 : vector<128x128xf32>
    %121 = math.exp %120 : vector<128x128xf32>
    %cst_47 = arith.constant dense<0.000000e+00> : vector<128xf32>
    %122 = vector.multi_reduction <add>, %121, %cst_47 [1] : vector<128x128xf32> to vector<128xf32>
    %123 = vector.shape_cast %122 : vector<128xf32> to vector<128x1xf32>
    %124 = tpu.reciprocal %123 {approx = true} : vector<128x1xf32> -> vector<128x1xf32>
    %125 = vector.broadcast %124 : vector<128x1xf32> to vector<128x128xf32>
    %126 = arith.mulf %121, %125 : vector<128x128xf32>
    %127 = arith.truncf %126 : vector<128x128xf32> to vector<128x128xbf16>
    %cst_48 = arith.constant dense<0.000000e+00> : vector<128x8xf32>
    %128 = tpu.matmul %127, %113, %cst_48 {dimension_numbers = #tpu.dot_dimension_numbers<[1], [0], [0], [1], [0, 0, 1, 1], [], []>} : vector<128x128xbf16>, vector<128x8xbf16>, vector<128x8xf32> -> vector<128x8xf32>
    %129 = tpu.concatenate %65, %86, %107, %128 in 1 : vector<128x8xf32>, vector<128x8xf32>, vector<128x8xf32>, vector<128x8xf32> -> vector<128x32xf32>
    %130 = arith.truncf %129 : vector<128x32xf32> to vector<128x32xbf16>
    %c0_49 = arith.constant 0 : index
    %c0_50 = arith.constant 0 : index
    %c0_51 = arith.constant 0 : index
    %131 = vector.load %arg8[%c0_49, %c0_50, %c0_51] : memref<2x32x32xbf16, #tpu.memory_space<vmem>>, vector<1x32x32xbf16>
    %132 = vector.shape_cast %131 : vector<1x32x32xbf16> to vector<32x32xbf16>
    %cst_52 = arith.constant dense<0.000000e+00> : vector<128x32xf32>
    %133 = tpu.matmul %130, %132, %cst_52 {dimension_numbers = #tpu.dot_dimension_numbers<[1], [0], [0], [1], [0, 0, 1, 1], [], []>} : vector<128x32xbf16>, vector<32x32xbf16>, vector<128x32xf32> -> vector<128x32xf32>
    %c4 = arith.constant 4 : index
    %c0_53 = arith.constant 0 : index
    %134 = vector.load %arg5[%c4, %c0_53] : memref<15x32xf32, #tpu.memory_space<vmem>>, vector<1x32xf32>
    %135 = vector.shape_cast %134 : vector<1x32xf32> to vector<32xf32>
    %136 = vector.shape_cast %135 : vector<32xf32> to vector<1x32xf32>
    %137 = vector.broadcast %136 : vector<1x32xf32> to vector<128x32xf32>
    %138 = arith.addf %133, %137 : vector<128x32xf32>
    %139 = arith.addf %7, %138 : vector<128x32xf32>
    %c2 = arith.constant 2 : index
    %c0_54 = arith.constant 0 : index
    %140 = vector.load %arg5[%c2, %c0_54] : memref<15x32xf32, #tpu.memory_space<vmem>>, vector<1x32xf32>
    %141 = vector.shape_cast %140 : vector<1x32xf32> to vector<32xf32>
    %c3 = arith.constant 3 : index
    %c0_55 = arith.constant 0 : index
    %142 = vector.load %arg5[%c3, %c0_55] : memref<15x32xf32, #tpu.memory_space<vmem>>, vector<1x32xf32>
    %143 = vector.shape_cast %142 : vector<1x32xf32> to vector<32xf32>
    %cst_56 = arith.constant dense<0.000000e+00> : vector<128xf32>
    %144 = vector.multi_reduction <add>, %139, %cst_56 [1] : vector<128x32xf32> to vector<128xf32>
    %145 = vector.shape_cast %144 : vector<128xf32> to vector<128x1xf32>
    %cst_57 = arith.constant 3.200000e+01 : f32
    %146 = vector.broadcast %cst_57 : f32 to vector<128x1xf32>
    %147 = arith.divf %145, %146 : vector<128x1xf32>
    %148 = vector.broadcast %147 : vector<128x1xf32> to vector<128x32xf32>
    %149 = arith.subf %139, %148 : vector<128x32xf32>
    %150 = arith.mulf %149, %149 : vector<128x32xf32>
    %cst_58 = arith.constant dense<0.000000e+00> : vector<128xf32>
    %151 = vector.multi_reduction <add>, %150, %cst_58 [1] : vector<128x32xf32> to vector<128xf32>
    %152 = vector.shape_cast %151 : vector<128xf32> to vector<128x1xf32>
    %cst_59 = arith.constant 3.200000e+01 : f32
    %153 = vector.broadcast %cst_59 : f32 to vector<128x1xf32>
    %154 = arith.divf %152, %153 : vector<128x1xf32>
    %155 = vector.broadcast %147 : vector<128x1xf32> to vector<128x32xf32>
    %156 = arith.subf %139, %155 : vector<128x32xf32>
    %cst_60 = arith.constant 9.99999974E-6 : f32
    %157 = vector.broadcast %cst_60 : f32 to vector<128x1xf32>
    %158 = arith.addf %154, %157 : vector<128x1xf32>
    %159 = math.rsqrt %158 : vector<128x1xf32>
    %160 = vector.broadcast %159 : vector<128x1xf32> to vector<128x32xf32>
    %161 = arith.mulf %156, %160 : vector<128x32xf32>
    %162 = vector.shape_cast %141 : vector<32xf32> to vector<1x32xf32>
    %163 = vector.broadcast %162 : vector<1x32xf32> to vector<128x32xf32>
    %164 = arith.mulf %161, %163 : vector<128x32xf32>
    %165 = vector.shape_cast %143 : vector<32xf32> to vector<1x32xf32>
    %166 = vector.broadcast %165 : vector<1x32xf32> to vector<128x32xf32>
    %167 = arith.addf %164, %166 : vector<128x32xf32>
    %168 = arith.truncf %167 : vector<128x32xf32> to vector<128x32xbf16>
    %c0_61 = arith.constant 0 : index
    %c0_62 = arith.constant 0 : index
    %c0_63 = arith.constant 0 : index
    %169 = vector.load %arg9[%c0_61, %c0_62, %c0_63] : memref<2x32x128xbf16, #tpu.memory_space<vmem>>, vector<1x32x128xbf16>
    %170 = vector.shape_cast %169 : vector<1x32x128xbf16> to vector<32x128xbf16>
    %cst_64 = arith.constant dense<0.000000e+00> : vector<128x128xf32>
    %171 = tpu.matmul %168, %170, %cst_64 {dimension_numbers = #tpu.dot_dimension_numbers<[1], [0], [0], [1], [0, 0, 1, 1], [], []>} : vector<128x32xbf16>, vector<32x128xbf16>, vector<128x128xf32> -> vector<128x128xf32>
    %c0_65 = arith.constant 0 : index
    %c0_66 = arith.constant 0 : index
    %172 = vector.load %arg10[%c0_65, %c0_66] : memref<2x128xf32, #tpu.memory_space<vmem>>, vector<1x128xf32>
    %173 = vector.shape_cast %172 : vector<1x128xf32> to vector<128xf32>
    %174 = vector.shape_cast %173 : vector<128xf32> to vector<1x128xf32>
    %175 = vector.broadcast %174 : vector<1x128xf32> to vector<128x128xf32>
    %176 = arith.addf %171, %175 : vector<128x128xf32>
    %cst_67 = arith.constant 5.000000e-01 : f32
    %177 = vector.broadcast %cst_67 : f32 to vector<128x128xf32>
    %178 = arith.mulf %177, %176 : vector<128x128xf32>
    %cst_68 = arith.constant 0.707106769 : f32
    %179 = vector.broadcast %cst_68 : f32 to vector<128x128xf32>
    %180 = arith.mulf %176, %179 : vector<128x128xf32>
    %181 = math.absf %180 : vector<128x128xf32>
    %cst_69 = arith.constant 0.327591091 : f32
    %182 = vector.broadcast %cst_69 : f32 to vector<128x128xf32>
    %183 = arith.mulf %182, %181 : vector<128x128xf32>
    %cst_70 = arith.constant 1.000000e+00 : f32
    %184 = vector.broadcast %cst_70 : f32 to vector<128x128xf32>
    %185 = arith.addf %184, %183 : vector<128x128xf32>
    %cst_71 = arith.constant 1.000000e+00 : f32
    %186 = vector.broadcast %cst_71 : f32 to vector<128x128xf32>
    %187 = arith.divf %186, %185 : vector<128x128xf32>
    %cst_72 = arith.constant 1.06140542 : f32
    %188 = vector.broadcast %cst_72 : f32 to vector<128x128xf32>
    %189 = arith.mulf %188, %187 : vector<128x128xf32>
    %cst_73 = arith.constant -1.45315206 : f32
    %190 = vector.broadcast %cst_73 : f32 to vector<128x128xf32>
    %191 = arith.addf %189, %190 : vector<128x128xf32>
    %192 = arith.mulf %191, %187 : vector<128x128xf32>
    %cst_74 = arith.constant 1.42141378 : f32
    %193 = vector.broadcast %cst_74 : f32 to vector<128x128xf32>
    %194 = arith.addf %192, %193 : vector<128x128xf32>
    %195 = arith.mulf %194, %187 : vector<128x128xf32>
    %cst_75 = arith.constant -0.284496725 : f32
    %196 = vector.broadcast %cst_75 : f32 to vector<128x128xf32>
    %197 = arith.addf %195, %196 : vector<128x128xf32>
    %198 = arith.mulf %197, %187 : vector<128x128xf32>
    %cst_76 = arith.constant 0.254829586 : f32
    %199 = vector.broadcast %cst_76 : f32 to vector<128x128xf32>
    %200 = arith.addf %198, %199 : vector<128x128xf32>
    %201 = arith.mulf %200, %187 : vector<128x128xf32>
    %cst_77 = arith.constant 0.000000e+00 : f32
    %202 = vector.broadcast %cst_77 : f32 to vector<128x128xf32>
    %203 = arith.subf %202, %181 : vector<128x128xf32>
    %204 = arith.mulf %203, %181 : vector<128x128xf32>
    %205 = math.exp %204 : vector<128x128xf32>
    %206 = arith.mulf %201, %205 : vector<128x128xf32>
    %cst_78 = arith.constant 1.000000e+00 : f32
    %207 = vector.broadcast %cst_78 : f32 to vector<128x128xf32>
    %208 = arith.subf %207, %206 : vector<128x128xf32>
    %cst_79 = arith.constant 0.000000e+00 : f32
    %209 = vector.broadcast %cst_79 : f32 to vector<128x128xf32>
    %210 = arith.cmpf oge, %180, %209 : vector<128x128xf32>
    %cst_80 = arith.constant 0.000000e+00 : f32
    %211 = vector.broadcast %cst_80 : f32 to vector<128x128xf32>
    %212 = arith.subf %211, %208 : vector<128x128xf32>
    %213 = arith.select %210, %208, %212 : vector<128x128xi1>, vector<128x128xf32>
    %cst_81 = arith.constant 1.000000e+00 : f32
    %214 = vector.broadcast %cst_81 : f32 to vector<128x128xf32>
    %215 = arith.addf %214, %213 : vector<128x128xf32>
    %216 = arith.mulf %178, %215 : vector<128x128xf32>
    %217 = arith.truncf %216 : vector<128x128xf32> to vector<128x128xbf16>
    %c0_82 = arith.constant 0 : index
    %c0_83 = arith.constant 0 : index
    %c0_84 = arith.constant 0 : index
    %218 = vector.load %arg11[%c0_82, %c0_83, %c0_84] : memref<2x128x32xbf16, #tpu.memory_space<vmem>>, vector<1x128x32xbf16>
    %219 = vector.shape_cast %218 : vector<1x128x32xbf16> to vector<128x32xbf16>
    %cst_85 = arith.constant dense<0.000000e+00> : vector<128x32xf32>
    %220 = tpu.matmul %217, %219, %cst_85 {dimension_numbers = #tpu.dot_dimension_numbers<[1], [0], [0], [1], [0, 0, 1, 1], [], []>} : vector<128x128xbf16>, vector<128x32xbf16>, vector<128x32xf32> -> vector<128x32xf32>
    %c5 = arith.constant 5 : index
    %c0_86 = arith.constant 0 : index
    %221 = vector.load %arg5[%c5, %c0_86] : memref<15x32xf32, #tpu.memory_space<vmem>>, vector<1x32xf32>
    %222 = vector.shape_cast %221 : vector<1x32xf32> to vector<32xf32>
    %223 = vector.shape_cast %222 : vector<32xf32> to vector<1x32xf32>
    %224 = vector.broadcast %223 : vector<1x32xf32> to vector<128x32xf32>
    %225 = arith.addf %220, %224 : vector<128x32xf32>
    %226 = arith.addf %139, %225 : vector<128x32xf32>
    %c6 = arith.constant 6 : index
    %c0_87 = arith.constant 0 : index
    %227 = vector.load %arg5[%c6, %c0_87] : memref<15x32xf32, #tpu.memory_space<vmem>>, vector<1x32xf32>
    %228 = vector.shape_cast %227 : vector<1x32xf32> to vector<32xf32>
    %c7 = arith.constant 7 : index
    %c0_88 = arith.constant 0 : index
    %229 = vector.load %arg5[%c7, %c0_88] : memref<15x32xf32, #tpu.memory_space<vmem>>, vector<1x32xf32>
    %230 = vector.shape_cast %229 : vector<1x32xf32> to vector<32xf32>
    %cst_89 = arith.constant dense<0.000000e+00> : vector<128xf32>
    %231 = vector.multi_reduction <add>, %226, %cst_89 [1] : vector<128x32xf32> to vector<128xf32>
    %232 = vector.shape_cast %231 : vector<128xf32> to vector<128x1xf32>
    %cst_90 = arith.constant 3.200000e+01 : f32
    %233 = vector.broadcast %cst_90 : f32 to vector<128x1xf32>
    %234 = arith.divf %232, %233 : vector<128x1xf32>
    %235 = vector.broadcast %234 : vector<128x1xf32> to vector<128x32xf32>
    %236 = arith.subf %226, %235 : vector<128x32xf32>
    %237 = arith.mulf %236, %236 : vector<128x32xf32>
    %cst_91 = arith.constant dense<0.000000e+00> : vector<128xf32>
    %238 = vector.multi_reduction <add>, %237, %cst_91 [1] : vector<128x32xf32> to vector<128xf32>
    %239 = vector.shape_cast %238 : vector<128xf32> to vector<128x1xf32>
    %cst_92 = arith.constant 3.200000e+01 : f32
    %240 = vector.broadcast %cst_92 : f32 to vector<128x1xf32>
    %241 = arith.divf %239, %240 : vector<128x1xf32>
    %242 = vector.broadcast %234 : vector<128x1xf32> to vector<128x32xf32>
    %243 = arith.subf %226, %242 : vector<128x32xf32>
    %cst_93 = arith.constant 9.99999974E-6 : f32
    %244 = vector.broadcast %cst_93 : f32 to vector<128x1xf32>
    %245 = arith.addf %241, %244 : vector<128x1xf32>
    %246 = math.rsqrt %245 : vector<128x1xf32>
    %247 = vector.broadcast %246 : vector<128x1xf32> to vector<128x32xf32>
    %248 = arith.mulf %243, %247 : vector<128x32xf32>
    %249 = vector.shape_cast %228 : vector<32xf32> to vector<1x32xf32>
    %250 = vector.broadcast %249 : vector<1x32xf32> to vector<128x32xf32>
    %251 = arith.mulf %248, %250 : vector<128x32xf32>
    %252 = vector.shape_cast %230 : vector<32xf32> to vector<1x32xf32>
    %253 = vector.broadcast %252 : vector<1x32xf32> to vector<128x32xf32>
    %254 = arith.addf %251, %253 : vector<128x32xf32>
    %255 = arith.truncf %254 : vector<128x32xf32> to vector<128x32xbf16>
    %c1_94 = arith.constant 1 : index
    %c0_95 = arith.constant 0 : index
    %c0_96 = arith.constant 0 : index
    %256 = vector.load %arg6[%c1_94, %c0_95, %c0_96] : memref<2x32x96xbf16, #tpu.memory_space<vmem>>, vector<1x32x96xbf16>
    %257 = vector.shape_cast %256 : vector<1x32x96xbf16> to vector<32x96xbf16>
    %cst_97 = arith.constant dense<0.000000e+00> : vector<128x96xf32>
    %258 = tpu.matmul %255, %257, %cst_97 {dimension_numbers = #tpu.dot_dimension_numbers<[1], [0], [0], [1], [0, 0, 1, 1], [], []>} : vector<128x32xbf16>, vector<32x96xbf16>, vector<128x96xf32> -> vector<128x96xf32>
    %c1_98 = arith.constant 1 : index
    %c0_99 = arith.constant 0 : index
    %259 = vector.load %arg7[%c1_98, %c0_99] : memref<2x96xf32, #tpu.memory_space<vmem>>, vector<1x96xf32>
    %260 = vector.shape_cast %259 : vector<1x96xf32> to vector<96xf32>
    %261 = vector.shape_cast %260 : vector<96xf32> to vector<1x96xf32>
    %262 = vector.broadcast %261 : vector<1x96xf32> to vector<128x96xf32>
    %263 = arith.addf %258, %262 : vector<128x96xf32>
    %264 = vector.extract_strided_slice %263 {offsets = [0, 0], sizes = [128, 8], strides = [1, 1]} : vector<128x96xf32> to vector<128x8xf32>
    %cst_100 = arith.constant 0.353553385 : f32
    %265 = vector.broadcast %cst_100 : f32 to vector<128x8xf32>
    %266 = arith.mulf %264, %265 : vector<128x8xf32>
    %267 = vector.extract_strided_slice %263 {offsets = [0, 32], sizes = [128, 8], strides = [1, 1]} : vector<128x96xf32> to vector<128x8xf32>
    %268 = vector.extract_strided_slice %263 {offsets = [0, 64], sizes = [128, 8], strides = [1, 1]} : vector<128x96xf32> to vector<128x8xf32>
    %269 = arith.truncf %268 : vector<128x8xf32> to vector<128x8xbf16>
    "tpu.trace_start"() <{level = 10 : i32, message = "md,nd->mn"}> : () -> ()
    %cst_101 = arith.constant dense<0.000000e+00> : vector<128x128xf32>
    %270 = tpu.matmul %266, %267, %cst_101 {dimension_numbers = #tpu.dot_dimension_numbers<[1], [1], [0], [0], [0, 0, 1, 0], [], []>} : vector<128x8xf32>, vector<128x8xf32>, vector<128x128xf32> -> vector<128x128xf32>
    "tpu.trace_stop"() : () -> ()
    %c0_102 = arith.constant 0 : index
    %c0_103 = arith.constant 0 : index
    %271 = vector.load %arg3[%c0_102, %c0_103] : memref<128x128xf32, #tpu.memory_space<vmem>>, vector<128x128xf32>
    %272 = arith.addf %270, %271 : vector<128x128xf32>
    %cst_104 = arith.constant dense<0xFF800000> : vector<128xf32>
    %273 = vector.multi_reduction <maximumf>, %272, %cst_104 [1] : vector<128x128xf32> to vector<128xf32>
    %274 = vector.shape_cast %273 : vector<128xf32> to vector<128x1xf32>
    %275 = vector.broadcast %274 : vector<128x1xf32> to vector<128x128xf32>
    %276 = arith.subf %272, %275 : vector<128x128xf32>
    %277 = math.exp %276 : vector<128x128xf32>
    %cst_105 = arith.constant dense<0.000000e+00> : vector<128xf32>
    %278 = vector.multi_reduction <add>, %277, %cst_105 [1] : vector<128x128xf32> to vector<128xf32>
    %279 = vector.shape_cast %278 : vector<128xf32> to vector<128x1xf32>
    %280 = tpu.reciprocal %279 {approx = true} : vector<128x1xf32> -> vector<128x1xf32>
    %281 = vector.broadcast %280 : vector<128x1xf32> to vector<128x128xf32>
    %282 = arith.mulf %277, %281 : vector<128x128xf32>
    %283 = arith.truncf %282 : vector<128x128xf32> to vector<128x128xbf16>
    %cst_106 = arith.constant dense<0.000000e+00> : vector<128x8xf32>
    %284 = tpu.matmul %283, %269, %cst_106 {dimension_numbers = #tpu.dot_dimension_numbers<[1], [0], [0], [1], [0, 0, 1, 1], [], []>} : vector<128x128xbf16>, vector<128x8xbf16>, vector<128x8xf32> -> vector<128x8xf32>
    %285 = vector.extract_strided_slice %263 {offsets = [0, 8], sizes = [128, 8], strides = [1, 1]} : vector<128x96xf32> to vector<128x8xf32>
    %cst_107 = arith.constant 0.353553385 : f32
    %286 = vector.broadcast %cst_107 : f32 to vector<128x8xf32>
    %287 = arith.mulf %285, %286 : vector<128x8xf32>
    %288 = vector.extract_strided_slice %263 {offsets = [0, 40], sizes = [128, 8], strides = [1, 1]} : vector<128x96xf32> to vector<128x8xf32>
    %289 = vector.extract_strided_slice %263 {offsets = [0, 72], sizes = [128, 8], strides = [1, 1]} : vector<128x96xf32> to vector<128x8xf32>
    %290 = arith.truncf %289 : vector<128x8xf32> to vector<128x8xbf16>
    "tpu.trace_start"() <{level = 10 : i32, message = "md,nd->mn"}> : () -> ()
    %cst_108 = arith.constant dense<0.000000e+00> : vector<128x128xf32>
    %291 = tpu.matmul %287, %288, %cst_108 {dimension_numbers = #tpu.dot_dimension_numbers<[1], [1], [0], [0], [0, 0, 1, 0], [], []>} : vector<128x8xf32>, vector<128x8xf32>, vector<128x128xf32> -> vector<128x128xf32>
    "tpu.trace_stop"() : () -> ()
    %c0_109 = arith.constant 0 : index
    %c0_110 = arith.constant 0 : index
    %292 = vector.load %arg3[%c0_109, %c0_110] : memref<128x128xf32, #tpu.memory_space<vmem>>, vector<128x128xf32>
    %293 = arith.addf %291, %292 : vector<128x128xf32>
    %cst_111 = arith.constant dense<0xFF800000> : vector<128xf32>
    %294 = vector.multi_reduction <maximumf>, %293, %cst_111 [1] : vector<128x128xf32> to vector<128xf32>
    %295 = vector.shape_cast %294 : vector<128xf32> to vector<128x1xf32>
    %296 = vector.broadcast %295 : vector<128x1xf32> to vector<128x128xf32>
    %297 = arith.subf %293, %296 : vector<128x128xf32>
    %298 = math.exp %297 : vector<128x128xf32>
    %cst_112 = arith.constant dense<0.000000e+00> : vector<128xf32>
    %299 = vector.multi_reduction <add>, %298, %cst_112 [1] : vector<128x128xf32> to vector<128xf32>
    %300 = vector.shape_cast %299 : vector<128xf32> to vector<128x1xf32>
    %301 = tpu.reciprocal %300 {approx = true} : vector<128x1xf32> -> vector<128x1xf32>
    %302 = vector.broadcast %301 : vector<128x1xf32> to vector<128x128xf32>
    %303 = arith.mulf %298, %302 : vector<128x128xf32>
    %304 = arith.truncf %303 : vector<128x128xf32> to vector<128x128xbf16>
    %cst_113 = arith.constant dense<0.000000e+00> : vector<128x8xf32>
    %305 = tpu.matmul %304, %290, %cst_113 {dimension_numbers = #tpu.dot_dimension_numbers<[1], [0], [0], [1], [0, 0, 1, 1], [], []>} : vector<128x128xbf16>, vector<128x8xbf16>, vector<128x8xf32> -> vector<128x8xf32>
    %306 = vector.extract_strided_slice %263 {offsets = [0, 16], sizes = [128, 8], strides = [1, 1]} : vector<128x96xf32> to vector<128x8xf32>
    %cst_114 = arith.constant 0.353553385 : f32
    %307 = vector.broadcast %cst_114 : f32 to vector<128x8xf32>
    %308 = arith.mulf %306, %307 : vector<128x8xf32>
    %309 = vector.extract_strided_slice %263 {offsets = [0, 48], sizes = [128, 8], strides = [1, 1]} : vector<128x96xf32> to vector<128x8xf32>
    %310 = vector.extract_strided_slice %263 {offsets = [0, 80], sizes = [128, 8], strides = [1, 1]} : vector<128x96xf32> to vector<128x8xf32>
    %311 = arith.truncf %310 : vector<128x8xf32> to vector<128x8xbf16>
    "tpu.trace_start"() <{level = 10 : i32, message = "md,nd->mn"}> : () -> ()
    %cst_115 = arith.constant dense<0.000000e+00> : vector<128x128xf32>
    %312 = tpu.matmul %308, %309, %cst_115 {dimension_numbers = #tpu.dot_dimension_numbers<[1], [1], [0], [0], [0, 0, 1, 0], [], []>} : vector<128x8xf32>, vector<128x8xf32>, vector<128x128xf32> -> vector<128x128xf32>
    "tpu.trace_stop"() : () -> ()
    %c0_116 = arith.constant 0 : index
    %c0_117 = arith.constant 0 : index
    %313 = vector.load %arg3[%c0_116, %c0_117] : memref<128x128xf32, #tpu.memory_space<vmem>>, vector<128x128xf32>
    %314 = arith.addf %312, %313 : vector<128x128xf32>
    %cst_118 = arith.constant dense<0xFF800000> : vector<128xf32>
    %315 = vector.multi_reduction <maximumf>, %314, %cst_118 [1] : vector<128x128xf32> to vector<128xf32>
    %316 = vector.shape_cast %315 : vector<128xf32> to vector<128x1xf32>
    %317 = vector.broadcast %316 : vector<128x1xf32> to vector<128x128xf32>
    %318 = arith.subf %314, %317 : vector<128x128xf32>
    %319 = math.exp %318 : vector<128x128xf32>
    %cst_119 = arith.constant dense<0.000000e+00> : vector<128xf32>
    %320 = vector.multi_reduction <add>, %319, %cst_119 [1] : vector<128x128xf32> to vector<128xf32>
    %321 = vector.shape_cast %320 : vector<128xf32> to vector<128x1xf32>
    %322 = tpu.reciprocal %321 {approx = true} : vector<128x1xf32> -> vector<128x1xf32>
    %323 = vector.broadcast %322 : vector<128x1xf32> to vector<128x128xf32>
    %324 = arith.mulf %319, %323 : vector<128x128xf32>
    %325 = arith.truncf %324 : vector<128x128xf32> to vector<128x128xbf16>
    %cst_120 = arith.constant dense<0.000000e+00> : vector<128x8xf32>
    %326 = tpu.matmul %325, %311, %cst_120 {dimension_numbers = #tpu.dot_dimension_numbers<[1], [0], [0], [1], [0, 0, 1, 1], [], []>} : vector<128x128xbf16>, vector<128x8xbf16>, vector<128x8xf32> -> vector<128x8xf32>
    %327 = vector.extract_strided_slice %263 {offsets = [0, 24], sizes = [128, 8], strides = [1, 1]} : vector<128x96xf32> to vector<128x8xf32>
    %cst_121 = arith.constant 0.353553385 : f32
    %328 = vector.broadcast %cst_121 : f32 to vector<128x8xf32>
    %329 = arith.mulf %327, %328 : vector<128x8xf32>
    %330 = vector.extract_strided_slice %263 {offsets = [0, 56], sizes = [128, 8], strides = [1, 1]} : vector<128x96xf32> to vector<128x8xf32>
    %331 = vector.extract_strided_slice %263 {offsets = [0, 88], sizes = [128, 8], strides = [1, 1]} : vector<128x96xf32> to vector<128x8xf32>
    %332 = arith.truncf %331 : vector<128x8xf32> to vector<128x8xbf16>
    "tpu.trace_start"() <{level = 10 : i32, message = "md,nd->mn"}> : () -> ()
    %cst_122 = arith.constant dense<0.000000e+00> : vector<128x128xf32>
    %333 = tpu.matmul %329, %330, %cst_122 {dimension_numbers = #tpu.dot_dimension_numbers<[1], [1], [0], [0], [0, 0, 1, 0], [], []>} : vector<128x8xf32>, vector<128x8xf32>, vector<128x128xf32> -> vector<128x128xf32>
    "tpu.trace_stop"() : () -> ()
    %c0_123 = arith.constant 0 : index
    %c0_124 = arith.constant 0 : index
    %334 = vector.load %arg3[%c0_123, %c0_124] : memref<128x128xf32, #tpu.memory_space<vmem>>, vector<128x128xf32>
    %335 = arith.addf %333, %334 : vector<128x128xf32>
    %cst_125 = arith.constant dense<0xFF800000> : vector<128xf32>
    %336 = vector.multi_reduction <maximumf>, %335, %cst_125 [1] : vector<128x128xf32> to vector<128xf32>
    %337 = vector.shape_cast %336 : vector<128xf32> to vector<128x1xf32>
    %338 = vector.broadcast %337 : vector<128x1xf32> to vector<128x128xf32>
    %339 = arith.subf %335, %338 : vector<128x128xf32>
    %340 = math.exp %339 : vector<128x128xf32>
    %cst_126 = arith.constant dense<0.000000e+00> : vector<128xf32>
    %341 = vector.multi_reduction <add>, %340, %cst_126 [1] : vector<128x128xf32> to vector<128xf32>
    %342 = vector.shape_cast %341 : vector<128xf32> to vector<128x1xf32>
    %343 = tpu.reciprocal %342 {approx = true} : vector<128x1xf32> -> vector<128x1xf32>
    %344 = vector.broadcast %343 : vector<128x1xf32> to vector<128x128xf32>
    %345 = arith.mulf %340, %344 : vector<128x128xf32>
    %346 = arith.truncf %345 : vector<128x128xf32> to vector<128x128xbf16>
    %cst_127 = arith.constant dense<0.000000e+00> : vector<128x8xf32>
    %347 = tpu.matmul %346, %332, %cst_127 {dimension_numbers = #tpu.dot_dimension_numbers<[1], [0], [0], [1], [0, 0, 1, 1], [], []>} : vector<128x128xbf16>, vector<128x8xbf16>, vector<128x8xf32> -> vector<128x8xf32>
    %348 = tpu.concatenate %284, %305, %326, %347 in 1 : vector<128x8xf32>, vector<128x8xf32>, vector<128x8xf32>, vector<128x8xf32> -> vector<128x32xf32>
    %349 = arith.truncf %348 : vector<128x32xf32> to vector<128x32xbf16>
    %c1_128 = arith.constant 1 : index
    %c0_129 = arith.constant 0 : index
    %c0_130 = arith.constant 0 : index
    %350 = vector.load %arg8[%c1_128, %c0_129, %c0_130] : memref<2x32x32xbf16, #tpu.memory_space<vmem>>, vector<1x32x32xbf16>
    %351 = vector.shape_cast %350 : vector<1x32x32xbf16> to vector<32x32xbf16>
    %cst_131 = arith.constant dense<0.000000e+00> : vector<128x32xf32>
    %352 = tpu.matmul %349, %351, %cst_131 {dimension_numbers = #tpu.dot_dimension_numbers<[1], [0], [0], [1], [0, 0, 1, 1], [], []>} : vector<128x32xbf16>, vector<32x32xbf16>, vector<128x32xf32> -> vector<128x32xf32>
    %c10 = arith.constant 10 : index
    %c0_132 = arith.constant 0 : index
    %353 = vector.load %arg5[%c10, %c0_132] : memref<15x32xf32, #tpu.memory_space<vmem>>, vector<1x32xf32>
    %354 = vector.shape_cast %353 : vector<1x32xf32> to vector<32xf32>
    %355 = vector.shape_cast %354 : vector<32xf32> to vector<1x32xf32>
    %356 = vector.broadcast %355 : vector<1x32xf32> to vector<128x32xf32>
    %357 = arith.addf %352, %356 : vector<128x32xf32>
    %358 = arith.addf %226, %357 : vector<128x32xf32>
    %c8 = arith.constant 8 : index
    %c0_133 = arith.constant 0 : index
    %359 = vector.load %arg5[%c8, %c0_133] : memref<15x32xf32, #tpu.memory_space<vmem>>, vector<1x32xf32>
    %360 = vector.shape_cast %359 : vector<1x32xf32> to vector<32xf32>
    %c9 = arith.constant 9 : index
    %c0_134 = arith.constant 0 : index
    %361 = vector.load %arg5[%c9, %c0_134] : memref<15x32xf32, #tpu.memory_space<vmem>>, vector<1x32xf32>
    %362 = vector.shape_cast %361 : vector<1x32xf32> to vector<32xf32>
    %cst_135 = arith.constant dense<0.000000e+00> : vector<128xf32>
    %363 = vector.multi_reduction <add>, %358, %cst_135 [1] : vector<128x32xf32> to vector<128xf32>
    %364 = vector.shape_cast %363 : vector<128xf32> to vector<128x1xf32>
    %cst_136 = arith.constant 3.200000e+01 : f32
    %365 = vector.broadcast %cst_136 : f32 to vector<128x1xf32>
    %366 = arith.divf %364, %365 : vector<128x1xf32>
    %367 = vector.broadcast %366 : vector<128x1xf32> to vector<128x32xf32>
    %368 = arith.subf %358, %367 : vector<128x32xf32>
    %369 = arith.mulf %368, %368 : vector<128x32xf32>
    %cst_137 = arith.constant dense<0.000000e+00> : vector<128xf32>
    %370 = vector.multi_reduction <add>, %369, %cst_137 [1] : vector<128x32xf32> to vector<128xf32>
    %371 = vector.shape_cast %370 : vector<128xf32> to vector<128x1xf32>
    %cst_138 = arith.constant 3.200000e+01 : f32
    %372 = vector.broadcast %cst_138 : f32 to vector<128x1xf32>
    %373 = arith.divf %371, %372 : vector<128x1xf32>
    %374 = vector.broadcast %366 : vector<128x1xf32> to vector<128x32xf32>
    %375 = arith.subf %358, %374 : vector<128x32xf32>
    %cst_139 = arith.constant 9.99999974E-6 : f32
    %376 = vector.broadcast %cst_139 : f32 to vector<128x1xf32>
    %377 = arith.addf %373, %376 : vector<128x1xf32>
    %378 = math.rsqrt %377 : vector<128x1xf32>
    %379 = vector.broadcast %378 : vector<128x1xf32> to vector<128x32xf32>
    %380 = arith.mulf %375, %379 : vector<128x32xf32>
    %381 = vector.shape_cast %360 : vector<32xf32> to vector<1x32xf32>
    %382 = vector.broadcast %381 : vector<1x32xf32> to vector<128x32xf32>
    %383 = arith.mulf %380, %382 : vector<128x32xf32>
    %384 = vector.shape_cast %362 : vector<32xf32> to vector<1x32xf32>
    %385 = vector.broadcast %384 : vector<1x32xf32> to vector<128x32xf32>
    %386 = arith.addf %383, %385 : vector<128x32xf32>
    %387 = arith.truncf %386 : vector<128x32xf32> to vector<128x32xbf16>
    %c1_140 = arith.constant 1 : index
    %c0_141 = arith.constant 0 : index
    %c0_142 = arith.constant 0 : index
    %388 = vector.load %arg9[%c1_140, %c0_141, %c0_142] : memref<2x32x128xbf16, #tpu.memory_space<vmem>>, vector<1x32x128xbf16>
    %389 = vector.shape_cast %388 : vector<1x32x128xbf16> to vector<32x128xbf16>
    %cst_143 = arith.constant dense<0.000000e+00> : vector<128x128xf32>
    %390 = tpu.matmul %387, %389, %cst_143 {dimension_numbers = #tpu.dot_dimension_numbers<[1], [0], [0], [1], [0, 0, 1, 1], [], []>} : vector<128x32xbf16>, vector<32x128xbf16>, vector<128x128xf32> -> vector<128x128xf32>
    %c1_144 = arith.constant 1 : index
    %c0_145 = arith.constant 0 : index
    %391 = vector.load %arg10[%c1_144, %c0_145] : memref<2x128xf32, #tpu.memory_space<vmem>>, vector<1x128xf32>
    %392 = vector.shape_cast %391 : vector<1x128xf32> to vector<128xf32>
    %393 = vector.shape_cast %392 : vector<128xf32> to vector<1x128xf32>
    %394 = vector.broadcast %393 : vector<1x128xf32> to vector<128x128xf32>
    %395 = arith.addf %390, %394 : vector<128x128xf32>
    %cst_146 = arith.constant 5.000000e-01 : f32
    %396 = vector.broadcast %cst_146 : f32 to vector<128x128xf32>
    %397 = arith.mulf %396, %395 : vector<128x128xf32>
    %cst_147 = arith.constant 0.707106769 : f32
    %398 = vector.broadcast %cst_147 : f32 to vector<128x128xf32>
    %399 = arith.mulf %395, %398 : vector<128x128xf32>
    %400 = math.absf %399 : vector<128x128xf32>
    %cst_148 = arith.constant 0.327591091 : f32
    %401 = vector.broadcast %cst_148 : f32 to vector<128x128xf32>
    %402 = arith.mulf %401, %400 : vector<128x128xf32>
    %cst_149 = arith.constant 1.000000e+00 : f32
    %403 = vector.broadcast %cst_149 : f32 to vector<128x128xf32>
    %404 = arith.addf %403, %402 : vector<128x128xf32>
    %cst_150 = arith.constant 1.000000e+00 : f32
    %405 = vector.broadcast %cst_150 : f32 to vector<128x128xf32>
    %406 = arith.divf %405, %404 : vector<128x128xf32>
    %cst_151 = arith.constant 1.06140542 : f32
    %407 = vector.broadcast %cst_151 : f32 to vector<128x128xf32>
    %408 = arith.mulf %407, %406 : vector<128x128xf32>
    %cst_152 = arith.constant -1.45315206 : f32
    %409 = vector.broadcast %cst_152 : f32 to vector<128x128xf32>
    %410 = arith.addf %408, %409 : vector<128x128xf32>
    %411 = arith.mulf %410, %406 : vector<128x128xf32>
    %cst_153 = arith.constant 1.42141378 : f32
    %412 = vector.broadcast %cst_153 : f32 to vector<128x128xf32>
    %413 = arith.addf %411, %412 : vector<128x128xf32>
    %414 = arith.mulf %413, %406 : vector<128x128xf32>
    %cst_154 = arith.constant -0.284496725 : f32
    %415 = vector.broadcast %cst_154 : f32 to vector<128x128xf32>
    %416 = arith.addf %414, %415 : vector<128x128xf32>
    %417 = arith.mulf %416, %406 : vector<128x128xf32>
    %cst_155 = arith.constant 0.254829586 : f32
    %418 = vector.broadcast %cst_155 : f32 to vector<128x128xf32>
    %419 = arith.addf %417, %418 : vector<128x128xf32>
    %420 = arith.mulf %419, %406 : vector<128x128xf32>
    %cst_156 = arith.constant 0.000000e+00 : f32
    %421 = vector.broadcast %cst_156 : f32 to vector<128x128xf32>
    %422 = arith.subf %421, %400 : vector<128x128xf32>
    %423 = arith.mulf %422, %400 : vector<128x128xf32>
    %424 = math.exp %423 : vector<128x128xf32>
    %425 = arith.mulf %420, %424 : vector<128x128xf32>
    %cst_157 = arith.constant 1.000000e+00 : f32
    %426 = vector.broadcast %cst_157 : f32 to vector<128x128xf32>
    %427 = arith.subf %426, %425 : vector<128x128xf32>
    %cst_158 = arith.constant 0.000000e+00 : f32
    %428 = vector.broadcast %cst_158 : f32 to vector<128x128xf32>
    %429 = arith.cmpf oge, %399, %428 : vector<128x128xf32>
    %cst_159 = arith.constant 0.000000e+00 : f32
    %430 = vector.broadcast %cst_159 : f32 to vector<128x128xf32>
    %431 = arith.subf %430, %427 : vector<128x128xf32>
    %432 = arith.select %429, %427, %431 : vector<128x128xi1>, vector<128x128xf32>
    %cst_160 = arith.constant 1.000000e+00 : f32
    %433 = vector.broadcast %cst_160 : f32 to vector<128x128xf32>
    %434 = arith.addf %433, %432 : vector<128x128xf32>
    %435 = arith.mulf %397, %434 : vector<128x128xf32>
    %436 = arith.truncf %435 : vector<128x128xf32> to vector<128x128xbf16>
    %c1_161 = arith.constant 1 : index
    %c0_162 = arith.constant 0 : index
    %c0_163 = arith.constant 0 : index
    %437 = vector.load %arg11[%c1_161, %c0_162, %c0_163] : memref<2x128x32xbf16, #tpu.memory_space<vmem>>, vector<1x128x32xbf16>
    %438 = vector.shape_cast %437 : vector<1x128x32xbf16> to vector<128x32xbf16>
    %cst_164 = arith.constant dense<0.000000e+00> : vector<128x32xf32>
    %439 = tpu.matmul %436, %438, %cst_164 {dimension_numbers = #tpu.dot_dimension_numbers<[1], [0], [0], [1], [0, 0, 1, 1], [], []>} : vector<128x128xbf16>, vector<128x32xbf16>, vector<128x32xf32> -> vector<128x32xf32>
    %c11 = arith.constant 11 : index
    %c0_165 = arith.constant 0 : index
    %440 = vector.load %arg5[%c11, %c0_165] : memref<15x32xf32, #tpu.memory_space<vmem>>, vector<1x32xf32>
    %441 = vector.shape_cast %440 : vector<1x32xf32> to vector<32xf32>
    %442 = vector.shape_cast %441 : vector<32xf32> to vector<1x32xf32>
    %443 = vector.broadcast %442 : vector<1x32xf32> to vector<128x32xf32>
    %444 = arith.addf %439, %443 : vector<128x32xf32>
    %445 = arith.addf %358, %444 : vector<128x32xf32>
    %c12 = arith.constant 12 : index
    %c0_166 = arith.constant 0 : index
    %446 = vector.load %arg5[%c12, %c0_166] : memref<15x32xf32, #tpu.memory_space<vmem>>, vector<1x32xf32>
    %447 = vector.shape_cast %446 : vector<1x32xf32> to vector<32xf32>
    %c13 = arith.constant 13 : index
    %c0_167 = arith.constant 0 : index
    %448 = vector.load %arg5[%c13, %c0_167] : memref<15x32xf32, #tpu.memory_space<vmem>>, vector<1x32xf32>
    %449 = vector.shape_cast %448 : vector<1x32xf32> to vector<32xf32>
    %cst_168 = arith.constant dense<0.000000e+00> : vector<128xf32>
    %450 = vector.multi_reduction <add>, %445, %cst_168 [1] : vector<128x32xf32> to vector<128xf32>
    %451 = vector.shape_cast %450 : vector<128xf32> to vector<128x1xf32>
    %cst_169 = arith.constant 3.200000e+01 : f32
    %452 = vector.broadcast %cst_169 : f32 to vector<128x1xf32>
    %453 = arith.divf %451, %452 : vector<128x1xf32>
    %454 = vector.broadcast %453 : vector<128x1xf32> to vector<128x32xf32>
    %455 = arith.subf %445, %454 : vector<128x32xf32>
    %456 = arith.mulf %455, %455 : vector<128x32xf32>
    %cst_170 = arith.constant dense<0.000000e+00> : vector<128xf32>
    %457 = vector.multi_reduction <add>, %456, %cst_170 [1] : vector<128x32xf32> to vector<128xf32>
    %458 = vector.shape_cast %457 : vector<128xf32> to vector<128x1xf32>
    %cst_171 = arith.constant 3.200000e+01 : f32
    %459 = vector.broadcast %cst_171 : f32 to vector<128x1xf32>
    %460 = arith.divf %458, %459 : vector<128x1xf32>
    %461 = vector.broadcast %453 : vector<128x1xf32> to vector<128x32xf32>
    %462 = arith.subf %445, %461 : vector<128x32xf32>
    %cst_172 = arith.constant 9.99999974E-6 : f32
    %463 = vector.broadcast %cst_172 : f32 to vector<128x1xf32>
    %464 = arith.addf %460, %463 : vector<128x1xf32>
    %465 = math.rsqrt %464 : vector<128x1xf32>
    %466 = vector.broadcast %465 : vector<128x1xf32> to vector<128x32xf32>
    %467 = arith.mulf %462, %466 : vector<128x32xf32>
    %468 = vector.shape_cast %447 : vector<32xf32> to vector<1x32xf32>
    %469 = vector.broadcast %468 : vector<1x32xf32> to vector<128x32xf32>
    %470 = arith.mulf %467, %469 : vector<128x32xf32>
    %471 = vector.shape_cast %449 : vector<32xf32> to vector<1x32xf32>
    %472 = vector.broadcast %471 : vector<1x32xf32> to vector<128x32xf32>
    %473 = arith.addf %470, %472 : vector<128x32xf32>
    %c14 = arith.constant 14 : index
    %c0_173 = arith.constant 0 : index
    %474 = vector.load %arg5[%c14, %c0_173] : memref<15x32xf32, #tpu.memory_space<vmem>>, vector<1x32xf32>
    %cst_174 = arith.constant dense<0.000000e+00> : vector<1x128xf32>
    %475 = tpu.matmul %474, %473, %cst_174 {dimension_numbers = #tpu.dot_dimension_numbers<[1], [1], [0], [0], [0, 0, 1, 0], [], []>} : vector<1x32xf32>, vector<128x32xf32>, vector<1x128xf32> -> vector<1x128xf32>
    %476 = vector.shape_cast %475 : vector<1x128xf32> to vector<1x1x128xf32>
    %c0_175 = arith.constant 0 : index
    %c0_176 = arith.constant 0 : index
    %c0_177 = arith.constant 0 : index
    %477 = vector.load %arg12[%c0_175, %c0_176, %c0_177] : memref<1x1x128xf32, #tpu.memory_space<vmem>>, vector<1x1x128xf32>
    tpu.vector_store %arg12[%c0_175, %c0_176, %c0_177], %476 {strides = array<i32>} : memref<1x1x128xf32, #tpu.memory_space<vmem>>, vector<1x1x128xf32>,
    return
  }
  func.func @transform_0(%arg0: i32) -> (i32, i32, i32) {
    %c0_i32 = arith.constant 0 : i32
    %c0_i32_0 = arith.constant 0 : i32
    %c0_i32_1 = arith.constant 0 : i32
    return %arg0, %c0_i32, %c0_i32_0 : i32, i32, i32
  }
  func.func @transform_1(%arg0: i32) -> (i32, i32, i32) {
    %c0_i32 = arith.constant 0 : i32
    %c0_i32_0 = arith.constant 0 : i32
    %c0_i32_1 = arith.constant 0 : i32
    return %arg0, %c0_i32, %c0_i32_0 : i32, i32, i32
  }
  func.func @transform_2(%arg0: i32) -> (i32, i32) {
    %c0_i32 = arith.constant 0 : i32
    %c0_i32_0 = arith.constant 0 : i32
    %c0_i32_1 = arith.constant 0 : i32
    return %c0_i32, %c0_i32_0 : i32, i32
  }
  func.func @transform_3(%arg0: i32) -> (i32, i32) {
    %c0_i32 = arith.constant 0 : i32
    %c0_i32_0 = arith.constant 0 : i32
    %c0_i32_1 = arith.constant 0 : i32
    return %c0_i32, %c0_i32_0 : i32, i32
  }
  func.func @transform_4(%arg0: i32) -> (i32, i32) {
    %c0_i32 = arith.constant 0 : i32
    %c0_i32_0 = arith.constant 0 : i32
    %c0_i32_1 = arith.constant 0 : i32
    return %c0_i32, %c0_i32_0 : i32, i32
  }
  func.func @transform_5(%arg0: i32) -> (i32, i32, i32) {
    %c0_i32 = arith.constant 0 : i32
    %c0_i32_0 = arith.constant 0 : i32
    %c0_i32_1 = arith.constant 0 : i32
    %c0_i32_2 = arith.constant 0 : i32
    return %c0_i32, %c0_i32_0, %c0_i32_1 : i32, i32, i32
  }
  func.func @transform_6(%arg0: i32) -> (i32, i32) {
    %c0_i32 = arith.constant 0 : i32
    %c0_i32_0 = arith.constant 0 : i32
    %c0_i32_1 = arith.constant 0 : i32
    return %c0_i32, %c0_i32_0 : i32, i32
  }
  func.func @transform_7(%arg0: i32) -> (i32, i32, i32) {
    %c0_i32 = arith.constant 0 : i32
    %c0_i32_0 = arith.constant 0 : i32
    %c0_i32_1 = arith.constant 0 : i32
    %c0_i32_2 = arith.constant 0 : i32
    return %c0_i32, %c0_i32_0, %c0_i32_1 : i32, i32, i32
  }
  func.func @transform_8(%arg0: i32) -> (i32, i32, i32) {
    %c0_i32 = arith.constant 0 : i32
    %c0_i32_0 = arith.constant 0 : i32
    %c0_i32_1 = arith.constant 0 : i32
    %c0_i32_2 = arith.constant 0 : i32
    return %c0_i32, %c0_i32_0, %c0_i32_1 : i32, i32, i32
  }
  func.func @transform_9(%arg0: i32) -> (i32, i32) {
    %c0_i32 = arith.constant 0 : i32
    %c0_i32_0 = arith.constant 0 : i32
    %c0_i32_1 = arith.constant 0 : i32
    return %c0_i32, %c0_i32_0 : i32, i32
  }
  func.func @transform_10(%arg0: i32) -> (i32, i32, i32) {
    %c0_i32 = arith.constant 0 : i32
    %c0_i32_0 = arith.constant 0 : i32
    %c0_i32_1 = arith.constant 0 : i32
    %c0_i32_2 = arith.constant 0 : i32
    return %c0_i32, %c0_i32_0, %c0_i32_1 : i32, i32, i32
  }
  func.func @transform_11(%arg0: i32) -> (i32, i32, i32) {
    %c0_i32 = arith.constant 0 : i32
    %c0_i32_0 = arith.constant 0 : i32
    %c0_i32_1 = arith.constant 0 : i32
    return %arg0, %c0_i32, %c0_i32_0 : i32, i32, i32
  }
}

</mosaic_0001>

<bundles_post_ra>
// kernel: tpu_custom_call.1
= control target key start
LH: loop header
LB: loop body
LE: loop exit
PB: predicated region body
PF: predicated region fallthrough
CT: control target
= control target key end

     0   :  { %16 = vsyncpa [#allocation3], 0  ;;  %s17910_s0 = inlined_call_operand.vmem [shape: f32[16,8,10], index: 0, kind: input, shape index: {}]   ;;  %s17911_s1 = inlined_call_operand.vmem [shape: f32[16,8,32], index: 1, kind: input, shape index: {}]   ;;  %s17912_s2 = inlined_call_operand.vmem [shape: f32[128,128], index: 2, kind: input, shape index: {}]   ;;  %s17913_s3 = inlined_call_operand.hbm [shape: bf16[10,32], index: 3, kind: input, shape index: {}]   ;;  %s17914_s4 = inlined_call_operand.hbm [shape: f32[15,32], index: 4, kind: input, shape index: {}]   ;;  %s17915_s5 = inlined_call_operand.vmem [shape: bf16[2,32,96], index: 5, kind: input, shape index: {}]   ;;  %s17916_s6 = inlined_call_operand.vmem [shape: f32[2,96], index: 6, kind: input, shape index: {}]   ;;  %s17917_s7 = inlined_call_operand.vmem [shape: bf16[2,32,32], index: 7, kind: input, shape index: {}]   ;;  %s17918_s8 = inlined_call_operand.vmem [shape: bf16[2,32,128], index: 8, kind: input, shape index: {}]   ;;  %s17919_s9 = inlined_call_operand.vmem [shape: f32[2,128], index: 9, kind: input, shape index: {}]   ;;  %s17920_s10 = inlined_call_operand.vmem [shape: bf16[2,128,32], index: 10, kind: input, shape index: {}]   ;;  %s17921_s11 = inlined_call_operand.hbm [shape: f32[1,1,128], index: 11, kind: output, shape index: {}]  }
   0x1   :  { %17 = vsyncpa [#allocation6], 0 }
   0x2   :  { %18 = vsyncpa [#allocation4], 0  ;;  %s12602_s17 = smov [#allocation2]   ;;  %s12530_s21 = scalar_lea.hbm %s17913_s3, 128 }
   0x3   :  { %s30_s18 = sshll.u32 %s12602_s17, 4  ;;  %p12531_p0 = scmp.ne.s32.totalorder %s17913_s3, %s12530_s21  ;;  %s31_s18 = int_to_ptr.vmem [resolvable:$true] %s30_s18 }
   0x4   :  { %p12534_p1 = scmp.lt.u32.totalorder %s12530_s21, %s17913_s3 }
   0x6   :  { %p12536_p2 = pnand %p12534_p1, %p12531_p0 }
   0x8   :  { %12539 = shalt.err (!%p12536_p2)
}
   0x9   :  { %s12540_s26 = scalar_lea.vmem %s31_s18, 128  ;;  %p12545_p4 = scmp.lt.s32.totalorder %s31_s18, %s31_s18 }
   0xa   :  { %p12541_p3 = scmp.ne.s32.totalorder %s31_s18, %s12540_s26  ;;  %p12546_p5 = scmp.lt.s32.totalorder %s12540_s26, %s12540_s26 }
   0xc   :  { %p12547_p6 = por %p12546_p5, %p12545_p4 }
   0xe   :  { %p12548_p7 = pnand %p12547_p6, %p12541_p3 }
  0x10   :  { %12551 = shalt.err (!%p12548_p7)
}
  0x11   :  { %s12603_s27 = smov 64   ;;  %s12604_s28 = smov 4  }
  0x12   :  { %36 = dma.hbm_to_vmem [thread:$0]  %s17913_s3, 128, %s31_s18, [#allocation3], %s12603_s27, %s12603_s27, %s12604_s28  }
  0x13   :  { %s12605_s12 = smov [#allocation5]   ;;  %s12552_s16 = scalar_lea.hbm %s17914_s4, 256 }
  0x14   :  { %s42_s13 = sshll.u32 %s12605_s12, 4  ;;  %p12553_p8 = scmp.ne.s32.totalorder %s17914_s4, %s12552_s16  ;;  %s43_s13 = int_to_ptr.vmem [resolvable:$true] %s42_s13 }
  0x15   :  { %p12556_p9 = scmp.lt.u32.totalorder %s12552_s16, %s17914_s4 }
  0x17   :  { %p12558_p10 = pnand %p12556_p9, %p12553_p8 }
  0x19   :  { %12561 = shalt.err (!%p12558_p10)
}
  0x1a   :  { %s12562_s22 = scalar_lea.vmem %s43_s13, 256  ;;  %p12567_p12 = scmp.lt.s32.totalorder %s43_s13, %s43_s13 }
  0x1b   :  { %p12563_p11 = scmp.ne.s32.totalorder %s43_s13, %s12562_s22  ;;  %p12568_p13 = scmp.lt.s32.totalorder %s12562_s22, %s12562_s22 }
  0x1d   :  { %p12569_p0 = por %p12568_p13, %p12567_p12 }
  0x1f   :  { %p12570_p1 = pnand %p12569_p0, %p12563_p11 }
  0x21   :  { %12573 = shalt.err (!%p12570_p1)
}
  0x22   :  { %s12606_s3 = smov 128   ;;  %s12607_s18 = smov 8  }
  0x23   :  { %48 = dma.hbm_to_vmem [thread:$0]  %s17914_s4, 256, %s43_s13, [#allocation6], %s12606_s3, %s12606_s3, %s12607_s18  }
  0x24   :  { %12596 = dma.done.wait [#allocation3], 128  }
  0x25   :  { %12597 = vsyncadd [#allocation3], 4294967168 }
  0x26   :  { %12598 = dma.done.wait [#allocation6], 256  }
  0x27   :  { %12599 = vsyncadd [#allocation6], 4294967040  ;;  %vm140_vm0 = vcmask 1044480   ;;  %v11701_v0 = vld [vmem:[#allocation2] sm:$0x1f]   ;;  %v69_v2 = vld [vmem:[%s17910_s0 + $0x8] sm:$0xff] }
  0x28   :  { %v68_v1 = vld [vmem:[%s17910_s0] sm:$0xff]  ;;  %vm115_vm1 = vcmask 80896   ;;  %v70_v3 = vld [vmem:[%s17910_s0 + $0x10] sm:$0xff]  ;;  %11118 = vmatprep.subr.msk.bf16.mxu0 %vm140_vm0, %v11701_v0  ;;  %v142_v4 = vsel %vm140_vm0, %v11701_v0, 0  ;;  %v71_v6 = vld [vmem:[%s17910_s0 + $0x18] sm:$0xff]  ;;  %vm243_vm2 = vcmask 261120  }
  0x29   :  { %v84_v5 = vpack.c.bf16 %v69_v2, %v68_v1  ;;  %v72_v7 = vld [vmem:[%s17910_s0 + $0x20] sm:$0xff]  ;;  %v73_v8 = vld [vmem:[%s17910_s0 + $0x28] sm:$0xff]  ;;  %9762 = vmatpush3.bf16.msra.mxu0 %v142_v4  ;;  %v85_v9 = vpack.c.bf16 %v71_v6, %v70_v3  ;;  %v74_v11 = vld [vmem:[%s17910_s0 + $0x30] sm:$0xff]  ;;  %vm731_vm3 = vcmask 64512   ;;  %s12608_s16 = smov 96   ;;  %s12609_s17 = smov 88  }
  0x2a   :  { %v86_v10 = vpack.c.bf16 %v73_v8, %v72_v7  ;;  %v75_v12 = vld [vmem:[%s17910_s0 + $0x38] sm:$0xff]  ;;  %v76_v13 = vld [vmem:[%s17910_s0 + $0x40] sm:$0xff]  ;;  %v77_v14 = vld [vmem:[%s17910_s0 + $0x48] sm:$0xff]  ;;  %s12611_s12 = smov 56   ;;  %s12612_s4 = smov 80   ;;  %vm3132_vm5 = vcmask 130048  }
  0x2b   :  { %9763 = vmatprep.mubr.msk.bf16.mxu0 %vm115_vm1, %v84_v5  ;;  %v87_v15 = vpack.c.bf16 %v75_v12, %v74_v11  ;;  %v88_v16 = vpack.c.bf16 %v77_v14, %v76_v13  ;;  %v78_v17 = vld [vmem:[%s17910_s0 + $0x50] sm:$0xff]  ;;  %v79_v18 = vld [vmem:[%s17910_s0 + $0x58] sm:$0xff]  ;;  %v80_v19 = vld [vmem:[%s17910_s0 + $0x60] sm:$0xff]  ;;  %s12613_s13 = smov 112   ;;  %s12614_s14 = smov 48   ;;  %vm3149_vm6 = vcmask 195584  }
  0x2c   :  { %9764 = vmatmul.mubr.msk.bf16.vlgmr.msra.gmra.mrb[0].mxu0 %vm115_vm1, %v85_v9  ;;  %v81_v20 = vld [vmem:[%s17910_s0 + $0x68] sm:$0xff]  ;;  %v89_v21 = vpack.c.bf16 %v79_v18, %v78_v17  ;;  %v82_v23 = vld [vmem:[%s17910_s0 + $0x70] sm:$0xff]  ;;  %v83_v24 = vld [vmem:[%s17910_s0 + $0x78] sm:$0xff]  ;;  %s12615_s15 = smov 72   ;;  %s12616_s24 = smov 104  }
  0x2d   :  { %9767 = vmatprep.mubr.msk.bf16.mxu0 %vm115_vm1, %v86_v10  ;;  %v90_v22 = vpack.c.bf16 %v81_v20, %v80_v19  ;;  %v91_v25 = vpack.c.bf16 %v83_v24, %v82_v23  ;;  %v96_v26 = vld [vmem:[%s17911_s1 + $0x10] sm:$0xff]  ;;  %v94_v27 = vld [vmem:[%s17911_s1] sm:$0xff]  ;;  %v97_v29 = vld [vmem:[%s17911_s1 + $0x18] sm:$0xff]  ;;  %s12617_s0 = smov 40   ;;  %s12618_s25 = smov 16  }
  0x2e   :  { %v95_v32 = vld [vmem:[%s17911_s1 + $0x8] sm:$0xff]  ;;  %v100_v41 = vld [vmem:[%s17911_s1 + $0x30] sm:$0xff]  ;;  %v98_v42 = vld [vmem:[%s17911_s1 + $0x20] sm:$0xff]  ;;  %s12619_s19 = smov 24  }
  0x2f   :  { %v101_v46 = vld [vmem:[%s17911_s1 + $0x38] sm:$0xff]  ;;  %v99_v47 = vld [vmem:[%s17911_s1 + $0x28] sm:$0xff]  ;;  %v104_v57 = vld [vmem:[%s17911_s1 + $0x50] sm:$0xff] }
  0x30   :  { %v102_v58 = vld [vmem:[%s17911_s1 + $0x40] sm:$0xff]  ;;  %v105_v62 = vld [vmem:[%s17911_s1 + $0x58] sm:$0xff]  ;;  %v103_v63 = vld [vmem:[%s17911_s1 + $0x48] sm:$0xff] }
  0x31   :  { %v108_v9 = vld [vmem:[%s17911_s1 + $0x70] sm:$0xff]  ;;  %v106_v10 = vld [vmem:[%s17911_s1 + $0x60] sm:$0xff]  ;;  %v109_v14 = vld [vmem:[%s17911_s1 + $0x78] sm:$0xff] }
  0x32   :  { %vm13178_vm4 = vmpackc.low %vm731_vm3, %vm731_vm3 }
  0x34   :  { %9768 = vmatmul.mubr.msk.bf16.gmra.mrb[4].mxu0 %vm115_vm1, %v87_v15  ;;  %v107_v15 = vld [vmem:[%s17911_s1 + $0x68] sm:$0xff]  ;;  %s12610_s1 = smov 120  }
  0x35   :  { %9771 = vmatprep.mubr.msk.bf16.mxu0 %vm115_vm1, %v88_v16 }
  0x3c   :  { %9772 = vmatmul.mubr.msk.bf16.gmra.mrb[8].mxu0 %vm115_vm1, %v89_v21 }
  0x3d   :  { %9775 = vmatprep.mubr.msk.bf16.mxu0 %vm115_vm1, %v90_v22 }
  0x44   :  { %9776 = vmatmul.mubr.msk.bf16.gmra.mrb[12].mxu0 %vm115_vm1, %v91_v25 }
  0xff   :  { %v9765_v28 = vpop.f32.mrb[0].mxu0 }
 0x100   :  { %v12776_v30 = vadd.f32 %v9765_v28, %v96_v26  ;;  %v178_v31 = vpop.f32.mrb[1].mxu0 }
 0x101   :  { %v12781_v33 = vadd.f32 %v178_v31, %v94_v27  ;;  %v9766_v34 = vpop.f32.mrb[2].mxu0 }
 0x102   :  { %18072 = vst [vmem:[#allocation11_spill] sm:$0xff] %v12776_v30  ;;  %v12783_v35 = vadd.f32 %v9766_v34, %v97_v29  ;;  %v181_v36 = vpop.f32.mrb[3].mxu0  ;;  %v250_v37 = vsel %vm243_vm2, %v12776_v30, 0.0 }
 0x103   :  { %18073 = vst [vmem:[#allocation12_spill] sm:$0xff] %v12781_v33  ;;  %v12787_v38 = vadd.f32 %v181_v36, %v95_v32  ;;  %251 = vadd.xlane.f32.xlu1 %v250_v37  ;;  %v244_v39 = vsel %vm243_vm2, %v12781_v33, 0.0 }
 0x104   :  { %18074 = vst [vmem:[#allocation13_spill] sm:$0xff] %v12783_v35  ;;  %245 = vadd.xlane.f32.xlu0 %v244_v39  ;;  %v253_v40 = vsel %vm243_vm2, %v12783_v35, 0.0 }
 0x105   :  { %18075 = vst [vmem:[#allocation14_spill] sm:$0xff] %v12787_v38  ;;  %v247_v44 = vsel %vm243_vm2, %v12787_v38, 0.0 }
 0x107   :  { %254 = vadd.xlane.f32.xlu1 %v253_v40  ;;  %v9769_v43 = vpop.f32.mrb[4].mxu0 }
 0x108   :  { %v194_v45 = vpop.f32.mrb[5].mxu0  ;;  %248 = vadd.xlane.f32.xlu0 %v247_v44  ;;  %v12807_v48 = vadd.f32 %v9769_v43, %v100_v41 }
 0x109   :  { %v12809_v49 = vadd.f32 %v194_v45, %v98_v42  ;;  %v9770_v50 = vpop.f32.mrb[6].mxu0 }
 0x10a   :  { %18076 = vst [vmem:[#allocation15_spill] sm:$0xff] %v12807_v48  ;;  %v197_v51 = vpop.f32.mrb[7].mxu0  ;;  %v12811_v52 = vadd.f32 %v9770_v50, %v101_v46  ;;  %v262_v56 = vsel %vm243_vm2, %v12807_v48, 0.0 }
 0x10b   :  { %18077 = vst [vmem:[#allocation16_spill] sm:$0xff] %v12809_v49  ;;  %v12813_v53 = vadd.f32 %v197_v51, %v99_v47  ;;  %v256_v54 = vsel %vm243_vm2, %v12809_v49, 0.0 }
 0x10c   :  { %18078 = vst [vmem:[#allocation17_spill] sm:$0xff] %v12811_v52  ;;  %257 = vadd.xlane.f32.xlu0 %v256_v54  ;;  %v265_v60 = vsel %vm243_vm2, %v12811_v52, 0.0 }
 0x10d   :  { %18079 = vst [vmem:[#allocation18_spill] sm:$0xff] %v12813_v53  ;;  %v259_v55 = vsel %vm243_vm2, %v12813_v53, 0.0 }
 0x10e   :  { %260 = vadd.xlane.f32.xlu1 %v259_v55 }
 0x10f   :  { %v9773_v59 = vpop.f32.mrb[8].mxu0 }
 0x110   :  { %v210_v61 = vpop.f32.mrb[9].mxu0  ;;  %263 = vadd.xlane.f32.xlu0 %v262_v56  ;;  %v12835_v0 = vadd.f32 %v9773_v59, %v104_v57 }
 0x111   :  { %v12837_v1 = vadd.f32 %v210_v61, %v102_v58  ;;  %v9774_v2 = vpop.f32.mrb[10].mxu0 }
 0x112   :  { %18080 = vst [vmem:[#allocation19_spill] sm:$0xff] %v12835_v0  ;;  %v213_v3 = vpop.f32.mrb[11].mxu0  ;;  %266 = vadd.xlane.f32.xlu1 %v265_v60  ;;  %v12839_v4 = vadd.f32 %v9774_v2, %v105_v62  ;;  %v274_v8 = vsel %vm243_vm2, %v12835_v0, 0.0 }
 0x113   :  { %18081 = vst [vmem:[#allocation20_spill] sm:$0xff] %v12837_v1  ;;  %v12841_v5 = vadd.f32 %v213_v3, %v103_v63  ;;  %v268_v6 = vsel %vm243_vm2, %v12837_v1, 0.0 }
 0x114   :  { %18082 = vst [vmem:[#allocation21_spill] sm:$0xff] %v12839_v4  ;;  %269 = vadd.xlane.f32.xlu0 %v268_v6  ;;  %v277_v12 = vsel %vm243_vm2, %v12839_v4, 0.0 }
 0x115   :  { %18083 = vst [vmem:[#allocation22_spill] sm:$0xff] %v12841_v5  ;;  %v271_v7 = vsel %vm243_vm2, %v12841_v5, 0.0 }
 0x116   :  { %272 = vadd.xlane.f32.xlu1 %v271_v7 }
 0x117   :  { %v9777_v11 = vpop.f32.mrb[12].mxu0 }
 0x118   :  { %v226_v13 = vpop.f32.mrb[13].mxu0  ;;  %275 = vadd.xlane.f32.xlu0 %v274_v8  ;;  %v12863_v16 = vadd.f32 %v9777_v11, %v108_v9 }
 0x119   :  { %v12865_v17 = vadd.f32 %v226_v13, %v106_v10  ;;  %v9778_v18 = vpop.f32.mrb[14].mxu0 }
 0x11a   :  { %18084 = vst [vmem:[#allocation23_spill] sm:$0xff] %v12863_v16  ;;  %v229_v19 = vpop.f32.mrb[15].mxu0  ;;  %278 = vadd.xlane.f32.xlu1 %v277_v12  ;;  %v12867_v20 = vadd.f32 %v9778_v18, %v109_v14  ;;  %v286_v24 = vsel %vm243_vm2, %v12863_v16, 0.0 }
 0x11b   :  { %18085 = vst [vmem:[#allocation24_spill] sm:$0xff] %v12865_v17  ;;  %v12869_v21 = vadd.f32 %v229_v19, %v107_v15  ;;  %v280_v22 = vsel %vm243_vm2, %v12865_v17, 0.0 }
 0x11c   :  { %18086 = vst [vmem:[#allocation25_spill] sm:$0xff] %v12867_v20  ;;  %281 = vadd.xlane.f32.xlu0 %v280_v22  ;;  %v289_v25 = vsel %vm243_vm2, %v12867_v20, 0.0 }
 0x11d   :  { %18087 = vst [vmem:[#allocation26_spill] sm:$0xff] %v12869_v21  ;;  %v283_v23 = vsel %vm243_vm2, %v12869_v21, 0.0 }
 0x11e   :  { %284 = vadd.xlane.f32.xlu1 %v283_v23 }
 0x120   :  { %287 = vadd.xlane.f32.xlu0 %v286_v24 }
 0x122   :  { %290 = vadd.xlane.f32.xlu1 %v289_v25 }
 0x190   :  { %v252_v26 = vpop.xlane.xlu1 %251 }
 0x191   :  { %v295_v27 = vmul.f32 0.03125, %v252_v26  ;;  %v246_v28 = vpop.xlane.xlu0 %245 }
 0x192   :  { %v293_v29 = vmul.f32 0.03125, %v246_v28 }
 0x193   :  { %v12880_v31 = vsub.f32 %v12776_v30, %v295_v27  ;;  %v13378_v30 = vld [vmem:[%s17912_s2 + $0x30] sm:$0xff] }
 0x194   :  { %v12883_v32 = vsub.f32 %v12781_v33, %v293_v29  ;;  %v255_v34 = vpop.xlane.xlu1 %254  ;;  %18108 = vst [vmem:[#allocation45_spill] sm:$0xff] %v13378_v30  ;;  %v13391_v33 = vld [vmem:[%s17912_s2 + $0x68] sm:$0xff] }
 0x195   :  { %v296_v36 = vmul.f32 0.03125, %v255_v34  ;;  %v249_v37 = vpop.xlane.xlu0 %248  ;;  %v327_v44 = vmul.f32 %v12880_v31, %v12880_v31  ;;  %18109 = vst [vmem:[#allocation46_spill] sm:$0xff] %v13391_v33 }
 0x196   :  { %v294_v39 = vmul.f32 0.03125, %v249_v37  ;;  %v325_v40 = vmul.f32 %v12883_v32, %v12883_v32 }
 0x197   :  { %v12888_v41 = vsub.f32 %v12783_v35, %v296_v36  ;;  %v347_v56 = vsel %vm243_vm2, %v327_v44, 0.0 }
 0x198   :  { %v12891_v42 = vsub.f32 %v12787_v38, %v294_v39  ;;  %v341_v43 = vsel %vm243_vm2, %v325_v40, 0.0 }
 0x199   :  { %342 = vadd.xlane.f32.xlu0 %v341_v43  ;;  %v258_v45 = vpop.xlane.xlu0 %257  ;;  %v328_v51 = vmul.f32 %v12888_v41, %v12888_v41 }
 0x19a   :  { %v297_v46 = vmul.f32 0.03125, %v258_v45  ;;  %v326_v47 = vmul.f32 %v12891_v42, %v12891_v42 }
 0x19b   :  { %v261_v50 = vpop.xlane.xlu1 %260  ;;  %v350_v63 = vsel %vm243_vm2, %v328_v51, 0.0 }
 0x19c   :  { %v12901_v54 = vsub.f32 %v12809_v49, %v297_v46  ;;  %v298_v55 = vmul.f32 0.03125, %v261_v50  ;;  %v344_v57 = vsel %vm243_vm2, %v326_v47, 0.0  ;;  %v13356_v49 = vld [vmem:[%s17912_s2 + $0x48] sm:$0xff] }
 0x19d   :  { %348 = vadd.xlane.f32.xlu0 %v347_v56  ;;  %345 = vadd.xlane.f32.xlu1 %v344_v57  ;;  %v264_v58 = vpop.xlane.xlu0 %263  ;;  %18105 = vst [vmem:[#allocation42_spill] sm:$0xff] %v13356_v49 }
 0x19e   :  { %v12906_v59 = vsub.f32 %v12813_v53, %v298_v55  ;;  %v299_v60 = vmul.f32 0.03125, %v264_v58  ;;  %v329_v61 = vmul.f32 %v12901_v54, %v12901_v54  ;;  %v13347_v53 = vld [vmem:[%s17912_s2 + $0x38] sm:$0xff] }
 0x19f   :  { %v267_v62 = vpop.xlane.xlu1 %266  ;;  %18104 = vst [vmem:[#allocation41_spill] sm:$0xff] %v13347_v53 }
 0x1a0   :  { %v12912_v2 = vsub.f32 %v12807_v48, %v299_v60  ;;  %v300_v3 = vmul.f32 0.03125, %v267_v62  ;;  %v353_v6 = vsel %vm243_vm2, %v329_v61, 0.0  ;;  %v330_v7 = vmul.f32 %v12906_v59, %v12906_v59 }
 0x1a1   :  { %351 = vadd.xlane.f32.xlu1 %v350_v63  ;;  %354 = vadd.xlane.f32.xlu0 %v353_v6  ;;  %v270_v8 = vpop.xlane.xlu0 %269 }
 0x1a2   :  { %v12918_v9 = vsub.f32 %v12811_v52, %v300_v3  ;;  %v301_v10 = vmul.f32 0.03125, %v270_v8  ;;  %v331_v11 = vmul.f32 %v12912_v2, %v12912_v2  ;;  %v356_v13 = vsel %vm243_vm2, %v330_v7, 0.0 }
 0x1a3   :  { %v273_v12 = vpop.xlane.xlu1 %272 }
 0x1a4   :  { %v12924_v14 = vsub.f32 %v12837_v1, %v301_v10  ;;  %v302_v15 = vmul.f32 0.03125, %v273_v12  ;;  %v359_v18 = vsel %vm243_vm2, %v331_v11, 0.0  ;;  %v332_v19 = vmul.f32 %v12918_v9, %v12918_v9 }
 0x1a5   :  { %357 = vadd.xlane.f32.xlu1 %v356_v13  ;;  %360 = vadd.xlane.f32.xlu0 %v359_v18  ;;  %v276_v22 = vpop.xlane.xlu0 %275  ;;  %v11703_v18 = vld [vmem:[%s17915_s5 + $0x8] sm:$0xff]  }
 0x1a6   :  { %v12930_v23 = vsub.f32 %v12841_v5, %v302_v15  ;;  %v303_v24 = vmul.f32 0.03125, %v276_v22  ;;  %v333_v25 = vmul.f32 %v12924_v14, %v12924_v14  ;;  %v362_v27 = vsel %vm243_vm2, %v332_v19, 0.0  ;;  %v11702_v15 = vld [vmem:[%s17915_s5] sm:$0xff]  }
 0x1a7   :  { %v279_v26 = vpop.xlane.xlu1 %278  ;;  %9779 = vmatprep.subr.bf16.mxu1 %v11702_v15 }
 0x1a8   :  { %v12936_v28 = vsub.f32 %v12835_v0, %v303_v24  ;;  %v304_v29 = vmul.f32 0.03125, %v279_v26  ;;  %v365_v34 = vsel %vm243_vm2, %v333_v25, 0.0  ;;  %v334_v36 = vmul.f32 %v12930_v23, %v12930_v23  ;;  %9780 = vmatpush3.bf16.msra.mxu1 %v11702_v15 }
 0x1a9   :  { %363 = vadd.xlane.f32.xlu1 %v362_v27  ;;  %366 = vadd.xlane.f32.xlu0 %v365_v34  ;;  %v282_v37 = vpop.xlane.xlu0 %281 }
 0x1aa   :  { %v12942_v39 = vsub.f32 %v12839_v4, %v304_v29  ;;  %v305_v40 = vmul.f32 0.03125, %v282_v37  ;;  %v335_v43 = vmul.f32 %v12936_v28, %v12936_v28  ;;  %v368_v45 = vsel %vm243_vm2, %v334_v36, 0.0  ;;  %9781 = vmatprep.subr.bf16.mxu1 %v11703_v18 }
 0x1ab   :  { %v285_v44 = vpop.xlane.xlu1 %284 }
 0x1ac   :  { %v12948_v46 = vsub.f32 %v12865_v17, %v305_v40  ;;  %v306_v47 = vmul.f32 0.03125, %v285_v44  ;;  %v371_v50 = vsel %vm243_vm2, %v335_v43, 0.0  ;;  %v336_v51 = vmul.f32 %v12942_v39, %v12942_v39  ;;  %9782 = vmatpush3.bf16.msra.mxu1 %v11703_v18 }
 0x1ad   :  { %369 = vadd.xlane.f32.xlu1 %v368_v45  ;;  %372 = vadd.xlane.f32.xlu0 %v371_v50  ;;  %v288_v55 = vpop.xlane.xlu0 %287 }
 0x1ae   :  { %v12954_v56 = vsub.f32 %v12869_v21, %v306_v47  ;;  %v307_v57 = vmul.f32 0.03125, %v288_v55  ;;  %v337_v58 = vmul.f32 %v12948_v46, %v12948_v46  ;;  %v374_v61 = vsel %vm243_vm2, %v336_v51, 0.0 }
 0x1af   :  { %v291_v60 = vpop.xlane.xlu1 %290 }
 0x1b0   :  { %v12960_v62 = vsub.f32 %v12863_v16, %v307_v57  ;;  %v308_v63 = vmul.f32 0.03125, %v291_v60  ;;  %v377_v3 = vsel %vm243_vm2, %v337_v58, 0.0  ;;  %v338_v6 = vmul.f32 %v12954_v56, %v12954_v56 }
 0x1b1   :  { %375 = vadd.xlane.f32.xlu1 %v374_v61  ;;  %378 = vadd.xlane.f32.xlu0 %v377_v3 }
 0x1b2   :  { %v12966_v7 = vsub.f32 %v12867_v20, %v308_v63  ;;  %v339_v8 = vmul.f32 %v12960_v62, %v12960_v62  ;;  %v380_v10 = vsel %vm243_vm2, %v338_v6, 0.0 }
 0x1b4   :  { %v383_v11 = vsel %vm243_vm2, %v339_v8, 0.0  ;;  %v340_v12 = vmul.f32 %v12966_v7, %v12966_v7 }
 0x1b5   :  { %381 = vadd.xlane.f32.xlu1 %v380_v10  ;;  %384 = vadd.xlane.f32.xlu0 %v383_v11  ;;  %v12982_v11 = vld [vmem:[#allocation5] ss:$0 sm:$0xff] }
 0x1b6   :  { %v386_v13 = vsel %vm243_vm2, %v340_v12, 0.0 }
 0x1b9   :  { %387 = vadd.xlane.f32.xlu1 %v386_v13 }
 0x226   :  { %v343_v19 = vpop.xlane.xlu0 %342 }
 0x227   :  { %v389_v22 = vmul.f32 0.03125, %v343_v19 }
 0x229   :  { %v405_v24 = vadd.f32 1e-05, %v389_v22 }
 0x22a   :  { %v346_v25 = vpop.xlane.xlu1 %345  ;;  %v349_v26 = vpop.xlane.xlu0 %348 }
 0x22b   :  { %11730 = vrsqrt.f32 %v405_v24  ;;  %v390_v27 = vmul.f32 0.03125, %v346_v25  ;;  %v391_v29 = vmul.f32 0.03125, %v349_v26 }
 0x22d   :  { %v406_v34 = vadd.f32 1e-05, %v390_v27  ;;  %v407_v36 = vadd.f32 1e-05, %v391_v29 }
 0x22e   :  { %v352_v37 = vpop.xlane.xlu1 %351  ;;  %v355_v40 = vpop.xlane.xlu0 %354 }
 0x22f   :  { %11732 = vrsqrt.f32 %v406_v34  ;;  %v392_v43 = vmul.f32 0.03125, %v352_v37  ;;  %v393_v44 = vmul.f32 0.03125, %v355_v40 }
 0x230   :  { %11734 = vrsqrt.f32 %v407_v36 }
 0x231   :  { %v408_v45 = vadd.f32 1e-05, %v392_v43  ;;  %v409_v47 = vadd.f32 1e-05, %v393_v44 }
 0x232   :  { %v358_v50 = vpop.xlane.xlu1 %357  ;;  %v361_v51 = vpop.xlane.xlu0 %360 }
 0x233   :  { %11736 = vrsqrt.f32 %v408_v45  ;;  %v394_v55 = vmul.f32 0.03125, %v358_v50  ;;  %v395_v57 = vmul.f32 0.03125, %v361_v51 }
 0x234   :  { %11738 = vrsqrt.f32 %v409_v47 }
 0x235   :  { %v11731_v58 = vpop.eup %11730  ;;  %v410_v60 = vadd.f32 1e-05, %v394_v55  ;;  %v411_v61 = vadd.f32 1e-05, %v395_v57 }
 0x236   :  { %v364_v63 = vpop.xlane.xlu1 %363  ;;  %v367_v3 = vpop.xlane.xlu0 %366  ;;  %v437_v6 = vmul.f32 %v11731_v58, %v12883_v32  ;;  %v12986_v32 = vld [vmem:[#allocation5 + $0x1] ss:$0 sm:$0xff] }
 0x237   :  { %11740 = vrsqrt.f32 %v410_v60  ;;  %v396_v8 = vmul.f32 0.03125, %v364_v63  ;;  %v397_v10 = vmul.f32 0.03125, %v367_v3 }
 0x238   :  { %11742 = vrsqrt.f32 %v411_v61  ;;  %v457_v25 = vmul.f32 %v12982_v11, %v437_v6 }
 0x239   :  { %v11733_v12 = vpop.eup %11732  ;;  %v412_v13 = vadd.f32 1e-05, %v396_v8  ;;  %v413_v15 = vadd.f32 1e-05, %v397_v10 }
 0x23a   :  { %v11735_v18 = vpop.eup %11734  ;;  %v370_v19 = vpop.xlane.xlu1 %369  ;;  %v438_v24 = vmul.f32 %v11733_v12, %v12891_v42  ;;  %v477_v42 = vadd.f32 %v12986_v32, %v457_v25 }
 0x23b   :  { %v373_v22 = vpop.xlane.xlu0 %372  ;;  %11744 = vrsqrt.f32 %v412_v13  ;;  %v398_v26 = vmul.f32 0.03125, %v370_v19  ;;  %v439_v29 = vmul.f32 %v11735_v18, %v12880_v31 }
 0x23c   :  { %v399_v27 = vmul.f32 0.03125, %v373_v22  ;;  %11746 = vrsqrt.f32 %v413_v15  ;;  %v458_v34 = vmul.f32 %v12982_v11, %v438_v24 }
 0x23d   :  { %v11737_v36 = vpop.eup %11736  ;;  %v414_v37 = vadd.f32 1e-05, %v398_v26  ;;  %v459_v51 = vmul.f32 %v12982_v11, %v439_v29 }
 0x23e   :  { %v415_v40 = vadd.f32 1e-05, %v399_v27  ;;  %v11739_v43 = vpop.eup %11738  ;;  %v376_v44 = vpop.xlane.xlu1 %375  ;;  %v478_v47 = vadd.f32 %v12986_v32, %v458_v34  ;;  %v440_v50 = vmul.f32 %v11737_v36, %v12888_v41 }
 0x23f   :  { %v379_v45 = vpop.xlane.xlu0 %378  ;;  %11748 = vrsqrt.f32 %v414_v37  ;;  %v400_v55 = vmul.f32 0.03125, %v376_v44  ;;  %v441_v60 = vmul.f32 %v11739_v43, %v12901_v54  ;;  %v479_v41 = vadd.f32 %v12986_v32, %v459_v51 }
 0x240   :  { %v401_v31 = vmul.f32 0.03125, %v379_v45  ;;  %11750 = vrsqrt.f32 %v415_v40  ;;  %v493_v57 = vpack.c.bf16 %v478_v47, %v477_v42  ;;  %v460_v58 = vmul.f32 %v12982_v11, %v440_v50 }
 0x241   :  { %v11741_v61 = vpop.eup %11740  ;;  %v416_v63 = vadd.f32 1e-05, %v400_v55  ;;  %v461_v15 = vmul.f32 %v12982_v11, %v441_v60 }
 0x242   :  { %v417_v3 = vadd.f32 1e-05, %v401_v31  ;;  %v11743_v6 = vpop.eup %11742  ;;  %v382_v8 = vpop.xlane.xlu1 %381  ;;  %9783 = vmatprep.mubr.msk.bf16.mxu1 %vm243_vm2, %v493_v57  ;;  %v480_v12 = vadd.f32 %v12986_v32, %v460_v58  ;;  %v442_v13 = vmul.f32 %v11741_v61, %v12906_v59 }
 0x243   :  { %v385_v10 = vpop.xlane.xlu0 %384  ;;  %11752 = vrsqrt.f32 %v416_v63  ;;  %v402_v18 = vmul.f32 0.03125, %v382_v8  ;;  %v443_v54 = vmul.f32 %v11743_v6, %v12912_v2  ;;  %v481_v59 = vadd.f32 %v12986_v32, %v461_v15 }
 0x244   :  { %v403_v19 = vmul.f32 0.03125, %v385_v10  ;;  %11754 = vrsqrt.f32 %v417_v3  ;;  %v494_v22 = vpack.c.bf16 %v480_v12, %v479_v41  ;;  %v462_v24 = vmul.f32 %v12982_v11, %v442_v13 }
 0x245   :  { %v11745_v25 = vpop.eup %11744  ;;  %v418_v26 = vadd.f32 1e-05, %v402_v18  ;;  %v463_v40 = vmul.f32 %v12982_v11, %v443_v54 }
 0x246   :  { %v419_v27 = vadd.f32 1e-05, %v403_v19  ;;  %v11747_v29 = vpop.eup %11746  ;;  %v388_v34 = vpop.xlane.xlu1 %387  ;;  %9784 = vmatmul.mubr.msk.bf16.vlgmr.msra.gmra.mrb[0].mxu1 %vm243_vm2, %v494_v22  ;;  %v482_v36 = vadd.f32 %v12986_v32, %v462_v24  ;;  %v444_v37 = vmul.f32 %v11745_v25, %v12918_v9 }
 0x247   :  { %11756 = vrsqrt.f32 %v418_v26  ;;  %v404_v2 = vmul.f32 0.03125, %v388_v34  ;;  %v445_v43 = vmul.f32 %v11747_v29, %v12924_v14  ;;  %v483_v51 = vadd.f32 %v12986_v32, %v463_v40 }
 0x248   :  { %11758 = vrsqrt.f32 %v419_v27  ;;  %v495_v44 = vpack.c.bf16 %v482_v36, %v481_v59  ;;  %v464_v45 = vmul.f32 %v12982_v11, %v444_v37  ;;  %v8866_v36 = vld [vmem:[%s17916_s6] ss:$0 sm:$0xff] }
 0x249   :  { %v11749_v42 = vpop.eup %11748  ;;  %v420_v47 = vadd.f32 1e-05, %v404_v2  ;;  %v465_v31 = vmul.f32 %v12982_v11, %v445_v43 }
 0x24a   :  { %v11751_v50 = vpop.eup %11750  ;;  %9787 = vmatprep.mubr.msk.bf16.mxu1 %vm243_vm2, %v495_v44  ;;  %v484_v55 = vadd.f32 %v12986_v32, %v464_v45  ;;  %v446_v9 = vmul.f32 %v11749_v42, %v12930_v23 }
 0x24b   :  { %11760 = vrsqrt.f32 %v420_v47  ;;  %v447_v14 = vmul.f32 %v11751_v50, %v12936_v28  ;;  %v485_v63 = vadd.f32 %v12986_v32, %v465_v31 }
 0x24c   :  { %v496_v57 = vpack.c.bf16 %v484_v55, %v483_v51  ;;  %v466_v58 = vmul.f32 %v12982_v11, %v446_v9 }
 0x24d   :  { %v11753_v60 = vpop.eup %11752  ;;  %v467_v23 = vmul.f32 %v12982_v11, %v447_v14 }
 0x24e   :  { %v11755_v61 = vpop.eup %11754  ;;  %9788 = vmatmul.mubr.msk.bf16.gmra.mrb[4].mxu1 %vm243_vm2, %v496_v57  ;;  %v486_v3 = vadd.f32 %v12986_v32, %v466_v58  ;;  %v448_v6 = vmul.f32 %v11753_v60, %v12942_v39 }
 0x24f   :  { %v449_v8 = vmul.f32 %v11755_v61, %v12948_v46  ;;  %v487_v13 = vadd.f32 %v12986_v32, %v467_v23 }
 0x250   :  { %v497_v10 = vpack.c.bf16 %v486_v3, %v485_v63  ;;  %v468_v28 = vmul.f32 %v12982_v11, %v448_v6 }
 0x251   :  { %v11757_v41 = vpop.eup %11756  ;;  %v469_v19 = vmul.f32 %v12982_v11, %v449_v8 }
 0x252   :  { %v11759_v12 = vpop.eup %11758  ;;  %9791 = vmatprep.mubr.msk.bf16.mxu1 %vm243_vm2, %v497_v10  ;;  %v488_v15 = vadd.f32 %v12986_v32, %v468_v28  ;;  %v450_v18 = vmul.f32 %v11757_v41, %v12954_v56 }
 0x253   :  { %v451_v39 = vmul.f32 %v11759_v12, %v12960_v62  ;;  %v489_v24 = vadd.f32 %v12986_v32, %v469_v19 }
 0x254   :  { %v498_v54 = vpack.c.bf16 %v488_v15, %v487_v13  ;;  %v470_v46 = vmul.f32 %v12982_v11, %v450_v18 }
 0x255   :  { %v11761_v22 = vpop.eup %11760  ;;  %v471_v27 = vmul.f32 %v12982_v11, %v451_v39 }
 0x256   :  { %9792 = vmatmul.mubr.msk.bf16.gmra.mrb[8].mxu1 %vm243_vm2, %v498_v54  ;;  %v490_v25 = vadd.f32 %v12986_v32, %v470_v46  ;;  %v452_v26 = vmul.f32 %v11761_v22, %v12966_v7 }
 0x257   :  { %v491_v62 = vadd.f32 %v12986_v32, %v471_v27 }
 0x258   :  { %v499_v29 = vpack.c.bf16 %v490_v25, %v489_v24  ;;  %v472_v56 = vmul.f32 %v12982_v11, %v452_v26 }
 0x25a   :  { %9795 = vmatprep.mubr.msk.bf16.mxu1 %vm243_vm2, %v499_v29  ;;  %v492_v34 = vadd.f32 %v12986_v32, %v472_v56 }
 0x25c   :  { %v500_v59 = vpack.c.bf16 %v492_v34, %v491_v62 }
 0x25e   :  { %9796 = vmatmul.mubr.msk.bf16.gmra.mrb[12].mxu1 %vm243_vm2, %v500_v59 }
 0x319   :  { %v9785_v37 = vpop.f32.mrb[0].mxu1 }
 0x31a   :  { %v580_v7 = vpop.f32.mrb[1].mxu1  ;;  %v13044_v43 = vadd.f32 %v9785_v37, %v8866_v36 }
 0x31b   :  { %v581_v40 = vadd.f32 %v8866_v36, %v580_v7  ;;  %v9786_v2 = vpop.f32.mrb[2].mxu1 }
 0x31c   :  { %v13046_v11 = vadd.f32 %v9786_v2, %v8866_v36  ;;  %v583_v44 = vpop.f32.mrb[3].mxu1 }
 0x31d   :  { %v13048_v45 = vadd.f32 %v8866_v36, %v583_v44  ;;  %v13050_v32 = vmul.f32 0.35355338, %v581_v40 }
 0x31e   :  { %v13054_v42 = vpack.i.bf16 %v13046_v11, %v13044_v43  ;;  %v13058_v47 = vpack.c.bf16 %v13046_v11, %v13044_v43 }
 0x31f   :  { %9831 = vmatprep.mubr.msk.f32.mxu0 %vm731_vm3, %v13050_v32  ;;  %v13063_v50 = vpack.i.bf16 %v13048_v45, %v581_v40  ;;  %v13066_v51 = vpack.c.bf16 %v13048_v45, %v581_v40 }
 0x320   :  { %11147 = vrot.lane.b32.xlu1 %v13054_v42, %s12608_s16 }
 0x321   :  { %11142 = vrot.lane.b32.xlu0 %v13063_v50, %s12608_s16  ;;  %v9789_v55 = vpop.f32.mrb[4].mxu1 }
 0x322   :  { %v596_v9 = vpop.f32.mrb[5].mxu1  ;;  %v13072_v14 = vadd.f32 %v9789_v55, %v8866_v36 }
 0x323   :  { %v9790_v31 = vpop.f32.mrb[6].mxu1  ;;  %v13076_v60 = vadd.f32 %v8866_v36, %v596_v9 }
 0x324   :  { %v13074_v57 = vadd.f32 %v9790_v31, %v8866_v36  ;;  %v599_v58 = vpop.f32.mrb[7].mxu1  ;;  %v18096_v31 = vmov 0 }
 0x325   :  { %v13078_v61 = vadd.f32 %v8866_v36, %v599_v58  ;;  %v18097_v31 = vsel %vm13178_vm4, 4294967295, %v18096_v31 }
 0x326   :  { %v13082_v63 = vpack.i.bf16 %v13074_v57, %v13072_v14  ;;  %v13086_v3 = vpack.c.bf16 %v13074_v57, %v13072_v14  ;;  %18098 = vst [vmem:[#allocation35_spill] sm:$0xff] %v18097_v31 }
 0x327   :  { %v13090_v6 = vpack.i.bf16 %v13078_v61, %v13076_v60  ;;  %v13094_v23 = vpack.c.bf16 %v13078_v61, %v13076_v60 }
 0x328   :  { %18088 = vst [vmem:[#allocation27_spill] sm:$0xff] %v13082_v63 }
 0x329   :  { %18089 = vst [vmem:[#allocation28_spill] sm:$0xff] %v13090_v6  ;;  %11152 = vrot.lane.b32.xlu1 %v13090_v6, %s12608_s16  ;;  %v9793_v8 = vpop.f32.mrb[8].mxu1 }
 0x32a   :  { %v612_v10 = vpop.f32.mrb[9].mxu1  ;;  %v13098_v41 = vadd.f32 %v9793_v8, %v8866_v36 }
 0x32b   :  { %v9794_v28 = vpop.f32.mrb[10].mxu1  ;;  %v13102_v15 = vadd.f32 %v8866_v36, %v612_v10 }
 0x32c   :  { %v13100_v12 = vadd.f32 %v9794_v28, %v8866_v36  ;;  %v615_v13 = vpop.f32.mrb[11].mxu1 }
 0x32d   :  { %v13104_v18 = vadd.f32 %v8866_v36, %v615_v13  ;;  %11157 = vrot.lane.b32.xlu1 %v13082_v63, %s12608_s16 }
 0x32e   :  { %v13110_v19 = vpack.i.bf16 %v13100_v12, %v13098_v41  ;;  %v13114_v39 = vpack.c.bf16 %v13100_v12, %v13098_v41 }
 0x32f   :  { %v13118_v54 = vpack.i.bf16 %v13104_v18, %v13102_v15  ;;  %v13122_v46 = vpack.c.bf16 %v13104_v18, %v13102_v15 }
 0x330   :  { %18090 = vst [vmem:[#allocation29_spill] sm:$0xff] %v13110_v19  ;;  %18091 = vst [vmem:[#allocation30_spill] sm:$0xff] %v13114_v39 }
 0x331   :  { %18092 = vst [vmem:[#allocation31_spill] sm:$0xff] %v13118_v54  ;;  %18093 = vst [vmem:[#allocation32_spill] sm:$0xff] %v13122_v46  ;;  %11167 = vrot.lane.b32.xlu1 %v13110_v19, %s12608_s16  ;;  %11162 = vrot.lane.b32.xlu0 %v13118_v54, %s12608_s16  ;;  %v9797_v22 = vpop.f32.mrb[12].mxu1 }
 0x332   :  { %v628_v24 = vpop.f32.mrb[13].mxu1  ;;  %v13128_v26 = vadd.f32 %v9797_v22, %v8866_v36 }
 0x333   :  { %v9798_v25 = vpop.f32.mrb[14].mxu1  ;;  %v13132_v56 = vadd.f32 %v8866_v36, %v628_v24 }
 0x334   :  { %v13130_v27 = vadd.f32 %v9798_v25, %v8866_v36  ;;  %v631_v29 = vpop.f32.mrb[15].mxu1 }
 0x335   :  { %v13134_v62 = vadd.f32 %v8866_v36, %v631_v29 }
 0x336   :  { %v13138_v34 = vpack.i.bf16 %v13130_v27, %v13128_v26  ;;  %v13142_v59 = vpack.c.bf16 %v13130_v27, %v13128_v26 }
 0x337   :  { %v13146_v37 = vpack.i.bf16 %v13134_v62, %v13132_v56  ;;  %v13150_v7 = vpack.c.bf16 %v13134_v62, %v13132_v56 }
 0x338   :  { %18094 = vst [vmem:[#allocation33_spill] sm:$0xff] %v13142_v59  ;;  %11177 = vrot.lane.b32.xlu1 %v13138_v34, %s12608_s16 }
 0x339   :  { %18095 = vst [vmem:[#allocation34_spill] sm:$0xff] %v13150_v7  ;;  %11172 = vrot.lane.b32.xlu0 %v13146_v37, %s12608_s16 }
 0x33c   :  { %1119 = vrot.lane.b32.xlu1 %v13058_v47, %s12603_s27 }
 0x33d   :  { %1117 = vrot.lane.b32.xlu0 %v13066_v51, %s12603_s27 }
 0x340   :  { %1123 = vrot.lane.b32.xlu1 %v13086_v3, %s12603_s27 }
 0x341   :  { %1121 = vrot.lane.b32.xlu0 %v13094_v23, %s12603_s27 }
 0x344   :  { %1127 = vrot.lane.b32.xlu1 %v13114_v39, %s12603_s27 }
 0x345   :  { %1125 = vrot.lane.b32.xlu0 %v13122_v46, %s12603_s27 }
 0x348   :  { %11187 = vrot.lane.b32.xlu1 %v13054_v42, %s12609_s17 }
 0x349   :  { %11182 = vrot.lane.b32.xlu0 %v13063_v50, %s12609_s17 }
 0x34c   :  { %1131 = vrot.lane.b32.xlu1 %v13142_v59, %s12603_s27 }
 0x34d   :  { %1129 = vrot.lane.b32.xlu0 %v13150_v7, %s12603_s27 }
 0x392   :  { %v11148_v36 = vpop.permute.xlu1 %11147 }
 0x393   :  { %v11143_v40 = vpop.permute.xlu0 %11142  ;;  %v11150_v2 = vunpack.i.h.bf16 %v11148_v36  ;;  %v11149_v44 = vunpack.i.l.bf16 %v11148_v36 }
 0x394   :  { %v11145_v55 = vunpack.i.h.bf16 %v11143_v40  ;;  %v11144_v9 = vunpack.i.l.bf16 %v11143_v40 }
 0x395   :  { %v10708_v8 = vpack.c.bf16 %v11150_v2, %v11149_v44 }
 0x396   :  { %v10702_v58 = vpack.c.bf16 %v11145_v55, %v11144_v9 }
 0x398   :  { %10704 = vmatprep.subr.msk.bf16.mxu0 %vm13178_vm4, %v10702_v58 }
 0x399   :  { %10707 = vmatpush3.bf16.xpose.msk.msra.mxu0 %vm13178_vm4, %v10702_v58 }
 0x39a   :  { %10710 = vmatprep.subr.msk.bf16.mxu0 %vm13178_vm4, %v10708_v8 }
 0x39b   :  { %v11153_v10 = vpop.permute.xlu1 %11152 }
 0x39c   :  { %v11155_v28 = vunpack.i.h.bf16 %v11153_v10  ;;  %v11154_v13 = vunpack.i.l.bf16 %v11153_v10 }
 0x39e   :  { %v10714_v22 = vpack.c.bf16 %v11155_v28, %v11154_v13 }
 0x39f   :  { %v11158_v24 = vpop.permute.xlu1 %11157 }
 0x3a0   :  { %v11160_v25 = vunpack.i.h.bf16 %v11158_v24  ;;  %v11159_v29 = vunpack.i.l.bf16 %v11158_v24 }
 0x3a1   :  { %10713 = vmatpush3.bf16.xpose.msk.msra.mxu0 %vm13178_vm4, %v10708_v8 }
 0x3a2   :  { %10716 = vmatprep.subr.msk.bf16.mxu0 %vm13178_vm4, %v10714_v22  ;;  %v10720_v2 = vpack.c.bf16 %v11160_v25, %v11159_v29 }
 0x3a3   :  { %v11168_v36 = vpop.permute.xlu1 %11167  ;;  %v11163_v40 = vpop.permute.xlu0 %11162 }
 0x3a4   :  { %v11165_v9 = vunpack.i.h.bf16 %v11163_v40  ;;  %v11164_v58 = vunpack.i.l.bf16 %v11163_v40  ;;  %v11169_v24 = vunpack.i.l.bf16 %v11168_v36 }
 0x3a6   :  { %v10726_v8 = vpack.c.bf16 %v11165_v9, %v11164_v58 }
 0x3a9   :  { %10719 = vmatpush3.bf16.xpose.msk.msra.mxu0 %vm13178_vm4, %v10714_v22  ;;  %v11170_v22 = vunpack.i.h.bf16 %v11168_v36 }
 0x3aa   :  { %10722 = vmatprep.subr.msk.bf16.mxu0 %vm13178_vm4, %v10720_v2  ;;  %v11178_v44 = vpop.permute.xlu1 %11177 }
 0x3ab   :  { %v11173_v55 = vpop.permute.xlu0 %11172  ;;  %v10732_v29 = vpack.c.bf16 %v11170_v22, %v11169_v24 }
 0x3ac   :  { %v11174_v9 = vunpack.i.l.bf16 %v11173_v55 }
 0x3ae   :  { %v1120_v28 = vpop.permute.xlu1 %1119 }
 0x3af   :  { %v1118_v10 = vpop.permute.xlu0 %1117 }
 0x3b0   :  { %9855 = vmatprep.subr.bf16.mxu1 %v1118_v10 }
 0x3b1   :  { %10725 = vmatpush3.bf16.xpose.msk.msra.mxu0 %vm13178_vm4, %v10720_v2  ;;  %9856 = vmatpush3.bf16.msra.mxu1 %v1118_v10  ;;  %v11175_v2 = vunpack.i.h.bf16 %v11173_v55 }
 0x3b2   :  { %10728 = vmatprep.subr.msk.bf16.mxu0 %vm13178_vm4, %v10726_v8  ;;  %9857 = vmatprep.subr.bf16.mxu1 %v1120_v28  ;;  %v1124_v25 = vpop.permute.xlu1 %1123 }
 0x3b3   :  { %v1122_v13 = vpop.permute.xlu0 %1121  ;;  %v10738_v36 = vpack.c.bf16 %v11175_v2, %v11174_v9  ;;  %v13235_v2 = vmul.f32 0.35355338, %v13076_v60  ;;  %v13255_v60 = vmul.f32 0.35355338, %v13102_v15  ;;  %v13275_v15 = vmul.f32 0.35355338, %v13132_v56 }
 0x3b4   :  { %v13299_v56 = vld [vmem:[%s17912_s2 + $0x8] sm:$0xff] }
 0x3b5   :  { %9858 = vmatpush3.bf16.msra.mxu1 %v1120_v28  ;;  %v11180_v28 = vunpack.i.h.bf16 %v11178_v44  ;;  %18099 = vst [vmem:[#allocation36_spill] sm:$0xff] %v13299_v56 }
 0x3b6   :  { %9859 = vmatprep.subr.bf16.mxu1 %v1122_v13  ;;  %v1128_v58 = vpop.permute.xlu1 %1127 }
 0x3b7   :  { %v1126_v40 = vpop.permute.xlu0 %1125 }
 0x3b9   :  { %10731 = vmatpush3.bf16.xpose.msk.msra.mxu0 %vm13178_vm4, %v10726_v8  ;;  %9860 = vmatpush3.bf16.msra.mxu1 %v1122_v13  ;;  %v11179_v13 = vunpack.i.l.bf16 %v11178_v44  ;;  %v13222_v44 = vmul.f32 0.35355338, %v13048_v45  ;;  %v13245_v45 = vmul.f32 0.35355338, %v13072_v14  ;;  %v13262_v14 = vmul.f32 0.35355338, %v13104_v18 }
 0x3ba   :  { %10734 = vmatprep.subr.msk.bf16.mxu0 %vm13178_vm4, %v10732_v29  ;;  %9861 = vmatprep.subr.bf16.mxu1 %v1124_v25  ;;  %v13208_v8 = vpop.permute.xlu1 %11187  ;;  %v13285_v18 = vmul.f32 0.35355338, %v13128_v26  ;;  %v13304_v26 = vld [vmem:[%s17912_s2] sm:$0xff] }
 0x3bb   :  { %v11183_v10 = vpop.permute.xlu0 %11182  ;;  %v10744_v55 = vpack.c.bf16 %v11180_v28, %v11179_v13  ;;  %18100 = vst [vmem:[#allocation37_spill] sm:$0xff] %v13304_v26 }
 0x3bc   :  { %v11185_v24 = vunpack.i.h.bf16 %v11183_v10 }
 0x3bd   :  { %9862 = vmatpush3.bf16.msra.mxu1 %v1124_v25  ;;  %v11184_v25 = vunpack.i.l.bf16 %v11183_v10  ;;  %v13315_v10 = vld [vmem:[%s17912_s2 + $0x18] sm:$0xff] }
 0x3be   :  { %9863 = vmatprep.subr.bf16.mxu1 %v1126_v40  ;;  %v1132_v20 = vpop.permute.xlu1 %1131  ;;  %18101 = vst [vmem:[#allocation38_spill] sm:$0xff] %v13315_v10 }
 0x3bf   :  { %v1130_v22 = vpop.permute.xlu0 %1129 }
 0x3c1   :  { %10737 = vmatpush3.bf16.xpose.msk.msra.mxu0 %vm13178_vm4, %v10732_v29  ;;  %9864 = vmatpush3.bf16.msra.mxu1 %v1126_v40  ;;  %v13214_v29 = vpack.c.bf16 %v11185_v24, %v11184_v25  ;;  %v13225_v40 = vmul.f32 0.35355338, %v13044_v43  ;;  %v13242_v43 = vmul.f32 0.35355338, %v13078_v61  ;;  %v13265_v61 = vmul.f32 0.35355338, %v13098_v41 }
 0x3c2   :  { %10740 = vmatprep.subr.msk.bf16.mxu0 %vm13178_vm4, %v10738_v36  ;;  %9865 = vmatprep.subr.bf16.mxu1 %v1128_v58  ;;  %v13282_v41 = vmul.f32 0.35355338, %v13134_v62 }
 0x3c5   :  { %9866 = vmatpush3.bf16.msra.mxu1 %v1128_v58 }
 0x3c6   :  { %9867 = vmatprep.subr.bf16.mxu1 %v1130_v22 }
 0x3c9   :  { %10743 = vmatpush3.bf16.xpose.msk.msra.mxu0 %vm13178_vm4, %v10738_v36  ;;  %9868 = vmatpush3.bf16.msra.mxu1 %v1130_v22  ;;  %v13325_v22 = vld [vmem:[%s17912_s2 + $0x10] sm:$0xff] }
 0x3ca   :  { %10746 = vmatprep.subr.msk.bf16.mxu0 %vm13178_vm4, %v10744_v55  ;;  %9869 = vmatprep.subr.bf16.mxu1 %v1132_v20  ;;  %18102 = vst [vmem:[#allocation39_spill] sm:$0xff] %v13325_v22 }
 0x3cd   :  { %9870 = vmatpush3.bf16.msra.mxu1 %v1132_v20  ;;  %v13232_v20 = vmul.f32 0.35355338, %v13046_v11  ;;  %v13252_v11 = vmul.f32 0.35355338, %v13074_v57  ;;  %v13272_v57 = vmul.f32 0.35355338, %v13100_v12 }
 0x3ce   :  { %10752 = vmatprep.subr.msk.bf16.mxu1 %vm13178_vm4, %v13214_v29  ;;  %v13292_v12 = vmul.f32 0.35355338, %v13130_v27 }
 0x3d1   :  { %10749 = vmatpush3.bf16.xpose.msk.msra.mxu0 %vm13178_vm4, %v10744_v55 }
 0x3d8   :  { %9832 = vmatmul.mubr.msk.f32.vlgmr.msra.gmra.mrb[16].mxu0 %vm731_vm3, %v13222_v44 }
 0x3d9   :  { %9834 = vmatprep.mubr.msk.f32.mxu0 %vm731_vm3, %v13225_v40 }
 0x3dc   :  { %9835 = vmatmul.mubr.msk.f32.gmra.mrb[18].mxu0 %vm731_vm3, %v13232_v20 }
 0x3dd   :  { %9837 = vmatprep.mubr.msk.f32.mxu0 %vm731_vm3, %v13235_v2 }
 0x3e0   :  { %9838 = vmatmul.mubr.msk.f32.gmra.mrb[20].mxu0 %vm731_vm3, %v13242_v43 }
 0x3e1   :  { %9840 = vmatprep.mubr.msk.f32.mxu0 %vm731_vm3, %v13245_v45 }
 0x3e4   :  { %9841 = vmatmul.mubr.msk.f32.gmra.mrb[22].mxu0 %vm731_vm3, %v13252_v11 }
 0x3e5   :  { %9843 = vmatprep.mubr.msk.f32.mxu0 %vm731_vm3, %v13255_v60 }
 0x3e8   :  { %9844 = vmatmul.mubr.msk.f32.gmra.mrb[24].mxu0 %vm731_vm3, %v13262_v14 }
 0x3e9   :  { %9846 = vmatprep.mubr.msk.f32.mxu0 %vm731_vm3, %v13265_v61 }
 0x3ec   :  { %9847 = vmatmul.mubr.msk.f32.gmra.mrb[26].mxu0 %vm731_vm3, %v13272_v57 }
 0x3ed   :  { %9849 = vmatprep.mubr.msk.f32.mxu0 %vm731_vm3, %v13275_v15 }
 0x3f0   :  { %9850 = vmatmul.mubr.msk.f32.gmra.mrb[28].mxu0 %vm731_vm3, %v13282_v41 }
 0x3f1   :  { %9852 = vmatprep.mubr.msk.f32.mxu0 %vm731_vm3, %v13285_v18 }
 0x3f4   :  { %9853 = vmatmul.mubr.msk.f32.gmra.mrb[30].mxu0 %vm731_vm3, %v13292_v12 }
 0x4ab   :  { %v9833_v62 = vpop.f32.mrb[16].mxu0 }
 0x4ac   :  { %v13307_v9 = vadd.f32 %v9833_v62, %v13299_v56  ;;  %v878_v58 = vpop.f32.mrb[17].mxu0 }
 0x4ad   :  { %v13310_v27 = vadd.f32 %v878_v58, %v13304_v26 }
 0x4ae   :  { %959 = vmax.xlane.f32.xlu1 %v13307_v9 }
 0x4af   :  { %v9836_v36 = vpop.f32.mrb[18].mxu0  ;;  %957 = vmax.xlane.f32.xlu0 %v13310_v27 }
 0x4b0   :  { %v13320_v28 = vadd.f32 %v9836_v36, %v13315_v10  ;;  %v888_v13 = vpop.f32.mrb[19].mxu0 }
 0x4b1   :  { %v13329_v25 = vadd.f32 %v888_v13, %v13325_v22  ;;  %v13339_v13 = vld [vmem:[%s17912_s2 + $0x28] sm:$0xff] }
 0x4b2   :  { %18103 = vst [vmem:[#allocation40_spill] sm:$0xff] %v13339_v13 }
 0x4b3   :  { %v9839_v55 = vpop.f32.mrb[20].mxu0  ;;  %963 = vmax.xlane.f32.xlu0 %v13320_v28 }
 0x4b4   :  { %v898_v24 = vpop.f32.mrb[21].mxu0  ;;  %v13342_v52 = vadd.f32 %v9839_v55, %v13339_v13  ;;  %v13361_v55 = vld [vmem:[%s17912_s2 + $0x20] sm:$0xff] }
 0x4b5   :  { %18106 = vst [vmem:[#allocation43_spill] sm:$0xff] %v13361_v55  ;;  %v13368_v38 = vadd.f32 %v898_v24, %v13361_v55  ;;  %v13396_v55 = vld [vmem:[%s17912_s2 + $0x40] sm:$0xff] }
 0x4b6   :  { %18110 = vst [vmem:[#allocation47_spill] sm:$0xff] %v13396_v55 }
 0x4b7   :  { %v9842_v62 = vpop.f32.mrb[22].mxu0  ;;  %961 = vmax.xlane.f32.xlu0 %v13329_v25 }
 0x4b8   :  { %v908_v58 = vpop.f32.mrb[23].mxu0  ;;  %v13351_v48 = vadd.f32 %v9842_v62, %v13347_v53  ;;  %v13373_v62 = vld [vmem:[%s17912_s2 + $0x58] sm:$0xff] }
 0x4b9   :  { %18107 = vst [vmem:[#allocation44_spill] sm:$0xff] %v13373_v62  ;;  %v13386_v24 = vadd.f32 %v908_v58, %v13378_v30  ;;  %v13409_v30 = vld [vmem:[%s17912_s2 + $0x78] sm:$0xff] }
 0x4ba   :  { %18111 = vst [vmem:[#allocation48_spill] sm:$0xff] %v13409_v30 }
 0x4bb   :  { %v9845_v21 = vpop.f32.mrb[24].mxu0 }
 0x4bc   :  { %v918_v36 = vpop.f32.mrb[25].mxu0  ;;  %v13365_v35 = vadd.f32 %v9845_v21, %v13356_v49 }
 0x4bd   :  { %v13404_v58 = vadd.f32 %v918_v36, %v13396_v55  ;;  %v13427_v55 = vld [vmem:[%s17912_s2 + $0x60] sm:$0xff] }
 0x4be   :  { %18113 = vst [vmem:[#allocation50_spill] sm:$0xff] %v13427_v55 }
 0x4bf   :  { %11197 = vrot.lane.b32.xlu1 %v13082_v63, %s12609_s17  ;;  %v9848_v16 = vpop.f32.mrb[26].mxu0 }
 0x4c0   :  { %v928_v17 = vpop.f32.mrb[27].mxu0  ;;  %v13383_v21 = vadd.f32 %v9848_v16, %v13373_v62  ;;  %v13414_v62 = vld [vmem:[%s17912_s2 + $0x50] sm:$0xff] }
 0x4c1   :  { %18112 = vst [vmem:[#allocation49_spill] sm:$0xff] %v13414_v62  ;;  %v13422_v36 = vadd.f32 %v928_v17, %v13414_v62 }
 0x4c3   :  { %v9851_v4 = vpop.f32.mrb[28].mxu0 }
 0x4c4   :  { %v938_v5 = vpop.f32.mrb[29].mxu0  ;;  %v13401_v16 = vadd.f32 %v9851_v4, %v13391_v33 }
 0x4c5   :  { %v13432_v33 = vadd.f32 %v938_v5, %v13427_v55 }
 0x4c7   :  { %v9854_v0 = vpop.f32.mrb[30].mxu0 }
 0x4c8   :  { %v948_v1 = vpop.f32.mrb[31].mxu0  ;;  %v13419_v4 = vadd.f32 %v9854_v0, %v13409_v30  ;;  %v13437_v0 = vld [vmem:[%s17912_s2 + $0x70] sm:$0xff] }
 0x4c9   :  { %18114 = vst [vmem:[#allocation51_spill] sm:$0xff] %v13437_v0  ;;  %v13441_v17 = vadd.f32 %v948_v1, %v13437_v0 }
 0x4cd   :  { %11192 = vrot.lane.b32.xlu0 %v13090_v6, %s12609_s17 }
 0x4e3   :  { %967 = vmax.xlane.f32.xlu1 %v13342_v52 }
 0x4e7   :  { %971 = vmax.xlane.f32.xlu1 %v13351_v48 }
 0x4eb   :  { %975 = vmax.xlane.f32.xlu1 %v13365_v35 }
 0x4ec   :  { %965 = vmax.xlane.f32.xlu0 %v13368_v38 }
 0x4ef   :  { %979 = vmax.xlane.f32.xlu1 %v13383_v21 }
 0x4f0   :  { %969 = vmax.xlane.f32.xlu0 %v13386_v24 }
 0x4f3   :  { %983 = vmax.xlane.f32.xlu1 %v13401_v16 }
 0x4f4   :  { %973 = vmax.xlane.f32.xlu0 %v13404_v58 }
 0x4f7   :  { %987 = vmax.xlane.f32.xlu1 %v13419_v4 }
 0x4f8   :  { %977 = vmax.xlane.f32.xlu0 %v13422_v36 }
 0x4fc   :  { %981 = vmax.xlane.f32.xlu0 %v13432_v33 }
 0x500   :  { %985 = vmax.xlane.f32.xlu0 %v13441_v17 }
 0x53b   :  { %v960_v62 = vpop.xlane.xlu1 %959 }
 0x53c   :  { %v990_v30 = vsub.f32 %v13307_v9, %v960_v62  ;;  %v958_v49 = vpop.xlane.xlu0 %957 }
 0x53d   :  { %v989_v53 = vsub.f32 %v13310_v27, %v958_v49 }
 0x53e   :  { %v1007_v5 = vmul.f32 1.442695, %v990_v30 }
 0x53f   :  { %v1005_v55 = vmul.f32 1.442695, %v989_v53  ;;  %v13464_v53 = vpop.permute.xlu1 %11197 }
 0x540   :  { %11762 = vpow2.f32 %v1007_v5  ;;  %v964_v13 = vpop.xlane.xlu0 %963 }
 0x541   :  { %11764 = vpow2.f32 %v1005_v55  ;;  %v992_v6 = vsub.f32 %v13320_v28, %v964_v13 }
 0x543   :  { %v1011_v63 = vmul.f32 1.442695, %v992_v6 }
 0x544   :  { %v962_v22 = vpop.xlane.xlu0 %961 }
 0x545   :  { %11766 = vpow2.f32 %v1011_v63  ;;  %v991_v1 = vsub.f32 %v13329_v25, %v962_v22 }
 0x547   :  { %v1009_v0 = vmul.f32 1.442695, %v991_v1 }
 0x548   :  { %v13466_v27 = vpop.permute.xlu0 %11192 }
 0x549   :  { %11768 = vpow2.f32 %v1009_v0 }
 0x54a   :  { %v13448_v10 = vpop.eup %11762 }
 0x54b   :  { %v13450_v9 = vpop.eup %11764  ;;  %1039 = vadd.xlane.f32.xlu0 %v13448_v10 }
 0x54c   :  { %1037 = vadd.xlane.f32.xlu1 %v13450_v9 }
 0x54f   :  { %v13454_v30 = vpop.eup %11766 }
 0x550   :  { %1043 = vadd.xlane.f32.xlu1 %v13454_v30 }
 0x553   :  { %v13457_v49 = vpop.eup %11768 }
 0x554   :  { %1041 = vadd.xlane.f32.xlu1 %v13457_v49 }
 0x561   :  { %11202 = vrot.lane.b32.xlu0 %v13118_v54, %s12609_s17 }
 0x565   :  { %11207 = vrot.lane.b32.xlu1 %v13110_v19, %s12609_s17 }
 0x570   :  { %v968_v63 = vpop.xlane.xlu1 %967 }
 0x571   :  { %v994_v28 = vsub.f32 %v13342_v52, %v968_v63 }
 0x573   :  { %v1015_v25 = vmul.f32 1.442695, %v994_v28 }
 0x574   :  { %v972_v6 = vpop.xlane.xlu1 %971 }
 0x575   :  { %v996_v13 = vsub.f32 %v13351_v48, %v972_v6  ;;  %11770 = vpow2.f32 %v1015_v25 }
 0x577   :  { %v1019_v19 = vmul.f32 1.442695, %v996_v13 }
 0x578   :  { %v976_v22 = vpop.xlane.xlu1 %975 }
 0x579   :  { %v966_v55 = vpop.xlane.xlu0 %965  ;;  %v998_v62 = vsub.f32 %v13365_v35, %v976_v22 }
 0x57a   :  { %v993_v0 = vsub.f32 %v13368_v38, %v966_v55 }
 0x57b   :  { %v1023_v26 = vmul.f32 1.442695, %v998_v62 }
 0x57c   :  { %v1013_v5 = vmul.f32 1.442695, %v993_v0  ;;  %v980_v1 = vpop.xlane.xlu1 %979 }
 0x57d   :  { %v970_v54 = vpop.xlane.xlu0 %969  ;;  %v1000_v48 = vsub.f32 %v13383_v21, %v980_v1 }
 0x57e   :  { %11772 = vpow2.f32 %v1013_v5  ;;  %v995_v56 = vsub.f32 %v13386_v24, %v970_v54 }
 0x57f   :  { %11774 = vpow2.f32 %v1019_v19  ;;  %v1027_v22 = vmul.f32 1.442695, %v1000_v48  ;;  %v13476_v13 = vpop.eup %11770 }
 0x580   :  { %v1017_v52 = vmul.f32 1.442695, %v995_v56  ;;  %v984_v63 = vpop.xlane.xlu1 %983  ;;  %11776 = vpow2.f32 %v1023_v26 }
 0x581   :  { %v974_v28 = vpop.xlane.xlu0 %973  ;;  %v1002_v19 = vsub.f32 %v13401_v16, %v984_v63 }
 0x582   :  { %v997_v35 = vsub.f32 %v13404_v58, %v974_v28  ;;  %11778 = vpow2.f32 %v1017_v52 }
 0x583   :  { %v1031_v0 = vmul.f32 1.442695, %v1002_v19 }
 0x584   :  { %v1021_v6 = vmul.f32 1.442695, %v997_v35  ;;  %v988_v55 = vpop.xlane.xlu1 %987 }
 0x585   :  { %v978_v38 = vpop.xlane.xlu0 %977  ;;  %v1004_v21 = vsub.f32 %v13419_v4, %v988_v55 }
 0x586   :  { %11780 = vpow2.f32 %v1021_v6  ;;  %v999_v25 = vsub.f32 %v13422_v36, %v978_v38 }
 0x587   :  { %11782 = vpow2.f32 %v1027_v22  ;;  %v1035_v5 = vmul.f32 1.442695, %v1004_v21 }
 0x588   :  { %v13478_v54 = vpop.eup %11772  ;;  %v1025_v56 = vmul.f32 1.442695, %v999_v25 }
 0x589   :  { %1047 = vadd.xlane.f32.xlu1 %v13476_v13  ;;  %1045 = vadd.xlane.f32.xlu0 %v13478_v54  ;;  %v982_v26 = vpop.xlane.xlu0 %981  ;;  %v13485_v58 = vpop.eup %11774 }
 0x58a   :  { %v1001_v24 = vsub.f32 %v13432_v33, %v982_v26  ;;  %v13487_v36 = vpop.eup %11776  ;;  %11784 = vpow2.f32 %v1025_v56 }
 0x58c   :  { %v1029_v62 = vmul.f32 1.442695, %v1001_v24  ;;  %v13492_v52 = vpop.eup %11778 }
 0x58d   :  { %1055 = vadd.xlane.f32.xlu1 %v13487_v36  ;;  %1051 = vadd.xlane.f32.xlu0 %v13485_v58  ;;  %v986_v16 = vpop.xlane.xlu0 %985 }
 0x58e   :  { %11786 = vpow2.f32 %v1029_v62  ;;  %v1003_v1 = vsub.f32 %v13441_v17, %v986_v16  ;;  %v11190_v16 = vunpack.i.h.bf16 %v13208_v8 }
 0x58f   :  { %11788 = vpow2.f32 %v1031_v0 }
 0x590   :  { %v13494_v4 = vpop.eup %11780  ;;  %11790 = vpow2.f32 %v1035_v5  ;;  %v1033_v33 = vmul.f32 1.442695, %v1003_v1  ;;  %v11189_v5 = vunpack.i.l.bf16 %v13208_v8  ;;  %v11200_v8 = vunpack.i.h.bf16 %v13464_v53 }
 0x591   :  { %1049 = vadd.xlane.f32.xlu0 %v13492_v52  ;;  %1053 = vadd.xlane.f32.xlu1 %v13494_v4  ;;  %v13498_v63 = vpop.eup %11782 }
 0x592   :  { %11792 = vpow2.f32 %v1033_v33 }
 0x594   :  { %v13501_v28 = vpop.eup %11784 }
 0x595   :  { %1059 = vadd.xlane.f32.xlu1 %v13498_v63 }
 0x598   :  { %v13503_v48 = vpop.eup %11786 }
 0x599   :  { %1057 = vadd.xlane.f32.xlu1 %v13501_v28  ;;  %1061 = vadd.xlane.f32.xlu0 %v13503_v48  ;;  %v13507_v17 = vpop.eup %11788 }
 0x59a   :  { %v13509_v35 = vpop.eup %11790 }
 0x59c   :  { %v13513_v6 = vpop.eup %11792 }
 0x59d   :  { %1063 = vadd.xlane.f32.xlu1 %v13507_v17  ;;  %1067 = vadd.xlane.f32.xlu0 %v13509_v35 }
 0x5a1   :  { %1065 = vadd.xlane.f32.xlu0 %v13513_v6 }
 0x5ae   :  { %11217 = vrot.lane.b32.xlu1 %v13138_v34, %s12609_s17 }
 0x5b2   :  { %1256 = vrot.lane.b32.xlu1 %v13222_v44, %s12610_s1 }
 0x5b6   :  { %1260 = vrot.lane.b32.xlu1 %v13232_v20, %s12610_s1 }
 0x5b7   :  { %11212 = vrot.lane.b32.xlu0 %v13146_v37, %s12609_s17 }
 0x5ba   :  { %1264 = vrot.lane.b32.xlu1 %v13242_v43, %s12610_s1 }
 0x5bb   :  { %1254 = vrot.lane.b32.xlu0 %v13050_v32, %s12610_s1 }
 0x5be   :  { %1268 = vrot.lane.b32.xlu1 %v13252_v11, %s12610_s1 }
 0x5bf   :  { %1258 = vrot.lane.b32.xlu0 %v13225_v40, %s12610_s1 }
 0x5c2   :  { %1272 = vrot.lane.b32.xlu1 %v13262_v14, %s12610_s1 }
 0x5c3   :  { %1262 = vrot.lane.b32.xlu0 %v13235_v2, %s12610_s1 }
 0x5c6   :  { %1276 = vrot.lane.b32.xlu1 %v13272_v57, %s12610_s1 }
 0x5c7   :  { %1266 = vrot.lane.b32.xlu0 %v13245_v45, %s12610_s1 }
 0x5ca   :  { %1280 = vrot.lane.b32.xlu1 %v13282_v41, %s12610_s1 }
 0x5cb   :  { %1270 = vrot.lane.b32.xlu0 %v13255_v60, %s12610_s1 }
 0x5ce   :  { %1284 = vrot.lane.b32.xlu1 %v13292_v12, %s12610_s1 }
 0x5cf   :  { %1274 = vrot.lane.b32.xlu0 %v13265_v61, %s12610_s1 }
 0x5d2   :  { %1681 = vrot.lane.b32.xlu1 %v13058_v47, %s12611_s12 }
 0x5d3   :  { %1278 = vrot.lane.b32.xlu0 %v13275_v15, %s12610_s1 }
 0x5d6   :  { %1685 = vrot.lane.b32.xlu1 %v13086_v3, %s12611_s12 }
 0x5d7   :  { %1282 = vrot.lane.b32.xlu0 %v13285_v18, %s12610_s1 }
 0x5d8   :  { %v1040_v38 = vpop.xlane.xlu0 %1039 }
 0x5d9   :  { %11794 = vrcp.f32 %v1040_v38  ;;  %v1038_v22 = vpop.xlane.xlu1 %1037  ;;  %v11195_v38 = vunpack.i.h.bf16 %v13466_v27 }
 0x5da   :  { %11796 = vrcp.f32 %v1038_v22  ;;  %1689 = vrot.lane.b32.xlu1 %v13114_v39, %s12611_s12  ;;  %v11194_v22 = vunpack.i.l.bf16 %v13466_v27 }
 0x5db   :  { %1679 = vrot.lane.b32.xlu0 %v13066_v51, %s12611_s12 }
 0x5dd   :  { %v1044_v25 = vpop.xlane.xlu1 %1043 }
 0x5de   :  { %1693 = vrot.lane.b32.xlu1 %v13142_v59, %s12611_s12  ;;  %11798 = vrcp.f32 %v1044_v25  ;;  %v10762_v25 = vpack.c.bf16 %v11195_v38, %v11194_v22 }
 0x5df   :  { %1683 = vrot.lane.b32.xlu0 %v13094_v23, %s12611_s12 }
 0x5e1   :  { %v1042_v55 = vpop.xlane.xlu1 %1041 }
 0x5e2   :  { %11800 = vrcp.f32 %v1042_v55  ;;  %11227 = vrot.lane.b32.xlu1 %v13054_v42, %s12612_s4 }
 0x5e3   :  { %v11795_v19 = vpop.eup %11794  ;;  %1687 = vrot.lane.b32.xlu0 %v13122_v46, %s12611_s12 }
 0x5e4   :  { %v11797_v56 = vpop.eup %11796  ;;  %v1086_v26 = vmul.f32 %v11795_v19, %v13448_v10 }
 0x5e5   :  { %v1085_v21 = vmul.f32 %v11797_v56, %v13450_v9  ;;  %v10756_v9 = vpack.c.bf16 %v11190_v16, %v11189_v5  ;;  %v11208_v56 = vpop.permute.xlu1 %11207 }
 0x5e7   :  { %1691 = vrot.lane.b32.xlu0 %v13150_v7, %s12611_s12  ;;  %v1101_v24 = vpack.c.bf16 %v1086_v26, %v1085_v21  ;;  %v11210_v26 = vunpack.i.h.bf16 %v11208_v56 }
 0x5e8   :  { %v11799_v62 = vpop.eup %11798 }
 0x5e9   :  { %9871 = vmatprep.mubr.bf16.mxu1 %v1101_v24  ;;  %v1088_v1 = vmul.f32 %v11799_v62, %v13454_v30  ;;  %v11199_v30 = vunpack.i.l.bf16 %v13464_v53  ;;  %v11209_v53 = vunpack.i.l.bf16 %v11208_v56 }
 0x5eb   :  { %11222 = vrot.lane.b32.xlu0 %v13063_v50, %s12612_s4  ;;  %v10780_v21 = vpack.c.bf16 %v11210_v26, %v11209_v53 }
 0x5ec   :  { %v11801_v0 = vpop.eup %11800 }
 0x5ed   :  { %v1087_v10 = vmul.f32 %v11801_v0, %v13457_v49  ;;  %v10768_v49 = vpack.c.bf16 %v11200_v8, %v11199_v30 }
 0x5ef   :  { %v1102_v33 = vpack.c.bf16 %v1088_v1, %v1087_v10 }
 0x5f1   :  { %9872 = vmatmul.mubr.bf16.vlgmr.msra.gmra.mrb[16].mxu1 %v1102_v33 }
 0x5f2   :  { %10755 = vmatpush3.bf16.xpose.msk.msra.mxu1 %vm13178_vm4, %v13214_v29  ;;  %v11203_v29 = vpop.permute.xlu0 %11202 }
 0x5f3   :  { %10758 = vmatprep.subr.msk.bf16.mxu1 %vm13178_vm4, %v10756_v9  ;;  %v11205_v27 = vunpack.i.h.bf16 %v11203_v29  ;;  %v11204_v55 = vunpack.i.l.bf16 %v11203_v29 }
 0x5f5   :  { %v10774_v19 = vpack.c.bf16 %v11205_v27, %v11204_v55 }
 0x5fa   :  { %10761 = vmatpush3.bf16.xpose.msk.msra.mxu1 %vm13178_vm4, %v10756_v9 }
 0x5fb   :  { %10764 = vmatprep.subr.msk.bf16.mxu1 %vm13178_vm4, %v10762_v25 }
 0x602   :  { %10767 = vmatpush3.bf16.xpose.msk.msra.mxu1 %vm13178_vm4, %v10762_v25 }
 0x603   :  { %10770 = vmatprep.subr.msk.bf16.mxu1 %vm13178_vm4, %v10768_v49 }
 0x60a   :  { %10773 = vmatpush3.bf16.xpose.msk.msra.mxu1 %vm13178_vm4, %v10768_v49 }
 0x60b   :  { %10776 = vmatprep.subr.msk.bf16.mxu1 %vm13178_vm4, %v10774_v19 }
 0x612   :  { %10779 = vmatpush3.bf16.xpose.msk.msra.mxu1 %vm13178_vm4, %v10774_v19 }
 0x613   :  { %10782 = vmatprep.subr.msk.bf16.mxu1 %vm13178_vm4, %v10780_v21 }
 0x616   :  { %v1048_v24 = vpop.xlane.xlu1 %1047  ;;  %v1046_v62 = vpop.xlane.xlu0 %1045 }
 0x617   :  { %11802 = vrcp.f32 %v1048_v24 }
 0x618   :  { %11804 = vrcp.f32 %v1046_v62 }
 0x61a   :  { %10785 = vmatpush3.bf16.xpose.msk.msra.mxu1 %vm13178_vm4, %v10780_v21  ;;  %v1056_v0 = vpop.xlane.xlu1 %1055  ;;  %v1052_v16 = vpop.xlane.xlu0 %1051 }
 0x61b   :  { %11806 = vrcp.f32 %v1056_v0 }
 0x61c   :  { %11808 = vrcp.f32 %v1052_v16 }
 0x61e   :  { %v1054_v5 = vpop.xlane.xlu1 %1053  ;;  %v1050_v1 = vpop.xlane.xlu0 %1049 }
 0x61f   :  { %11810 = vrcp.f32 %v1054_v5 }
 0x620   :  { %11812 = vrcp.f32 %v1050_v1 }
 0x621   :  { %v11803_v10 = vpop.eup %11802 }
 0x622   :  { %v11805_v33 = vpop.eup %11804  ;;  %v1060_v9 = vpop.xlane.xlu1 %1059  ;;  %v1090_v38 = vmul.f32 %v11803_v10, %v13476_v13 }
 0x623   :  { %v1089_v22 = vmul.f32 %v11805_v33, %v13478_v54  ;;  %11814 = vrcp.f32 %v1060_v9 }
 0x625   :  { %v1103_v25 = vpack.c.bf16 %v1090_v38, %v1089_v22  ;;  %v11807_v49 = vpop.eup %11806 }
 0x626   :  { %v1058_v8 = vpop.xlane.xlu1 %1057  ;;  %v1062_v30 = vpop.xlane.xlu0 %1061  ;;  %v1094_v53 = vmul.f32 %v11807_v49, %v13487_v36 }
 0x627   :  { %11816 = vrcp.f32 %v1058_v8  ;;  %9875 = vmatprep.mubr.bf16.mxu1 %v1103_v25  ;;  %v11809_v29 = vpop.eup %11808 }
 0x628   :  { %11818 = vrcp.f32 %v1062_v30  ;;  %v1092_v54 = vmul.f32 %v11809_v29, %v13485_v58 }
 0x629   :  { %v11811_v27 = vpop.eup %11810 }
 0x62a   :  { %v11813_v55 = vpop.eup %11812  ;;  %v1064_v19 = vpop.xlane.xlu1 %1063  ;;  %v1093_v26 = vmul.f32 %v11811_v27, %v13494_v4 }
 0x62b   :  { %v1068_v56 = vpop.xlane.xlu0 %1067  ;;  %11820 = vrcp.f32 %v1064_v19  ;;  %v1091_v13 = vmul.f32 %v11813_v55, %v13492_v52 }
 0x62c   :  { %v1105_v21 = vpack.c.bf16 %v1094_v53, %v1093_v26  ;;  %11822 = vrcp.f32 %v1068_v56 }
 0x62d   :  { %v1104_v24 = vpack.c.bf16 %v1092_v54, %v1091_v13  ;;  %v11815_v16 = vpop.eup %11814 }
 0x62e   :  { %v11218_v62 = vpop.permute.xlu1 %11217  ;;  %v1096_v36 = vmul.f32 %v11815_v16, %v13498_v63 }
 0x62f   :  { %v1066_v0 = vpop.xlane.xlu0 %1065  ;;  %9876 = vmatmul.mubr.bf16.gmra.mrb[20].mxu1 %v1104_v24  ;;  %v11220_v52 = vunpack.i.h.bf16 %v11218_v62  ;;  %v11219_v9 = vunpack.i.l.bf16 %v11218_v62 }
 0x630   :  { %11824 = vrcp.f32 %v1066_v0  ;;  %9879 = vmatprep.mubr.bf16.mxu1 %v1105_v21 }
 0x631   :  { %v11817_v5 = vpop.eup %11816  ;;  %v10792_v19 = vpack.c.bf16 %v11220_v52, %v11219_v9 }
 0x632   :  { %v1257_v1 = vpop.permute.xlu1 %1256  ;;  %v1095_v4 = vmul.f32 %v11817_v5, %v13501_v28  ;;  %v11819_v33 = vpop.eup %11818 }
 0x633   :  { %v11213_v10 = vpop.permute.xlu0 %11212  ;;  %v1097_v29 = vmul.f32 %v11819_v33, %v13503_v48 }
 0x634   :  { %v11215_v58 = vunpack.i.h.bf16 %v11213_v10  ;;  %v11214_v38 = vunpack.i.l.bf16 %v11213_v10  ;;  %v1106_v22 = vpack.c.bf16 %v1096_v36, %v1095_v4 }
 0x635   :  { %v11821_v25 = vpop.eup %11820 }
 0x636   :  { %v10786_v8 = vpack.c.bf16 %v11215_v58, %v11214_v38  ;;  %v1261_v30 = vpop.permute.xlu1 %1260  ;;  %v1098_v27 = vmul.f32 %v11821_v25, %v13507_v17  ;;  %v11823_v55 = vpop.eup %11822 }
 0x637   :  { %v1255_v49 = vpop.permute.xlu0 %1254  ;;  %9880 = vmatmul.mubr.bf16.gmra.mrb[24].mxu1 %v1106_v22  ;;  %v1100_v17 = vmul.f32 %v11823_v55, %v13509_v35 }
 0x638   :  { %10788 = vmatprep.subr.msk.bf16.mxu1 %vm13178_vm4, %v10786_v8  ;;  %v1107_v63 = vpack.c.bf16 %v1098_v27, %v1097_v29 }
 0x639   :  { %10791 = vmatpush3.bf16.xpose.msk.msra.mxu1 %vm13178_vm4, %v10786_v8 }
 0x63a   :  { %v11825_v28 = vpop.eup %11824  ;;  %10794 = vmatprep.subr.msk.bf16.mxu1 %vm13178_vm4, %v10792_v19  ;;  %v1265_v56 = vpop.permute.xlu1 %1264  ;;  %9883 = vmatprep.mubr.bf16.mxu1 %v1107_v63 }
 0x63b   :  { %v1259_v26 = vpop.permute.xlu0 %1258  ;;  %v1099_v48 = vmul.f32 %v11825_v28, %v13513_v6 }
 0x63d   :  { %v1108_v53 = vpack.c.bf16 %v1100_v17, %v1099_v48 }
 0x63e   :  { %v1269_v13 = vpop.permute.xlu1 %1268 }
 0x63f   :  { %v1263_v54 = vpop.permute.xlu0 %1262  ;;  %9884 = vmatmul.mubr.bf16.gmra.mrb[28].mxu1 %v1108_v53 }
 0x640   :  { %9919 = vmatprep.mubr.msk.f32.mxu1 %vm731_vm3, %v1255_v49 }
 0x641   :  { %10797 = vmatpush3.bf16.xpose.msk.msra.mxu1 %vm13178_vm4, %v10792_v19 }
 0x642   :  { %v1273_v21 = vpop.permute.xlu1 %1272 }
 0x643   :  { %v1267_v24 = vpop.permute.xlu0 %1266 }
 0x646   :  { %v1277_v62 = vpop.permute.xlu1 %1276 }
 0x647   :  { %v1271_v0 = vpop.permute.xlu0 %1270 }
 0x648   :  { %9920 = vmatmul.mubr.msk.f32.vlgmr.msra.gmra.mrb[32].mxu1 %vm731_vm3, %v1257_v1 }
 0x649   :  { %9922 = vmatprep.mubr.msk.f32.mxu1 %vm731_vm3, %v1259_v26 }
 0x64a   :  { %v1281_v35 = vpop.permute.xlu1 %1280 }
 0x64b   :  { %v1275_v6 = vpop.permute.xlu0 %1274 }
 0x64c   :  { %9923 = vmatmul.mubr.msk.f32.gmra.mrb[34].mxu1 %vm731_vm3, %v1261_v30 }
 0x64d   :  { %9925 = vmatprep.mubr.msk.f32.mxu1 %vm731_vm3, %v1263_v54 }
 0x64e   :  { %v1285_v5 = vpop.permute.xlu1 %1284 }
 0x64f   :  { %v1279_v16 = vpop.permute.xlu0 %1278 }
 0x650   :  { %9926 = vmatmul.mubr.msk.f32.gmra.mrb[36].mxu1 %vm731_vm3, %v1265_v56 }
 0x651   :  { %9928 = vmatprep.mubr.msk.f32.mxu1 %vm731_vm3, %v1267_v24 }
 0x652   :  { %v1682_v4 = vpop.permute.xlu1 %1681 }
 0x653   :  { %v1283_v10 = vpop.permute.xlu0 %1282 }
 0x654   :  { %9929 = vmatmul.mubr.msk.f32.gmra.mrb[38].mxu1 %vm731_vm3, %v1269_v13 }
 0x655   :  { %9931 = vmatprep.mubr.msk.f32.mxu1 %vm731_vm3, %v1271_v0  ;;  %v18131_v0 = vld [vmem:[#allocation36_spill] sm:$0xff] }
 0x656   :  { %v1686_v33 = vpop.permute.xlu1 %1685 }
 0x657   :  { %v1680_v1 = vpop.permute.xlu0 %1679 }
 0x658   :  { %9932 = vmatmul.mubr.msk.f32.gmra.mrb[40].mxu1 %vm731_vm3, %v1273_v21  ;;  %9943 = vmatprep.subr.bf16.mxu0 %v1680_v1 }
 0x659   :  { %9934 = vmatprep.mubr.msk.f32.mxu1 %vm731_vm3, %v1275_v6  ;;  %9944 = vmatpush3.bf16.msra.mxu0 %v1680_v1  ;;  %v18133_v1 = vld [vmem:[#allocation38_spill] sm:$0xff] }
 0x65a   :  { %9945 = vmatprep.subr.bf16.mxu0 %v1682_v4  ;;  %v1690_v58 = vpop.permute.xlu1 %1689 }
 0x65b   :  { %v1684_v36 = vpop.permute.xlu0 %1683 }
 0x65c   :  { %9935 = vmatmul.mubr.msk.f32.gmra.mrb[42].mxu1 %vm731_vm3, %v1277_v62 }
 0x65d   :  { %9937 = vmatprep.mubr.msk.f32.mxu1 %vm731_vm3, %v1279_v16  ;;  %9946 = vmatpush3.bf16.msra.mxu0 %v1682_v4  ;;  %v18132_v16 = vld [vmem:[#allocation37_spill] sm:$0xff] }
 0x65e   :  { %9947 = vmatprep.subr.bf16.mxu0 %v1684_v36  ;;  %v1694_v8 = vpop.permute.xlu1 %1693 }
 0x65f   :  { %v1688_v52 = vpop.permute.xlu0 %1687 }
 0x660   :  { %9938 = vmatmul.mubr.msk.f32.gmra.mrb[44].mxu1 %vm731_vm3, %v1281_v35 }
 0x661   :  { %9940 = vmatprep.mubr.msk.f32.mxu1 %vm731_vm3, %v1283_v10  ;;  %9948 = vmatpush3.bf16.msra.mxu0 %v1684_v36 }
 0x662   :  { %9949 = vmatprep.subr.bf16.mxu0 %v1686_v33 }
 0x663   :  { %v1692_v9 = vpop.permute.xlu0 %1691 }
 0x664   :  { %9941 = vmatmul.mubr.msk.f32.gmra.mrb[46].mxu1 %vm731_vm3, %v1285_v5 }
 0x665   :  { %9950 = vmatpush3.bf16.msra.mxu0 %v1686_v33 }
 0x666   :  { %9951 = vmatprep.subr.bf16.mxu0 %v1688_v52 }
 0x667   :  { %v11223_v38 = vpop.permute.xlu0 %11222 }
 0x668   :  { %v11225_v22 = vunpack.i.h.bf16 %v11223_v38  ;;  %v11224_v25 = vunpack.i.l.bf16 %v11223_v38 }
 0x669   :  { %9952 = vmatpush3.bf16.msra.mxu0 %v1688_v52 }
 0x66a   :  { %9953 = vmatprep.subr.bf16.mxu0 %v1690_v58  ;;  %v13641_v30 = vpack.c.bf16 %v11225_v22, %v11224_v25 }
 0x66d   :  { %9954 = vmatpush3.bf16.msra.mxu0 %v1690_v58 }
 0x66e   :  { %9955 = vmatprep.subr.bf16.mxu0 %v1692_v9 }
 0x671   :  { %9956 = vmatpush3.bf16.msra.mxu0 %v1692_v9  ;;  %v18134_v9 = vld [vmem:[#allocation39_spill] sm:$0xff] }
 0x672   :  { %9957 = vmatprep.subr.bf16.mxu0 %v1694_v8 }
 0x675   :  { %9958 = vmatpush3.bf16.msra.mxu0 %v1694_v8 }
 0x676   :  { %10800 = vmatprep.subr.msk.bf16.mxu0 %vm13178_vm4, %v13641_v30 }
 0x6c4   :  { %v13646_v49 = vpop.f32.mrb[16].mxu1 }
 0x6c5   :  { %18115 = vst [vmem:[#allocation52_spill] sm:$0xff] %v13646_v49  ;;  %v13648_v29 = vpop.f32.mrb[17].mxu1 }
 0x6c6   :  { %18116 = vst [vmem:[#allocation53_spill] sm:$0xff] %v13648_v29  ;;  %v13650_v27 = vpop.f32.mrb[18].mxu1 }
 0x6c7   :  { %18117 = vst [vmem:[#allocation54_spill] sm:$0xff] %v13650_v27  ;;  %v13652_v55 = vpop.f32.mrb[19].mxu1 }
 0x6c8   :  { %18118 = vst [vmem:[#allocation55_spill] sm:$0xff] %v13652_v55 }
 0x702   :  { %v13654_v19 = vpop.f32.mrb[20].mxu1 }
 0x703   :  { %18119 = vst [vmem:[#allocation56_spill] sm:$0xff] %v13654_v19  ;;  %v13656_v63 = vpop.f32.mrb[21].mxu1  ;;  %v18142_v19 = vld [vmem:[#allocation45_spill] sm:$0xff] }
 0x704   :  { %18120 = vst [vmem:[#allocation57_spill] sm:$0xff] %v13656_v63  ;;  %v13658_v28 = vpop.f32.mrb[22].mxu1  ;;  %v18141_v63 = vld [vmem:[#allocation44_spill] sm:$0xff] }
 0x705   :  { %18121 = vst [vmem:[#allocation58_spill] sm:$0xff] %v13658_v28  ;;  %v13660_v56 = vpop.f32.mrb[23].mxu1 }
 0x706   :  { %18122 = vst [vmem:[#allocation59_spill] sm:$0xff] %v13660_v56 }
 0x70a   :  { %v13662_v26 = vpop.f32.mrb[24].mxu1 }
 0x70b   :  { %18123 = vst [vmem:[#allocation60_spill] sm:$0xff] %v13662_v26  ;;  %v13664_v48 = vpop.f32.mrb[25].mxu1  ;;  %v18140_v26 = vld [vmem:[#allocation43_spill] sm:$0xff] }
 0x70c   :  { %18124 = vst [vmem:[#allocation61_spill] sm:$0xff] %v13664_v48  ;;  %v13666_v17 = vpop.f32.mrb[26].mxu1  ;;  %v18139_v48 = vld [vmem:[#allocation42_spill] sm:$0xff] }
 0x70d   :  { %18125 = vst [vmem:[#allocation62_spill] sm:$0xff] %v13666_v17  ;;  %v13668_v53 = vpop.f32.mrb[27].mxu1 }
 0x70e   :  { %18126 = vst [vmem:[#allocation63_spill] sm:$0xff] %v13668_v53 }
 0x712   :  { %v13670_v13 = vpop.f32.mrb[28].mxu1 }
 0x713   :  { %18127 = vst [vmem:[#allocation64_spill] sm:$0xff] %v13670_v13  ;;  %v13672_v54 = vpop.f32.mrb[29].mxu1  ;;  %v18137_v13 = vld [vmem:[#allocation40_spill] sm:$0xff] }
 0x714   :  { %18128 = vst [vmem:[#allocation65_spill] sm:$0xff] %v13672_v54  ;;  %v13674_v21 = vpop.f32.mrb[30].mxu1 }
 0x715   :  { %18129 = vst [vmem:[#allocation66_spill] sm:$0xff] %v13674_v21  ;;  %v13676_v24 = vpop.f32.mrb[31].mxu1 }
 0x716   :  { %18130 = vst [vmem:[#allocation67_spill] sm:$0xff] %v13676_v24 }
 0x71b   :  { %v9921_v62 = vpop.f32.mrb[32].mxu1 }
 0x71c   :  { %v1454_v6 = vadd.f32 %v9921_v62, %v18131_v0  ;;  %v1448_v35 = vpop.f32.mrb[33].mxu1  ;;  %v18135_v62 = vld [vmem:[#allocation27_spill] sm:$0xff] }
 0x71d   :  { %v1449_v5 = vadd.f32 %v1448_v35, %v18132_v16 }
 0x71e   :  { %1529 = vmax.xlane.f32.xlu1 %v1454_v6 }
 0x71f   :  { %v9924_v10 = vpop.f32.mrb[34].mxu1  ;;  %1527 = vmax.xlane.f32.xlu0 %v1449_v5 }
 0x720   :  { %v1464_v4 = vadd.f32 %v9924_v10, %v18133_v1  ;;  %v1458_v36 = vpop.f32.mrb[35].mxu1  ;;  %v18136_v1 = vld [vmem:[#allocation28_spill] sm:$0xff] }
 0x721   :  { %v1459_v58 = vadd.f32 %v1458_v36, %v18134_v9  ;;  %v18138_v36 = vld [vmem:[#allocation41_spill] sm:$0xff] }
 0x723   :  { %v9927_v33 = vpop.f32.mrb[36].mxu1  ;;  %1533 = vmax.xlane.f32.xlu0 %v1464_v4 }
 0x724   :  { %v1468_v52 = vpop.f32.mrb[37].mxu1  ;;  %v1474_v21 = vadd.f32 %v9927_v33, %v18137_v13  ;;  %v18143_v13 = vld [vmem:[#allocation46_spill] sm:$0xff] }
 0x725   :  { %v1469_v17 = vadd.f32 %v1468_v52, %v18140_v26  ;;  %v18145_v26 = vld [vmem:[#allocation48_spill] sm:$0xff] }
 0x727   :  { %v9930_v38 = vpop.f32.mrb[38].mxu1  ;;  %1531 = vmax.xlane.f32.xlu0 %v1459_v58 }
 0x728   :  { %v1478_v22 = vpop.f32.mrb[39].mxu1  ;;  %v13688_v9 = vadd.f32 %v9930_v38, %v18138_v36  ;;  %v18144_v38 = vld [vmem:[#allocation47_spill] sm:$0xff] }
 0x729   :  { %v1479_v28 = vadd.f32 %v1478_v22, %v18142_v19  ;;  %v18147_v19 = vld [vmem:[#allocation50_spill] sm:$0xff] }
 0x72b   :  { %v9933_v25 = vpop.f32.mrb[40].mxu1 }
 0x72c   :  { %v1488_v8 = vpop.f32.mrb[41].mxu1  ;;  %v13692_v53 = vadd.f32 %v9933_v25, %v18139_v48  ;;  %v18148_v25 = vld [vmem:[#allocation51_spill] sm:$0xff] }
 0x72d   :  { %v13705_v36 = vadd.f32 %v1488_v8, %v18144_v38 }
 0x72f   :  { %11237 = vrot.lane.b32.xlu1 %v18135_v62, %s12612_s4  ;;  %v9936_v0 = vpop.f32.mrb[42].mxu1 }
 0x730   :  { %v1498_v35 = vpop.f32.mrb[43].mxu1  ;;  %v13697_v56 = vadd.f32 %v9936_v0, %v18141_v63  ;;  %v18146_v63 = vld [vmem:[#allocation49_spill] sm:$0xff]  ;;  %v13725_v0 = vpop.permute.xlu1 %11227 }
 0x731   :  { %v13713_v52 = vadd.f32 %v1498_v35, %v18146_v63 }
 0x733   :  { %v9939_v16 = vpop.f32.mrb[44].mxu1 }
 0x734   :  { %v1508_v54 = vpop.f32.mrb[45].mxu1  ;;  %v13702_v33 = vadd.f32 %v9939_v16, %v18143_v13 }
 0x735   :  { %v13718_v22 = vadd.f32 %v1508_v54, %v18147_v19 }
 0x737   :  { %v9942_v24 = vpop.f32.mrb[46].mxu1 }
 0x738   :  { %v1518_v10 = vpop.f32.mrb[47].mxu1  ;;  %v13710_v48 = vadd.f32 %v9942_v24, %v18145_v26 }
 0x739   :  { %v13722_v8 = vadd.f32 %v1518_v10, %v18148_v25 }
 0x73d   :  { %11232 = vrot.lane.b32.xlu0 %v18136_v1, %s12612_s4 }
 0x753   :  { %1537 = vmax.xlane.f32.xlu1 %v1474_v21 }
 0x757   :  { %1541 = vmax.xlane.f32.xlu1 %v13688_v9 }
 0x75b   :  { %1545 = vmax.xlane.f32.xlu1 %v13692_v53 }
 0x75c   :  { %1535 = vmax.xlane.f32.xlu0 %v1469_v17 }
 0x75f   :  { %1549 = vmax.xlane.f32.xlu1 %v13697_v56 }
 0x760   :  { %1539 = vmax.xlane.f32.xlu0 %v1479_v28 }
 0x763   :  { %1553 = vmax.xlane.f32.xlu1 %v13702_v33 }
 0x764   :  { %1543 = vmax.xlane.f32.xlu0 %v13705_v36 }
 0x767   :  { %1557 = vmax.xlane.f32.xlu1 %v13710_v48 }
 0x768   :  { %1547 = vmax.xlane.f32.xlu0 %v13713_v52 }
 0x76c   :  { %1551 = vmax.xlane.f32.xlu0 %v13718_v22 }
 0x770   :  { %1555 = vmax.xlane.f32.xlu0 %v13722_v8 }
 0x7ab   :  { %v1530_v24 = vpop.xlane.xlu1 %1529 }
 0x7ac   :  { %v1560_v16 = vsub.f32 %v1454_v6, %v1530_v24  ;;  %v1528_v35 = vpop.xlane.xlu0 %1527 }
 0x7ad   :  { %v1559_v13 = vsub.f32 %v1449_v5, %v1528_v35 }
 0x7ae   :  { %v1577_v38 = vmul.f32 1.442695, %v1560_v16 }
 0x7af   :  { %v1575_v26 = vmul.f32 1.442695, %v1559_v13 }
 0x7b0   :  { %11826 = vpow2.f32 %v1577_v38  ;;  %v1534_v63 = vpop.xlane.xlu0 %1533 }
 0x7b1   :  { %11828 = vpow2.f32 %v1575_v26  ;;  %v1562_v54 = vsub.f32 %v1464_v4, %v1534_v63  ;;  %v13743_v4 = vpop.permute.xlu1 %11237 }
 0x7b2   :  { %18151 = vst [vmem:[#allocation36_spill] sm:$0xff] %v13743_v4 }
 0x7b3   :  { %v1581_v19 = vmul.f32 1.442695, %v1562_v54 }
 0x7b4   :  { %v1532_v29 = vpop.xlane.xlu0 %1531 }
 0x7b5   :  { %11830 = vpow2.f32 %v1581_v19  ;;  %v1561_v55 = vsub.f32 %v1459_v58, %v1532_v29  ;;  %v18149_v29 = vld [vmem:[#allocation31_spill] sm:$0xff] }
 0x7b7   :  { %v1579_v10 = vmul.f32 1.442695, %v1561_v55  ;;  %v18150_v55 = vld [vmem:[#allocation29_spill] sm:$0xff] }
 0x7b8   :  { %v13745_v16 = vpop.permute.xlu0 %11232 }
 0x7b9   :  { %11832 = vpow2.f32 %v1579_v10  ;;  %18152 = vst [vmem:[#allocation37_spill] sm:$0xff] %v13745_v16 }
 0x7ba   :  { %v13727_v25 = vpop.eup %11826 }
 0x7bb   :  { %v13729_v49 = vpop.eup %11828  ;;  %1609 = vadd.xlane.f32.xlu0 %v13727_v25 }
 0x7bc   :  { %1607 = vadd.xlane.f32.xlu1 %v13729_v49 }
 0x7bf   :  { %v13733_v6 = vpop.eup %11830 }
 0x7c0   :  { %1613 = vadd.xlane.f32.xlu1 %v13733_v6 }
 0x7c3   :  { %v13736_v5 = vpop.eup %11832 }
 0x7c4   :  { %1611 = vadd.xlane.f32.xlu1 %v13736_v5 }
 0x7d1   :  { %11242 = vrot.lane.b32.xlu0 %v18149_v29, %s12612_s4 }
 0x7d5   :  { %11247 = vrot.lane.b32.xlu1 %v18150_v55, %s12612_s4 }
 0x7e0   :  { %v1538_v58 = vpop.xlane.xlu1 %1537 }
 0x7e1   :  { %v1564_v35 = vsub.f32 %v1474_v21, %v1538_v58 }
 0x7e3   :  { %v1585_v38 = vmul.f32 1.442695, %v1564_v35 }
 0x7e4   :  { %v1542_v24 = vpop.xlane.xlu1 %1541 }
 0x7e5   :  { %v1566_v26 = vsub.f32 %v13688_v9, %v1542_v24  ;;  %11834 = vpow2.f32 %v1585_v38 }
 0x7e7   :  { %v1589_v29 = vmul.f32 1.442695, %v1566_v26 }
 0x7e8   :  { %v1546_v13 = vpop.xlane.xlu1 %1545 }
 0x7e9   :  { %v1536_v63 = vpop.xlane.xlu0 %1535  ;;  %v1568_v54 = vsub.f32 %v13692_v53, %v1546_v13 }
 0x7ea   :  { %v1563_v19 = vsub.f32 %v1469_v17, %v1536_v63 }
 0x7eb   :  { %v1593_v1 = vmul.f32 1.442695, %v1568_v54 }
 0x7ec   :  { %v1583_v10 = vmul.f32 1.442695, %v1563_v19  ;;  %v1550_v27 = vpop.xlane.xlu1 %1549 }
 0x7ed   :  { %v1540_v55 = vpop.xlane.xlu0 %1539  ;;  %v1570_v58 = vsub.f32 %v13697_v56, %v1550_v27 }
 0x7ee   :  { %11836 = vpow2.f32 %v1583_v10  ;;  %v1565_v62 = vsub.f32 %v1479_v28, %v1540_v55 }
 0x7ef   :  { %11838 = vpow2.f32 %v1589_v29  ;;  %v1597_v53 = vmul.f32 1.442695, %v1570_v58  ;;  %v13752_v13 = vpop.eup %11834 }
 0x7f0   :  { %v1587_v4 = vmul.f32 1.442695, %v1565_v62  ;;  %v1554_v16 = vpop.xlane.xlu1 %1553  ;;  %11840 = vpow2.f32 %v1593_v1 }
 0x7f1   :  { %v1544_v21 = vpop.xlane.xlu0 %1543  ;;  %v1572_v62 = vsub.f32 %v13702_v33, %v1554_v16 }
 0x7f2   :  { %v1567_v9 = vsub.f32 %v13705_v36, %v1544_v21  ;;  %11842 = vpow2.f32 %v1587_v4 }
 0x7f3   :  { %v1601_v4 = vmul.f32 1.442695, %v1572_v62 }
 0x7f4   :  { %v1591_v24 = vmul.f32 1.442695, %v1567_v9  ;;  %v1558_v38 = vpop.xlane.xlu1 %1557 }
 0x7f5   :  { %v1548_v17 = vpop.xlane.xlu0 %1547  ;;  %v1574_v56 = vsub.f32 %v13710_v48, %v1558_v38 }
 0x7f6   :  { %11844 = vpow2.f32 %v1591_v24  ;;  %v1569_v35 = vsub.f32 %v13713_v52, %v1548_v17 }
 0x7f7   :  { %11846 = vpow2.f32 %v1597_v53  ;;  %v1605_v16 = vmul.f32 1.442695, %v1574_v56 }
 0x7f8   :  { %v13754_v28 = vpop.eup %11836  ;;  %v1595_v29 = vmul.f32 1.442695, %v1569_v35 }
 0x7f9   :  { %1617 = vadd.xlane.f32.xlu1 %v13752_v13  ;;  %1615 = vadd.xlane.f32.xlu0 %v13754_v28  ;;  %v1552_v27 = vpop.xlane.xlu0 %1551  ;;  %v13761_v36 = vpop.eup %11838 }
 0x7fa   :  { %v1571_v1 = vsub.f32 %v13718_v22, %v1552_v27  ;;  %v13763_v52 = vpop.eup %11840  ;;  %11848 = vpow2.f32 %v1595_v29 }
 0x7fc   :  { %v1599_v55 = vmul.f32 1.442695, %v1571_v1  ;;  %v13768_v63 = vpop.eup %11842 }
 0x7fd   :  { %1625 = vadd.xlane.f32.xlu1 %v13763_v52  ;;  %1621 = vadd.xlane.f32.xlu0 %v13761_v36  ;;  %v1556_v33 = vpop.xlane.xlu0 %1555 }
 0x7fe   :  { %11850 = vpow2.f32 %v1599_v55  ;;  %v1573_v26 = vsub.f32 %v13722_v8, %v1556_v33  ;;  %v11229_v55 = vunpack.i.l.bf16 %v13725_v0 }
 0x7ff   :  { %11852 = vpow2.f32 %v1601_v4 }
 0x800   :  { %v13770_v48 = vpop.eup %11844  ;;  %11854 = vpow2.f32 %v1605_v16  ;;  %v1603_v22 = vmul.f32 1.442695, %v1573_v26 }
 0x801   :  { %1619 = vadd.xlane.f32.xlu0 %v13768_v63  ;;  %1623 = vadd.xlane.f32.xlu1 %v13770_v48  ;;  %v13774_v54 = vpop.eup %11846 }
 0x802   :  { %11856 = vpow2.f32 %v1603_v22 }
 0x804   :  { %v13777_v19 = vpop.eup %11848 }
 0x805   :  { %1629 = vadd.xlane.f32.xlu1 %v13774_v54 }
 0x808   :  { %v13779_v10 = vpop.eup %11850 }
 0x809   :  { %1627 = vadd.xlane.f32.xlu1 %v13777_v19  ;;  %1631 = vadd.xlane.f32.xlu0 %v13779_v10  ;;  %v13783_v8 = vpop.eup %11852 }
 0x80a   :  { %v13785_v21 = vpop.eup %11854 }
 0x80c   :  { %v13789_v58 = vpop.eup %11856 }
 0x80d   :  { %1633 = vadd.xlane.f32.xlu1 %v13783_v8  ;;  %1637 = vadd.xlane.f32.xlu0 %v13785_v21 }
 0x811   :  { %1635 = vadd.xlane.f32.xlu0 %v13789_v58 }
 0x81e   :  { %11257 = vrot.lane.b32.xlu1 %v13138_v34, %s12612_s4 }
 0x822   :  { %1818 = vrot.lane.b32.xlu1 %v13222_v44, %s12613_s13 }
 0x826   :  { %1822 = vrot.lane.b32.xlu1 %v13232_v20, %s12613_s13 }
 0x827   :  { %11252 = vrot.lane.b32.xlu0 %v13146_v37, %s12612_s4 }
 0x82a   :  { %1826 = vrot.lane.b32.xlu1 %v13242_v43, %s12613_s13 }
 0x82b   :  { %1816 = vrot.lane.b32.xlu0 %v13050_v32, %s12613_s13 }
 0x82e   :  { %1830 = vrot.lane.b32.xlu1 %v13252_v11, %s12613_s13 }
 0x82f   :  { %1820 = vrot.lane.b32.xlu0 %v13225_v40, %s12613_s13 }
 0x832   :  { %1834 = vrot.lane.b32.xlu1 %v13262_v14, %s12613_s13 }
 0x833   :  { %1824 = vrot.lane.b32.xlu0 %v13235_v2, %s12613_s13 }
 0x836   :  { %1838 = vrot.lane.b32.xlu1 %v13272_v57, %s12613_s13 }
 0x837   :  { %1828 = vrot.lane.b32.xlu0 %v13245_v45, %s12613_s13 }
 0x83a   :  { %1842 = vrot.lane.b32.xlu1 %v13282_v41, %s12613_s13 }
 0x83b   :  { %1832 = vrot.lane.b32.xlu0 %v13255_v60, %s12613_s13 }
 0x83e   :  { %1846 = vrot.lane.b32.xlu1 %v13292_v12, %s12613_s13 }
 0x83f   :  { %1836 = vrot.lane.b32.xlu0 %v13265_v61, %s12613_s13 }
 0x842   :  { %2243 = vrot.lane.b32.xlu1 %v13058_v47, %s12614_s14 }
 0x843   :  { %1840 = vrot.lane.b32.xlu0 %v13275_v15, %s12613_s13 }
 0x846   :  { %2247 = vrot.lane.b32.xlu1 %v13086_v3, %s12614_s14 }
 0x847   :  { %1844 = vrot.lane.b32.xlu0 %v13285_v18, %s12613_s13 }
 0x848   :  { %v1610_v9 = vpop.xlane.xlu0 %1609 }
 0x849   :  { %11858 = vrcp.f32 %v1610_v9  ;;  %v1608_v24 = vpop.xlane.xlu1 %1607 }
 0x84a   :  { %11860 = vrcp.f32 %v1608_v24  ;;  %2251 = vrot.lane.b32.xlu1 %v13114_v39, %s12614_s14 }
 0x84b   :  { %2241 = vrot.lane.b32.xlu0 %v13066_v51, %s12614_s14 }
 0x84d   :  { %v1614_v17 = vpop.xlane.xlu1 %1613 }
 0x84e   :  { %2255 = vrot.lane.b32.xlu1 %v13142_v59, %s12614_s14  ;;  %11862 = vrcp.f32 %v1614_v17 }
 0x84f   :  { %2245 = vrot.lane.b32.xlu0 %v13094_v23, %s12614_s14 }
 0x851   :  { %v1612_v53 = vpop.xlane.xlu1 %1611 }
 0x852   :  { %11864 = vrcp.f32 %v1612_v53  ;;  %11267 = vrot.lane.b32.xlu1 %v13054_v42, %s12615_s15  ;;  %v11230_v42 = vunpack.i.h.bf16 %v13725_v0  ;;  %v18154_v0 = vld [vmem:[#allocation36_spill] sm:$0xff] }
 0x853   :  { %v11859_v35 = vpop.eup %11858  ;;  %2249 = vrot.lane.b32.xlu0 %v13122_v46, %s12614_s14 }
 0x854   :  { %v11861_v38 = vpop.eup %11860  ;;  %v1656_v62 = vmul.f32 %v11859_v35, %v13727_v25 }
 0x855   :  { %v1655_v29 = vmul.f32 %v11861_v38, %v13729_v49  ;;  %v10804_v49 = vpack.c.bf16 %v11230_v42, %v11229_v55  ;;  %v11248_v35 = vpop.permute.xlu1 %11247 }
 0x856   :  { %v11250_v38 = vunpack.i.h.bf16 %v11248_v35 }
 0x857   :  { %2253 = vrot.lane.b32.xlu0 %v13150_v7, %s12614_s14  ;;  %v1671_v27 = vpack.c.bf16 %v1656_v62, %v1655_v29  ;;  %v11249_v62 = vunpack.i.l.bf16 %v11248_v35 }
 0x858   :  { %v11863_v56 = vpop.eup %11862 }
 0x859   :  { %9959 = vmatprep.mubr.bf16.mxu0 %v1671_v27  ;;  %v1658_v4 = vmul.f32 %v11863_v56, %v13733_v6  ;;  %v11240_v6 = vunpack.i.h.bf16 %v18154_v0  ;;  %v10828_v29 = vpack.c.bf16 %v11250_v38, %v11249_v62 }
 0x85b   :  { %11262 = vrot.lane.b32.xlu0 %v13063_v50, %s12615_s15  ;;  %v18153_v50 = vld [vmem:[#allocation37_spill] sm:$0xff] }
 0x85c   :  { %v11865_v1 = vpop.eup %11864  ;;  %v11235_v16 = vunpack.i.h.bf16 %v18153_v50  ;;  %v11234_v26 = vunpack.i.l.bf16 %v18153_v50 }
 0x85d   :  { %v1657_v25 = vmul.f32 %v11865_v1, %v13736_v5  ;;  %v11239_v5 = vunpack.i.l.bf16 %v18154_v0 }
 0x85e   :  { %v10810_v22 = vpack.c.bf16 %v11235_v16, %v11234_v26 }
 0x85f   :  { %v1672_v33 = vpack.c.bf16 %v1658_v4, %v1657_v25  ;;  %v10816_v9 = vpack.c.bf16 %v11240_v6, %v11239_v5 }
 0x861   :  { %9960 = vmatmul.mubr.bf16.vlgmr.msra.gmra.mrb[32].mxu0 %v1672_v33 }
 0x862   :  { %10803 = vmatpush3.bf16.xpose.msk.msra.mxu0 %vm13178_vm4, %v13641_v30  ;;  %v11243_v30 = vpop.permute.xlu0 %11242 }
 0x863   :  { %10806 = vmatprep.subr.msk.bf16.mxu0 %vm13178_vm4, %v10804_v49  ;;  %v11245_v24 = vunpack.i.h.bf16 %v11243_v30  ;;  %v11244_v17 = vunpack.i.l.bf16 %v11243_v30 }
 0x865   :  { %v10822_v53 = vpack.c.bf16 %v11245_v24, %v11244_v17 }
 0x86a   :  { %10809 = vmatpush3.bf16.xpose.msk.msra.mxu0 %vm13178_vm4, %v10804_v49 }
 0x86b   :  { %10812 = vmatprep.subr.msk.bf16.mxu0 %vm13178_vm4, %v10810_v22 }
 0x872   :  { %10815 = vmatpush3.bf16.xpose.msk.msra.mxu0 %vm13178_vm4, %v10810_v22 }
 0x873   :  { %10818 = vmatprep.subr.msk.bf16.mxu0 %vm13178_vm4, %v10816_v9 }
 0x87a   :  { %10821 = vmatpush3.bf16.xpose.msk.msra.mxu0 %vm13178_vm4, %v10816_v9 }
 0x87b   :  { %10824 = vmatprep.subr.msk.bf16.mxu0 %vm13178_vm4, %v10822_v53 }
 0x882   :  { %10827 = vmatpush3.bf16.xpose.msk.msra.mxu0 %vm13178_vm4, %v10822_v53 }
 0x883   :  { %10830 = vmatprep.subr.msk.bf16.mxu0 %vm13178_vm4, %v10828_v29 }
 0x886   :  { %v1618_v27 = vpop.xlane.xlu1 %1617  ;;  %v1616_v56 = vpop.xlane.xlu0 %1615 }
 0x887   :  { %11866 = vrcp.f32 %v1618_v27 }
 0x888   :  { %11868 = vrcp.f32 %v1616_v56 }
 0x88a   :  { %10833 = vmatpush3.bf16.xpose.msk.msra.mxu0 %vm13178_vm4, %v10828_v29  ;;  %v1626_v1 = vpop.xlane.xlu1 %1625  ;;  %v1622_v42 = vpop.xlane.xlu0 %1621 }
 0x88b   :  { %11870 = vrcp.f32 %v1626_v1 }
 0x88c   :  { %11872 = vrcp.f32 %v1622_v42 }
 0x88e   :  { %v1624_v55 = vpop.xlane.xlu1 %1623  ;;  %v1620_v4 = vpop.xlane.xlu0 %1619 }
 0x88f   :  { %11874 = vrcp.f32 %v1624_v55 }
 0x890   :  { %11876 = vrcp.f32 %v1620_v4 }
 0x891   :  { %v11867_v25 = vpop.eup %11866 }
 0x892   :  { %v11869_v33 = vpop.eup %11868  ;;  %v1630_v49 = vpop.xlane.xlu1 %1629  ;;  %v1660_v50 = vmul.f32 %v11867_v25, %v13752_v13 }
 0x893   :  { %v1659_v16 = vmul.f32 %v11869_v33, %v13754_v28  ;;  %11878 = vrcp.f32 %v1630_v49 }
 0x895   :  { %v1673_v26 = vpack.c.bf16 %v1660_v50, %v1659_v16  ;;  %v11871_v6 = vpop.eup %11870 }
 0x896   :  { %v1628_v22 = vpop.xlane.xlu1 %1627  ;;  %v1632_v0 = vpop.xlane.xlu0 %1631  ;;  %v1664_v35 = vmul.f32 %v11871_v6, %v13763_v52 }
 0x897   :  { %11880 = vrcp.f32 %v1628_v22  ;;  %9963 = vmatprep.mubr.bf16.mxu0 %v1673_v26  ;;  %v11873_v5 = vpop.eup %11872 }
 0x898   :  { %11882 = vrcp.f32 %v1632_v0  ;;  %v1662_v28 = vmul.f32 %v11873_v5, %v13761_v36 }
 0x899   :  { %v11875_v9 = vpop.eup %11874 }
 0x89a   :  { %v11877_v30 = vpop.eup %11876  ;;  %v1634_v24 = vpop.xlane.xlu1 %1633  ;;  %v1663_v53 = vmul.f32 %v11875_v9, %v13770_v48 }
 0x89b   :  { %v1638_v17 = vpop.xlane.xlu0 %1637  ;;  %11884 = vrcp.f32 %v1634_v24  ;;  %v1661_v13 = vmul.f32 %v11877_v30, %v13768_v63 }
 0x89c   :  { %v1675_v38 = vpack.c.bf16 %v1664_v35, %v1663_v53  ;;  %11886 = vrcp.f32 %v1638_v17 }
 0x89d   :  { %v1674_v62 = vpack.c.bf16 %v1662_v28, %v1661_v13  ;;  %v11879_v56 = vpop.eup %11878 }
 0x89e   :  { %v11258_v29 = vpop.permute.xlu1 %11257  ;;  %v1666_v52 = vmul.f32 %v11879_v56, %v13774_v54 }
 0x89f   :  { %v1636_v27 = vpop.xlane.xlu0 %1635  ;;  %9964 = vmatmul.mubr.bf16.gmra.mrb[36].mxu0 %v1674_v62  ;;  %v11260_v63 = vunpack.i.h.bf16 %v11258_v29  ;;  %v11259_v25 = vunpack.i.l.bf16 %v11258_v29 }
 0x8a0   :  { %11888 = vrcp.f32 %v1636_v27  ;;  %9967 = vmatprep.mubr.bf16.mxu0 %v1675_v38 }
 0x8a1   :  { %v11881_v1 = vpop.eup %11880  ;;  %v10840_v9 = vpack.c.bf16 %v11260_v63, %v11259_v25 }
 0x8a2   :  { %v1819_v42 = vpop.permute.xlu1 %1818  ;;  %v1665_v48 = vmul.f32 %v11881_v1, %v13777_v19  ;;  %v11883_v4 = vpop.eup %11882 }
 0x8a3   :  { %v11253_v55 = vpop.permute.xlu0 %11252  ;;  %v1667_v0 = vmul.f32 %v11883_v4, %v13779_v10 }
 0x8a4   :  { %v11255_v36 = vunpack.i.h.bf16 %v11253_v55  ;;  %v11254_v33 = vunpack.i.l.bf16 %v11253_v55  ;;  %v1676_v49 = vpack.c.bf16 %v1666_v52, %v1665_v48 }
 0x8a5   :  { %v11885_v50 = vpop.eup %11884 }
 0x8a6   :  { %v10834_v16 = vpack.c.bf16 %v11255_v36, %v11254_v33  ;;  %v1823_v26 = vpop.permute.xlu1 %1822  ;;  %v1668_v6 = vmul.f32 %v11885_v50, %v13783_v8  ;;  %v11887_v5 = vpop.eup %11886 }
 0x8a7   :  { %v1817_v22 = vpop.permute.xlu0 %1816  ;;  %9968 = vmatmul.mubr.bf16.gmra.mrb[40].mxu0 %v1676_v49  ;;  %v1670_v8 = vmul.f32 %v11887_v5, %v13785_v21 }
 0x8a8   :  { %10836 = vmatprep.subr.msk.bf16.mxu0 %vm13178_vm4, %v10834_v16  ;;  %v1677_v54 = vpack.c.bf16 %v1668_v6, %v1667_v0 }
 0x8a9   :  { %10839 = vmatpush3.bf16.xpose.msk.msra.mxu0 %vm13178_vm4, %v10834_v16 }
 0x8aa   :  { %v11889_v19 = vpop.eup %11888  ;;  %10842 = vmatprep.subr.msk.bf16.mxu0 %vm13178_vm4, %v10840_v9  ;;  %v1827_v30 = vpop.permute.xlu1 %1826  ;;  %9971 = vmatprep.mubr.bf16.mxu0 %v1677_v54 }
 0x8ab   :  { %v1821_v24 = vpop.permute.xlu0 %1820  ;;  %v1669_v10 = vmul.f32 %v11889_v19, %v13789_v58 }
 0x8ad   :  { %v1678_v17 = vpack.c.bf16 %v1670_v8, %v1669_v10 }
 0x8ae   :  { %v1831_v53 = vpop.permute.xlu1 %1830 }
 0x8af   :  { %v1825_v35 = vpop.permute.xlu0 %1824  ;;  %9972 = vmatmul.mubr.bf16.gmra.mrb[44].mxu0 %v1678_v17 }
 0x8b0   :  { %10007 = vmatprep.mubr.msk.f32.mxu0 %vm731_vm3, %v1817_v22 }
 0x8b1   :  { %10845 = vmatpush3.bf16.xpose.msk.msra.mxu0 %vm13178_vm4, %v10840_v9 }
 0x8b2   :  { %v1835_v13 = vpop.permute.xlu1 %1834 }
 0x8b3   :  { %v1829_v28 = vpop.permute.xlu0 %1828 }
 0x8b6   :  { %v1839_v38 = vpop.permute.xlu1 %1838 }
 0x8b7   :  { %v1833_v62 = vpop.permute.xlu0 %1832 }
 0x8b8   :  { %10008 = vmatmul.mubr.msk.f32.vlgmr.msra.gmra.mrb[48].mxu0 %vm731_vm3, %v1819_v42 }
 0x8b9   :  { %10010 = vmatprep.mubr.msk.f32.mxu0 %vm731_vm3, %v1821_v24 }
 0x8ba   :  { %v1843_v21 = vpop.permute.xlu1 %1842 }
 0x8bb   :  { %v1837_v58 = vpop.permute.xlu0 %1836 }
 0x8bc   :  { %10011 = vmatmul.mubr.msk.f32.gmra.mrb[50].mxu0 %vm731_vm3, %v1823_v26 }
 0x8bd   :  { %10013 = vmatprep.mubr.msk.f32.mxu0 %vm731_vm3, %v1825_v35  ;;  %v18171_v35 = vld [vmem:[#allocation27_spill] sm:$0xff] }
 0x8be   :  { %v1847_v27 = vpop.permute.xlu1 %1846 }
 0x8bf   :  { %v1841_v29 = vpop.permute.xlu0 %1840 }
 0x8c0   :  { %10014 = vmatmul.mubr.msk.f32.gmra.mrb[52].mxu0 %vm731_vm3, %v1827_v30 }
 0x8c1   :  { %10016 = vmatprep.mubr.msk.f32.mxu0 %vm731_vm3, %v1829_v28 }
 0x8c2   :  { %v2244_v42 = vpop.permute.xlu1 %2243 }
 0x8c3   :  { %v1845_v56 = vpop.permute.xlu0 %1844 }
 0x8c4   :  { %10017 = vmatmul.mubr.msk.f32.gmra.mrb[54].mxu0 %vm731_vm3, %v1831_v53 }
 0x8c5   :  { %10019 = vmatprep.mubr.msk.f32.mxu0 %vm731_vm3, %v1833_v62 }
 0x8c6   :  { %v2248_v48 = vpop.permute.xlu1 %2247 }
 0x8c7   :  { %v2242_v1 = vpop.permute.xlu0 %2241 }
 0x8c8   :  { %10020 = vmatmul.mubr.msk.f32.gmra.mrb[56].mxu0 %vm731_vm3, %v1835_v13  ;;  %10031 = vmatprep.subr.bf16.mxu1 %v2242_v1 }
 0x8c9   :  { %10022 = vmatprep.mubr.msk.f32.mxu0 %vm731_vm3, %v1837_v58  ;;  %10032 = vmatpush3.bf16.msra.mxu1 %v2242_v1  ;;  %v13978_v1 = vld [vmem:[%s17912_s2] sm:$0xff] }
 0x8ca   :  { %10033 = vmatprep.subr.bf16.mxu1 %v2244_v42  ;;  %v2252_v63 = vpop.permute.xlu1 %2251 }
 0x8cb   :  { %v2246_v55 = vpop.permute.xlu0 %2245 }
 0x8cc   :  { %10023 = vmatmul.mubr.msk.f32.gmra.mrb[58].mxu0 %vm731_vm3, %v1839_v38 }
 0x8cd   :  { %10025 = vmatprep.mubr.msk.f32.mxu0 %vm731_vm3, %v1841_v29  ;;  %10034 = vmatpush3.bf16.msra.mxu1 %v2244_v42 }
 0x8ce   :  { %10035 = vmatprep.subr.bf16.mxu1 %v2246_v55  ;;  %v2256_v49 = vpop.permute.xlu1 %2255 }
 0x8cf   :  { %v2250_v52 = vpop.permute.xlu0 %2249 }
 0x8d0   :  { %10026 = vmatmul.mubr.msk.f32.gmra.mrb[60].mxu0 %vm731_vm3, %v1843_v21 }
 0x8d1   :  { %10028 = vmatprep.mubr.msk.f32.mxu0 %vm731_vm3, %v1845_v56  ;;  %10036 = vmatpush3.bf16.msra.mxu1 %v2246_v55  ;;  %v13973_v56 = vld [vmem:[%s17912_s2 + $0x8] sm:$0xff] }
 0x8d2   :  { %10037 = vmatprep.subr.bf16.mxu1 %v2248_v48 }
 0x8d3   :  { %v2254_v4 = vpop.permute.xlu0 %2253 }
 0x8d4   :  { %10029 = vmatmul.mubr.msk.f32.gmra.mrb[62].mxu0 %vm731_vm3, %v1847_v27 }
 0x8d5   :  { %10038 = vmatpush3.bf16.msra.mxu1 %v2248_v48 }
 0x8d6   :  { %10039 = vmatprep.subr.bf16.mxu1 %v2250_v52 }
 0x8d7   :  { %v11263_v25 = vpop.permute.xlu0 %11262 }
 0x8d8   :  { %v11265_v36 = vunpack.i.h.bf16 %v11263_v25  ;;  %v11264_v33 = vunpack.i.l.bf16 %v11263_v25 }
 0x8d9   :  { %10040 = vmatpush3.bf16.msra.mxu1 %v2250_v52 }
 0x8da   :  { %10041 = vmatprep.subr.bf16.mxu1 %v2252_v63  ;;  %v13917_v50 = vpack.c.bf16 %v11265_v36, %v11264_v33  ;;  %v13999_v33 = vld [vmem:[%s17912_s2 + $0x10] sm:$0xff] }
 0x8dd   :  { %10042 = vmatpush3.bf16.msra.mxu1 %v2252_v63 }
 0x8de   :  { %10043 = vmatprep.subr.bf16.mxu1 %v2254_v4 }
 0x8e1   :  { %10044 = vmatpush3.bf16.msra.mxu1 %v2254_v4  ;;  %v13989_v4 = vld [vmem:[%s17912_s2 + $0x18] sm:$0xff] }
 0x8e2   :  { %10045 = vmatprep.subr.bf16.mxu1 %v2256_v49 }
 0x8e5   :  { %10046 = vmatpush3.bf16.msra.mxu1 %v2256_v49 }
 0x8e6   :  { %10848 = vmatprep.subr.msk.bf16.mxu1 %vm13178_vm4, %v13917_v50 }
 0x934   :  { %v13922_v16 = vpop.f32.mrb[32].mxu0 }
 0x935   :  { %18155 = vst [vmem:[#allocation38_spill] sm:$0xff] %v13922_v16  ;;  %v13924_v26 = vpop.f32.mrb[33].mxu0  ;;  %v14118_v16 = vpop.permute.xlu1 %11267 }
 0x936   :  { %18156 = vst [vmem:[#allocation39_spill] sm:$0xff] %v13924_v26  ;;  %v13926_v22 = vpop.f32.mrb[34].mxu0  ;;  %v14101_v26 = vld [vmem:[%s17912_s2 + $0x60] sm:$0xff] }
 0x937   :  { %18157 = vst [vmem:[#allocation40_spill] sm:$0xff] %v13926_v22  ;;  %v13930_v6 = vpop.f32.mrb[35].mxu0  ;;  %18181 = vst [vmem:[#allocation74_spill] sm:$0xff] %v14101_v26 }
 0x938   :  { %18158 = vst [vmem:[#allocation41_spill] sm:$0xff] %v13930_v6 }
 0x972   :  { %v13934_v9 = vpop.f32.mrb[36].mxu0 }
 0x973   :  { %18159 = vst [vmem:[#allocation42_spill] sm:$0xff] %v13934_v9  ;;  %v13936_v54 = vpop.f32.mrb[37].mxu0  ;;  %v14083_v9 = vld [vmem:[%s17912_s2 + $0x78] sm:$0xff] }
 0x974   :  { %18160 = vst [vmem:[#allocation43_spill] sm:$0xff] %v13936_v54  ;;  %v13938_v19 = vpop.f32.mrb[38].mxu0  ;;  %v14065_v54 = vld [vmem:[%s17912_s2 + $0x68] sm:$0xff]  ;;  %18179 = vst [vmem:[#allocation72_spill] sm:$0xff] %v14083_v9 }
 0x975   :  { %18161 = vst [vmem:[#allocation44_spill] sm:$0xff] %v13938_v19  ;;  %v13942_v24 = vpop.f32.mrb[39].mxu0  ;;  %18177 = vst [vmem:[#allocation70_spill] sm:$0xff] %v14065_v54  ;;  %v14088_v19 = vld [vmem:[%s17912_s2 + $0x50] sm:$0xff] }
 0x976   :  { %18162 = vst [vmem:[#allocation45_spill] sm:$0xff] %v13942_v24  ;;  %v14070_v24 = vld [vmem:[%s17912_s2 + $0x40] sm:$0xff]  ;;  %18180 = vst [vmem:[#allocation73_spill] sm:$0xff] %v14088_v19 }
 0x977   :  { %18178 = vst [vmem:[#allocation71_spill] sm:$0xff] %v14070_v24 }
 0x97a   :  { %v13946_v8 = vpop.f32.mrb[40].mxu0 }
 0x97b   :  { %18163 = vst [vmem:[#allocation46_spill] sm:$0xff] %v13946_v8  ;;  %v13948_v17 = vpop.f32.mrb[41].mxu0 }
 0x97c   :  { %18164 = vst [vmem:[#allocation47_spill] sm:$0xff] %v13948_v17  ;;  %v13950_v53 = vpop.f32.mrb[42].mxu0 }
 0x97d   :  { %18165 = vst [vmem:[#allocation48_spill] sm:$0xff] %v13950_v53  ;;  %v13954_v13 = vpop.f32.mrb[43].mxu0  ;;  %v14052_v53 = vld [vmem:[%s17912_s2 + $0x30] sm:$0xff] }
 0x97e   :  { %18166 = vst [vmem:[#allocation49_spill] sm:$0xff] %v13954_v13  ;;  %18176 = vst [vmem:[#allocation69_spill] sm:$0xff] %v14052_v53 }
 0x982   :  { %v13958_v38 = vpop.f32.mrb[44].mxu0 }
 0x983   :  { %18167 = vst [vmem:[#allocation50_spill] sm:$0xff] %v13958_v38  ;;  %v13960_v62 = vpop.f32.mrb[45].mxu0  ;;  %v18172_v38 = vld [vmem:[#allocation28_spill] sm:$0xff] }
 0x984   :  { %18168 = vst [vmem:[#allocation51_spill] sm:$0xff] %v13960_v62  ;;  %v13962_v58 = vpop.f32.mrb[46].mxu0 }
 0x985   :  { %18169 = vst [vmem:[#allocation37_spill] sm:$0xff] %v13962_v58  ;;  %v13966_v29 = vpop.f32.mrb[47].mxu0 }
 0x986   :  { %18170 = vst [vmem:[#allocation36_spill] sm:$0xff] %v13966_v29 }
 0x98b   :  { %v10009_v42 = vpop.f32.mrb[48].mxu0 }
 0x98c   :  { %v13981_v55 = vadd.f32 %v10009_v42, %v13973_v56  ;;  %v2010_v48 = vpop.f32.mrb[49].mxu0 }
 0x98d   :  { %v13984_v52 = vadd.f32 %v2010_v48, %v13978_v1 }
 0x98e   :  { %2091 = vmax.xlane.f32.xlu1 %v13981_v55 }
 0x98f   :  { %v10012_v63 = vpop.f32.mrb[50].mxu0  ;;  %2089 = vmax.xlane.f32.xlu0 %v13984_v52 }
 0x990   :  { %v13994_v25 = vadd.f32 %v10012_v63, %v13989_v4  ;;  %v2020_v36 = vpop.f32.mrb[51].mxu0 }
 0x991   :  { %v14003_v48 = vadd.f32 %v2020_v36, %v13999_v33  ;;  %v14013_v36 = vld [vmem:[%s17912_s2 + $0x28] sm:$0xff] }
 0x993   :  { %v10015_v49 = vpop.f32.mrb[52].mxu0  ;;  %2095 = vmax.xlane.f32.xlu0 %v13994_v25 }
 0x994   :  { %v2030_v42 = vpop.f32.mrb[53].mxu0  ;;  %v14016_v58 = vadd.f32 %v10015_v49, %v14013_v36  ;;  %v14035_v49 = vld [vmem:[%s17912_s2 + $0x20] sm:$0xff] }
 0x995   :  { %18174 = vst [vmem:[#allocation28_spill] sm:$0xff] %v14035_v49  ;;  %v14042_v8 = vadd.f32 %v2030_v42, %v14035_v49 }
 0x997   :  { %v10018_v27 = vpop.f32.mrb[54].mxu0  ;;  %2093 = vmax.xlane.f32.xlu0 %v14003_v48 }
 0x998   :  { %v2040_v21 = vpop.f32.mrb[55].mxu0 }
 0x999   :  { %v14060_v42 = vadd.f32 %v2040_v21, %v14052_v53 }
 0x99b   :  { %v10021_v28 = vpop.f32.mrb[56].mxu0 }
 0x99c   :  { %v2050_v63 = vpop.f32.mrb[57].mxu0 }
 0x99d   :  { %v14078_v21 = vadd.f32 %v2050_v63, %v14070_v24 }
 0x99f   :  { %11277 = vrot.lane.b32.xlu1 %v18171_v35, %s12615_s15  ;;  %v10024_v10 = vpop.f32.mrb[58].mxu0  ;;  %v14021_v35 = vld [vmem:[%s17912_s2 + $0x38] sm:$0xff] }
 0x9a0   :  { %v2060_v30 = vpop.f32.mrb[59].mxu0  ;;  %v14025_v17 = vadd.f32 %v10018_v27, %v14021_v35  ;;  %v14047_v27 = vld [vmem:[%s17912_s2 + $0x58] sm:$0xff] }
 0x9a1   :  { %18175 = vst [vmem:[#allocation68_spill] sm:$0xff] %v14047_v27  ;;  %v14096_v63 = vadd.f32 %v2060_v30, %v14088_v19 }
 0x9a3   :  { %v10027_v5 = vpop.f32.mrb[60].mxu0 }
 0x9a4   :  { %v2070_v0 = vpop.f32.mrb[61].mxu0 }
 0x9a5   :  { %v14106_v6 = vadd.f32 %v2070_v0, %v14101_v26 }
 0x9a7   :  { %v10030_v62 = vpop.f32.mrb[62].mxu0 }
 0x9a8   :  { %v2080_v29 = vpop.f32.mrb[63].mxu0 }
 0x9ad   :  { %11272 = vrot.lane.b32.xlu0 %v18172_v38, %s12615_s15  ;;  %v14030_v38 = vld [vmem:[%s17912_s2 + $0x48] sm:$0xff] }
 0x9ae   :  { %18173 = vst [vmem:[#allocation27_spill] sm:$0xff] %v14030_v38  ;;  %v14039_v13 = vadd.f32 %v10021_v28, %v14030_v38  ;;  %v14057_v28 = vadd.f32 %v10024_v10, %v14047_v27  ;;  %v14075_v10 = vadd.f32 %v10027_v5, %v14065_v54  ;;  %v14093_v5 = vadd.f32 %v10030_v62, %v14083_v9  ;;  %v14111_v62 = vld [vmem:[%s17912_s2 + $0x70] sm:$0xff] }
 0x9af   :  { %18182 = vst [vmem:[#allocation75_spill] sm:$0xff] %v14111_v62  ;;  %v14115_v30 = vadd.f32 %v2080_v29, %v14111_v62 }
 0x9c3   :  { %2099 = vmax.xlane.f32.xlu1 %v14016_v58 }
 0x9c7   :  { %2103 = vmax.xlane.f32.xlu1 %v14025_v17 }
 0x9cb   :  { %2107 = vmax.xlane.f32.xlu1 %v14039_v13 }
 0x9cc   :  { %2097 = vmax.xlane.f32.xlu0 %v14042_v8 }
 0x9cf   :  { %2111 = vmax.xlane.f32.xlu1 %v14057_v28 }
 0x9d0   :  { %2101 = vmax.xlane.f32.xlu0 %v14060_v42 }
 0x9d3   :  { %2115 = vmax.xlane.f32.xlu1 %v14075_v10 }
 0x9d4   :  { %2105 = vmax.xlane.f32.xlu0 %v14078_v21 }
 0x9d7   :  { %2119 = vmax.xlane.f32.xlu1 %v14093_v5 }
 0x9d8   :  { %2109 = vmax.xlane.f32.xlu0 %v14096_v63 }
 0x9dc   :  { %2113 = vmax.xlane.f32.xlu0 %v14106_v6 }
 0x9e0   :  { %2117 = vmax.xlane.f32.xlu0 %v14115_v30 }
 0xa1b   :  { %v2092_v22 = vpop.xlane.xlu1 %2091 }
 0xa1c   :  { %v2122_v7 = vsub.f32 %v13981_v55, %v2092_v22  ;;  %v2090_v59 = vpop.xlane.xlu0 %2089 }
 0xa1d   :  { %v2121_v0 = vsub.f32 %v13984_v52, %v2090_v59  ;;  %v18183_v59 = vld [vmem:[#allocation31_spill] sm:$0xff] }
 0xa1e   :  { %v2139_v46 = vmul.f32 1.442695, %v2122_v7  ;;  %v18184_v7 = vld [vmem:[#allocation29_spill] sm:$0xff] }
 0xa1f   :  { %v2137_v39 = vmul.f32 1.442695, %v2121_v0 }
 0xa20   :  { %11890 = vpow2.f32 %v2139_v46  ;;  %v2096_v26 = vpop.xlane.xlu0 %2095 }
 0xa21   :  { %11892 = vpow2.f32 %v2137_v39  ;;  %v2124_v9 = vsub.f32 %v13994_v25, %v2096_v26  ;;  %v14140_v26 = vpop.permute.xlu1 %11277 }
 0xa23   :  { %v2143_v19 = vmul.f32 1.442695, %v2124_v9 }
 0xa24   :  { %v2094_v29 = vpop.xlane.xlu0 %2093 }
 0xa25   :  { %11894 = vpow2.f32 %v2143_v19  ;;  %v2123_v62 = vsub.f32 %v14003_v48, %v2094_v29 }
 0xa27   :  { %v2141_v54 = vmul.f32 1.442695, %v2123_v62 }
 0xa28   :  { %v14142_v19 = vpop.permute.xlu0 %11272 }
 0xa29   :  { %11896 = vpow2.f32 %v2141_v54 }
 0xa2a   :  { %v14124_v24 = vpop.eup %11890 }
 0xa2b   :  { %v14126_v22 = vpop.eup %11892  ;;  %2171 = vadd.xlane.f32.xlu0 %v14124_v24 }
 0xa2c   :  { %2169 = vadd.xlane.f32.xlu1 %v14126_v22 }
 0xa2f   :  { %v14130_v46 = vpop.eup %11894 }
 0xa30   :  { %2175 = vadd.xlane.f32.xlu1 %v14130_v46 }
 0xa33   :  { %v14133_v39 = vpop.eup %11896 }
 0xa34   :  { %2173 = vadd.xlane.f32.xlu1 %v14133_v39 }
 0xa41   :  { %11282 = vrot.lane.b32.xlu0 %v18183_v59, %s12615_s15 }
 0xa45   :  { %11287 = vrot.lane.b32.xlu1 %v18184_v7, %s12615_s15 }
 0xa50   :  { %v2100_v9 = vpop.xlane.xlu1 %2099 }
 0xa51   :  { %v2126_v55 = vsub.f32 %v14016_v58, %v2100_v9 }
 0xa53   :  { %v2147_v25 = vmul.f32 1.442695, %v2126_v55 }
 0xa54   :  { %v2104_v54 = vpop.xlane.xlu1 %2103 }
 0xa55   :  { %v2128_v48 = vsub.f32 %v14025_v17, %v2104_v54  ;;  %11898 = vpow2.f32 %v2147_v25 }
 0xa57   :  { %v2151_v7 = vmul.f32 1.442695, %v2128_v48 }
 0xa58   :  { %v2108_v52 = vpop.xlane.xlu1 %2107 }
 0xa59   :  { %v2098_v62 = vpop.xlane.xlu0 %2097  ;;  %v2130_v0 = vsub.f32 %v14039_v13, %v2108_v52 }
 0xa5a   :  { %v2125_v29 = vsub.f32 %v14042_v8, %v2098_v62 }
 0xa5b   :  { %v2155_v38 = vmul.f32 1.442695, %v2130_v0 }
 0xa5c   :  { %v2145_v59 = vmul.f32 1.442695, %v2125_v29  ;;  %v2112_v27 = vpop.xlane.xlu1 %2111 }
 0xa5d   :  { %v2102_v53 = vpop.xlane.xlu0 %2101  ;;  %v2132_v17 = vsub.f32 %v14057_v28, %v2112_v27 }
 0xa5e   :  { %11900 = vpow2.f32 %v2145_v59  ;;  %v2127_v49 = vsub.f32 %v14060_v42, %v2102_v53 }
 0xa5f   :  { %11902 = vpow2.f32 %v2151_v7  ;;  %v2159_v52 = vmul.f32 1.442695, %v2132_v17  ;;  %v14152_v48 = vpop.eup %11898 }
 0xa60   :  { %v2149_v58 = vmul.f32 1.442695, %v2127_v49  ;;  %v2116_v9 = vpop.xlane.xlu1 %2115  ;;  %11904 = vpow2.f32 %v2155_v38 }
 0xa61   :  { %v2106_v55 = vpop.xlane.xlu0 %2105  ;;  %v2134_v49 = vsub.f32 %v14075_v10, %v2116_v9 }
 0xa62   :  { %v2129_v13 = vsub.f32 %v14078_v21, %v2106_v55  ;;  %11906 = vpow2.f32 %v2149_v58 }
 0xa63   :  { %v2163_v29 = vmul.f32 1.442695, %v2134_v49 }
 0xa64   :  { %v2153_v54 = vmul.f32 1.442695, %v2129_v13  ;;  %v2120_v62 = vpop.xlane.xlu1 %2119 }
 0xa65   :  { %v2110_v8 = vpop.xlane.xlu0 %2109  ;;  %v2136_v27 = vsub.f32 %v14093_v5, %v2120_v62 }
 0xa66   :  { %11908 = vpow2.f32 %v2153_v54  ;;  %v2131_v25 = vsub.f32 %v14096_v63, %v2110_v8 }
 0xa67   :  { %11910 = vpow2.f32 %v2159_v52  ;;  %v2167_v59 = vmul.f32 1.442695, %v2136_v27 }
 0xa68   :  { %v14154_v53 = vpop.eup %11900  ;;  %v2157_v42 = vmul.f32 1.442695, %v2131_v25 }
 0xa69   :  { %2179 = vadd.xlane.f32.xlu1 %v14152_v48  ;;  %2177 = vadd.xlane.f32.xlu0 %v14154_v53  ;;  %v2114_v38 = vpop.xlane.xlu0 %2113  ;;  %v14161_v21 = vpop.eup %11902 }
 0xa6a   :  { %v2133_v28 = vsub.f32 %v14106_v6, %v2114_v38  ;;  %v14163_v63 = vpop.eup %11904  ;;  %11912 = vpow2.f32 %v2157_v42 }
 0xa6c   :  { %v2161_v0 = vmul.f32 1.442695, %v2133_v28  ;;  %v14168_v58 = vpop.eup %11906 }
 0xa6d   :  { %2187 = vadd.xlane.f32.xlu1 %v14163_v63  ;;  %2183 = vadd.xlane.f32.xlu0 %v14161_v21  ;;  %v2118_v10 = vpop.xlane.xlu0 %2117 }
 0xa6e   :  { %11914 = vpow2.f32 %v2161_v0  ;;  %v2135_v7 = vsub.f32 %v14115_v30, %v2118_v10 }
 0xa6f   :  { %11916 = vpow2.f32 %v2163_v29 }
 0xa70   :  { %v14170_v5 = vpop.eup %11908  ;;  %11918 = vpow2.f32 %v2167_v59  ;;  %v2165_v6 = vmul.f32 1.442695, %v2135_v7 }
 0xa71   :  { %2181 = vadd.xlane.f32.xlu0 %v14168_v58  ;;  %2185 = vadd.xlane.f32.xlu1 %v14170_v5  ;;  %v14174_v9 = vpop.eup %11910 }
 0xa72   :  { %11920 = vpow2.f32 %v2165_v6 }
 0xa74   :  { %v14177_v55 = vpop.eup %11912 }
 0xa75   :  { %2191 = vadd.xlane.f32.xlu1 %v14174_v9 }
 0xa78   :  { %v14179_v17 = vpop.eup %11914 }
 0xa79   :  { %2189 = vadd.xlane.f32.xlu1 %v14177_v55  ;;  %2193 = vadd.xlane.f32.xlu0 %v14179_v17  ;;  %v14183_v30 = vpop.eup %11916 }
 0xa7a   :  { %v14185_v13 = vpop.eup %11918 }
 0xa7c   :  { %v14189_v54 = vpop.eup %11920 }
 0xa7d   :  { %2195 = vadd.xlane.f32.xlu1 %v14183_v30  ;;  %2199 = vadd.xlane.f32.xlu0 %v14185_v13 }
 0xa81   :  { %2197 = vadd.xlane.f32.xlu0 %v14189_v54 }
 0xa8e   :  { %11297 = vrot.lane.b32.xlu1 %v13138_v34, %s12615_s15 }
 0xa92   :  { %2380 = vrot.lane.b32.xlu1 %v13222_v44, %s12616_s24 }
 0xa96   :  { %2384 = vrot.lane.b32.xlu1 %v13232_v20, %s12616_s24 }
 0xa97   :  { %11292 = vrot.lane.b32.xlu0 %v13146_v37, %s12615_s15 }
 0xa9a   :  { %2388 = vrot.lane.b32.xlu1 %v13242_v43, %s12616_s24 }
 0xa9b   :  { %2378 = vrot.lane.b32.xlu0 %v13050_v32, %s12616_s24 }
 0xa9e   :  { %2392 = vrot.lane.b32.xlu1 %v13252_v11, %s12616_s24  ;;  %v11270_v11 = vunpack.i.h.bf16 %v14118_v16 }
 0xa9f   :  { %2382 = vrot.lane.b32.xlu0 %v13225_v40, %s12616_s24 }
 0xaa2   :  { %2396 = vrot.lane.b32.xlu1 %v13262_v14, %s12616_s24 }
 0xaa3   :  { %2386 = vrot.lane.b32.xlu0 %v13235_v2, %s12616_s24 }
 0xaa6   :  { %2400 = vrot.lane.b32.xlu1 %v13272_v57, %s12616_s24 }
 0xaa7   :  { %2390 = vrot.lane.b32.xlu0 %v13245_v45, %s12616_s24 }
 0xaaa   :  { %2404 = vrot.lane.b32.xlu1 %v13282_v41, %s12616_s24 }
 0xaab   :  { %2394 = vrot.lane.b32.xlu0 %v13255_v60, %s12616_s24 }
 0xaae   :  { %2408 = vrot.lane.b32.xlu1 %v13292_v12, %s12616_s24  ;;  %v11279_v12 = vunpack.i.l.bf16 %v14140_v26 }
 0xaaf   :  { %2398 = vrot.lane.b32.xlu0 %v13265_v61, %s12616_s24 }
 0xab2   :  { %2805 = vrot.lane.b32.xlu1 %v13058_v47, %s12617_s0 }
 0xab3   :  { %2402 = vrot.lane.b32.xlu0 %v13275_v15, %s12616_s24  ;;  %v11274_v15 = vunpack.i.l.bf16 %v14142_v19 }
 0xab7   :  { %2406 = vrot.lane.b32.xlu0 %v13285_v18, %s12616_s24  ;;  %v11280_v18 = vunpack.i.h.bf16 %v14140_v26 }
 0xab8   :  { %v2172_v32 = vpop.xlane.xlu0 %2171 }
 0xab9   :  { %11922 = vrcp.f32 %v2172_v32  ;;  %v2170_v34 = vpop.xlane.xlu1 %2169 }
 0xaba   :  { %11924 = vrcp.f32 %v2170_v34 }
 0xabb   :  { %2803 = vrot.lane.b32.xlu0 %v13066_v51, %s12617_s0 }
 0xabd   :  { %v2176_v37 = vpop.xlane.xlu1 %2175 }
 0xabe   :  { %11926 = vrcp.f32 %v2176_v37 }
 0xabf   :  { %2807 = vrot.lane.b32.xlu0 %v13094_v23, %s12617_s0  ;;  %v11269_v23 = vunpack.i.l.bf16 %v14118_v16  ;;  %v10864_v16 = vpack.c.bf16 %v11280_v18, %v11279_v12 }
 0xac1   :  { %v2174_v44 = vpop.xlane.xlu1 %2173  ;;  %v10852_v57 = vpack.c.bf16 %v11270_v11, %v11269_v23 }
 0xac2   :  { %11928 = vrcp.f32 %v2174_v44 }
 0xac3   :  { %v11923_v47 = vpop.eup %11922  ;;  %2809 = vrot.lane.b32.xlu0 %v13086_v3, %s12617_s0  ;;  %v11275_v3 = vunpack.i.h.bf16 %v14142_v19 }
 0xac4   :  { %v11925_v40 = vpop.eup %11924  ;;  %v2218_v20 = vmul.f32 %v11923_v47, %v14124_v24 }
 0xac5   :  { %v2217_v2 = vmul.f32 %v11925_v40, %v14126_v22  ;;  %v10858_v41 = vpack.c.bf16 %v11275_v3, %v11274_v15 }
 0xac7   :  { %v2233_v43 = vpack.c.bf16 %v2218_v20, %v2217_v2 }
 0xac8   :  { %v11927_v45 = vpop.eup %11926 }
 0xac9   :  { %10047 = vmatprep.mubr.bf16.mxu1 %v2233_v43  ;;  %v2220_v60 = vmul.f32 %v11927_v45, %v14130_v46 }
 0xacc   :  { %v11929_v51 = vpop.eup %11928 }
 0xacd   :  { %v2219_v14 = vmul.f32 %v11929_v51, %v14133_v39  ;;  %v11288_v39 = vpop.permute.xlu1 %11287 }
 0xace   :  { %v11290_v19 = vunpack.i.h.bf16 %v11288_v39  ;;  %v11289_v26 = vunpack.i.l.bf16 %v11288_v39 }
 0xacf   :  { %v2234_v61 = vpack.c.bf16 %v2220_v60, %v2219_v14 }
 0xad0   :  { %v10876_v8 = vpack.c.bf16 %v11290_v19, %v11289_v26 }
 0xad1   :  { %10048 = vmatmul.mubr.bf16.vlgmr.msra.gmra.mrb[48].mxu1 %v2234_v61 }
 0xad2   :  { %10851 = vmatpush3.bf16.xpose.msk.msra.mxu1 %vm13178_vm4, %v13917_v50  ;;  %v11283_v50 = vpop.permute.xlu0 %11282 }
 0xad3   :  { %10854 = vmatprep.subr.msk.bf16.mxu1 %vm13178_vm4, %v10852_v57  ;;  %v11285_v24 = vunpack.i.h.bf16 %v11283_v50  ;;  %v11284_v22 = vunpack.i.l.bf16 %v11283_v50 }
 0xad5   :  { %v10870_v46 = vpack.c.bf16 %v11285_v24, %v11284_v22 }
 0xada   :  { %10857 = vmatpush3.bf16.xpose.msk.msra.mxu1 %vm13178_vm4, %v10852_v57 }
 0xadb   :  { %10860 = vmatprep.subr.msk.bf16.mxu1 %vm13178_vm4, %v10858_v41 }
 0xae2   :  { %10863 = vmatpush3.bf16.xpose.msk.msra.mxu1 %vm13178_vm4, %v10858_v41 }
 0xae3   :  { %10866 = vmatprep.subr.msk.bf16.mxu1 %vm13178_vm4, %v10864_v16 }
 0xaea   :  { %10869 = vmatpush3.bf16.xpose.msk.msra.mxu1 %vm13178_vm4, %v10864_v16 }
 0xaeb   :  { %10872 = vmatprep.subr.msk.bf16.mxu1 %vm13178_vm4, %v10870_v46 }
 0xaf2   :  { %10875 = vmatpush3.bf16.xpose.msk.msra.mxu1 %vm13178_vm4, %v10870_v46 }
 0xaf3   :  { %10878 = vmatprep.subr.msk.bf16.mxu1 %vm13178_vm4, %v10876_v8 }
 0xaf6   :  { %v2180_v52 = vpop.xlane.xlu1 %2179  ;;  %v2178_v25 = vpop.xlane.xlu0 %2177 }
 0xaf7   :  { %11930 = vrcp.f32 %v2180_v52 }
 0xaf8   :  { %11932 = vrcp.f32 %v2178_v25 }
 0xafa   :  { %10881 = vmatpush3.bf16.xpose.msk.msra.mxu1 %vm13178_vm4, %v10876_v8  ;;  %v2188_v62 = vpop.xlane.xlu1 %2187  ;;  %v2184_v49 = vpop.xlane.xlu0 %2183 }
 0xafb   :  { %11934 = vrcp.f32 %v2188_v62 }
 0xafc   :  { %11936 = vrcp.f32 %v2184_v49 }
 0xafe   :  { %v2186_v42 = vpop.xlane.xlu1 %2185  ;;  %v2182_v38 = vpop.xlane.xlu0 %2181 }
 0xaff   :  { %11938 = vrcp.f32 %v2186_v42 }
 0xb00   :  { %11940 = vrcp.f32 %v2182_v38 }
 0xb01   :  { %v11931_v27 = vpop.eup %11930 }
 0xb02   :  { %v11933_v28 = vpop.eup %11932  ;;  %v2192_v0 = vpop.xlane.xlu1 %2191  ;;  %v2222_v29 = vmul.f32 %v11931_v27, %v14152_v48 }
 0xb03   :  { %v2221_v10 = vmul.f32 %v11933_v28, %v14154_v53  ;;  %11942 = vrcp.f32 %v2192_v0 }
 0xb05   :  { %v2235_v59 = vpack.c.bf16 %v2222_v29, %v2221_v10  ;;  %v11935_v32 = vpop.eup %11934 }
 0xb06   :  { %v2190_v7 = vpop.xlane.xlu1 %2189  ;;  %v2194_v6 = vpop.xlane.xlu0 %2193  ;;  %v2226_v2 = vmul.f32 %v11935_v32, %v14163_v63 }
 0xb07   :  { %11944 = vrcp.f32 %v2190_v7  ;;  %10051 = vmatprep.mubr.bf16.mxu1 %v2235_v59  ;;  %v11937_v34 = vpop.eup %11936 }
 0xb08   :  { %11946 = vrcp.f32 %v2194_v6  ;;  %v2224_v53 = vmul.f32 %v11937_v34, %v14161_v21 }
 0xb09   :  { %v11939_v37 = vpop.eup %11938 }
 0xb0a   :  { %v11941_v44 = vpop.eup %11940  ;;  %v2196_v47 = vpop.xlane.xlu1 %2195  ;;  %v2225_v20 = vmul.f32 %v11939_v37, %v14170_v5 }
 0xb0b   :  { %v2200_v40 = vpop.xlane.xlu0 %2199  ;;  %11948 = vrcp.f32 %v2196_v47  ;;  %v2223_v48 = vmul.f32 %v11941_v44, %v14168_v58 }
 0xb0c   :  { %v2237_v43 = vpack.c.bf16 %v2226_v2, %v2225_v20  ;;  %11950 = vrcp.f32 %v2200_v40 }
 0xb0d   :  { %v2236_v45 = vpack.c.bf16 %v2224_v53, %v2223_v48  ;;  %v11943_v23 = vpop.eup %11942 }
 0xb0e   :  { %v11298_v51 = vpop.permute.xlu1 %11297  ;;  %v2228_v63 = vmul.f32 %v11943_v23, %v14174_v9 }
 0xb0f   :  { %v2198_v11 = vpop.xlane.xlu0 %2197  ;;  %10052 = vmatmul.mubr.bf16.gmra.mrb[52].mxu1 %v2236_v45  ;;  %v11300_v58 = vunpack.i.h.bf16 %v11298_v51  ;;  %v11299_v3 = vunpack.i.l.bf16 %v11298_v51 }
 0xb10   :  { %11952 = vrcp.f32 %v2198_v11  ;;  %10055 = vmatprep.mubr.bf16.mxu1 %v2237_v43 }
 0xb11   :  { %v11945_v60 = vpop.eup %11944  ;;  %v10888_v39 = vpack.c.bf16 %v11300_v58, %v11299_v3 }
 0xb12   :  { %v2381_v14 = vpop.permute.xlu1 %2380  ;;  %v2227_v5 = vmul.f32 %v11945_v60, %v14177_v55  ;;  %v11947_v57 = vpop.eup %11946 }
 0xb13   :  { %v11293_v61 = vpop.permute.xlu0 %11292  ;;  %v2229_v24 = vmul.f32 %v11947_v57, %v14179_v17 }
 0xb14   :  { %v11295_v21 = vunpack.i.h.bf16 %v11293_v61  ;;  %v11294_v15 = vunpack.i.l.bf16 %v11293_v61  ;;  %v2238_v41 = vpack.c.bf16 %v2228_v63, %v2227_v5 }
 0xb15   :  { %v11949_v18 = vpop.eup %11948 }
 0xb16   :  { %v10882_v12 = vpack.c.bf16 %v11295_v21, %v11294_v15  ;;  %v2385_v16 = vpop.permute.xlu1 %2384  ;;  %v2230_v22 = vmul.f32 %v11949_v18, %v14183_v30  ;;  %v11951_v46 = vpop.eup %11950 }
 0xb17   :  { %v2379_v50 = vpop.permute.xlu0 %2378  ;;  %10056 = vmatmul.mubr.bf16.gmra.mrb[56].mxu1 %v2238_v41  ;;  %v2232_v30 = vmul.f32 %v11951_v46, %v14185_v13 }
 0xb18   :  { %10884 = vmatprep.subr.msk.bf16.mxu1 %vm13178_vm4, %v10882_v12  ;;  %v2239_v9 = vpack.c.bf16 %v2230_v22, %v2229_v24 }
 0xb19   :  { %10887 = vmatpush3.bf16.xpose.msk.msra.mxu1 %vm13178_vm4, %v10882_v12 }
 0xb1a   :  { %v11953_v55 = vpop.eup %11952  ;;  %10890 = vmatprep.subr.msk.bf16.mxu1 %vm13178_vm4, %v10888_v39  ;;  %v2389_v19 = vpop.permute.xlu1 %2388  ;;  %10059 = vmatprep.mubr.bf16.mxu1 %v2239_v9 }
 0xb1b   :  { %v2383_v26 = vpop.permute.xlu0 %2382  ;;  %v2231_v17 = vmul.f32 %v11953_v55, %v14189_v54 }
 0xb1d   :  { %v2240_v8 = vpack.c.bf16 %v2232_v30, %v2231_v17 }
 0xb1e   :  { %v2393_v52 = vpop.permute.xlu1 %2392 }
 0xb1f   :  { %v2387_v25 = vpop.permute.xlu0 %2386  ;;  %10060 = vmatmul.mubr.bf16.gmra.mrb[60].mxu1 %v2240_v8  ;;  %v18187_v8 = vld [vmem:[#allocation69_spill] sm:$0xff] }
 0xb20   :  { %10095 = vmatprep.mubr.msk.f32.mxu1 %vm731_vm3, %v2379_v50 }
 0xb21   :  { %10893 = vmatpush3.bf16.xpose.msk.msra.mxu1 %vm13178_vm4, %v10888_v39 }
 0xb22   :  { %v2397_v62 = vpop.permute.xlu1 %2396 }
 0xb23   :  { %v2391_v49 = vpop.permute.xlu0 %2390 }
 0xb26   :  { %v2401_v42 = vpop.permute.xlu1 %2400 }
 0xb27   :  { %v2395_v38 = vpop.permute.xlu0 %2394 }
 0xb28   :  { %10096 = vmatmul.mubr.msk.f32.vlgmr.msra.gmra.mrb[64].mxu1 %vm731_vm3, %v2381_v14 }
 0xb29   :  { %10098 = vmatprep.mubr.msk.f32.mxu1 %vm731_vm3, %v2383_v26 }
 0xb2a   :  { %v2405_v13 = vpop.permute.xlu1 %2404 }
 0xb2b   :  { %v2399_v54 = vpop.permute.xlu0 %2398 }
 0xb2c   :  { %10099 = vmatmul.mubr.msk.f32.gmra.mrb[66].mxu1 %vm731_vm3, %v2385_v16 }
 0xb2d   :  { %10101 = vmatprep.mubr.msk.f32.mxu1 %vm731_vm3, %v2387_v25 }
 0xb2e   :  { %v2409_v28 = vpop.permute.xlu1 %2408 }
 0xb2f   :  { %v2403_v27 = vpop.permute.xlu0 %2402 }
 0xb30   :  { %10102 = vmatmul.mubr.msk.f32.gmra.mrb[68].mxu1 %vm731_vm3, %v2389_v19 }
 0xb31   :  { %10104 = vmatprep.mubr.msk.f32.mxu1 %vm731_vm3, %v2391_v49 }
 0xb32   :  { %v2806_v10 = vpop.permute.xlu1 %2805 }
 0xb33   :  { %v2407_v0 = vpop.permute.xlu0 %2406 }
 0xb34   :  { %10105 = vmatmul.mubr.msk.f32.gmra.mrb[70].mxu1 %vm731_vm3, %v2393_v52  ;;  %v18188_v52 = vld [vmem:[#allocation68_spill] sm:$0xff] }
 0xb35   :  { %10107 = vmatprep.mubr.msk.f32.mxu1 %vm731_vm3, %v2395_v38  ;;  %v18190_v38 = vld [vmem:[#allocation70_spill] sm:$0xff] }
 0xb37   :  { %v2804_v29 = vpop.permute.xlu0 %2803 }
 0xb38   :  { %10108 = vmatmul.mubr.msk.f32.gmra.mrb[72].mxu1 %vm731_vm3, %v2397_v62  ;;  %10119 = vmatprep.subr.bf16.mxu0 %v2804_v29  ;;  %v18189_v62 = vld [vmem:[#allocation71_spill] sm:$0xff] }
 0xb39   :  { %10110 = vmatprep.mubr.msk.f32.mxu1 %vm731_vm3, %v2399_v54  ;;  %10120 = vmatpush3.bf16.msra.mxu0 %v2804_v29  ;;  %v18192_v29 = vld [vmem:[#allocation72_spill] sm:$0xff] }
 0xb3a   :  { %10121 = vmatprep.subr.bf16.mxu0 %v2806_v10 }
 0xb3b   :  { %v2808_v59 = vpop.permute.xlu0 %2807 }
 0xb3c   :  { %10111 = vmatmul.mubr.msk.f32.gmra.mrb[74].mxu1 %vm731_vm3, %v2401_v42 }
 0xb3d   :  { %10113 = vmatprep.mubr.msk.f32.mxu1 %vm731_vm3, %v2403_v27  ;;  %10122 = vmatpush3.bf16.msra.mxu0 %v2806_v10  ;;  %v18191_v27 = vld [vmem:[#allocation73_spill] sm:$0xff] }
 0xb3e   :  { %10123 = vmatprep.subr.bf16.mxu0 %v2808_v59 }
 0xb3f   :  { %v2810_v7 = vpop.permute.xlu0 %2809 }
 0xb40   :  { %10114 = vmatmul.mubr.msk.f32.gmra.mrb[76].mxu1 %vm731_vm3, %v2405_v13 }
 0xb41   :  { %10116 = vmatprep.mubr.msk.f32.mxu1 %vm731_vm3, %v2407_v0  ;;  %10124 = vmatpush3.bf16.msra.mxu0 %v2808_v59 }
 0xb42   :  { %10125 = vmatprep.subr.bf16.mxu0 %v2810_v7 }
 0xb44   :  { %10117 = vmatmul.mubr.msk.f32.gmra.mrb[78].mxu1 %vm731_vm3, %v2409_v28 }
 0xb45   :  { %10126 = vmatpush3.bf16.msra.mxu0 %v2810_v7  ;;  %v18193_v7 = vld [vmem:[#allocation74_spill] sm:$0xff] }
 0xba4   :  { %v14305_v6 = vpop.f32.mrb[48].mxu1 }
 0xba5   :  { %v14307_v32 = vpop.f32.mrb[49].mxu1 }
 0xba6   :  { %v14309_v34 = vpop.f32.mrb[50].mxu1 }
 0xba7   :  { %v11316_v37 = vpack.i.bf16 %v14309_v34, %v14305_v6  ;;  %v14313_v44 = vpop.f32.mrb[51].mxu1 }
 0xba8   :  { %v11311_v47 = vpack.i.bf16 %v14313_v44, %v14307_v32 }
 0xbe2   :  { %v14317_v40 = vpop.f32.mrb[52].mxu1 }
 0xbe3   :  { %v14319_v20 = vpop.f32.mrb[53].mxu1 }
 0xbe4   :  { %v14321_v2 = vpop.f32.mrb[54].mxu1 }
 0xbe5   :  { %v11346_v48 = vpack.i.bf16 %v14321_v2, %v14317_v40  ;;  %v14325_v53 = vpop.f32.mrb[55].mxu1 }
 0xbe6   :  { %v11341_v43 = vpack.i.bf16 %v14325_v53, %v14319_v20 }
 0xbea   :  { %v14329_v45 = vpop.f32.mrb[56].mxu1 }
 0xbeb   :  { %v14331_v51 = vpop.f32.mrb[57].mxu1 }
 0xbec   :  { %v14333_v11 = vpop.f32.mrb[58].mxu1 }
 0xbed   :  { %v11376_v23 = vpack.i.bf16 %v14333_v11, %v14329_v45  ;;  %v14337_v60 = vpop.f32.mrb[59].mxu1  ;;  %v18218_v45 = vld [vmem:[#allocation50_spill] sm:$0xff] }
 0xbee   :  { %v11371_v14 = vpack.i.bf16 %v14337_v60, %v14331_v51  ;;  %v18220_v51 = vld [vmem:[#allocation36_spill] sm:$0xff]  ;;  %v18221_v60 = vld [vmem:[#allocation51_spill] sm:$0xff] }
 0xbf2   :  { %v14341_v61 = vpop.f32.mrb[60].mxu1 }
 0xbf3   :  { %v14343_v5 = vpop.f32.mrb[61].mxu1 }
 0xbf4   :  { %v14345_v63 = vpop.f32.mrb[62].mxu1 }
 0xbf5   :  { %v11406_v57 = vpack.i.bf16 %v14345_v63, %v14341_v61  ;;  %v14349_v58 = vpop.f32.mrb[63].mxu1 }
 0xbf6   :  { %v11401_v3 = vpack.i.bf16 %v14349_v58, %v14343_v5  ;;  %v18224_v58 = vld [vmem:[#allocation52_spill] sm:$0xff] }
 0xbfb   :  { %v10097_v21 = vpop.f32.mrb[64].mxu1 }
 0xbfc   :  { %v2578_v15 = vadd.f32 %v10097_v21, %v13973_v56  ;;  %v2572_v41 = vpop.f32.mrb[65].mxu1 }
 0xbfd   :  { %v2573_v18 = vadd.f32 %v2572_v41, %v13978_v1  ;;  %v18185_v1 = vld [vmem:[#allocation28_spill] sm:$0xff]  ;;  %v18194_v41 = vld [vmem:[#allocation75_spill] sm:$0xff] }
 0xbfe   :  { %2653 = vmax.xlane.f32.xlu1 %v2578_v15 }
 0xbff   :  { %v10100_v12 = vpop.f32.mrb[66].mxu1  ;;  %2651 = vmax.xlane.f32.xlu0 %v2573_v18 }
 0xc00   :  { %v2588_v16 = vadd.f32 %v10100_v12, %v13989_v4  ;;  %v2582_v50 = vpop.f32.mrb[67].mxu1  ;;  %v18186_v4 = vld [vmem:[#allocation27_spill] sm:$0xff] }
 0xc01   :  { %v2583_v39 = vadd.f32 %v2582_v50, %v13999_v33  ;;  %v18195_v50 = vld [vmem:[#allocation30_spill] sm:$0xff] }
 0xc03   :  { %v10103_v24 = vpop.f32.mrb[68].mxu1  ;;  %2657 = vmax.xlane.f32.xlu0 %v2588_v16 }
 0xc04   :  { %v2598_v22 = vadd.f32 %v10103_v24, %v14013_v36  ;;  %v2592_v46 = vpop.f32.mrb[69].mxu1  ;;  %v18196_v24 = vld [vmem:[#allocation32_spill] sm:$0xff] }
 0xc05   :  { %v2593_v19 = vadd.f32 %v2592_v46, %v18185_v1 }
 0xc06   :  { %2661 = vmax.xlane.f32.xlu1 %v2598_v22 }
 0xc07   :  { %v10106_v9 = vpop.f32.mrb[70].mxu1  ;;  %2655 = vmax.xlane.f32.xlu0 %v2583_v39 }
 0xc08   :  { %v2608_v56 = vadd.f32 %v10106_v9, %v14021_v35  ;;  %v2602_v55 = vpop.f32.mrb[71].mxu1 }
 0xc09   :  { %v2603_v36 = vadd.f32 %v2602_v55, %v18187_v8 }
 0xc0a   :  { %2665 = vmax.xlane.f32.xlu1 %v2608_v56 }
 0xc0b   :  { %v10109_v26 = vpop.f32.mrb[72].mxu1  ;;  %2659 = vmax.xlane.f32.xlu0 %v2593_v19 }
 0xc0c   :  { %v14361_v17 = vadd.f32 %v10109_v26, %v18186_v4  ;;  %v2612_v30 = vpop.f32.mrb[73].mxu1 }
 0xc0d   :  { %v14369_v49 = vadd.f32 %v2612_v30, %v18189_v62 }
 0xc0e   :  { %2669 = vmax.xlane.f32.xlu1 %v14361_v17 }
 0xc0f   :  { %v10112_v33 = vpop.f32.mrb[74].mxu1  ;;  %2663 = vmax.xlane.f32.xlu0 %v2603_v36 }
 0xc10   :  { %v14366_v25 = vadd.f32 %v10112_v33, %v18188_v52  ;;  %v2622_v35 = vpop.f32.mrb[75].mxu1 }
 0xc11   :  { %v14377_v28 = vadd.f32 %v2622_v35, %v18191_v27 }
 0xc12   :  { %2673 = vmax.xlane.f32.xlu1 %v14366_v25 }
 0xc13   :  { %v10115_v42 = vpop.f32.mrb[76].mxu1  ;;  %2667 = vmax.xlane.f32.xlu0 %v14369_v49 }
 0xc14   :  { %v14374_v54 = vadd.f32 %v10115_v42, %v18190_v38  ;;  %v2632_v13 = vpop.f32.mrb[77].mxu1 }
 0xc15   :  { %v14385_v21 = vadd.f32 %v2632_v13, %v18193_v7 }
 0xc16   :  { %2677 = vmax.xlane.f32.xlu1 %v14374_v54 }
 0xc17   :  { %v10118_v0 = vpop.f32.mrb[78].mxu1  ;;  %2671 = vmax.xlane.f32.xlu0 %v14377_v28 }
 0xc18   :  { %v14382_v10 = vadd.f32 %v10118_v0, %v18192_v29  ;;  %v2642_v59 = vpop.f32.mrb[79].mxu1 }
 0xc19   :  { %v14390_v12 = vadd.f32 %v2642_v59, %v18194_v41 }
 0xc1a   :  { %2681 = vmax.xlane.f32.xlu1 %v14382_v10 }
 0xc1b   :  { %2675 = vmax.xlane.f32.xlu0 %v14385_v21 }
 0xc1f   :  { %2679 = vmax.xlane.f32.xlu0 %v14390_v12 }
 0xc2b   :  { %2813 = vrot.lane.b32.xlu1 %v18195_v50, %s12617_s0 }
 0xc35   :  { %2811 = vrot.lane.b32.xlu0 %v18196_v24, %s12617_s0 }
 0xc8b   :  { %v2654_v46 = vpop.xlane.xlu1 %2653 }
 0xc8c   :  { %v2684_v9 = vsub.f32 %v2578_v15, %v2654_v46  ;;  %v2652_v55 = vpop.xlane.xlu0 %2651 }
 0xc8d   :  { %v2683_v1 = vsub.f32 %v2573_v18, %v2652_v55 }
 0xc8e   :  { %v2701_v26 = vmul.f32 1.442695, %v2684_v9 }
 0xc8f   :  { %v2699_v4 = vmul.f32 1.442695, %v2683_v1 }
 0xc90   :  { %11954 = vpow2.f32 %v2701_v26  ;;  %v2658_v30 = vpop.xlane.xlu0 %2657 }
 0xc91   :  { %v2686_v8 = vsub.f32 %v2588_v16, %v2658_v30  ;;  %11956 = vpow2.f32 %v2699_v4 }
 0xc93   :  { %v2705_v33 = vmul.f32 1.442695, %v2686_v8  ;;  %v2662_v52 = vpop.xlane.xlu1 %2661 }
 0xc94   :  { %v2688_v35 = vsub.f32 %v2598_v22, %v2662_v52  ;;  %v2656_v62 = vpop.xlane.xlu0 %2655 }
 0xc95   :  { %v2685_v42 = vsub.f32 %v2583_v39, %v2656_v62  ;;  %11958 = vpow2.f32 %v2705_v33  ;;  %v18197_v62 = vld [vmem:[#allocation33_spill] sm:$0xff] }
 0xc96   :  { %v2709_v38 = vmul.f32 1.442695, %v2688_v35 }
 0xc97   :  { %v2703_v13 = vmul.f32 1.442695, %v2685_v42  ;;  %v2666_v27 = vpop.xlane.xlu1 %2665  ;;  %v18198_v42 = vld [vmem:[#allocation34_spill] sm:$0xff] }
 0xc98   :  { %11960 = vpow2.f32 %v2709_v38  ;;  %v2690_v0 = vsub.f32 %v2608_v56, %v2666_v27  ;;  %v2660_v15 = vpop.xlane.xlu0 %2659 }
 0xc99   :  { %v2687_v29 = vsub.f32 %v2593_v19, %v2660_v15  ;;  %11962 = vpow2.f32 %v2703_v13 }
 0xc9a   :  { %v14397_v18 = vpop.eup %11954  ;;  %v2713_v59 = vmul.f32 1.442695, %v2690_v0 }
 0xc9b   :  { %v2670_v7 = vpop.xlane.xlu1 %2669  ;;  %2733 = vadd.xlane.f32.xlu1 %v14397_v18  ;;  %v2707_v16 = vmul.f32 1.442695, %v2687_v29  ;;  %v14400_v39 = vpop.eup %11956 }
 0xc9c   :  { %11964 = vpow2.f32 %v2713_v59  ;;  %v2664_v22 = vpop.xlane.xlu0 %2663  ;;  %v2692_v13 = vsub.f32 %v14361_v17, %v2670_v7 }
 0xc9d   :  { %v2689_v41 = vsub.f32 %v2603_v36, %v2664_v22  ;;  %11966 = vpow2.f32 %v2707_v16 }
 0xc9e   :  { %v2717_v15 = vmul.f32 1.442695, %v2692_v13 }
 0xc9f   :  { %v2711_v50 = vmul.f32 1.442695, %v2689_v41  ;;  %2731 = vadd.xlane.f32.xlu1 %v14400_v39  ;;  %v2674_v56 = vpop.xlane.xlu1 %2673  ;;  %v14403_v19 = vpop.eup %11958 }
 0xca0   :  { %v2668_v24 = vpop.xlane.xlu0 %2667  ;;  %v2694_v27 = vsub.f32 %v14366_v25, %v2674_v56 }
 0xca1   :  { %11968 = vpow2.f32 %v2711_v50  ;;  %v2691_v38 = vsub.f32 %v14369_v49, %v2668_v24 }
 0xca2   :  { %v14405_v46 = vpop.eup %11960  ;;  %v2721_v59 = vmul.f32 1.442695, %v2694_v27 }
 0xca3   :  { %2741 = vadd.xlane.f32.xlu0 %v14405_v46  ;;  %2737 = vadd.xlane.f32.xlu1 %v14403_v19  ;;  %v14409_v55 = vpop.eup %11962  ;;  %v2678_v1 = vpop.xlane.xlu1 %2677  ;;  %v2715_v0 = vmul.f32 1.442695, %v2691_v38 }
 0xca4   :  { %v2672_v9 = vpop.xlane.xlu0 %2671  ;;  %v2696_v16 = vsub.f32 %v14374_v54, %v2678_v1 }
 0xca5   :  { %v2693_v29 = vsub.f32 %v14377_v28, %v2672_v9  ;;  %11970 = vpow2.f32 %v2715_v0 }
 0xca6   :  { %v14411_v36 = vpop.eup %11964  ;;  %11972 = vpow2.f32 %v2717_v15  ;;  %v2725_v50 = vmul.f32 1.442695, %v2696_v16 }
 0xca7   :  { %2745 = vadd.xlane.f32.xlu0 %v14411_v36  ;;  %2735 = vadd.xlane.f32.xlu1 %v14409_v55  ;;  %v14415_v4 = vpop.eup %11966  ;;  %v2682_v8 = vpop.xlane.xlu1 %2681  ;;  %v2719_v22 = vmul.f32 1.442695, %v2693_v29  ;;  %11974 = vpow2.f32 %v2721_v59 }
 0xca8   :  { %v2676_v26 = vpop.xlane.xlu0 %2675  ;;  %v2698_v49 = vsub.f32 %v14382_v10, %v2682_v8  ;;  %v18200_v8 = vld [vmem:[#allocation38_spill] sm:$0xff] }
 0xca9   :  { %v2695_v41 = vsub.f32 %v14385_v21, %v2676_v26  ;;  %11976 = vpow2.f32 %v2719_v22  ;;  %v18199_v26 = vld [vmem:[#allocation40_spill] sm:$0xff] }
 0xcaa   :  { %11978 = vpow2.f32 %v2725_v50  ;;  %v2729_v7 = vmul.f32 1.442695, %v2698_v49 }
 0xcab   :  { %v14417_v30 = vpop.eup %11968  ;;  %2739 = vadd.xlane.f32.xlu1 %v14415_v4  ;;  %v2814_v35 = vpop.permute.xlu1 %2813  ;;  %v2723_v17 = vmul.f32 1.442695, %v2695_v41 }
 0xcac   :  { %2743 = vadd.xlane.f32.xlu0 %v14417_v30  ;;  %v2680_v33 = vpop.xlane.xlu0 %2679 }
 0xcad   :  { %v2697_v25 = vsub.f32 %v14390_v12, %v2680_v33  ;;  %11980 = vpow2.f32 %v2723_v17  ;;  %v18201_v33 = vpack.i.bf16 %v18199_v26, %v18200_v8 }
 0xcae   :  { %11982 = vpow2.f32 %v2729_v7 }
 0xcaf   :  { %v2727_v28 = vmul.f32 1.442695, %v2697_v25  ;;  %v14433_v56 = vpop.eup %11970 }
 0xcb0   :  { %v2812_v52 = vpop.permute.xlu0 %2811  ;;  %v14435_v24 = vpop.eup %11972 }
 0xcb1   :  { %10127 = vmatprep.subr.bf16.mxu0 %v2812_v52  ;;  %11984 = vpow2.f32 %v2727_v28  ;;  %v14439_v54 = vpop.eup %11974 }
 0xcb2   :  { %10128 = vmatpush3.bf16.msra.mxu0 %v2812_v52  ;;  %v18202_v52 = vld [vmem:[#allocation41_spill] sm:$0xff] }
 0xcb3   :  { %10129 = vmatprep.subr.bf16.mxu0 %v2814_v35  ;;  %v14441_v10 = vpop.eup %11976 }
 0xcb4   :  { %v14445_v21 = vpop.eup %11978 }
 0xcb6   :  { %10130 = vmatpush3.bf16.msra.mxu0 %v2814_v35  ;;  %v18203_v35 = vld [vmem:[#allocation39_spill] sm:$0xff] }
 0xcb7   :  { %v14447_v12 = vpop.eup %11980 }
 0xcb8   :  { %v14451_v9 = vpop.eup %11982 }
 0xcbb   :  { %v14453_v1 = vpop.eup %11984 }
 0xcbc   :  { %2817 = vrot.lane.b32.xlu1 %v18197_v62, %s12617_s0  ;;  %v18204_v62 = vpack.i.bf16 %v18202_v52, %v18203_v35 }
 0xcc2   :  { %2815 = vrot.lane.b32.xlu0 %v18198_v42, %s12617_s0 }
 0xce0   :  { %2747 = vadd.xlane.f32.xlu1 %v14433_v56 }
 0xce1   :  { %2749 = vadd.xlane.f32.xlu0 %v14435_v24 }
 0xce4   :  { %2753 = vadd.xlane.f32.xlu1 %v14439_v54 }
 0xce5   :  { %2751 = vadd.xlane.f32.xlu0 %v14441_v10 }
 0xce8   :  { %2757 = vadd.xlane.f32.xlu1 %v14445_v21 }
 0xce9   :  { %2755 = vadd.xlane.f32.xlu0 %v14447_v12 }
 0xcec   :  { %2761 = vadd.xlane.f32.xlu1 %v14451_v9 }
 0xced   :  { %2759 = vadd.xlane.f32.xlu0 %v14453_v1 }
 0xcfd   :  { %11307 = vrot.lane.b32.xlu1 %v18201_v33, %s12607_s18 }
 0xd01   :  { %11312 = vrot.lane.b32.xlu1 %v11311_v47, %s12618_s25 }
 0xd03   :  { %11302 = vrot.lane.b32.xlu0 %v18204_v62, %s12607_s18 }
 0xd05   :  { %11317 = vrot.lane.b32.xlu1 %v11316_v37, %s12618_s25 }
 0xd28   :  { %v2734_v42 = vpop.xlane.xlu1 %2733 }
 0xd29   :  { %11986 = vrcp.f32 %v2734_v42 }
 0xd2c   :  { %v2732_v38 = vpop.xlane.xlu1 %2731 }
 0xd2d   :  { %11988 = vrcp.f32 %v2732_v38 }
 0xd30   :  { %v2738_v13 = vpop.xlane.xlu1 %2737  ;;  %v2742_v27 = vpop.xlane.xlu0 %2741 }
 0xd31   :  { %11990 = vrcp.f32 %v2738_v13 }
 0xd33   :  { %v11987_v44 = vpop.eup %11986 }
 0xd34   :  { %v2736_v0 = vpop.xlane.xlu1 %2735  ;;  %v2746_v32 = vpop.xlane.xlu0 %2745  ;;  %v2780_v59 = vmul.f32 %v11987_v44, %v14397_v18 }
 0xd35   :  { %11992 = vrcp.f32 %v2736_v0 }
 0xd36   :  { %11994 = vrcp.f32 %v2742_v27 }
 0xd37   :  { %v11989_v47 = vpop.eup %11988 }
 0xd38   :  { %v2740_v15 = vpop.xlane.xlu1 %2739  ;;  %v2779_v29 = vmul.f32 %v11989_v47, %v14400_v39 }
 0xd39   :  { %11996 = vrcp.f32 %v2740_v15  ;;  %v2744_v6 = vpop.xlane.xlu0 %2743 }
 0xd3a   :  { %v2795_v34 = vpack.c.bf16 %v2780_v59, %v2779_v29  ;;  %11998 = vrcp.f32 %v2744_v6 }
 0xd3b   :  { %12000 = vrcp.f32 %v2746_v32  ;;  %v11991_v16 = vpop.eup %11990 }
 0xd3c   :  { %10135 = vmatprep.mubr.bf16.mxu0 %v2795_v34  ;;  %v2818_v41 = vpop.permute.xlu1 %2817  ;;  %v2782_v39 = vmul.f32 %v11991_v16, %v14403_v19 }
 0xd3d   :  { %v2816_v37 = vpop.permute.xlu0 %2815 }
 0xd3e   :  { %10131 = vmatprep.subr.bf16.mxu0 %v2816_v37 }
 0xd3f   :  { %v11993_v22 = vpop.eup %11992  ;;  %10132 = vmatpush3.bf16.msra.mxu0 %v2816_v37 }
 0xd40   :  { %v2781_v50 = vmul.f32 %v11993_v22, %v14409_v55  ;;  %10133 = vmatprep.subr.bf16.mxu0 %v2818_v41  ;;  %v11995_v49 = vpop.eup %11994 }
 0xd41   :  { %v2784_v7 = vmul.f32 %v11995_v49, %v14405_v46 }
 0xd42   :  { %v2796_v18 = vpack.c.bf16 %v2782_v39, %v2781_v50 }
 0xd43   :  { %v11997_v17 = vpop.eup %11996  ;;  %10134 = vmatpush3.bf16.msra.mxu0 %v2818_v41 }
 0xd44   :  { %v2783_v25 = vmul.f32 %v11997_v17, %v14415_v4  ;;  %v11999_v28 = vpop.eup %11998 }
 0xd45   :  { %v12001_v8 = vpop.eup %12000  ;;  %v2785_v33 = vmul.f32 %v11999_v28, %v14417_v30 }
 0xd46   :  { %10136 = vmatmul.mubr.bf16.vlgmr.msra.gmra.mrb[64].mxu0 %v2796_v18  ;;  %v2797_v26 = vpack.c.bf16 %v2784_v7, %v2783_v25  ;;  %v2786_v55 = vmul.f32 %v12001_v8, %v14411_v36  ;;  %v18205_v25 = vld [vmem:[#allocation44_spill] sm:$0xff]  ;;  %v18206_v7 = vld [vmem:[#allocation42_spill] sm:$0xff]  ;;  %v18208_v8 = vld [vmem:[#allocation45_spill] sm:$0xff] }
 0xd47   :  { %v18207_v28 = vpack.i.bf16 %v18205_v25, %v18206_v7 }
 0xd48   :  { %10139 = vmatprep.mubr.bf16.mxu0 %v2797_v26  ;;  %v2798_v52 = vpack.c.bf16 %v2786_v55, %v2785_v33  ;;  %v18209_v33 = vld [vmem:[#allocation43_spill] sm:$0xff] }
 0xd49   :  { %v18210_v55 = vpack.i.bf16 %v18208_v8, %v18209_v33 }
 0xd4e   :  { %10140 = vmatmul.mubr.bf16.gmra.mrb[68].mxu0 %v2798_v52 }
 0xd6d   :  { %v2748_v35 = vpop.xlane.xlu1 %2747 }
 0xd6e   :  { %12002 = vrcp.f32 %v2748_v35  ;;  %v2750_v19 = vpop.xlane.xlu0 %2749 }
 0xd6f   :  { %12004 = vrcp.f32 %v2750_v19 }
 0xd71   :  { %v2754_v62 = vpop.xlane.xlu1 %2753 }
 0xd72   :  { %12006 = vrcp.f32 %v2754_v62  ;;  %v2752_v4 = vpop.xlane.xlu0 %2751 }
 0xd73   :  { %12008 = vrcp.f32 %v2752_v4  ;;  %v18211_v4 = vld [vmem:[#allocation48_spill] sm:$0xff] }
 0xd75   :  { %v2758_v46 = vpop.xlane.xlu1 %2757 }
 0xd76   :  { %12010 = vrcp.f32 %v2758_v46  ;;  %v2756_v42 = vpop.xlane.xlu0 %2755  ;;  %v18212_v46 = vld [vmem:[#allocation46_spill] sm:$0xff] }
 0xd77   :  { %12012 = vrcp.f32 %v2756_v42  ;;  %v18213_v42 = vpack.i.bf16 %v18211_v4, %v18212_v46 }
 0xd78   :  { %v12003_v38 = vpop.eup %12002 }
 0xd79   :  { %v12005_v13 = vpop.eup %12004  ;;  %v2762_v27 = vpop.xlane.xlu1 %2761  ;;  %v2787_v30 = vmul.f32 %v12003_v38, %v14433_v56  ;;  %v18214_v38 = vld [vmem:[#allocation49_spill] sm:$0xff] }
 0xd7a   :  { %12014 = vrcp.f32 %v2762_v27  ;;  %v2760_v36 = vpop.xlane.xlu0 %2759  ;;  %v2788_v0 = vmul.f32 %v12005_v13, %v14435_v24  ;;  %v18215_v13 = vld [vmem:[#allocation47_spill] sm:$0xff] }
 0xd7b   :  { %12016 = vrcp.f32 %v2760_v36  ;;  %v18216_v27 = vpack.i.bf16 %v18214_v38, %v18215_v13  ;;  %v18217_v36 = vld [vmem:[#allocation37_spill] sm:$0xff] }
 0xd7c   :  { %v12007_v32 = vpop.eup %12006  ;;  %v2799_v44 = vpack.c.bf16 %v2788_v0, %v2787_v30  ;;  %v18219_v11 = vpack.i.bf16 %v18217_v36, %v18218_v45  ;;  %v18229_v45 = vld [vmem:[#allocation59_spill] sm:$0xff] }
 0xd7d   :  { %v12009_v47 = vpop.eup %12008  ;;  %v2790_v15 = vmul.f32 %v12007_v32, %v14439_v54 }
 0xd7e   :  { %10143 = vmatprep.mubr.bf16.mxu0 %v2799_v44  ;;  %v2789_v29 = vmul.f32 %v12009_v47, %v14441_v10  ;;  %v11704_v10 = vld [vmem:[%s17917_s7] sm:$0xff]  }
 0xd7f   :  { %10151 = vmatprep.subr.bf16.mxu0 %v11704_v10 }
 0xd80   :  { %v12011_v59 = vpop.eup %12010  ;;  %v2800_v6 = vpack.c.bf16 %v2790_v15, %v2789_v29  ;;  %10152 = vmatpush3.bf16.msra.mxu0 %v11704_v10  ;;  %v11308_v15 = vpop.permute.xlu1 %11307  ;;  %v18226_v10 = vld [vmem:[#allocation53_spill] sm:$0xff] }
 0xd81   :  { %v12013_v34 = vpop.eup %12012  ;;  %v2792_v37 = vmul.f32 %v12011_v59, %v14445_v21  ;;  %v11705_v21 = vld [vmem:[%s17917_s7 + $0x8] sm:$0xff]   ;;  %v11303_v59 = vpop.permute.xlu0 %11302 }
 0xd82   :  { %10144 = vmatmul.mubr.bf16.gmra.mrb[72].mxu0 %v2800_v6  ;;  %v2791_v56 = vmul.f32 %v12013_v34, %v14447_v12  ;;  %10153 = vmatprep.subr.bf16.mxu0 %v11705_v21  ;;  %v11310_v34 = vunpack.i.h.bf16 %v11308_v15 }
 0xd84   :  { %v12015_v16 = vpop.eup %12014  ;;  %v2801_v22 = vpack.c.bf16 %v2792_v37, %v2791_v56  ;;  %10154 = vmatpush3.bf16.msra.mxu0 %v11705_v21  ;;  %v11313_v29 = vpop.permute.xlu1 %11312  ;;  %v11309_v37 = vunpack.i.l.bf16 %v11308_v15  ;;  %v11305_v56 = vunpack.i.h.bf16 %v11303_v59 }
 0xd85   :  { %v12017_v24 = vpop.eup %12016  ;;  %v2794_v41 = vmul.f32 %v12015_v16, %v14451_v9  ;;  %v11304_v16 = vunpack.i.l.bf16 %v11303_v59  ;;  %v11315_v63 = vunpack.i.h.bf16 %v11313_v29 }
 0xd86   :  { %10147 = vmatprep.mubr.bf16.mxu0 %v2801_v22  ;;  %v2793_v50 = vmul.f32 %v12017_v24, %v14453_v1  ;;  %v18223_v24 = vld [vmem:[#allocation54_spill] sm:$0xff] }
 0xd87   :  { %v3119_v5 = vsel %vm731_vm3, %v18223_v24, %v11310_v34  ;;  %v3116_v21 = vsel %vm731_vm3, %v18226_v10, %v11304_v16 }
 0xd88   :  { %v2802_v54 = vpack.c.bf16 %v2794_v41, %v2793_v50  ;;  %v11318_v6 = vpop.permute.xlu1 %11317  ;;  %v18225_v50 = vld [vmem:[#allocation55_spill] sm:$0xff] }
 0xd89   :  { %v11320_v22 = vunpack.i.h.bf16 %v11318_v6  ;;  %v11319_v61 = vunpack.i.l.bf16 %v11318_v6 }
 0xd8a   :  { %10148 = vmatmul.mubr.bf16.gmra.mrb[76].mxu0 %v2802_v54  ;;  %v3117_v54 = vsel %vm731_vm3, %v18225_v50, %v11305_v56 }
 0xd8b   :  { %v3134_v7 = vsel %vm3132_vm5, %v3117_v54, %v11315_v63 }
 0xe19   :  { %v10137_v12 = vpop.f32.mrb[64].mxu0 }
 0xe1a   :  { %v2861_v49 = vpop.f32.mrb[65].mxu0 }
 0xe1b   :  { %v10138_v9 = vpop.f32.mrb[66].mxu0 }
 0xe1c   :  { %v11326_v39 = vpack.i.bf16 %v10138_v9, %v10137_v12  ;;  %v2864_v17 = vpop.f32.mrb[67].mxu0 }
 0xe1d   :  { %v11321_v1 = vpack.i.bf16 %v2864_v17, %v2861_v49  ;;  %v3136_v17 = vsel %vm3132_vm5, %v3119_v5, %v11320_v22 }
 0xe1e   :  { %11327 = vrot.lane.b32.xlu1 %v11326_v39, %s12619_s19 }
 0xe1f   :  { %11322 = vrot.lane.b32.xlu0 %v11321_v1, %s12619_s19 }
 0xe21   :  { %v10141_v18 = vpop.f32.mrb[68].mxu0 }
 0xe22   :  { %11337 = vrot.lane.b32.xlu1 %v18207_v28, %s12607_s18  ;;  %v2877_v26 = vpop.f32.mrb[69].mxu0 }
 0xe23   :  { %11332 = vrot.lane.b32.xlu0 %v18210_v55, %s12607_s18  ;;  %v10142_v52 = vpop.f32.mrb[70].mxu0 }
 0xe24   :  { %v11356_v35 = vpack.i.bf16 %v10142_v52, %v10141_v18  ;;  %v2880_v19 = vpop.f32.mrb[71].mxu0 }
 0xe25   :  { %v11351_v62 = vpack.i.bf16 %v2880_v19, %v2877_v26 }
 0xe26   :  { %11347 = vrot.lane.b32.xlu1 %v11346_v48, %s12618_s25 }
 0xe27   :  { %11342 = vrot.lane.b32.xlu0 %v11341_v43, %s12618_s25 }
 0xe2a   :  { %11357 = vrot.lane.b32.xlu1 %v11356_v35, %s12619_s19 }
 0xe2b   :  { %11352 = vrot.lane.b32.xlu0 %v11351_v62, %s12619_s19 }
 0xe2e   :  { %11367 = vrot.lane.b32.xlu1 %v18213_v42, %s12607_s18 }
 0xe2f   :  { %11362 = vrot.lane.b32.xlu0 %v18216_v27, %s12607_s18 }
 0xe32   :  { %11377 = vrot.lane.b32.xlu1 %v11376_v23, %s12618_s25 }
 0xe33   :  { %11372 = vrot.lane.b32.xlu0 %v11371_v14, %s12618_s25  ;;  %v18222_v14 = vpack.i.bf16 %v18220_v51, %v18221_v60 }
 0xe55   :  { %v10145_v40 = vpop.f32.mrb[72].mxu0 }
 0xe56   :  { %v2893_v20 = vpop.f32.mrb[73].mxu0 }
 0xe57   :  { %v10146_v2 = vpop.f32.mrb[74].mxu0 }
 0xe58   :  { %v11386_v48 = vpack.i.bf16 %v10146_v2, %v10145_v40  ;;  %v2896_v53 = vpop.f32.mrb[75].mxu0 }
 0xe59   :  { %v11381_v43 = vpack.i.bf16 %v2896_v53, %v2893_v20 }
 0xe5a   :  { %11387 = vrot.lane.b32.xlu1 %v11386_v48, %s12619_s19  ;;  %v18227_v48 = vld [vmem:[#allocation58_spill] sm:$0xff] }
 0xe5b   :  { %11382 = vrot.lane.b32.xlu0 %v11381_v43, %s12619_s19  ;;  %v18228_v43 = vld [vmem:[#allocation56_spill] sm:$0xff] }
 0xe5d   :  { %v10149_v30 = vpop.f32.mrb[76].mxu0 }
 0xe5e   :  { %11397 = vrot.lane.b32.xlu1 %v18219_v11, %s12607_s18  ;;  %v2909_v23 = vpop.f32.mrb[77].mxu0 }
 0xe5f   :  { %11392 = vrot.lane.b32.xlu0 %v18222_v14, %s12607_s18  ;;  %v10150_v0 = vpop.f32.mrb[78].mxu0 }
 0xe60   :  { %v11416_v32 = vpack.i.bf16 %v10150_v0, %v10149_v30  ;;  %v2912_v44 = vpop.f32.mrb[79].mxu0 }
 0xe61   :  { %v11411_v47 = vpack.i.bf16 %v2912_v44, %v2909_v23  ;;  %v18230_v23 = vld [vmem:[#allocation57_spill] sm:$0xff] }
 0xe62   :  { %11407 = vrot.lane.b32.xlu1 %v11406_v57, %s12618_s25  ;;  %v11314_v57 = vunpack.i.l.bf16 %v11313_v29 }
 0xe63   :  { %11402 = vrot.lane.b32.xlu0 %v11401_v3, %s12618_s25  ;;  %v3118_v3 = vsel %vm731_vm3, %v18224_v58, %v11309_v37 }
 0xe64   :  { %v3135_v39 = vsel %vm3132_vm5, %v3118_v3, %v11319_v61  ;;  %v3133_v25 = vsel %vm3132_vm5, %v3116_v21, %v11314_v57 }
 0xe66   :  { %11417 = vrot.lane.b32.xlu1 %v11416_v32, %s12619_s19 }
 0xe67   :  { %11412 = vrot.lane.b32.xlu0 %v11411_v47, %s12619_s19 }
 0xe90   :  { %v11328_v41 = vpop.permute.xlu1 %11327 }
 0xe91   :  { %v11330_v12 = vunpack.i.h.bf16 %v11328_v41  ;;  %v11329_v49 = vunpack.i.l.bf16 %v11328_v41  ;;  %v11323_v9 = vpop.permute.xlu0 %11322 }
 0xe92   :  { %v11325_v1 = vunpack.i.h.bf16 %v11323_v9  ;;  %v11324_v18 = vunpack.i.l.bf16 %v11323_v9  ;;  %v18232_v9 = vld [vmem:[#allocation60_spill] sm:$0xff] }
 0xe93   :  { %v3153_v28 = vsel %vm3149_vm6, %v3136_v17, %v11330_v12  ;;  %v3152_v26 = vsel %vm3149_vm6, %v3135_v39, %v11329_v49  ;;  %v18231_v12 = vld [vmem:[#allocation62_spill] sm:$0xff] }
 0xe94   :  { %v3167_v8 = vpack.c.bf16 %v3153_v28, %v3152_v26  ;;  %v3150_v33 = vsel %vm3149_vm6, %v3133_v25, %v11324_v18  ;;  %v3151_v55 = vsel %vm3149_vm6, %v3134_v7, %v11325_v1  ;;  %v11338_v52 = vpop.permute.xlu1 %11337  ;;  %v18233_v1 = vld [vmem:[#allocation63_spill] sm:$0xff]  ;;  %v18234_v25 = vld [vmem:[#allocation61_spill] sm:$0xff] }
 0xe95   :  { %v11333_v35 = vpop.permute.xlu0 %11332  ;;  %v3166_v19 = vpack.c.bf16 %v3151_v55, %v3150_v33  ;;  %v11340_v62 = vunpack.i.h.bf16 %v11338_v52  ;;  %v11339_v4 = vunpack.i.l.bf16 %v11338_v52 }
 0xe96   :  { %v11335_v42 = vunpack.i.h.bf16 %v11333_v35  ;;  %v11334_v38 = vunpack.i.l.bf16 %v11333_v35 }
 0xe97   :  { %10155 = vmatprep.mubr.msk.bf16.mxu0 %vm243_vm2, %v3166_v19  ;;  %v3123_v53 = vsel %vm731_vm3, %v18227_v48, %v11340_v62  ;;  %v3122_v30 = vsel %vm731_vm3, %v18228_v43, %v11339_v4 }
 0xe98   :  { %v11348_v46 = vpop.permute.xlu1 %11347  ;;  %10156 = vmatmul.mubr.msk.bf16.vlgmr.msra.gmra.mrb[80].mxu0 %vm243_vm2, %v3167_v8  ;;  %v3121_v11 = vsel %vm731_vm3, %v18229_v45, %v11335_v42  ;;  %v3120_v51 = vsel %vm731_vm3, %v18230_v23, %v11334_v38 }
 0xe99   :  { %v11343_v13 = vpop.permute.xlu0 %11342  ;;  %v11350_v27 = vunpack.i.h.bf16 %v11348_v46  ;;  %v11349_v40 = vunpack.i.l.bf16 %v11348_v46 }
 0xe9a   :  { %v11345_v20 = vunpack.i.h.bf16 %v11343_v13  ;;  %v11344_v2 = vunpack.i.l.bf16 %v11343_v13 }
 0xe9b   :  { %v3139_v32 = vsel %vm3132_vm5, %v3122_v30, %v11349_v40  ;;  %v3140_v44 = vsel %vm3132_vm5, %v3123_v53, %v11350_v27 }
 0xe9c   :  { %v11358_v36 = vpop.permute.xlu1 %11357  ;;  %v3137_v29 = vsel %vm3132_vm5, %v3120_v51, %v11344_v2  ;;  %v3138_v59 = vsel %vm3132_vm5, %v3121_v11, %v11345_v20 }
 0xe9d   :  { %v11360_v60 = vunpack.i.h.bf16 %v11358_v36  ;;  %v11359_v14 = vunpack.i.l.bf16 %v11358_v36  ;;  %v11353_v0 = vpop.permute.xlu0 %11352 }
 0xe9e   :  { %v11355_v47 = vunpack.i.h.bf16 %v11353_v0  ;;  %v11354_v15 = vunpack.i.l.bf16 %v11353_v0  ;;  %v18236_v0 = vld [vmem:[#allocation64_spill] sm:$0xff] }
 0xe9f   :  { %v3157_v6 = vsel %vm3149_vm6, %v3140_v44, %v11360_v60  ;;  %v3156_v34 = vsel %vm3149_vm6, %v3139_v32, %v11359_v14  ;;  %v18235_v60 = vld [vmem:[#allocation66_spill] sm:$0xff] }
 0xea0   :  { %v3154_v37 = vsel %vm3149_vm6, %v3137_v29, %v11354_v15  ;;  %v3155_v56 = vsel %vm3149_vm6, %v3138_v59, %v11355_v47  ;;  %v3169_v16 = vpack.c.bf16 %v3157_v6, %v3156_v34  ;;  %v11368_v61 = vpop.permute.xlu1 %11367  ;;  %v18237_v47 = vld [vmem:[#allocation67_spill] sm:$0xff]  ;;  %v18238_v29 = vld [vmem:[#allocation65_spill] sm:$0xff] }
 0xea1   :  { %v3168_v22 = vpack.c.bf16 %v3155_v56, %v3154_v37  ;;  %v11363_v63 = vpop.permute.xlu0 %11362  ;;  %v11370_v24 = vunpack.i.h.bf16 %v11368_v61  ;;  %v11369_v5 = vunpack.i.l.bf16 %v11368_v61 }
 0xea2   :  { %v11365_v3 = vunpack.i.h.bf16 %v11363_v63  ;;  %v11364_v41 = vunpack.i.l.bf16 %v11363_v63 }
 0xea3   :  { %10159 = vmatprep.mubr.msk.bf16.mxu0 %vm243_vm2, %v3168_v22  ;;  %v3127_v49 = vsel %vm731_vm3, %v18231_v12, %v11370_v24  ;;  %v3126_v39 = vsel %vm731_vm3, %v18232_v9, %v11369_v5 }
 0xea4   :  { %10160 = vmatmul.mubr.msk.bf16.gmra.mrb[84].mxu0 %vm243_vm2, %v3169_v16  ;;  %v11378_v57 = vpop.permute.xlu1 %11377  ;;  %v3125_v18 = vsel %vm731_vm3, %v18233_v1, %v11365_v3  ;;  %v3124_v7 = vsel %vm731_vm3, %v18234_v25, %v11364_v41  ;;  %v18240_v25 = vld [vmem:[#allocation11_spill] sm:$0xff] }
 0xea5   :  { %v11373_v58 = vpop.permute.xlu0 %11372  ;;  %v11380_v50 = vunpack.i.h.bf16 %v11378_v57  ;;  %v11379_v54 = vunpack.i.l.bf16 %v11378_v57 }
 0xea6   :  { %v11375_v10 = vunpack.i.h.bf16 %v11373_v58  ;;  %v11374_v21 = vunpack.i.l.bf16 %v11373_v58 }
 0xea7   :  { %v3143_v33 = vsel %vm3132_vm5, %v3126_v39, %v11379_v54  ;;  %v3144_v55 = vsel %vm3132_vm5, %v3127_v49, %v11380_v50  ;;  %v14623_v54 = vld [vmem:[#allocation5 + $0x4] ss:$0 sm:$0xff] }
 0xea8   :  { %v3141_v19 = vsel %vm3132_vm5, %v3124_v7, %v11374_v21  ;;  %v3142_v62 = vsel %vm3132_vm5, %v3125_v18, %v11375_v10 }
 0xecc   :  { %v11388_v17 = vpop.permute.xlu1 %11387 }
 0xecd   :  { %v11390_v28 = vunpack.i.h.bf16 %v11388_v17  ;;  %v11389_v26 = vunpack.i.l.bf16 %v11388_v17  ;;  %v11383_v8 = vpop.permute.xlu0 %11382  ;;  %v18239_v17 = vld [vmem:[#allocation12_spill] sm:$0xff] }
 0xece   :  { %v11385_v52 = vunpack.i.h.bf16 %v11383_v8  ;;  %v11384_v35 = vunpack.i.l.bf16 %v11383_v8 }
 0xecf   :  { %v3161_v4 = vsel %vm3149_vm6, %v3144_v55, %v11390_v28  ;;  %v3160_v46 = vsel %vm3149_vm6, %v3143_v33, %v11389_v26  ;;  %v18241_v26 = vld [vmem:[#allocation14_spill] sm:$0xff] }
 0xed0   :  { %v3158_v42 = vsel %vm3149_vm6, %v3141_v19, %v11384_v35  ;;  %v3159_v38 = vsel %vm3149_vm6, %v3142_v62, %v11385_v52  ;;  %v11398_v13 = vpop.permute.xlu1 %11397  ;;  %v3171_v27 = vpack.c.bf16 %v3161_v4, %v3160_v46  ;;  %v18242_v52 = vld [vmem:[#allocation13_spill] sm:$0xff] }
 0xed1   :  { %v11393_v40 = vpop.permute.xlu0 %11392  ;;  %v3170_v20 = vpack.c.bf16 %v3159_v38, %v3158_v42  ;;  %v11400_v2 = vunpack.i.h.bf16 %v11398_v13  ;;  %v11399_v48 = vunpack.i.l.bf16 %v11398_v13 }
 0xed2   :  { %v11395_v43 = vunpack.i.h.bf16 %v11393_v40  ;;  %v11394_v30 = vunpack.i.l.bf16 %v11393_v40  ;;  %v18243_v40 = vld [vmem:[#allocation16_spill] sm:$0xff] }
 0xed3   :  { %10163 = vmatprep.mubr.msk.bf16.mxu0 %vm243_vm2, %v3170_v20  ;;  %v3131_v14 = vsel %vm731_vm3, %v18235_v60, %v11400_v2  ;;  %v3130_v32 = vsel %vm731_vm3, %v18236_v0, %v11399_v48 }
 0xed4   :  { %v11408_v53 = vpop.permute.xlu1 %11407  ;;  %10164 = vmatmul.mubr.msk.bf16.gmra.mrb[88].mxu0 %vm243_vm2, %v3171_v27  ;;  %v3129_v15 = vsel %vm731_vm3, %v18237_v47, %v11395_v43  ;;  %v3128_v59 = vsel %vm731_vm3, %v18238_v29, %v11394_v30  ;;  %v18245_v30 = vld [vmem:[#allocation18_spill] sm:$0xff] }
 0xed5   :  { %v11403_v36 = vpop.permute.xlu0 %11402  ;;  %v11410_v45 = vunpack.i.h.bf16 %v11408_v53  ;;  %v11409_v11 = vunpack.i.l.bf16 %v11408_v53  ;;  %v18244_v53 = vld [vmem:[#allocation15_spill] sm:$0xff] }
 0xed6   :  { %v11405_v23 = vunpack.i.h.bf16 %v11403_v36  ;;  %v11404_v51 = vunpack.i.l.bf16 %v11403_v36 }
 0xed7   :  { %v3147_v56 = vsel %vm3132_vm5, %v3130_v32, %v11409_v11  ;;  %v3148_v16 = vsel %vm3132_vm5, %v3131_v14, %v11410_v45  ;;  %v18246_v11 = vld [vmem:[#allocation17_spill] sm:$0xff] }
 0xed8   :  { %v11418_v44 = vpop.permute.xlu1 %11417  ;;  %v3145_v63 = vsel %vm3132_vm5, %v3128_v59, %v11404_v51  ;;  %v3146_v57 = vsel %vm3132_vm5, %v3129_v15, %v11405_v23  ;;  %v18247_v59 = vld [vmem:[#allocation20_spill] sm:$0xff] }
 0xed9   :  { %v11420_v6 = vunpack.i.h.bf16 %v11418_v44  ;;  %v11419_v34 = vunpack.i.l.bf16 %v11418_v44  ;;  %v11413_v37 = vpop.permute.xlu0 %11412 }
 0xeda   :  { %v11415_v22 = vunpack.i.h.bf16 %v11413_v37  ;;  %v11414_v61 = vunpack.i.l.bf16 %v11413_v37 }
 0xedb   :  { %v3165_v24 = vsel %vm3149_vm6, %v3148_v16, %v11420_v6  ;;  %v3164_v5 = vsel %vm3149_vm6, %v3147_v56, %v11419_v34  ;;  %v18248_v56 = vld [vmem:[#allocation19_spill] sm:$0xff] }
 0xedc   :  { %v3162_v58 = vsel %vm3149_vm6, %v3145_v63, %v11414_v61  ;;  %v3163_v3 = vsel %vm3149_vm6, %v3146_v57, %v11415_v22  ;;  %v3173_v41 = vpack.c.bf16 %v3165_v24, %v3164_v5  ;;  %v18249_v22 = vld [vmem:[#allocation22_spill] sm:$0xff]  ;;  %v18250_v57 = vld [vmem:[#allocation21_spill] sm:$0xff] }
 0xedd   :  { %v3172_v50 = vpack.c.bf16 %v3163_v3, %v3162_v58 }
 0xedf   :  { %10167 = vmatprep.mubr.msk.bf16.mxu0 %vm243_vm2, %v3172_v50 }
 0xee0   :  { %10168 = vmatmul.mubr.msk.bf16.gmra.mrb[92].mxu0 %vm243_vm2, %v3173_v41 }
 0xf6b   :  { %v10157_v10 = vpop.f32.mrb[80].mxu0 }
 0xf6c   :  { %v3253_v21 = vpop.f32.mrb[81].mxu0  ;;  %v3262_v12 = vadd.f32 %v10157_v10, %v14623_v54 }
 0xf6d   :  { %v3254_v49 = vadd.f32 %v14623_v54, %v3253_v21  ;;  %v10158_v9 = vpop.f32.mrb[82].mxu0 }
 0xf6e   :  { %v3256_v39 = vpop.f32.mrb[83].mxu0  ;;  %v14632_v7 = vadd.f32 %v3262_v12, %v18240_v25  ;;  %v3265_v28 = vadd.f32 %v10158_v9, %v14623_v54  ;;  %v18251_v9 = vld [vmem:[#allocation24_spill] sm:$0xff]  ;;  %v18252_v25 = vld [vmem:[#allocation23_spill] sm:$0xff] }
 0xf6f   :  { %v14628_v1 = vadd.f32 %v3254_v49, %v18239_v17  ;;  %v3257_v18 = vadd.f32 %v14623_v54, %v3256_v39 }
 0xf70   :  { %v14643_v35 = vadd.f32 %v3265_v28, %v18242_v52  ;;  %v3340_v19 = vsel %vm243_vm2, %v14632_v7, 0.0  ;;  %v18255_v52 = vld [vmem:[#allocation25_spill] sm:$0xff] }
 0xf71   :  { %v14636_v8 = vadd.f32 %v3257_v18, %v18241_v26  ;;  %v3334_v33 = vsel %vm243_vm2, %v14628_v1, 0.0  ;;  %v18253_v26 = vld [vmem:[#allocation26_spill] sm:$0xff] }
 0xf72   :  { %3335 = vadd.xlane.f32.xlu0 %v3334_v33  ;;  %v3343_v13 = vsel %vm243_vm2, %v14643_v35, 0.0 }
 0xf73   :  { %v3337_v55 = vsel %vm243_vm2, %v14636_v8, 0.0 }
 0xf74   :  { %3338 = vadd.xlane.f32.xlu1 %v3337_v55 }
 0xf76   :  { %3341 = vadd.xlane.f32.xlu0 %v3340_v19 }
 0xf77   :  { %v10161_v62 = vpop.f32.mrb[84].mxu0 }
 0xf78   :  { %v3269_v4 = vpop.f32.mrb[85].mxu0  ;;  %v3278_v46 = vadd.f32 %v10161_v62, %v14623_v54 }
 0xf79   :  { %v3270_v42 = vadd.f32 %v14623_v54, %v3269_v4  ;;  %v10162_v38 = vpop.f32.mrb[86].mxu0 }
 0xf7a   :  { %v3272_v27 = vpop.f32.mrb[87].mxu0  ;;  %3344 = vadd.xlane.f32.xlu0 %v3343_v13  ;;  %v3281_v2 = vadd.f32 %v10162_v38, %v14623_v54  ;;  %v14657_v43 = vadd.f32 %v3278_v46, %v18244_v53 }
 0xf7b   :  { %v14652_v20 = vadd.f32 %v3270_v42, %v18243_v40  ;;  %v3273_v48 = vadd.f32 %v14623_v54, %v3272_v27 }
 0xf7c   :  { %v14665_v23 = vadd.f32 %v3281_v2, %v18246_v11  ;;  %v3352_v60 = vsel %vm243_vm2, %v14657_v43, 0.0 }
 0xf7d   :  { %v14660_v36 = vadd.f32 %v3273_v48, %v18245_v30  ;;  %v3346_v45 = vsel %vm243_vm2, %v14652_v20, 0.0 }
 0xf7e   :  { %3347 = vadd.xlane.f32.xlu0 %v3346_v45  ;;  %v3355_v14 = vsel %vm243_vm2, %v14665_v23, 0.0 }
 0xf7f   :  { %v3349_v51 = vsel %vm243_vm2, %v14660_v36, 0.0 }
 0xf80   :  { %3350 = vadd.xlane.f32.xlu1 %v3349_v51 }
 0xf82   :  { %3353 = vadd.xlane.f32.xlu0 %v3352_v60 }
 0xf84   :  { %3356 = vadd.xlane.f32.xlu1 %v3355_v14 }
 0xfa7   :  { %v10165_v0 = vpop.f32.mrb[88].mxu0 }
 0xfa8   :  { %v3285_v32 = vpop.f32.mrb[89].mxu0  ;;  %v3294_v44 = vadd.f32 %v10165_v0, %v14623_v54 }
 0xfa9   :  { %v3286_v47 = vadd.f32 %v14623_v54, %v3285_v32  ;;  %v10166_v15 = vpop.f32.mrb[90].mxu0 }
 0xfaa   :  { %v3288_v29 = vpop.f32.mrb[91].mxu0  ;;  %v3297_v34 = vadd.f32 %v10166_v15, %v14623_v54  ;;  %v14681_v16 = vadd.f32 %v3294_v44, %v18248_v56 }
 0xfab   :  { %v14676_v6 = vadd.f32 %v3286_v47, %v18247_v59  ;;  %v3289_v37 = vadd.f32 %v14623_v54, %v3288_v29 }
 0xfac   :  { %v14689_v24 = vadd.f32 %v3297_v34, %v18250_v57  ;;  %v3364_v58 = vsel %vm243_vm2, %v14681_v16, 0.0 }
 0xfad   :  { %v14684_v61 = vadd.f32 %v3289_v37, %v18249_v22  ;;  %v3358_v63 = vsel %vm243_vm2, %v14676_v6, 0.0 }
 0xfae   :  { %3359 = vadd.xlane.f32.xlu0 %v3358_v63  ;;  %v3367_v41 = vsel %vm243_vm2, %v14689_v24, 0.0 }
 0xfaf   :  { %v3361_v5 = vsel %vm243_vm2, %v14684_v61, 0.0 }
 0xfb0   :  { %3362 = vadd.xlane.f32.xlu1 %v3361_v5 }
 0xfb2   :  { %3365 = vadd.xlane.f32.xlu0 %v3364_v58 }
 0xfb3   :  { %v10169_v3 = vpop.f32.mrb[92].mxu0 }
 0xfb4   :  { %v3301_v50 = vpop.f32.mrb[93].mxu0  ;;  %3368 = vadd.xlane.f32.xlu1 %v3367_v41  ;;  %v3310_v10 = vadd.f32 %v10169_v3, %v14623_v54 }
 0xfb5   :  { %v3302_v21 = vadd.f32 %v14623_v54, %v3301_v50  ;;  %v10170_v12 = vpop.f32.mrb[94].mxu0 }
 0xfb6   :  { %v3304_v49 = vpop.f32.mrb[95].mxu0  ;;  %v3313_v17 = vadd.f32 %v10170_v12, %v14623_v54  ;;  %v14705_v28 = vadd.f32 %v3310_v10, %v18252_v25  ;;  %v11706_v25 = vld [vmem:[%s17918_s8] sm:$0xff]  }
 0xfb7   :  { %v14700_v39 = vadd.f32 %v3302_v21, %v18251_v9  ;;  %v3305_v18 = vadd.f32 %v14623_v54, %v3304_v49  ;;  %10171 = vmatprep.subr.bf16.mxu1 %v11706_v25 }
 0xfb8   :  { %v14713_v19 = vadd.f32 %v3313_v17, %v18255_v52  ;;  %v3376_v54 = vsel %vm243_vm2, %v14705_v28, 0.0  ;;  %10172 = vmatpush3.bf16.msra.mxu1 %v11706_v25 }
 0xfb9   :  { %v14708_v33 = vadd.f32 %v3305_v18, %v18253_v26  ;;  %v3370_v55 = vsel %vm243_vm2, %v14700_v39, 0.0  ;;  %v11707_v26 = vld [vmem:[%s17918_s8 + $0x8] sm:$0xff]  }
 0xfba   :  { %3371 = vadd.xlane.f32.xlu0 %v3370_v55  ;;  %18256 = vst [vmem:[#allocation29_spill] sm:$0xff] %v14713_v19  ;;  %v3379_v4 = vsel %vm243_vm2, %v14713_v19, 0.0  ;;  %10173 = vmatprep.subr.bf16.mxu1 %v11707_v26 }
 0xfbb   :  { %18254 = vst [vmem:[#allocation31_spill] sm:$0xff] %v14708_v33  ;;  %v3373_v62 = vsel %vm243_vm2, %v14708_v33, 0.0 }
 0xfbc   :  { %3374 = vadd.xlane.f32.xlu1 %v3373_v62  ;;  %10174 = vmatpush3.bf16.msra.mxu1 %v11707_v26 }
 0xfbe   :  { %3377 = vadd.xlane.f32.xlu0 %v3376_v54 }
 0xfc0   :  { %3380 = vadd.xlane.f32.xlu1 %v3379_v4 }
 0xfff   :  { %v3336_v46 = vpop.xlane.xlu0 %3335 }
0x1000   :  { %v3382_v42 = vmul.f32 0.03125, %v3336_v46 }
0x1001   :  { %v3339_v38 = vpop.xlane.xlu1 %3338 }
0x1002   :  { %v14722_v13 = vsub.f32 %v14628_v1, %v3382_v42  ;;  %v3383_v27 = vmul.f32 0.03125, %v3339_v38 }
0x1003   :  { %v3342_v40 = vpop.xlane.xlu0 %3341 }
0x1004   :  { %v14725_v2 = vsub.f32 %v14636_v8, %v3383_v27  ;;  %v3384_v48 = vmul.f32 0.03125, %v3342_v40  ;;  %v3414_v53 = vmul.f32 %v14722_v13, %v14722_v13 }
0x1006   :  { %v14730_v30 = vsub.f32 %v14632_v7, %v3384_v48  ;;  %v3430_v45 = vsel %vm243_vm2, %v3414_v53, 0.0  ;;  %v3415_v11 = vmul.f32 %v14725_v2, %v14725_v2 }
0x1007   :  { %3431 = vadd.xlane.f32.xlu0 %v3430_v45  ;;  %v3345_v51 = vpop.xlane.xlu0 %3344 }
0x1008   :  { %v3385_v60 = vmul.f32 0.03125, %v3345_v51  ;;  %v3433_v14 = vsel %vm243_vm2, %v3415_v11, 0.0  ;;  %v3416_v0 = vmul.f32 %v14730_v30, %v14730_v30 }
0x1009   :  { %3434 = vadd.xlane.f32.xlu1 %v3433_v14 }
0x100a   :  { %v14739_v32 = vsub.f32 %v14643_v35, %v3385_v60  ;;  %v3436_v44 = vsel %vm243_vm2, %v3416_v0, 0.0 }
0x100b   :  { %3437 = vadd.xlane.f32.xlu0 %v3436_v44  ;;  %v3348_v47 = vpop.xlane.xlu0 %3347 }
0x100c   :  { %v3386_v15 = vmul.f32 0.03125, %v3348_v47  ;;  %v3417_v29 = vmul.f32 %v14739_v32, %v14739_v32 }
0x100d   :  { %v3351_v59 = vpop.xlane.xlu1 %3350 }
0x100e   :  { %v14745_v34 = vsub.f32 %v14652_v20, %v3386_v15  ;;  %v3387_v37 = vmul.f32 0.03125, %v3351_v59  ;;  %v3439_v56 = vsel %vm243_vm2, %v3417_v29, 0.0 }
0x100f   :  { %3440 = vadd.xlane.f32.xlu1 %v3439_v56  ;;  %v3354_v22 = vpop.xlane.xlu0 %3353 }
0x1010   :  { %v14749_v63 = vsub.f32 %v14660_v36, %v3387_v37  ;;  %v3388_v57 = vmul.f32 0.03125, %v3354_v22  ;;  %v3418_v5 = vmul.f32 %v14745_v34, %v14745_v34 }
0x1011   :  { %v3357_v58 = vpop.xlane.xlu1 %3356 }
0x1012   :  { %v14754_v3 = vsub.f32 %v14657_v43, %v3388_v57  ;;  %v3389_v41 = vmul.f32 0.03125, %v3357_v58  ;;  %v3442_v50 = vsel %vm243_vm2, %v3418_v5, 0.0  ;;  %v3419_v10 = vmul.f32 %v14749_v63, %v14749_v63 }
0x1013   :  { %3443 = vadd.xlane.f32.xlu0 %v3442_v50 }
0x1014   :  { %v14760_v21 = vsub.f32 %v14665_v23, %v3389_v41  ;;  %v3445_v12 = vsel %vm243_vm2, %v3419_v10, 0.0  ;;  %v3420_v49 = vmul.f32 %v14754_v3, %v14754_v3 }
0x1015   :  { %3446 = vadd.xlane.f32.xlu1 %v3445_v12 }
0x1016   :  { %v3448_v9 = vsel %vm243_vm2, %v3420_v49, 0.0  ;;  %v3421_v17 = vmul.f32 %v14760_v21, %v14760_v21 }
0x1017   :  { %3449 = vadd.xlane.f32.xlu0 %v3448_v9 }
0x1018   :  { %v3451_v18 = vsel %vm243_vm2, %v3421_v17, 0.0 }
0x1019   :  { %3452 = vadd.xlane.f32.xlu1 %v3451_v18 }
0x103b   :  { %v3360_v55 = vpop.xlane.xlu0 %3359 }
0x103c   :  { %v3390_v52 = vmul.f32 0.03125, %v3360_v55 }
0x103d   :  { %v3363_v62 = vpop.xlane.xlu1 %3362 }
0x103e   :  { %v14776_v54 = vsub.f32 %v14676_v6, %v3390_v52  ;;  %v3391_v4 = vmul.f32 0.03125, %v3363_v62 }
0x103f   :  { %v3366_v46 = vpop.xlane.xlu0 %3365 }
0x1040   :  { %v14779_v42 = vsub.f32 %v14684_v61, %v3391_v4  ;;  %v3392_v38 = vmul.f32 0.03125, %v3366_v46  ;;  %v3422_v27 = vmul.f32 %v14776_v54, %v14776_v54 }
0x1041   :  { %v3369_v40 = vpop.xlane.xlu1 %3368 }
0x1042   :  { %v14784_v48 = vsub.f32 %v14681_v16, %v3392_v38  ;;  %v3393_v53 = vmul.f32 0.03125, %v3369_v40  ;;  %v3454_v45 = vsel %vm243_vm2, %v3422_v27, 0.0  ;;  %v3423_v11 = vmul.f32 %v14779_v42, %v14779_v42 }
0x1043   :  { %3455 = vadd.xlane.f32.xlu0 %v3454_v45 }
0x1044   :  { %v14790_v51 = vsub.f32 %v14689_v24, %v3393_v53  ;;  %v3457_v60 = vsel %vm243_vm2, %v3423_v11, 0.0  ;;  %v3424_v14 = vmul.f32 %v14784_v48, %v14784_v48 }
0x1045   :  { %3458 = vadd.xlane.f32.xlu1 %v3457_v60 }
0x1046   :  { %v3460_v0 = vsel %vm243_vm2, %v3424_v14, 0.0  ;;  %v3425_v44 = vmul.f32 %v14790_v51, %v14790_v51 }
0x1047   :  { %3461 = vadd.xlane.f32.xlu0 %v3460_v0  ;;  %v3372_v47 = vpop.xlane.xlu0 %3371 }
0x1048   :  { %v3394_v15 = vmul.f32 0.03125, %v3372_v47  ;;  %v3463_v29 = vsel %vm243_vm2, %v3425_v44, 0.0 }
0x1049   :  { %v3375_v59 = vpop.xlane.xlu1 %3374  ;;  %3464 = vadd.xlane.f32.xlu1 %v3463_v29  ;;  %v14823_v29 = vld [vmem:[#allocation5 + $0x2] ss:$0 sm:$0xff] }
0x104a   :  { %v14800_v37 = vsub.f32 %v14700_v39, %v3394_v15  ;;  %v3395_v56 = vmul.f32 0.03125, %v3375_v59 }
0x104b   :  { %v3378_v22 = vpop.xlane.xlu0 %3377 }
0x104c   :  { %v14803_v57 = vsub.f32 %v14708_v33, %v3395_v56  ;;  %v3396_v5 = vmul.f32 0.03125, %v3378_v22  ;;  %v3426_v58 = vmul.f32 %v14800_v37, %v14800_v37 }
0x104d   :  { %v3381_v41 = vpop.xlane.xlu1 %3380 }
0x104e   :  { %v14808_v50 = vsub.f32 %v14705_v28, %v3396_v5  ;;  %v3397_v10 = vmul.f32 0.03125, %v3381_v41  ;;  %v3466_v12 = vsel %vm243_vm2, %v3426_v58, 0.0  ;;  %v3427_v49 = vmul.f32 %v14803_v57, %v14803_v57 }
0x104f   :  { %3467 = vadd.xlane.f32.xlu0 %v3466_v12 }
0x1050   :  { %v14814_v9 = vsub.f32 %v14713_v19, %v3397_v10  ;;  %v3469_v17 = vsel %vm243_vm2, %v3427_v49, 0.0  ;;  %v3428_v18 = vmul.f32 %v14808_v50, %v14808_v50 }
0x1051   :  { %3470 = vadd.xlane.f32.xlu1 %v3469_v17 }
0x1052   :  { %v3472_v25 = vsel %vm243_vm2, %v3428_v18, 0.0  ;;  %v3429_v26 = vmul.f32 %v14814_v9, %v14814_v9 }
0x1053   :  { %3473 = vadd.xlane.f32.xlu0 %v3472_v25  ;;  %v14828_v25 = vld [vmem:[#allocation5 + $0x3] ss:$0 sm:$0xff] }
0x1054   :  { %v3475_v55 = vsel %vm243_vm2, %v3429_v26, 0.0 }
0x1055   :  { %3476 = vadd.xlane.f32.xlu1 %v3475_v55 }
0x1094   :  { %v3432_v52 = vpop.xlane.xlu0 %3431 }
0x1095   :  { %v3478_v62 = vmul.f32 0.03125, %v3432_v52 }
0x1096   :  { %v3435_v4 = vpop.xlane.xlu1 %3434 }
0x1097   :  { %v3494_v46 = vadd.f32 1e-05, %v3478_v62  ;;  %v3479_v38 = vmul.f32 0.03125, %v3435_v4 }
0x1098   :  { %v3438_v27 = vpop.xlane.xlu0 %3437 }
0x1099   :  { %12018 = vrsqrt.f32 %v3494_v46  ;;  %v3495_v40 = vadd.f32 1e-05, %v3479_v38  ;;  %v3480_v53 = vmul.f32 0.03125, %v3438_v27 }
0x109b   :  { %12020 = vrsqrt.f32 %v3495_v40  ;;  %v3496_v45 = vadd.f32 1e-05, %v3480_v53 }
0x109c   :  { %v3441_v11 = vpop.xlane.xlu1 %3440 }
0x109d   :  { %12022 = vrsqrt.f32 %v3496_v45  ;;  %v3481_v60 = vmul.f32 0.03125, %v3441_v11 }
0x109f   :  { %v3497_v14 = vadd.f32 1e-05, %v3481_v60 }
0x10a0   :  { %v3444_v0 = vpop.xlane.xlu0 %3443 }
0x10a1   :  { %12024 = vrsqrt.f32 %v3497_v14  ;;  %v3482_v44 = vmul.f32 0.03125, %v3444_v0 }
0x10a2   :  { %v3447_v47 = vpop.xlane.xlu1 %3446 }
0x10a3   :  { %v12019_v15 = vpop.eup %12018  ;;  %v3498_v59 = vadd.f32 1e-05, %v3482_v44  ;;  %v3483_v56 = vmul.f32 0.03125, %v3447_v47 }
0x10a4   :  { %v3450_v22 = vpop.xlane.xlu0 %3449  ;;  %v3526_v5 = vmul.f32 %v12019_v15, %v14722_v13 }
0x10a5   :  { %v12021_v58 = vpop.eup %12020  ;;  %12026 = vrsqrt.f32 %v3498_v59  ;;  %v3499_v41 = vadd.f32 1e-05, %v3483_v56  ;;  %v3484_v10 = vmul.f32 0.03125, %v3450_v22 }
0x10a6   :  { %v3453_v12 = vpop.xlane.xlu1 %3452  ;;  %v3527_v49 = vmul.f32 %v12021_v58, %v14725_v2  ;;  %v3546_v17 = vmul.f32 %v14823_v29, %v3526_v5 }
0x10a7   :  { %v12023_v18 = vpop.eup %12022  ;;  %12028 = vrsqrt.f32 %v3499_v41  ;;  %v3500_v26 = vadd.f32 1e-05, %v3484_v10  ;;  %v3485_v55 = vmul.f32 0.03125, %v3453_v12 }
0x10a8   :  { %v3528_v52 = vmul.f32 %v12023_v18, %v14730_v30  ;;  %v3547_v62 = vmul.f32 %v14823_v29, %v3527_v49  ;;  %v3566_v4 = vadd.f32 %v14828_v25, %v3546_v17 }
0x10a9   :  { %12030 = vrsqrt.f32 %v3500_v26  ;;  %v3501_v13 = vadd.f32 1e-05, %v3485_v55 }
0x10aa   :  { %v3567_v46 = vadd.f32 %v14828_v25, %v3547_v62  ;;  %v3548_v2 = vmul.f32 %v14823_v29, %v3528_v52 }
0x10ab   :  { %v12025_v38 = vpop.eup %12024  ;;  %12032 = vrsqrt.f32 %v3501_v13 }
0x10ac   :  { %v3529_v27 = vmul.f32 %v12025_v38, %v14739_v32  ;;  %v3582_v40 = vpack.c.bf16 %v3567_v46, %v3566_v4  ;;  %v3568_v45 = vadd.f32 %v14828_v25, %v3548_v2 }
0x10ae   :  { %v3549_v53 = vmul.f32 %v14823_v29, %v3529_v27  ;;  %10175 = vmatprep.mubr.msk.bf16.mxu1 %vm243_vm2, %v3582_v40 }
0x10af   :  { %v12027_v30 = vpop.eup %12026 }
0x10b0   :  { %v3569_v11 = vadd.f32 %v14828_v25, %v3549_v53  ;;  %v3530_v60 = vmul.f32 %v12027_v30, %v14745_v34 }
0x10b1   :  { %v12029_v14 = vpop.eup %12028 }
0x10b2   :  { %v3583_v0 = vpack.c.bf16 %v3569_v11, %v3568_v45  ;;  %v3531_v44 = vmul.f32 %v12029_v14, %v14749_v63  ;;  %v3550_v47 = vmul.f32 %v14823_v29, %v3530_v60 }
0x10b3   :  { %v12031_v15 = vpop.eup %12030 }
0x10b4   :  { %10176 = vmatmul.mubr.msk.bf16.vlgmr.msra.gmra.mrb[80].mxu1 %vm243_vm2, %v3583_v0  ;;  %v3551_v32 = vmul.f32 %v14823_v29, %v3531_v44  ;;  %v3532_v59 = vmul.f32 %v12031_v15, %v14754_v3  ;;  %v3570_v22 = vadd.f32 %v14828_v25, %v3550_v47 }
0x10b5   :  { %v12033_v56 = vpop.eup %12032 }
0x10b6   :  { %v3571_v5 = vadd.f32 %v14828_v25, %v3551_v32  ;;  %v3533_v34 = vmul.f32 %v12033_v56, %v14760_v21  ;;  %v3552_v58 = vmul.f32 %v14823_v29, %v3532_v59 }
0x10b8   :  { %v3584_v41 = vpack.c.bf16 %v3571_v5, %v3570_v22  ;;  %v3553_v63 = vmul.f32 %v14823_v29, %v3533_v34  ;;  %v3572_v10 = vadd.f32 %v14828_v25, %v3552_v58 }
0x10ba   :  { %10179 = vmatprep.mubr.msk.bf16.mxu1 %vm243_vm2, %v3584_v41  ;;  %v3573_v12 = vadd.f32 %v14828_v25, %v3553_v63 }
0x10bc   :  { %v3585_v49 = vpack.c.bf16 %v3573_v12, %v3572_v10 }
0x10be   :  { %10180 = vmatmul.mubr.msk.bf16.gmra.mrb[84].mxu1 %vm243_vm2, %v3585_v49 }
0x10d0   :  { %v3456_v3 = vpop.xlane.xlu0 %3455 }
0x10d1   :  { %v3486_v17 = vmul.f32 0.03125, %v3456_v3 }
0x10d2   :  { %v3459_v18 = vpop.xlane.xlu1 %3458 }
0x10d3   :  { %v3502_v26 = vadd.f32 1e-05, %v3486_v17  ;;  %v3487_v55 = vmul.f32 0.03125, %v3459_v18 }
0x10d4   :  { %v3462_v21 = vpop.xlane.xlu0 %3461 }
0x10d5   :  { %12034 = vrsqrt.f32 %v3502_v26  ;;  %v3503_v52 = vadd.f32 1e-05, %v3487_v55  ;;  %v3488_v62 = vmul.f32 0.03125, %v3462_v21 }
0x10d6   :  { %v3465_v13 = vpop.xlane.xlu1 %3464 }
0x10d7   :  { %12036 = vrsqrt.f32 %v3503_v52  ;;  %v3504_v4 = vadd.f32 1e-05, %v3488_v62  ;;  %v3489_v46 = vmul.f32 0.03125, %v3465_v13 }
0x10d9   :  { %12038 = vrsqrt.f32 %v3504_v4  ;;  %v3505_v38 = vadd.f32 1e-05, %v3489_v46 }
0x10db   :  { %12040 = vrsqrt.f32 %v3505_v38 }
0x10dc   :  { %v3468_v2 = vpop.xlane.xlu0 %3467 }
0x10dd   :  { %v3490_v27 = vmul.f32 0.03125, %v3468_v2 }
0x10de   :  { %v3471_v40 = vpop.xlane.xlu1 %3470 }
0x10df   :  { %v12035_v53 = vpop.eup %12034  ;;  %v3506_v30 = vadd.f32 1e-05, %v3490_v27  ;;  %v3491_v45 = vmul.f32 0.03125, %v3471_v40 }
0x10e0   :  { %v3474_v11 = vpop.xlane.xlu0 %3473  ;;  %v3534_v60 = vmul.f32 %v12035_v53, %v14776_v54 }
0x10e1   :  { %v12037_v14 = vpop.eup %12036  ;;  %12042 = vrsqrt.f32 %v3506_v30  ;;  %v3507_v0 = vadd.f32 1e-05, %v3491_v45  ;;  %v3492_v44 = vmul.f32 0.03125, %v3474_v11  ;;  %v11712_v45 = vld [vmem:[%s17920_s10 + $0x20] sm:$0xff]   ;;  %v11713_v11 = vld [vmem:[%s17920_s10 + $0x28] sm:$0xff]  }
0x10e2   :  { %v3477_v47 = vpop.xlane.xlu1 %3476  ;;  %v3535_v15 = vmul.f32 %v12037_v14, %v14779_v42  ;;  %v3554_v32 = vmul.f32 %v14823_v29, %v3534_v60  ;;  %v11714_v60 = vld [vmem:[%s17920_s10 + $0x30] sm:$0xff]   ;;  %v11715_v14 = vld [vmem:[%s17920_s10 + $0x38] sm:$0xff]  }
0x10e3   :  { %v12039_v59 = vpop.eup %12038  ;;  %12044 = vrsqrt.f32 %v3507_v0  ;;  %v3508_v56 = vadd.f32 1e-05, %v3492_v44  ;;  %v3493_v22 = vmul.f32 0.03125, %v3477_v47  ;;  %v14910_v0 = vld [vmem:[%s17919_s9] ss:$0 sm:$0xff] }
0x10e4   :  { %v3555_v5 = vmul.f32 %v14823_v29, %v3535_v15  ;;  %v3536_v34 = vmul.f32 %v12039_v59, %v14784_v48  ;;  %v3574_v41 = vadd.f32 %v14828_v25, %v3554_v32 }
0x10e5   :  { %v12041_v58 = vpop.eup %12040  ;;  %12046 = vrsqrt.f32 %v3508_v56  ;;  %v3509_v54 = vadd.f32 1e-05, %v3493_v22 }
0x10e6   :  { %v3575_v63 = vadd.f32 %v14828_v25, %v3555_v5  ;;  %v3537_v10 = vmul.f32 %v12041_v58, %v14790_v51  ;;  %v3556_v42 = vmul.f32 %v14823_v29, %v3536_v34 }
0x10e7   :  { %12048 = vrsqrt.f32 %v3509_v54 }
0x10e8   :  { %v3586_v12 = vpack.c.bf16 %v3575_v63, %v3574_v41  ;;  %v3557_v49 = vmul.f32 %v14823_v29, %v3537_v10  ;;  %v3576_v3 = vadd.f32 %v14828_v25, %v3556_v42 }
0x10ea   :  { %10183 = vmatprep.mubr.msk.bf16.mxu1 %vm243_vm2, %v3586_v12  ;;  %v3577_v48 = vadd.f32 %v14828_v25, %v3557_v49 }
0x10eb   :  { %v12043_v17 = vpop.eup %12042 }
0x10ec   :  { %v3587_v18 = vpack.c.bf16 %v3577_v48, %v3576_v3  ;;  %v3538_v26 = vmul.f32 %v12043_v17, %v14800_v37 }
0x10ed   :  { %v12045_v55 = vpop.eup %12044 }
0x10ee   :  { %10184 = vmatmul.mubr.msk.bf16.gmra.mrb[88].mxu1 %vm243_vm2, %v3587_v18  ;;  %v3539_v51 = vmul.f32 %v12045_v55, %v14803_v57  ;;  %v3558_v21 = vmul.f32 %v14823_v29, %v3538_v26 }
0x10ef   :  { %v12047_v52 = vpop.eup %12046 }
0x10f0   :  { %v3559_v62 = vmul.f32 %v14823_v29, %v3539_v51  ;;  %v3540_v13 = vmul.f32 %v12047_v52, %v14808_v50  ;;  %v3578_v46 = vadd.f32 %v14828_v25, %v3558_v21  ;;  %v11708_v50 = vld [vmem:[%s17920_s10] sm:$0xff]  }
0x10f1   :  { %v12049_v4 = vpop.eup %12048  ;;  %10191 = vmatprep.subr.bf16.mxu0 %v11708_v50 }
0x10f2   :  { %v3579_v38 = vadd.f32 %v14828_v25, %v3559_v62  ;;  %v3541_v2 = vmul.f32 %v12049_v4, %v14814_v9  ;;  %v3560_v37 = vmul.f32 %v14823_v29, %v3540_v13  ;;  %10192 = vmatpush3.bf16.msra.mxu0 %v11708_v50  ;;  %v11709_v9 = vld [vmem:[%s17920_s10 + $0x8] sm:$0xff]  }
0x10f3   :  { %10193 = vmatprep.subr.bf16.mxu0 %v11709_v9 }
0x10f4   :  { %v3588_v27 = vpack.c.bf16 %v3579_v38, %v3578_v46  ;;  %v3561_v40 = vmul.f32 %v14823_v29, %v3541_v2  ;;  %v3580_v57 = vadd.f32 %v14828_v25, %v3560_v37  ;;  %v11710_v29 = vld [vmem:[%s17920_s10 + $0x10] sm:$0xff]  }
0x10f6   :  { %10187 = vmatprep.mubr.msk.bf16.mxu1 %vm243_vm2, %v3588_v27  ;;  %v3581_v53 = vadd.f32 %v14828_v25, %v3561_v40  ;;  %10194 = vmatpush3.bf16.msra.mxu0 %v11709_v9  ;;  %v11711_v25 = vld [vmem:[%s17920_s10 + $0x18] sm:$0xff]  }
0x10f7   :  { %10195 = vmatprep.subr.bf16.mxu0 %v11710_v29 }
0x10f8   :  { %v3589_v30 = vpack.c.bf16 %v3581_v53, %v3580_v57 }
0x10fa   :  { %10188 = vmatmul.mubr.msk.bf16.gmra.mrb[92].mxu1 %vm243_vm2, %v3589_v30  ;;  %10196 = vmatpush3.bf16.msra.mxu0 %v11710_v29 }
0x10fb   :  { %10197 = vmatprep.subr.bf16.mxu0 %v11711_v25 }
0x10fe   :  { %10198 = vmatpush3.bf16.msra.mxu0 %v11711_v25 }
0x10ff   :  { %10199 = vmatprep.subr.bf16.mxu0 %v11712_v45 }
0x1102   :  { %10200 = vmatpush3.bf16.msra.mxu0 %v11712_v45 }
0x1103   :  { %10201 = vmatprep.subr.bf16.mxu0 %v11713_v11 }
0x1106   :  { %10202 = vmatpush3.bf16.msra.mxu0 %v11713_v11 }
0x1107   :  { %10203 = vmatprep.subr.bf16.mxu0 %v11714_v60 }
0x110a   :  { %10204 = vmatpush3.bf16.msra.mxu0 %v11714_v60 }
0x110b   :  { %10205 = vmatprep.subr.bf16.mxu0 %v11715_v14 }
0x110e   :  { %10206 = vmatpush3.bf16.msra.mxu0 %v11715_v14 }
0x1187   :  { %v10177_v44 = vpop.f32.mrb[80].mxu1 }
0x1188   :  { %v3678_v47 = vadd.f32 %v10177_v44, %v14910_v0  ;;  %v3669_v15 = vpop.f32.mrb[81].mxu1 }
0x1189   :  { %v14914_v32 = vadd.f32 %v14910_v0, %v3669_v15  ;;  %v10178_v59 = vpop.f32.mrb[82].mxu1 }
0x118a   :  { %v14916_v56 = vmul.f32 0.70710677, %v3678_v47  ;;  %v14919_v22 = vadd.f32 %v10178_v59, %v14910_v0  ;;  %v3672_v5 = vpop.f32.mrb[83].mxu1  ;;  %v14964_v60 = vmul.f32 0.5, %v3678_v47 }
0x118b   :  { %v14922_v34 = vmul.f32 0.70710677, %v14914_v32  ;;  %v14925_v58 = vadd.f32 %v14910_v0, %v3672_v5 }
0x118c   :  { %v3766_v54 = vand.u32 2147483647, %v14916_v56  ;;  %v14929_v41 = vmul.f32 0.70710677, %v14919_v22  ;;  %vm4086_vm7 = vcmp.ge.f32.partialorder %v14916_v56, 0.0 }
0x118d   :  { %v3764_v63 = vand.u32 2147483647, %v14922_v34  ;;  %v14933_v10 = vmul.f32 0.70710677, %v14925_v58  ;;  %vm4084_vm8 = vcmp.ge.f32.partialorder %v14922_v34, 0.0 }
0x118e   :  { %v3782_v42 = vmul.f32 0.3275911, %v3766_v54  ;;  %v3767_v12 = vand.u32 2147483647, %v14929_v41  ;;  %v3990_v27 = vsub.f32 0.0, %v3766_v54  ;;  %vm4087_vm9 = vcmp.ge.f32.partialorder %v14929_v41, 0.0 }
0x118f   :  { %v3780_v49 = vmul.f32 0.3275911, %v3764_v63  ;;  %v3765_v3 = vand.u32 2147483647, %v14933_v10  ;;  %v3988_v53 = vsub.f32 0.0, %v3764_v63  ;;  %vm4085_vm10 = vcmp.ge.f32.partialorder %v14933_v10, 0.0 }
0x1190   :  { %v3798_v48 = vadd.f32 1.0, %v3782_v42  ;;  %v3783_v17 = vmul.f32 0.3275911, %v3767_v12  ;;  %v3991_v50 = vsub.f32 0.0, %v3767_v12  ;;  %v4006_v14 = vmul.f32 %v3990_v27, %v3766_v54 }
0x1191   :  { %v3796_v18 = vadd.f32 1.0, %v3780_v49  ;;  %v3781_v26 = vmul.f32 0.3275911, %v3765_v3  ;;  %v10181_v55 = vpop.f32.mrb[84].mxu1  ;;  %v3989_v9 = vsub.f32 0.0, %v3765_v3  ;;  %v4004_v5 = vmul.f32 %v3988_v53, %v3764_v63 }
0x1192   :  { %12050 = vrcp.f32 %v3798_v48  ;;  %v3799_v51 = vadd.f32 1.0, %v3783_v17  ;;  %v3685_v21 = vpop.f32.mrb[85].mxu1  ;;  %v14938_v13 = vadd.f32 %v10181_v55, %v14910_v0 }
0x1193   :  { %12052 = vrcp.f32 %v3796_v18  ;;  %v10182_v52 = vpop.f32.mrb[86].mxu1  ;;  %v3797_v62 = vadd.f32 1.0, %v3781_v26  ;;  %v14941_v4 = vadd.f32 %v14910_v0, %v3685_v21  ;;  %v4007_v26 = vmul.f32 %v3991_v50, %v3767_v12 }
0x1194   :  { %v3688_v46 = vpop.f32.mrb[87].mxu1  ;;  %v14944_v38 = vadd.f32 %v10182_v52, %v14910_v0  ;;  %12054 = vrcp.f32 %v3799_v51  ;;  %v14947_v2 = vmul.f32 0.70710677, %v14938_v13  ;;  %v4005_v55 = vmul.f32 %v3989_v9, %v3765_v3 }
0x1195   :  { %v14950_v37 = vadd.f32 %v14910_v0, %v3688_v46  ;;  %v14953_v40 = vmul.f32 0.70710677, %v14941_v4  ;;  %12056 = vrcp.f32 %v3797_v62  ;;  %v4024_v62 = vmul.f32 1.442695, %v4006_v14 }
0x1196   :  { %v14956_v57 = vmul.f32 0.70710677, %v14944_v38  ;;  %v3770_v30 = vand.u32 2147483647, %v14947_v2  ;;  %v4020_v53 = vmul.f32 1.442695, %v4004_v5 }
0x1197   :  { %v3768_v29 = vand.u32 2147483647, %v14953_v40  ;;  %v14962_v11 = vmul.f32 0.70710677, %v14950_v37  ;;  %v4026_v3 = vmul.f32 1.442695, %v4007_v26 }
0x1198   :  { %v3771_v25 = vand.u32 2147483647, %v14956_v57  ;;  %v3786_v45 = vmul.f32 0.3275911, %v3770_v30  ;;  %v3994_v49 = vsub.f32 0.0, %v3770_v30  ;;  %vm4090_vm11 = vcmp.ge.f32.partialorder %v14947_v2, 0.0 }
0x1199   :  { %v3784_v44 = vmul.f32 0.3275911, %v3768_v29  ;;  %v3769_v48 = vand.u32 2147483647, %v14962_v11  ;;  %v3992_v54 = vsub.f32 0.0, %v3768_v29  ;;  %vm4088_vm12 = vcmp.ge.f32.partialorder %v14953_v40, 0.0 }
0x119a   :  { %v3787_v15 = vmul.f32 0.3275911, %v3771_v25  ;;  %v3802_v42 = vadd.f32 1.0, %v3786_v45  ;;  %v4010_v45 = vmul.f32 %v3994_v49, %v3770_v30  ;;  %v3995_v31 = vsub.f32 0.0, %v3771_v25 }
0x119b   :  { %v3800_v51 = vadd.f32 1.0, %v3784_v44  ;;  %v3785_v63 = vmul.f32 0.3275911, %v3769_v48  ;;  %v4008_v14 = vmul.f32 %v3992_v54, %v3768_v29  ;;  %vm4091_vm13 = vcmp.ge.f32.partialorder %v14956_v57, 0.0 }
0x119c   :  { %v14966_v59 = vpop.eup %12050  ;;  %12058 = vrcp.f32 %v3802_v42  ;;  %v3803_v21 = vadd.f32 1.0, %v3787_v15  ;;  %v4022_v15 = vmul.f32 1.442695, %v4005_v55  ;;  %v4032_v49 = vmul.f32 1.442695, %v4010_v45 }
0x119d   :  { %v14969_v17 = vpop.eup %12052  ;;  %v3846_v18 = vmul.f32 1.0614054, %v14966_v59  ;;  %12060 = vrcp.f32 %v3800_v51  ;;  %v3801_v50 = vadd.f32 1.0, %v3785_v63  ;;  %v4011_v51 = vmul.f32 %v3995_v31, %v3771_v25 }
0x119e   :  { %v3844_v47 = vmul.f32 1.0614054, %v14969_v17  ;;  %v14973_v46 = vpop.eup %12054  ;;  %12062 = vrcp.f32 %v3803_v21  ;;  %v4028_v29 = vmul.f32 1.442695, %v4008_v14  ;;  %v3993_v55 = vsub.f32 0.0, %v3769_v48 }
0x119f   :  { %v3862_v52 = vadd.f32 -1.4531521, %v3846_v18  ;;  %v3847_v12 = vmul.f32 1.0614054, %v14973_v46  ;;  %v14977_v9 = vpop.eup %12056  ;;  %12064 = vpow2.f32 %v4024_v62  ;;  %v14988_v31 = vmul.f32 0.5, %v14914_v32 }
0x11a0   :  { %v3860_v27 = vadd.f32 -1.4531521, %v3844_v47  ;;  %v3845_v5 = vmul.f32 1.0614054, %v14977_v9  ;;  %12066 = vrcp.f32 %v3801_v50  ;;  %v4009_v14 = vmul.f32 %v3993_v55, %v3769_v48 }
0x11a1   :  { %v3878_v19 = vmul.f32 %v14966_v59, %v3862_v52  ;;  %v3863_v18 = vadd.f32 -1.4531521, %v3847_v12  ;;  %12068 = vpow2.f32 %v4020_v53  ;;  %vm4089_vm14 = vcmp.ge.f32.partialorder %v14962_v11, 0.0 }
0x11a2   :  { %v3876_v44 = vmul.f32 %v14969_v17, %v3860_v27  ;;  %v3861_v52 = vadd.f32 -1.4531521, %v3845_v5  ;;  %12070 = vpow2.f32 %v4026_v3  ;;  %v4034_v27 = vmul.f32 1.442695, %v4011_v51 }
0x11a3   :  { %v3894_v42 = vadd.f32 1.4214138, %v3878_v19  ;;  %v3879_v26 = vmul.f32 %v14973_v46, %v3863_v18  ;;  %12072 = vpow2.f32 %v4022_v15  ;;  %v15002_v51 = vmul.f32 0.5, %v14919_v22 }
0x11a4   :  { %v3892_v30 = vadd.f32 1.4214138, %v3876_v44  ;;  %v3877_v21 = vmul.f32 %v14977_v9, %v3861_v52  ;;  %12074 = vpow2.f32 %v4032_v49 }
0x11a5   :  { %v3910_v47 = vmul.f32 %v14966_v59, %v3894_v42  ;;  %v3895_v54 = vadd.f32 1.4214138, %v3879_v26  ;;  %12076 = vpow2.f32 %v4028_v29 }
0x11a6   :  { %v3908_v63 = vmul.f32 %v14969_v17, %v3892_v30  ;;  %v14985_v62 = vpop.eup %12058  ;;  %v3893_v3 = vadd.f32 1.4214138, %v3877_v21  ;;  %12078 = vpow2.f32 %v4034_v27  ;;  %v4030_v21 = vmul.f32 1.442695, %v4009_v14 }
0x11a7   :  { %v3926_v19 = vadd.f32 -0.28449672, %v3910_v47  ;;  %v14990_v53 = vpop.eup %12060  ;;  %v3911_v12 = vmul.f32 %v14973_v46, %v3895_v54  ;;  %v3850_v50 = vmul.f32 1.0614054, %v14985_v62 }
0x11a8   :  { %v3924_v25 = vadd.f32 -0.28449672, %v3908_v63  ;;  %v3848_v15 = vmul.f32 1.0614054, %v14990_v53  ;;  %v3909_v18 = vmul.f32 %v14977_v9, %v3893_v3  ;;  %v14998_v30 = vpop.eup %12062  ;;  %12080 = vpow2.f32 %v4030_v21 }
0x11a9   :  { %v3942_v45 = vmul.f32 %v14966_v59, %v3926_v19  ;;  %v3927_v42 = vadd.f32 -0.28449672, %v3911_v12  ;;  %v3866_v5 = vadd.f32 -1.4531521, %v3850_v50  ;;  %v12065_v26 = vpop.eup %12064  ;;  %v3851_v22 = vmul.f32 1.0614054, %v14998_v30 }
0x11aa   :  { %v3940_v44 = vmul.f32 %v14969_v17, %v3924_v25  ;;  %v3864_v47 = vadd.f32 -1.4531521, %v3848_v15  ;;  %v3925_v63 = vadd.f32 -0.28449672, %v3909_v18  ;;  %v15008_v55 = vpop.eup %12066 }
0x11ab   :  { %v3958_v32 = vadd.f32 0.2548296, %v3942_v45  ;;  %v3943_v48 = vmul.f32 %v14973_v46, %v3927_v42  ;;  %v3882_v29 = vmul.f32 %v14985_v62, %v3866_v5  ;;  %v12069_v25 = vpop.eup %12068  ;;  %v3867_v15 = vadd.f32 -1.4531521, %v3851_v22 }
0x11ac   :  { %v3956_v49 = vadd.f32 0.2548296, %v3940_v44  ;;  %v3880_v54 = vmul.f32 %v14990_v53, %v3864_v47  ;;  %v12071_v3 = vpop.eup %12070 }
0x11ad   :  { %v3974_v52 = vmul.f32 %v14966_v59, %v3958_v32  ;;  %v3959_v45 = vadd.f32 0.2548296, %v3943_v48  ;;  %v3941_v59 = vmul.f32 %v14977_v9, %v3925_v63  ;;  %v3898_v12 = vadd.f32 1.4214138, %v3882_v29 }
0x11ae   :  { %v3972_v19 = vmul.f32 %v14969_v17, %v3956_v49  ;;  %v3896_v44 = vadd.f32 1.4214138, %v3880_v54  ;;  %v3849_v32 = vmul.f32 1.0614054, %v15008_v55  ;;  %v12073_v17 = vpop.eup %12072 }
0x11af   :  { %v4054_v27 = vmul.f32 %v12065_v26, %v3974_v52  ;;  %v3975_v18 = vmul.f32 %v14973_v46, %v3959_v45  ;;  %v3957_v5 = vadd.f32 0.2548296, %v3941_v59  ;;  %v3914_v14 = vmul.f32 %v14985_v62, %v3898_v12  ;;  %v12075_v49 = vpop.eup %12074 }
0x11b0   :  { %v4052_v50 = vmul.f32 %v12069_v25, %v3972_v19  ;;  %v3912_v26 = vmul.f32 %v14990_v53, %v3896_v44  ;;  %v3883_v52 = vmul.f32 %v14998_v30, %v3867_v15  ;;  %v3865_v48 = vadd.f32 -1.4531521, %v3849_v32  ;;  %v12077_v22 = vpop.eup %12076 }
0x11b1   :  { %v4070_v42 = vsub.f32 1.0, %v4054_v27  ;;  %v4055_v29 = vmul.f32 %v12071_v3, %v3975_v18  ;;  %v3973_v19 = vmul.f32 %v14977_v9, %v3957_v5  ;;  %v3930_v54 = vadd.f32 -0.28449672, %v3914_v14  ;;  %v12079_v44 = vpop.eup %12078 }
0x11b2   :  { %v4068_v47 = vsub.f32 1.0, %v4052_v50  ;;  %v3928_v27 = vadd.f32 -0.28449672, %v3912_v26  ;;  %v3899_v33 = vadd.f32 1.4214138, %v3883_v52  ;;  %v3881_v46 = vmul.f32 %v15008_v55, %v3865_v48 }
0x11b3   :  { %v4102_v63 = vsub.f32 0.0, %v4070_v42  ;;  %v4071_v59 = vsub.f32 1.0, %v4055_v29  ;;  %v4053_v12 = vmul.f32 %v12073_v17, %v3973_v19  ;;  %v3946_v50 = vmul.f32 %v14985_v62, %v3930_v54 }
0x11b4   :  { %v4100_v25 = vsub.f32 0.0, %v4068_v47  ;;  %v3944_v9 = vmul.f32 %v14990_v53, %v3928_v27  ;;  %v3915_v15 = vmul.f32 %v14998_v30, %v3899_v33  ;;  %v3897_v26 = vadd.f32 1.4214138, %v3881_v46 }
0x11b5   :  { %v4118_v45 = vsel %vm4086_vm7, %v4070_v42, %v4102_v63  ;;  %v4103_v18 = vsub.f32 0.0, %v4071_v59  ;;  %v4069_v5 = vsub.f32 1.0, %v4053_v12  ;;  %v3962_v14 = vadd.f32 0.2548296, %v3946_v50 }
0x11b6   :  { %v4116_v3 = vsel %vm4084_vm8, %v4068_v47, %v4100_v25  ;;  %v4134_v32 = vadd.f32 1.0, %v4118_v45  ;;  %v3960_v56 = vadd.f32 0.2548296, %v3944_v9  ;;  %v3931_v42 = vadd.f32 -0.28449672, %v3915_v15 }
0x11b7   :  { %v4132_v17 = vadd.f32 1.0, %v4116_v3  ;;  %v4119_v52 = vsel %vm4087_vm9, %v4071_v59, %v4103_v18  ;;  %v4101_v34 = vsub.f32 0.0, %v4069_v5  ;;  %v3978_v47 = vmul.f32 %v14985_v62, %v3962_v14 }
0x11b8   :  { %v4135_v48 = vadd.f32 1.0, %v4119_v52  ;;  %v3976_v63 = vmul.f32 %v14990_v53, %v3960_v56  ;;  %v3947_v33 = vmul.f32 %v14998_v30, %v3931_v42  ;;  %v3913_v29 = vmul.f32 %v15008_v55, %v3897_v26 }
0x11b9   :  { %v4150_v19 = vmul.f32 %v4134_v32, %v14964_v60  ;;  %v3733_v54 = vmul.f32 0.5, %v14925_v58  ;;  %v4117_v21 = vsel %vm4085_vm10, %v4069_v5, %v4101_v34  ;;  %v4058_v25 = vmul.f32 %v12075_v49, %v3978_v47 }
0x11ba   :  { %v4151_v41 = vmul.f32 %v4135_v48, %v15002_v51  ;;  %v4133_v27 = vadd.f32 1.0, %v4117_v21  ;;  %v4056_v46 = vmul.f32 %v12077_v22, %v3976_v63  ;;  %v3963_v62 = vadd.f32 0.2548296, %v3947_v33  ;;  %v12081_v51 = vpop.eup %12080 }
0x11bb   :  { %v4148_v45 = vmul.f32 %v4132_v17, %v14988_v31  ;;  %v4074_v53 = vsub.f32 1.0, %v4058_v25  ;;  %v3929_v59 = vadd.f32 -0.28449672, %v3913_v29  ;;  %v3738_v29 = vmul.f32 0.5, %v14938_v13 }
0x11bc   :  { %v4165_v12 = vpack.c.bf16 %v4151_v41, %v4150_v19  ;;  %v4149_v50 = vmul.f32 %v4133_v27, %v3733_v54  ;;  %v4072_v3 = vsub.f32 1.0, %v4056_v46  ;;  %v3979_v60 = vmul.f32 %v14998_v30, %v3963_v62 }
0x11bd   :  { %v3945_v58 = vmul.f32 %v15008_v55, %v3929_v59  ;;  %v4106_v15 = vsub.f32 0.0, %v4074_v53  ;;  %v3739_v19 = vmul.f32 0.5, %v14944_v38  ;;  %v3736_v46 = vmul.f32 0.5, %v14941_v4 }
0x11be   :  { %v4059_v9 = vmul.f32 %v12079_v44, %v3979_v60  ;;  %v4164_v10 = vpack.c.bf16 %v4149_v50, %v4148_v45  ;;  %v4104_v18 = vsub.f32 0.0, %v4072_v3 }
0x11bf   :  { %v3961_v49 = vadd.f32 0.2548296, %v3945_v58  ;;  %v4122_v17 = vsel %vm4090_vm11, %v4074_v53, %v4106_v15 }
0x11c0   :  { %v4075_v22 = vsub.f32 1.0, %v4059_v9  ;;  %10207 = vmatprep.mubr.bf16.mxu0 %v4164_v10  ;;  %v4120_v34 = vsel %vm4088_vm12, %v4072_v3, %v4104_v18  ;;  %v4138_v21 = vadd.f32 1.0, %v4122_v17 }
0x11c1   :  { %v10185_v32 = vpop.f32.mrb[88].mxu1  ;;  %v3977_v14 = vmul.f32 %v15008_v55, %v3961_v49  ;;  %10208 = vmatmul.mubr.bf16.vlgmr.msra.gmra.mrb[96].mxu0 %v4165_v12  ;;  %v4136_v25 = vadd.f32 1.0, %v4120_v34  ;;  %v3737_v12 = vmul.f32 0.5, %v14950_v37 }
0x11c2   :  { %v15045_v31 = vadd.f32 %v10185_v32, %v14910_v0  ;;  %v3701_v5 = vpop.f32.mrb[89].mxu1  ;;  %v4107_v44 = vsub.f32 0.0, %v4075_v22  ;;  %v4154_v60 = vmul.f32 %v4138_v21, %v3738_v29 }
0x11c3   :  { %v15049_v30 = vadd.f32 %v14910_v0, %v3701_v5  ;;  %v10186_v56 = vpop.f32.mrb[90].mxu1  ;;  %v4057_v52 = vmul.f32 %v12081_v51, %v3977_v14  ;;  %v4152_v58 = vmul.f32 %v4136_v25, %v3736_v46 }
0x11c4   :  { %v15054_v42 = vmul.f32 0.70710677, %v15045_v31  ;;  %v3704_v26 = vpop.f32.mrb[91].mxu1  ;;  %v4123_v47 = vsel %vm4091_vm13, %v4075_v22, %v4107_v44  ;;  %v15062_v2 = vadd.f32 %v10186_v56, %v14910_v0 }
0x11c5   :  { %v15058_v55 = vmul.f32 0.70710677, %v15049_v30  ;;  %v4139_v40 = vadd.f32 1.0, %v4123_v47  ;;  %v4073_v63 = vsub.f32 1.0, %v4057_v52  ;;  %v15074_v38 = vadd.f32 %v14910_v0, %v3704_v26 }
0x11c6   :  { %v3774_v48 = vand.u32 2147483647, %v15054_v42  ;;  %v15068_v54 = vmul.f32 0.70710677, %v15062_v2  ;;  %vm4094_vm15 = vcmp.ge.f32.partialorder %v15054_v42, 0.0 }
0x11c7   :  { %v3772_v33 = vand.u32 2147483647, %v15058_v55  ;;  %v4105_v41 = vsub.f32 0.0, %v4073_v63  ;;  %v4155_v53 = vmul.f32 %v4139_v40, %v3739_v19  ;;  %v15078_v15 = vmul.f32 0.70710677, %v15074_v38 }
0x11c8   :  { %v3790_v57 = vmul.f32 0.3275911, %v3774_v48  ;;  %v3775_v45 = vand.u32 2147483647, %v15068_v54  ;;  %v3998_v11 = vsub.f32 0.0, %v3774_v48  ;;  %vm4092_vm0 = vcmp.ge.f32.partialorder %v15058_v55, 0.0 }
0x11c9   :  { %v3788_v27 = vmul.f32 0.3275911, %v3772_v33  ;;  %v4121_v59 = vsel %vm4089_vm14, %v4073_v63, %v4105_v41  ;;  %v4167_v32 = vpack.c.bf16 %v4155_v53, %v4154_v60  ;;  %v3773_v37 = vand.u32 2147483647, %v15078_v15 }
0x11ca   :  { %v3806_v62 = vadd.f32 1.0, %v3790_v57  ;;  %v4137_v50 = vadd.f32 1.0, %v4121_v59  ;;  %v3791_v3 = vmul.f32 0.3275911, %v3775_v45  ;;  %v3996_v14 = vsub.f32 0.0, %v3772_v33 }
0x11cb   :  { %v3804_v13 = vadd.f32 1.0, %v3788_v27  ;;  %v4014_v26 = vmul.f32 %v3998_v11, %v3774_v48  ;;  %v3789_v17 = vmul.f32 0.3275911, %v3773_v37  ;;  %v15098_v63 = vmul.f32 0.5, %v15045_v31 }
0x11cc   :  { %12082 = vrcp.f32 %v3806_v62  ;;  %v4153_v9 = vmul.f32 %v4137_v50, %v3737_v12  ;;  %v3807_v10 = vadd.f32 1.0, %v3791_v3  ;;  %v4012_v29 = vmul.f32 %v3996_v14, %v3772_v33 }
0x11cd   :  { %12084 = vrcp.f32 %v3804_v13  ;;  %v10189_v4 = vpop.f32.mrb[92].mxu1  ;;  %v3805_v47 = vadd.f32 1.0, %v3789_v17  ;;  %v4040_v21 = vmul.f32 1.442695, %v4014_v26  ;;  %v3999_v25 = vsub.f32 0.0, %v3775_v45 }
0x11ce   :  { %v3717_v49 = vpop.f32.mrb[93].mxu1  ;;  %v15081_v51 = vadd.f32 %v10189_v4, %v14910_v0  ;;  %12086 = vrcp.f32 %v3807_v10  ;;  %v4166_v22 = vpack.c.bf16 %v4153_v9, %v4152_v58  ;;  %v3997_v62 = vsub.f32 0.0, %v3773_v37 }
0x11cf   :  { %v10190_v18 = vpop.f32.mrb[94].mxu1  ;;  %v15088_v44 = vadd.f32 %v14910_v0, %v3717_v49  ;;  %12088 = vrcp.f32 %v3805_v47  ;;  %v15113_v33 = vmul.f32 0.5, %v15049_v30  ;;  %v4036_v3 = vmul.f32 1.442695, %v4012_v29 }
0x11d0   :  { %v3720_v5 = vpop.f32.mrb[95].mxu1  ;;  %v15085_v56 = vmul.f32 0.70710677, %v15081_v51  ;;  %10211 = vmatprep.mubr.bf16.mxu0 %v4166_v22  ;;  %v15091_v52 = vadd.f32 %v10190_v18, %v14910_v0  ;;  %v4015_v9 = vmul.f32 %v3999_v25, %v3775_v45  ;;  %v15126_v47 = vmul.f32 0.5, %v15062_v2 }
0x11d1   :  { %10212 = vmatmul.mubr.bf16.gmra.mrb[100].mxu0 %v4167_v32  ;;  %v15095_v40 = vmul.f32 0.70710677, %v15088_v44  ;;  %v15120_v10 = vadd.f32 %v14910_v0, %v3720_v5  ;;  %v4013_v32 = vmul.f32 %v3997_v62, %v3773_v37  ;;  %vm4095_vm1 = vcmp.ge.f32.partialorder %v15068_v54, 0.0 }
0x11d2   :  { %v3778_v34 = vand.u32 2147483647, %v15085_v56  ;;  %v15101_v57 = vmul.f32 0.70710677, %v15091_v52  ;;  %v4042_v5 = vmul.f32 1.442695, %v4015_v9 }
0x11d3   :  { %v3776_v41 = vand.u32 2147483647, %v15095_v40  ;;  %v15129_v29 = vmul.f32 0.70710677, %v15120_v10  ;;  %vm4093_vm7 = vcmp.ge.f32.partialorder %v15078_v15, 0.0  ;;  %vm4098_vm8 = vcmp.ge.f32.partialorder %v15085_v56, 0.0 }
0x11d4   :  { %v3794_v19 = vmul.f32 0.3275911, %v3778_v34  ;;  %v15110_v31 = vand.u32 2147483647, %v15101_v57  ;;  %v4002_v13 = vsub.f32 0.0, %v3778_v34  ;;  %vm4099_vm9 = vcmp.ge.f32.partialorder %v15101_v57, 0.0 }
0x11d5   :  { %v3792_v12 = vmul.f32 0.3275911, %v3776_v41  ;;  %v4000_v26 = vsub.f32 0.0, %v3776_v41  ;;  %vm4096_vm10 = vcmp.ge.f32.partialorder %v15095_v40, 0.0  ;;  %vm4097_vm11 = vcmp.ge.f32.partialorder %v15129_v29, 0.0 }
0x11d6   :  { %v15103_v48 = vpop.eup %12082  ;;  %v3810_v53 = vadd.f32 1.0, %v3794_v19  ;;  %v3795_v60 = vmul.f32 0.3275911, %v15110_v31  ;;  %v4018_v14 = vmul.f32 %v4002_v13, %v3778_v34  ;;  %v4038_v34 = vmul.f32 1.442695, %v4013_v32 }
0x11d7   :  { %v15106_v27 = vpop.eup %12084  ;;  %v3854_v46 = vmul.f32 1.0614054, %v15103_v48  ;;  %v3808_v11 = vadd.f32 1.0, %v3792_v12  ;;  %v4016_v62 = vmul.f32 %v4000_v26, %v3776_v41 }
0x11d8   :  { %v3852_v59 = vmul.f32 1.0614054, %v15106_v27  ;;  %12090 = vrcp.f32 %v3810_v53  ;;  %v15117_v58 = vpop.eup %12086  ;;  %v3811_v18 = vadd.f32 1.0, %v3795_v60  ;;  %v4048_v2 = vmul.f32 1.442695, %v4018_v14 }
0x11d9   :  { %v3870_v50 = vadd.f32 -1.4531521, %v3854_v46  ;;  %v3855_v49 = vmul.f32 1.0614054, %v15117_v58  ;;  %12092 = vrcp.f32 %v3808_v11  ;;  %v15133_v25 = vpop.eup %12088  ;;  %v15137_v53 = vand.u32 2147483647, %v15129_v29 }
0x11da   :  { %v3868_v4 = vadd.f32 -1.4531521, %v3852_v59  ;;  %12094 = vrcp.f32 %v3811_v18  ;;  %v3853_v13 = vmul.f32 1.0614054, %v15133_v25 }
0x11db   :  { %v3886_v30 = vmul.f32 %v15103_v48, %v3870_v50  ;;  %v3871_v45 = vadd.f32 -1.4531521, %v3855_v49  ;;  %12096 = vpow2.f32 %v4040_v21  ;;  %v4003_v50 = vsub.f32 0.0, %v15110_v31 }
0x11dc   :  { %v3884_v22 = vmul.f32 %v15106_v27, %v3868_v4  ;;  %12098 = vpow2.f32 %v4036_v3  ;;  %v3793_v3 = vmul.f32 0.3275911, %v15137_v53  ;;  %v3869_v41 = vadd.f32 -1.4531521, %v3853_v13 }
0x11dd   :  { %v3902_v17 = vadd.f32 1.4214138, %v3886_v30  ;;  %v3887_v19 = vmul.f32 %v15117_v58, %v3871_v45  ;;  %12100 = vpow2.f32 %v4042_v5  ;;  %v4044_v49 = vmul.f32 1.442695, %v4016_v62 }
0x11de   :  { %v3900_v0 = vadd.f32 1.4214138, %v3884_v22  ;;  %12102 = vpow2.f32 %v4038_v34  ;;  %v3809_v32 = vadd.f32 1.0, %v3793_v3  ;;  %v3885_v14 = vmul.f32 %v15133_v25, %v3869_v41 }
0x11df   :  { %v3918_v37 = vmul.f32 %v15103_v48, %v3902_v17  ;;  %v3903_v59 = vadd.f32 1.4214138, %v3887_v19  ;;  %12104 = vpow2.f32 %v4048_v2 }
0x11e0   :  { %v3916_v46 = vmul.f32 %v15106_v27, %v3900_v0  ;;  %v4019_v0 = vmul.f32 %v4003_v50, %v15110_v31  ;;  %12106 = vrcp.f32 %v3809_v32  ;;  %v3901_v34 = vadd.f32 1.4214138, %v3885_v14 }
0x11e1   :  { %v3934_v21 = vadd.f32 -0.28449672, %v3918_v37  ;;  %v3919_v9 = vmul.f32 %v15117_v58, %v3903_v59  ;;  %12108 = vpow2.f32 %v4044_v49 }
0x11e2   :  { %v3932_v12 = vadd.f32 -0.28449672, %v3916_v46  ;;  %v15142_v60 = vpop.eup %12090  ;;  %v3917_v50 = vmul.f32 %v15133_v25, %v3901_v34  ;;  %v4050_v41 = vmul.f32 1.442695, %v4019_v0 }
0x11e3   :  { %v3950_v4 = vmul.f32 %v15103_v48, %v3934_v21  ;;  %v3858_v30 = vmul.f32 1.0614054, %v15142_v60  ;;  %v3935_v22 = vadd.f32 -0.28449672, %v3919_v9  ;;  %v15149_v26 = vpop.eup %12092 }
0x11e4   :  { %v3948_v11 = vmul.f32 %v15106_v27, %v3932_v12  ;;  %v15153_v5 = vpop.eup %12094  ;;  %v3856_v46 = vmul.f32 1.0614054, %v15149_v26  ;;  %12110 = vpow2.f32 %v4050_v41 }
0x11e5   :  { %v3966_v18 = vadd.f32 0.2548296, %v3950_v4  ;;  %v3874_v45 = vadd.f32 -1.4531521, %v3858_v30  ;;  %v3951_v19 = vmul.f32 %v15117_v58, %v3935_v22  ;;  %v12097_v62 = vpop.eup %12096  ;;  %v3859_v59 = vmul.f32 1.0614054, %v15153_v5 }
0x11e6   :  { %v3964_v17 = vadd.f32 0.2548296, %v3948_v11  ;;  %v12099_v13 = vpop.eup %12098  ;;  %v3872_v3 = vadd.f32 -1.4531521, %v3856_v46  ;;  %v3933_v30 = vadd.f32 -0.28449672, %v3917_v50 }
0x11e7   :  { %v3982_v37 = vmul.f32 %v15103_v48, %v3966_v18  ;;  %v3890_v21 = vmul.f32 %v15142_v60, %v3874_v45  ;;  %v3967_v12 = vadd.f32 0.2548296, %v3951_v19  ;;  %v3875_v9 = vadd.f32 -1.4531521, %v3859_v59  ;;  %v12101_v32 = vpop.eup %12100 }
0x11e8   :  { %v3980_v2 = vmul.f32 %v15106_v27, %v3964_v17  ;;  %v3888_v49 = vmul.f32 %v15149_v26, %v3872_v3  ;;  %v4001_v17 = vsub.f32 0.0, %v15137_v53  ;;  %v12103_v45 = vpop.eup %12102  ;;  %v3949_v34 = vmul.f32 %v15133_v25, %v3933_v30 }
0x11e9   :  { %v4062_v31 = vmul.f32 %v12097_v62, %v3982_v37  ;;  %v3906_v4 = vadd.f32 1.4214138, %v3890_v21  ;;  %v3983_v27 = vmul.f32 %v15117_v58, %v3967_v12  ;;  %v3891_v14 = vmul.f32 %v15153_v5, %v3875_v9 }
0x11ea   :  { %v4060_v48 = vmul.f32 %v12099_v13, %v3980_v2  ;;  %v3904_v0 = vadd.f32 1.4214138, %v3888_v49  ;;  %v12105_v2 = vpop.eup %12104  ;;  %v3965_v13 = vadd.f32 0.2548296, %v3949_v34 }
0x11eb   :  { %v4078_v11 = vsub.f32 1.0, %v4062_v31  ;;  %v3922_v22 = vmul.f32 %v15142_v60, %v3906_v4  ;;  %v4063_v19 = vmul.f32 %v12101_v32, %v3983_v27  ;;  %v3907_v58 = vadd.f32 1.4214138, %v3891_v14  ;;  %v15172_v12 = vpop.eup %12106 }
0x11ec   :  { %v4076_v18 = vsub.f32 1.0, %v4060_v48  ;;  %v3920_v31 = vmul.f32 %v15149_v26, %v3904_v0  ;;  %v4017_v48 = vmul.f32 %v4001_v17, %v15137_v53  ;;  %v3981_v41 = vmul.f32 %v15133_v25, %v3965_v13 }
0x11ed   :  { %v4110_v37 = vsub.f32 0.0, %v4078_v11  ;;  %v3938_v62 = vadd.f32 -0.28449672, %v3922_v22  ;;  %v4079_v59 = vsub.f32 1.0, %v4063_v19  ;;  %v3923_v3 = vmul.f32 %v15153_v5, %v3907_v58 }
0x11ee   :  { %v4108_v46 = vsub.f32 0.0, %v4076_v18  ;;  %v3936_v42 = vadd.f32 -0.28449672, %v3920_v31  ;;  %v3857_v49 = vmul.f32 1.0614054, %v15172_v12  ;;  %v4061_v22 = vmul.f32 %v12103_v45, %v3981_v41 }
0x11ef   :  { %v4126_v21 = vsel %vm4094_vm15, %v4078_v11, %v4110_v37  ;;  %v3954_v50 = vmul.f32 %v15142_v60, %v3938_v62  ;;  %v4111_v9 = vsub.f32 0.0, %v4079_v59  ;;  %v12109_v11 = vpop.eup %12108  ;;  %v3939_v30 = vadd.f32 -0.28449672, %v3923_v3 }
0x11f0   :  { %v4142_v4 = vadd.f32 1.0, %v4126_v21  ;;  %v4124_v32 = vsel %vm4092_vm0, %v4076_v18, %v4108_v46  ;;  %v3952_v14 = vmul.f32 %v15149_v26, %v3936_v42  ;;  %v3873_v19 = vadd.f32 -1.4531521, %v3857_v49 }
0x11f1   :  { %v3970_v27 = vadd.f32 0.2548296, %v3954_v50  ;;  %v4127_v54 = vsel %vm4095_vm1, %v4079_v59, %v4111_v9  ;;  %v3955_v17 = vmul.f32 %v15153_v5, %v3939_v30  ;;  %v4077_v34 = vsub.f32 1.0, %v4061_v22  ;;  %v12111_v59 = vpop.eup %12110 }
0x11f2   :  { %v4143_v37 = vadd.f32 1.0, %v4127_v54  ;;  %v4158_v25 = vmul.f32 %v4142_v4, %v15098_v63  ;;  %v3968_v0 = vadd.f32 0.2548296, %v3952_v14  ;;  %v4046_v62 = vmul.f32 1.442695, %v4017_v48 }
0x11f3   :  { %v3986_v53 = vmul.f32 %v15142_v60, %v3970_v27  ;;  %v3971_v55 = vadd.f32 0.2548296, %v3955_v17  ;;  %v3889_v18 = vmul.f32 %v15172_v12, %v3873_v19  ;;  %v4140_v45 = vadd.f32 1.0, %v4124_v32 }
0x11f4   :  { %v4159_v58 = vmul.f32 %v4143_v37, %v15126_v47  ;;  %v4109_v46 = vsub.f32 0.0, %v4077_v34  ;;  %v3984_v60 = vmul.f32 %v15149_v26, %v3968_v0  ;;  %v3741_v3 = vmul.f32 0.5, %v15074_v38 }
0x11f5   :  { %v4066_v21 = vmul.f32 %v12105_v2, %v3986_v53  ;;  %v3987_v31 = vmul.f32 %v15153_v5, %v3971_v55  ;;  %v3905_v63 = vadd.f32 1.4214138, %v3889_v18  ;;  %12112 = vpow2.f32 %v4046_v62 }
0x11f6   :  { %v4169_v50 = vpack.c.bf16 %v4159_v58, %v4158_v25  ;;  %v4125_v48 = vsel %vm4093_vm7, %v4077_v34, %v4109_v46  ;;  %v4064_v47 = vmul.f32 %v12109_v11, %v3984_v60  ;;  %v4156_v15 = vmul.f32 %v4140_v45, %v15113_v33  ;;  %v15204_v60 = vld [vmem:[#allocation5 + $0x5] ss:$0 sm:$0xff] }
0x11f7   :  { %v4082_v13 = vsub.f32 1.0, %v4066_v21  ;;  %v4141_v2 = vadd.f32 1.0, %v4125_v48  ;;  %v4067_v9 = vmul.f32 %v12111_v59, %v3987_v31  ;;  %v3921_v41 = vmul.f32 %v15172_v12, %v3905_v63 }
0x11f8   :  { %v4080_v30 = vsub.f32 1.0, %v4064_v47  ;;  %v3746_v14 = vmul.f32 0.5, %v15081_v51  ;;  %v3747_v33 = vmul.f32 0.5, %v15091_v52  ;;  %v3744_v52 = vmul.f32 0.5, %v15088_v44 }
0x11f9   :  { %v4114_v4 = vsub.f32 0.0, %v4082_v13  ;;  %v4157_v26 = vmul.f32 %v4141_v2, %v3741_v3  ;;  %v4083_v27 = vsub.f32 1.0, %v4067_v9  ;;  %v3937_v5 = vadd.f32 -0.28449672, %v3921_v41 }
0x11fa   :  { %v4112_v37 = vsub.f32 0.0, %v4080_v30  ;;  %v3745_v55 = vmul.f32 0.5, %v15120_v10 }
0x11fb   :  { %v4130_v42 = vsel %vm4098_vm8, %v4082_v13, %v4114_v4  ;;  %v4115_v49 = vsub.f32 0.0, %v4083_v27  ;;  %v3953_v38 = vmul.f32 %v15172_v12, %v3937_v5  ;;  %v4168_v32 = vpack.c.bf16 %v4157_v26, %v4156_v15 }
0x11fc   :  { %v4146_v11 = vadd.f32 1.0, %v4130_v42  ;;  %v4128_v57 = vsel %vm4096_vm10, %v4080_v30, %v4112_v37 }
0x11fd   :  { %v4131_v54 = vsel %vm4099_vm9, %v4083_v27, %v4115_v49  ;;  %v3969_v22 = vadd.f32 0.2548296, %v3953_v38  ;;  %10215 = vmatprep.mubr.bf16.mxu0 %v4168_v32  ;;  %v4144_v21 = vadd.f32 1.0, %v4128_v57 }
0x11fe   :  { %v4147_v56 = vadd.f32 1.0, %v4131_v54  ;;  %10216 = vmatmul.mubr.bf16.gmra.mrb[104].mxu0 %v4169_v50  ;;  %v4162_v19 = vmul.f32 %v4146_v11, %v3746_v14 }
0x11ff   :  { %v3985_v53 = vmul.f32 %v15172_v12, %v3969_v22  ;;  %v12113_v17 = vpop.eup %12112  ;;  %v4160_v12 = vmul.f32 %v4144_v21, %v3744_v52 }
0x1200   :  { %v4163_v25 = vmul.f32 %v4147_v56, %v3747_v33 }
0x1201   :  { %v4065_v34 = vmul.f32 %v12113_v17, %v3985_v53 }
0x1202   :  { %v4171_v0 = vpack.c.bf16 %v4163_v25, %v4162_v19 }
0x1203   :  { %v4081_v62 = vsub.f32 1.0, %v4065_v34 }
0x1205   :  { %v4113_v58 = vsub.f32 0.0, %v4081_v62 }
0x1207   :  { %v4129_v51 = vsel %vm4097_vm11, %v4081_v62, %v4113_v58 }
0x1208   :  { %v4145_v18 = vadd.f32 1.0, %v4129_v51 }
0x120a   :  { %v4161_v45 = vmul.f32 %v4145_v18, %v3745_v55 }
0x120c   :  { %v4170_v46 = vpack.c.bf16 %v4161_v45, %v4160_v12  ;;  %v18271_v12 = vld [vmem:[#allocation31_spill] sm:$0xff] }
0x120e   :  { %10219 = vmatprep.mubr.bf16.mxu0 %v4170_v46 }
0x120f   :  { %10220 = vmatmul.mubr.bf16.gmra.mrb[108].mxu0 %v4171_v0 }
0x1294   :  { %v10209_v40 = vpop.f32.mrb[96].mxu0 }
0x1295   :  { %v4275_v59 = vpop.f32.mrb[97].mxu0  ;;  %v4284_v13 = vadd.f32 %v10209_v40, %v15204_v60  ;;  %v18273_v40 = vld [vmem:[#allocation29_spill] sm:$0xff] }
0x1296   :  { %v4276_v31 = vadd.f32 %v15204_v60, %v4275_v59  ;;  %v10210_v29 = vpop.f32.mrb[98].mxu0 }
0x1297   :  { %v4278_v63 = vpop.f32.mrb[99].mxu0  ;;  %v4287_v10 = vadd.f32 %v10210_v29, %v15204_v60  ;;  %v15214_v3 = vadd.f32 %v4284_v13, %v14632_v7 }
0x1298   :  { %v15209_v44 = vadd.f32 %v4276_v31, %v14628_v1  ;;  %v4279_v50 = vadd.f32 %v15204_v60, %v4278_v63 }
0x1299   :  { %18258 = vst [vmem:[#allocation27_spill] sm:$0xff] %v15214_v3  ;;  %v15222_v2 = vadd.f32 %v4287_v10, %v14643_v35  ;;  %v4362_v4 = vsel %vm243_vm2, %v15214_v3, 0.0 }
0x129a   :  { %18257 = vst [vmem:[#allocation28_spill] sm:$0xff] %v15209_v44  ;;  %v15217_v48 = vadd.f32 %v4279_v50, %v14636_v8  ;;  %v4356_v47 = vsel %vm243_vm2, %v15209_v44, 0.0 }
0x129b   :  { %4357 = vadd.xlane.f32.xlu0 %v4356_v47  ;;  %18260 = vst [vmem:[#allocation68_spill] sm:$0xff] %v15222_v2  ;;  %v4365_v7 = vsel %vm243_vm2, %v15222_v2, 0.0 }
0x129c   :  { %18259 = vst [vmem:[#allocation69_spill] sm:$0xff] %v15217_v48  ;;  %v4359_v1 = vsel %vm243_vm2, %v15217_v48, 0.0 }
0x129d   :  { %4360 = vadd.xlane.f32.xlu1 %v4359_v1 }
0x129f   :  { %4363 = vadd.xlane.f32.xlu0 %v4362_v4 }
0x12a1   :  { %4366 = vadd.xlane.f32.xlu1 %v4365_v7 }
0x12a4   :  { %v10213_v8 = vpop.f32.mrb[100].mxu0 }
0x12a5   :  { %v4291_v9 = vpop.f32.mrb[101].mxu0  ;;  %v4300_v41 = vadd.f32 %v10213_v8, %v15204_v60 }
0x12a6   :  { %v4292_v15 = vadd.f32 %v15204_v60, %v4291_v9  ;;  %v10214_v35 = vpop.f32.mrb[102].mxu0 }
0x12a7   :  { %v4294_v26 = vpop.f32.mrb[103].mxu0  ;;  %v4303_v27 = vadd.f32 %v10214_v35, %v15204_v60  ;;  %v15238_v30 = vadd.f32 %v4300_v41, %v14657_v43 }
0x12a8   :  { %v15233_v42 = vadd.f32 %v4292_v15, %v14652_v20  ;;  %v4295_v5 = vadd.f32 %v15204_v60, %v4294_v26 }
0x12a9   :  { %18262 = vst [vmem:[#allocation70_spill] sm:$0xff] %v15238_v30  ;;  %v15246_v32 = vadd.f32 %v4303_v27, %v14665_v23  ;;  %v4374_v11 = vsel %vm243_vm2, %v15238_v30, 0.0 }
0x12aa   :  { %18261 = vst [vmem:[#allocation71_spill] sm:$0xff] %v15233_v42  ;;  %v15241_v49 = vadd.f32 %v4295_v5, %v14660_v36  ;;  %v4368_v38 = vsel %vm243_vm2, %v15233_v42, 0.0 }
0x12ab   :  { %4369 = vadd.xlane.f32.xlu0 %v4368_v38  ;;  %18264 = vst [vmem:[#allocation72_spill] sm:$0xff] %v15246_v32  ;;  %v4377_v43 = vsel %vm243_vm2, %v15246_v32, 0.0 }
0x12ac   :  { %18263 = vst [vmem:[#allocation73_spill] sm:$0xff] %v15241_v49  ;;  %v4371_v20 = vsel %vm243_vm2, %v15241_v49, 0.0 }
0x12ad   :  { %4372 = vadd.xlane.f32.xlu1 %v4371_v20 }
0x12af   :  { %4375 = vadd.xlane.f32.xlu0 %v4374_v11 }
0x12b1   :  { %4378 = vadd.xlane.f32.xlu1 %v4377_v43 }
0x12d1   :  { %v10217_v36 = vpop.f32.mrb[104].mxu0 }
0x12d2   :  { %v4307_v54 = vpop.f32.mrb[105].mxu0  ;;  %v4316_v22 = vadd.f32 %v10217_v36, %v15204_v60 }
0x12d3   :  { %v4308_v14 = vadd.f32 %v15204_v60, %v4307_v54  ;;  %v10218_v23 = vpop.f32.mrb[106].mxu0 }
0x12d4   :  { %v4310_v33 = vpop.f32.mrb[107].mxu0  ;;  %v4319_v37 = vadd.f32 %v10218_v23, %v15204_v60  ;;  %v15262_v17 = vadd.f32 %v4316_v22, %v14681_v16 }
0x12d5   :  { %v15257_v56 = vadd.f32 %v4308_v14, %v14676_v6  ;;  %v4311_v53 = vadd.f32 %v15204_v60, %v4310_v33 }
0x12d6   :  { %18266 = vst [vmem:[#allocation75_spill] sm:$0xff] %v15262_v17  ;;  %v15270_v34 = vadd.f32 %v4319_v37, %v14689_v24  ;;  %v4386_v0 = vsel %vm243_vm2, %v15262_v17, 0.0 }
0x12d7   :  { %18265 = vst [vmem:[#allocation74_spill] sm:$0xff] %v15257_v56  ;;  %v15265_v19 = vadd.f32 %v4311_v53, %v14684_v61  ;;  %v4380_v25 = vsel %vm243_vm2, %v15257_v56, 0.0 }
0x12d8   :  { %4381 = vadd.xlane.f32.xlu0 %v4380_v25  ;;  %18268 = vst [vmem:[#allocation32_spill] sm:$0xff] %v15270_v34  ;;  %v4389_v16 = vsel %vm243_vm2, %v15270_v34, 0.0 }
0x12d9   :  { %18267 = vst [vmem:[#allocation30_spill] sm:$0xff] %v15265_v19  ;;  %v4383_v6 = vsel %vm243_vm2, %v15265_v19, 0.0 }
0x12da   :  { %4384 = vadd.xlane.f32.xlu1 %v4383_v6 }
0x12dc   :  { %4387 = vadd.xlane.f32.xlu0 %v4386_v0 }
0x12de   :  { %4390 = vadd.xlane.f32.xlu1 %v4389_v16 }
0x12e2   :  { %v10221_v61 = vpop.f32.mrb[108].mxu0 }
0x12e3   :  { %v4323_v57 = vpop.f32.mrb[109].mxu0  ;;  %v4332_v62 = vadd.f32 %v10221_v61, %v15204_v60 }
0x12e4   :  { %v4324_v58 = vadd.f32 %v15204_v60, %v4323_v57  ;;  %v10222_v24 = vpop.f32.mrb[110].mxu0 }
0x12e5   :  { %v4326_v21 = vpop.f32.mrb[111].mxu0  ;;  %v4335_v52 = vadd.f32 %v10222_v24, %v15204_v60  ;;  %v15286_v18 = vadd.f32 %v4332_v62, %v14705_v28 }
0x12e6   :  { %v15281_v51 = vadd.f32 %v4324_v58, %v14700_v39  ;;  %v4327_v55 = vadd.f32 %v15204_v60, %v4326_v21 }
0x12e7   :  { %18270 = vst [vmem:[#allocation34_spill] sm:$0xff] %v15286_v18  ;;  %v15294_v59 = vadd.f32 %v4335_v52, %v18273_v40  ;;  %v4398_v60 = vsel %vm243_vm2, %v15286_v18, 0.0  ;;  %v11716_v52 = vld [vmem:[%s17915_s5 + $0x10] sm:$0xff]  }
0x12e8   :  { %18269 = vst [vmem:[#allocation33_spill] sm:$0xff] %v15281_v51  ;;  %v15289_v45 = vadd.f32 %v4327_v55, %v18271_v12  ;;  %v4392_v46 = vsel %vm243_vm2, %v15281_v51, 0.0  ;;  %v11717_v55 = vld [vmem:[%s17915_s5 + $0x18] sm:$0xff]   ;;  %10223 = vmatprep.subr.bf16.mxu1 %v11716_v52 }
0x12e9   :  { %4393 = vadd.xlane.f32.xlu0 %v4392_v46  ;;  %18274 = vst [vmem:[#allocation38_spill] sm:$0xff] %v15294_v59  ;;  %v4401_v28 = vsel %vm243_vm2, %v15294_v59, 0.0  ;;  %10224 = vmatpush3.bf16.msra.mxu1 %v11716_v52 }
0x12ea   :  { %18272 = vst [vmem:[#allocation40_spill] sm:$0xff] %v15289_v45  ;;  %v4395_v39 = vsel %vm243_vm2, %v15289_v45, 0.0  ;;  %10225 = vmatprep.subr.bf16.mxu1 %v11717_v55 }
0x12eb   :  { %4396 = vadd.xlane.f32.xlu1 %v4395_v39 }
0x12ed   :  { %4399 = vadd.xlane.f32.xlu0 %v4398_v60  ;;  %10226 = vmatpush3.bf16.msra.mxu1 %v11717_v55 }
0x12ef   :  { %4402 = vadd.xlane.f32.xlu1 %v4401_v28 }
0x1328   :  { %v4358_v13 = vpop.xlane.xlu0 %4357 }
0x1329   :  { %v4404_v31 = vmul.f32 0.03125, %v4358_v13 }
0x132a   :  { %v4361_v29 = vpop.xlane.xlu1 %4360 }
0x132b   :  { %v15303_v63 = vsub.f32 %v15209_v44, %v4404_v31  ;;  %v4405_v10 = vmul.f32 0.03125, %v4361_v29  ;;  %v15808_v44 = vld [vmem:[%s17912_s2 + $0x68] sm:$0xff] }
0x132c   :  { %v4364_v50 = vpop.xlane.xlu0 %4363  ;;  %18294 = vst [vmem:[#allocation58_spill] sm:$0xff] %v15808_v44 }
0x132d   :  { %v15306_v47 = vsub.f32 %v15217_v48, %v4405_v10  ;;  %v4406_v1 = vmul.f32 0.03125, %v4364_v50  ;;  %v4436_v4 = vmul.f32 %v15303_v63, %v15303_v63 }
0x132e   :  { %v4367_v7 = vpop.xlane.xlu1 %4366 }
0x132f   :  { %v15311_v8 = vsub.f32 %v15214_v3, %v4406_v1  ;;  %v4407_v9 = vmul.f32 0.03125, %v4367_v7  ;;  %v4452_v41 = vsel %vm243_vm2, %v4436_v4, 0.0  ;;  %v4437_v15 = vmul.f32 %v15306_v47, %v15306_v47  ;;  %v15795_v3 = vld [vmem:[%s17912_s2 + $0x30] sm:$0xff] }
0x1330   :  { %4453 = vadd.xlane.f32.xlu0 %v4452_v41  ;;  %18293 = vst [vmem:[#allocation53_spill] sm:$0xff] %v15795_v3 }
0x1331   :  { %v15317_v35 = vsub.f32 %v15222_v2, %v4407_v9  ;;  %v4455_v26 = vsel %vm243_vm2, %v4437_v15, 0.0  ;;  %v4438_v27 = vmul.f32 %v15311_v8, %v15311_v8 }
0x1332   :  { %4456 = vadd.xlane.f32.xlu1 %v4455_v26 }
0x1333   :  { %v4458_v5 = vsel %vm243_vm2, %v4438_v27, 0.0  ;;  %v4439_v38 = vmul.f32 %v15317_v35, %v15317_v35 }
0x1334   :  { %4459 = vadd.xlane.f32.xlu0 %v4458_v5 }
0x1335   :  { %v4461_v20 = vsel %vm243_vm2, %v4439_v38, 0.0 }
0x1336   :  { %4462 = vadd.xlane.f32.xlu1 %v4461_v20 }
0x1338   :  { %v4370_v11 = vpop.xlane.xlu0 %4369 }
0x1339   :  { %v4408_v43 = vmul.f32 0.03125, %v4370_v11 }
0x133a   :  { %v4373_v36 = vpop.xlane.xlu1 %4372 }
0x133b   :  { %v15327_v54 = vsub.f32 %v15233_v42, %v4408_v43  ;;  %v4409_v22 = vmul.f32 0.03125, %v4373_v36  ;;  %v15773_v42 = vld [vmem:[%s17912_s2 + $0x48] sm:$0xff] }
0x133c   :  { %v4376_v14 = vpop.xlane.xlu0 %4375  ;;  %18290 = vst [vmem:[#allocation54_spill] sm:$0xff] %v15773_v42 }
0x133d   :  { %v15330_v23 = vsub.f32 %v15241_v49, %v4409_v22  ;;  %v4410_v33 = vmul.f32 0.03125, %v4376_v14  ;;  %v4440_v37 = vmul.f32 %v15327_v54, %v15327_v54  ;;  %v15764_v49 = vld [vmem:[%s17912_s2 + $0x38] sm:$0xff] }
0x133e   :  { %v4379_v53 = vpop.xlane.xlu1 %4378  ;;  %18289 = vst [vmem:[#allocation51_spill] sm:$0xff] %v15764_v49 }
0x133f   :  { %v15335_v25 = vsub.f32 %v15238_v30, %v4410_v33  ;;  %v4411_v6 = vmul.f32 0.03125, %v4379_v53  ;;  %v4464_v0 = vsel %vm243_vm2, %v4440_v37, 0.0  ;;  %v4441_v16 = vmul.f32 %v15330_v23, %v15330_v23 }
0x1340   :  { %4465 = vadd.xlane.f32.xlu0 %v4464_v0 }
0x1341   :  { %v15341_v61 = vsub.f32 %v15246_v32, %v4411_v6  ;;  %v4467_v57 = vsel %vm243_vm2, %v4441_v16, 0.0  ;;  %v4442_v62 = vmul.f32 %v15335_v25, %v15335_v25 }
0x1342   :  { %4468 = vadd.xlane.f32.xlu1 %v4467_v57 }
0x1343   :  { %v4470_v58 = vsel %vm243_vm2, %v4442_v62, 0.0  ;;  %v4443_v24 = vmul.f32 %v15341_v61, %v15341_v61 }
0x1344   :  { %4471 = vadd.xlane.f32.xlu0 %v4470_v58 }
0x1345   :  { %v4473_v21 = vsel %vm243_vm2, %v4443_v24, 0.0 }
0x1346   :  { %4474 = vadd.xlane.f32.xlu1 %v4473_v21 }
0x1365   :  { %v4382_v12 = vpop.xlane.xlu0 %4381 }
0x1366   :  { %v4412_v46 = vmul.f32 0.03125, %v4382_v12 }
0x1367   :  { %v4385_v40 = vpop.xlane.xlu1 %4384 }
0x1368   :  { %v15357_v39 = vsub.f32 %v15257_v56, %v4412_v46  ;;  %v4413_v60 = vmul.f32 0.03125, %v4385_v40 }
0x1369   :  { %v4388_v28 = vpop.xlane.xlu0 %4387 }
0x136a   :  { %v15360_v13 = vsub.f32 %v15265_v19, %v4413_v60  ;;  %v4414_v31 = vmul.f32 0.03125, %v4388_v28  ;;  %v4444_v29 = vmul.f32 %v15357_v39, %v15357_v39 }
0x136b   :  { %v4391_v10 = vpop.xlane.xlu1 %4390 }
0x136c   :  { %v15365_v50 = vsub.f32 %v15262_v17, %v4414_v31  ;;  %v4415_v1 = vmul.f32 0.03125, %v4391_v10  ;;  %v4476_v4 = vsel %vm243_vm2, %v4444_v29, 0.0  ;;  %v4445_v7 = vmul.f32 %v15360_v13, %v15360_v13 }
0x136d   :  { %4477 = vadd.xlane.f32.xlu0 %v4476_v4 }
0x136e   :  { %v15371_v9 = vsub.f32 %v15270_v34, %v4415_v1  ;;  %v4479_v41 = vsel %vm243_vm2, %v4445_v7, 0.0  ;;  %v4446_v15 = vmul.f32 %v15365_v50, %v15365_v50 }
0x136f   :  { %4480 = vadd.xlane.f32.xlu1 %v4479_v41 }
0x1370   :  { %v4482_v26 = vsel %vm243_vm2, %v4446_v15, 0.0  ;;  %v4447_v27 = vmul.f32 %v15371_v9, %v15371_v9 }
0x1371   :  { %4483 = vadd.xlane.f32.xlu0 %v4482_v26  ;;  %v15404_v26 = vld [vmem:[#allocation5 + $0x6] ss:$0 sm:$0xff] }
0x1372   :  { %v4485_v5 = vsel %vm243_vm2, %v4447_v27, 0.0 }
0x1373   :  { %4486 = vadd.xlane.f32.xlu1 %v4485_v5 }
0x1376   :  { %v4394_v38 = vpop.xlane.xlu0 %4393 }
0x1377   :  { %v4416_v20 = vmul.f32 0.03125, %v4394_v38 }
0x1378   :  { %v4397_v11 = vpop.xlane.xlu1 %4396 }
0x1379   :  { %v15381_v43 = vsub.f32 %v15281_v51, %v4416_v20  ;;  %v4417_v36 = vmul.f32 0.03125, %v4397_v11 }
0x137a   :  { %v4400_v22 = vpop.xlane.xlu0 %4399 }
0x137b   :  { %v15384_v14 = vsub.f32 %v15289_v45, %v4417_v36  ;;  %v4418_v33 = vmul.f32 0.03125, %v4400_v22  ;;  %v4448_v37 = vmul.f32 %v15381_v43, %v15381_v43 }
0x137c   :  { %v4403_v53 = vpop.xlane.xlu1 %4402 }
0x137d   :  { %v15389_v6 = vsub.f32 %v15286_v18, %v4418_v33  ;;  %v4419_v0 = vmul.f32 0.03125, %v4403_v53  ;;  %v4488_v16 = vsel %vm243_vm2, %v4448_v37, 0.0  ;;  %v4449_v57 = vmul.f32 %v15384_v14, %v15384_v14  ;;  %v15409_v37 = vld [vmem:[#allocation5 + $0x7] ss:$0 sm:$0xff] }
0x137e   :  { %4489 = vadd.xlane.f32.xlu0 %v4488_v16 }
0x137f   :  { %v15395_v62 = vsub.f32 %v15294_v59, %v4419_v0  ;;  %v4491_v58 = vsel %vm243_vm2, %v4449_v57, 0.0  ;;  %v4450_v24 = vmul.f32 %v15389_v6, %v15389_v6 }
0x1380   :  { %4492 = vadd.xlane.f32.xlu1 %v4491_v58 }
0x1381   :  { %v4494_v21 = vsel %vm243_vm2, %v4450_v24, 0.0  ;;  %v4451_v52 = vmul.f32 %v15395_v62, %v15395_v62 }
0x1382   :  { %4495 = vadd.xlane.f32.xlu0 %v4494_v21 }
0x1383   :  { %v4497_v55 = vsel %vm243_vm2, %v4451_v52, 0.0 }
0x1384   :  { %4498 = vadd.xlane.f32.xlu1 %v4497_v55 }
0x13bd   :  { %v4454_v12 = vpop.xlane.xlu0 %4453 }
0x13be   :  { %v4500_v46 = vmul.f32 0.03125, %v4454_v12 }
0x13bf   :  { %v4457_v40 = vpop.xlane.xlu1 %4456 }
0x13c0   :  { %v4516_v60 = vadd.f32 1e-05, %v4500_v46  ;;  %v4501_v28 = vmul.f32 0.03125, %v4457_v40 }
0x13c1   :  { %v4460_v31 = vpop.xlane.xlu0 %4459 }
0x13c2   :  { %12114 = vrsqrt.f32 %v4516_v60  ;;  %v4517_v29 = vadd.f32 1e-05, %v4501_v28  ;;  %v4502_v10 = vmul.f32 0.03125, %v4460_v31 }
0x13c3   :  { %v4463_v1 = vpop.xlane.xlu1 %4462 }
0x13c4   :  { %12116 = vrsqrt.f32 %v4517_v29  ;;  %v4518_v4 = vadd.f32 1e-05, %v4502_v10  ;;  %v4503_v7 = vmul.f32 0.03125, %v4463_v1 }
0x13c6   :  { %12118 = vrsqrt.f32 %v4518_v4  ;;  %v4519_v41 = vadd.f32 1e-05, %v4503_v7 }
0x13c8   :  { %12120 = vrsqrt.f32 %v4519_v41 }
0x13cc   :  { %v12115_v15 = vpop.eup %12114 }
0x13cd   :  { %v4466_v27 = vpop.xlane.xlu0 %4465  ;;  %v4548_v5 = vmul.f32 %v12115_v15, %v15303_v63 }
0x13ce   :  { %v12117_v38 = vpop.eup %12116  ;;  %v4504_v20 = vmul.f32 0.03125, %v4466_v27 }
0x13cf   :  { %v4469_v11 = vpop.xlane.xlu1 %4468  ;;  %v4549_v36 = vmul.f32 %v12117_v38, %v15306_v47  ;;  %v4568_v22 = vmul.f32 %v15404_v26, %v4548_v5 }
0x13d0   :  { %v12119_v33 = vpop.eup %12118  ;;  %v4520_v53 = vadd.f32 1e-05, %v4504_v20  ;;  %v4505_v0 = vmul.f32 0.03125, %v4469_v11 }
0x13d1   :  { %v4550_v16 = vmul.f32 %v12119_v33, %v15311_v8  ;;  %v4472_v57 = vpop.xlane.xlu0 %4471  ;;  %v4569_v58 = vmul.f32 %v15404_v26, %v4549_v36  ;;  %v4588_v12 = vadd.f32 %v15409_v37, %v4568_v22 }
0x13d2   :  { %v12121_v24 = vpop.eup %12120  ;;  %12122 = vrsqrt.f32 %v4520_v53  ;;  %v4521_v63 = vadd.f32 1e-05, %v4505_v0  ;;  %v4506_v21 = vmul.f32 0.03125, %v4472_v57 }
0x13d3   :  { %v4570_v52 = vmul.f32 %v15404_v26, %v4550_v16  ;;  %v4551_v47 = vmul.f32 %v12121_v24, %v15317_v35  ;;  %v4475_v55 = vpop.xlane.xlu1 %4474  ;;  %v4589_v46 = vadd.f32 %v15409_v37, %v4569_v58 }
0x13d4   :  { %12124 = vrsqrt.f32 %v4521_v63  ;;  %v4522_v40 = vadd.f32 1e-05, %v4506_v21  ;;  %v4507_v60 = vmul.f32 0.03125, %v4475_v55 }
0x13d5   :  { %v4571_v8 = vmul.f32 %v15404_v26, %v4551_v47  ;;  %v4604_v28 = vpack.c.bf16 %v4589_v46, %v4588_v12  ;;  %v4590_v29 = vadd.f32 %v15409_v37, %v4570_v52 }
0x13d6   :  { %12126 = vrsqrt.f32 %v4522_v40  ;;  %v4523_v31 = vadd.f32 1e-05, %v4507_v60 }
0x13d7   :  { %v4591_v10 = vadd.f32 %v15409_v37, %v4571_v8  ;;  %10227 = vmatprep.mubr.msk.bf16.mxu1 %vm243_vm2, %v4604_v28 }
0x13d8   :  { %12128 = vrsqrt.f32 %v4523_v31 }
0x13d9   :  { %v4605_v35 = vpack.c.bf16 %v4591_v10, %v4590_v29 }
0x13db   :  { %10228 = vmatmul.mubr.msk.bf16.vlgmr.msra.gmra.mrb[96].mxu1 %vm243_vm2, %v4605_v35 }
0x13dc   :  { %v12123_v1 = vpop.eup %12122 }
0x13dd   :  { %v4552_v4 = vmul.f32 %v12123_v1, %v15327_v54 }
0x13de   :  { %v12125_v7 = vpop.eup %12124 }
0x13df   :  { %v4553_v41 = vmul.f32 %v12125_v7, %v15330_v23  ;;  %v4572_v15 = vmul.f32 %v15404_v26, %v4552_v4 }
0x13e0   :  { %v12127_v27 = vpop.eup %12126 }
0x13e1   :  { %v4573_v5 = vmul.f32 %v15404_v26, %v4553_v41  ;;  %v4554_v38 = vmul.f32 %v12127_v27, %v15335_v25  ;;  %v4592_v11 = vadd.f32 %v15409_v37, %v4572_v15 }
0x13e2   :  { %v12129_v20 = vpop.eup %12128 }
0x13e3   :  { %v4593_v36 = vadd.f32 %v15409_v37, %v4573_v5  ;;  %v4555_v22 = vmul.f32 %v12129_v20, %v15341_v61  ;;  %v4574_v33 = vmul.f32 %v15404_v26, %v4554_v38 }
0x13e5   :  { %v4606_v54 = vpack.c.bf16 %v4593_v36, %v4592_v11  ;;  %v4575_v53 = vmul.f32 %v15404_v26, %v4555_v22  ;;  %v4594_v23 = vadd.f32 %v15409_v37, %v4574_v33 }
0x13e7   :  { %10231 = vmatprep.mubr.msk.bf16.mxu1 %vm243_vm2, %v4606_v54  ;;  %v4595_v0 = vadd.f32 %v15409_v37, %v4575_v53 }
0x13e9   :  { %v4607_v16 = vpack.c.bf16 %v4595_v0, %v4594_v23 }
0x13eb   :  { %10232 = vmatmul.mubr.msk.bf16.gmra.mrb[100].mxu1 %vm243_vm2, %v4607_v16 }
0x13fa   :  { %v4478_v25 = vpop.xlane.xlu0 %4477 }
0x13fb   :  { %v4508_v57 = vmul.f32 0.03125, %v4478_v25 }
0x13fc   :  { %v4481_v58 = vpop.xlane.xlu1 %4480 }
0x13fd   :  { %v4524_v24 = vadd.f32 1e-05, %v4508_v57  ;;  %v4509_v63 = vmul.f32 0.03125, %v4481_v58 }
0x13fe   :  { %v4484_v61 = vpop.xlane.xlu0 %4483 }
0x13ff   :  { %12130 = vrsqrt.f32 %v4524_v24  ;;  %v4525_v21 = vadd.f32 1e-05, %v4509_v63  ;;  %v4510_v52 = vmul.f32 0.03125, %v4484_v61 }
0x1400   :  { %v4487_v47 = vpop.xlane.xlu1 %4486 }
0x1401   :  { %12132 = vrsqrt.f32 %v4525_v21  ;;  %v4526_v55 = vadd.f32 1e-05, %v4510_v52  ;;  %v4511_v12 = vmul.f32 0.03125, %v4487_v47 }
0x1403   :  { %12134 = vrsqrt.f32 %v4526_v55  ;;  %v4527_v46 = vadd.f32 1e-05, %v4511_v12 }
0x1405   :  { %12136 = vrsqrt.f32 %v4527_v46 }
0x1409   :  { %v12131_v40 = vpop.eup %12130 }
0x140a   :  { %v4556_v60 = vmul.f32 %v12131_v40, %v15357_v39 }
0x140b   :  { %v12133_v8 = vpop.eup %12132  ;;  %v4490_v28 = vpop.xlane.xlu0 %4489 }
0x140c   :  { %v4512_v31 = vmul.f32 0.03125, %v4490_v28  ;;  %v4557_v29 = vmul.f32 %v12133_v8, %v15360_v13  ;;  %v4576_v10 = vmul.f32 %v15404_v26, %v4556_v60 }
0x140d   :  { %v12135_v35 = vpop.eup %12134  ;;  %v4493_v1 = vpop.xlane.xlu1 %4492 }
0x140e   :  { %v4528_v4 = vadd.f32 1e-05, %v4512_v31  ;;  %v4513_v7 = vmul.f32 0.03125, %v4493_v1  ;;  %v4577_v41 = vmul.f32 %v15404_v26, %v4557_v29  ;;  %v4596_v5 = vadd.f32 %v15409_v37, %v4576_v10 }
0x140f   :  { %v12137_v15 = vpop.eup %12136  ;;  %v4496_v27 = vpop.xlane.xlu0 %4495  ;;  %v4558_v38 = vmul.f32 %v12135_v35, %v15365_v50 }
0x1410   :  { %12138 = vrsqrt.f32 %v4528_v4  ;;  %v4529_v39 = vadd.f32 1e-05, %v4513_v7  ;;  %v4514_v20 = vmul.f32 0.03125, %v4496_v27  ;;  %v4597_v11 = vadd.f32 %v15409_v37, %v4577_v41 }
0x1411   :  { %v4499_v13 = vpop.xlane.xlu1 %4498  ;;  %v4559_v36 = vmul.f32 %v12137_v15, %v15371_v9  ;;  %v4578_v22 = vmul.f32 %v15404_v26, %v4558_v38 }
0x1412   :  { %12140 = vrsqrt.f32 %v4529_v39  ;;  %v4530_v33 = vadd.f32 1e-05, %v4514_v20  ;;  %v4515_v54 = vmul.f32 0.03125, %v4499_v13  ;;  %v4608_v53 = vpack.c.bf16 %v4597_v11, %v4596_v5 }
0x1413   :  { %v4579_v23 = vmul.f32 %v15404_v26, %v4559_v36  ;;  %v4598_v50 = vadd.f32 %v15409_v37, %v4578_v22 }
0x1414   :  { %12142 = vrsqrt.f32 %v4530_v33  ;;  %v4531_v0 = vadd.f32 1e-05, %v4515_v54  ;;  %10235 = vmatprep.mubr.msk.bf16.mxu1 %vm243_vm2, %v4608_v53 }
0x1415   :  { %v4599_v16 = vadd.f32 %v15409_v37, %v4579_v23 }
0x1416   :  { %12144 = vrsqrt.f32 %v4531_v0 }
0x1417   :  { %v4609_v25 = vpack.c.bf16 %v4599_v16, %v4598_v50 }
0x1419   :  { %10236 = vmatmul.mubr.msk.bf16.gmra.mrb[104].mxu1 %vm243_vm2, %v4609_v25 }
0x141a   :  { %v12139_v9 = vpop.eup %12138 }
0x141b   :  { %v4560_v57 = vmul.f32 %v12139_v9, %v15381_v43 }
0x141c   :  { %v12141_v58 = vpop.eup %12140 }
0x141d   :  { %v4561_v24 = vmul.f32 %v12141_v58, %v15384_v14  ;;  %v4580_v63 = vmul.f32 %v15404_v26, %v4560_v57 }
0x141e   :  { %v12143_v61 = vpop.eup %12142 }
0x141f   :  { %v4581_v21 = vmul.f32 %v15404_v26, %v4561_v24  ;;  %v4562_v52 = vmul.f32 %v12143_v61, %v15389_v6  ;;  %v4600_v55 = vadd.f32 %v15409_v37, %v4580_v63  ;;  %v9044_v6 = vld [vmem:[%s17916_s6 + $0x1] ss:$0 sm:$0xff] }
0x1420   :  { %v12145_v47 = vpop.eup %12144 }
0x1421   :  { %v4601_v12 = vadd.f32 %v15409_v37, %v4581_v21  ;;  %v4563_v46 = vmul.f32 %v12145_v47, %v15395_v62  ;;  %v4582_v40 = vmul.f32 %v15404_v26, %v4562_v52 }
0x1423   :  { %v4610_v43 = vpack.c.bf16 %v4601_v12, %v4600_v55  ;;  %v4583_v60 = vmul.f32 %v15404_v26, %v4563_v46  ;;  %v4602_v14 = vadd.f32 %v15409_v37, %v4582_v40 }
0x1425   :  { %10239 = vmatprep.mubr.msk.bf16.mxu1 %vm243_vm2, %v4610_v43  ;;  %v4603_v8 = vadd.f32 %v15409_v37, %v4583_v60 }
0x1427   :  { %v4611_v28 = vpack.c.bf16 %v4603_v8, %v4602_v14 }
0x1429   :  { %10240 = vmatmul.mubr.msk.bf16.gmra.mrb[108].mxu1 %vm243_vm2, %v4611_v28 }
0x14ae   :  { %v10229_v31 = vpop.f32.mrb[96].mxu1 }
0x14af   :  { %v4692_v62 = vpop.f32.mrb[97].mxu1  ;;  %v15467_v35 = vadd.f32 %v10229_v31, %v9044_v6 }
0x14b0   :  { %v4693_v29 = vadd.f32 %v9044_v6, %v4692_v62  ;;  %v10230_v10 = vpop.f32.mrb[98].mxu1 }
0x14b1   :  { %v15469_v26 = vadd.f32 %v10230_v10, %v9044_v6  ;;  %v4695_v1 = vpop.f32.mrb[99].mxu1 }
0x14b2   :  { %v15471_v4 = vadd.f32 %v9044_v6, %v4695_v1  ;;  %v15473_v7 = vmul.f32 0.35355338, %v4693_v29 }
0x14b3   :  { %v15477_v37 = vpack.i.bf16 %v15469_v26, %v15467_v35  ;;  %v15481_v41 = vpack.c.bf16 %v15469_v26, %v15467_v35 }
0x14b4   :  { %10275 = vmatprep.mubr.msk.f32.mxu0 %vm731_vm3, %v15473_v7  ;;  %v15486_v15 = vpack.i.bf16 %v15471_v4, %v4693_v29  ;;  %v15489_v27 = vpack.c.bf16 %v15471_v4, %v4693_v29 }
0x14b5   :  { %11427 = vrot.lane.b32.xlu1 %v15477_v37, %s12608_s16 }
0x14b6   :  { %11422 = vrot.lane.b32.xlu0 %v15486_v15, %s12608_s16 }
0x14be   :  { %v10233_v5 = vpop.f32.mrb[100].mxu1 }
0x14bf   :  { %v4708_v38 = vpop.f32.mrb[101].mxu1  ;;  %v15495_v20 = vadd.f32 %v10233_v5, %v9044_v6 }
0x14c0   :  { %v10234_v39 = vpop.f32.mrb[102].mxu1  ;;  %v15499_v36 = vadd.f32 %v9044_v6, %v4708_v38 }
0x14c1   :  { %v15497_v11 = vadd.f32 %v10234_v39, %v9044_v6  ;;  %v4711_v13 = vpop.f32.mrb[103].mxu1 }
0x14c2   :  { %v15501_v22 = vadd.f32 %v9044_v6, %v4711_v13 }
0x14c3   :  { %v15505_v33 = vpack.i.bf16 %v15497_v11, %v15495_v20  ;;  %v15509_v54 = vpack.c.bf16 %v15497_v11, %v15495_v20 }
0x14c4   :  { %v15513_v53 = vpack.i.bf16 %v15501_v22, %v15499_v36  ;;  %v15517_v23 = vpack.c.bf16 %v15501_v22, %v15499_v36 }
0x14c5   :  { %18275 = vst [vmem:[#allocation41_spill] sm:$0xff] %v15505_v33 }
0x14c6   :  { %18276 = vst [vmem:[#allocation39_spill] sm:$0xff] %v15513_v53  ;;  %11432 = vrot.lane.b32.xlu1 %v15513_v53, %s12608_s16 }
0x14ca   :  { %11437 = vrot.lane.b32.xlu1 %v15505_v33, %s12608_s16 }
0x14ec   :  { %v10237_v0 = vpop.f32.mrb[104].mxu1 }
0x14ed   :  { %v4724_v50 = vpop.f32.mrb[105].mxu1  ;;  %v15523_v25 = vadd.f32 %v10237_v0, %v9044_v6 }
0x14ee   :  { %v10238_v16 = vpop.f32.mrb[106].mxu1  ;;  %v15527_v58 = vadd.f32 %v9044_v6, %v4724_v50 }
0x14ef   :  { %v15525_v9 = vadd.f32 %v10238_v16, %v9044_v6  ;;  %v4727_v57 = vpop.f32.mrb[107].mxu1 }
0x14f0   :  { %v15529_v24 = vadd.f32 %v9044_v6, %v4727_v57 }
0x14f1   :  { %v15533_v63 = vpack.i.bf16 %v15525_v9, %v15523_v25  ;;  %v15537_v61 = vpack.c.bf16 %v15525_v9, %v15523_v25 }
0x14f2   :  { %v15541_v21 = vpack.i.bf16 %v15529_v24, %v15527_v58  ;;  %v15545_v52 = vpack.c.bf16 %v15529_v24, %v15527_v58 }
0x14f3   :  { %18277 = vst [vmem:[#allocation44_spill] sm:$0xff] %v15533_v63  ;;  %18278 = vst [vmem:[#allocation42_spill] sm:$0xff] %v15537_v61  ;;  %11447 = vrot.lane.b32.xlu1 %v15533_v63, %s12608_s16 }
0x14f4   :  { %18279 = vst [vmem:[#allocation45_spill] sm:$0xff] %v15541_v21  ;;  %18280 = vst [vmem:[#allocation43_spill] sm:$0xff] %v15545_v52  ;;  %11442 = vrot.lane.b32.xlu0 %v15541_v21, %s12608_s16 }
0x14fc   :  { %v10241_v47 = vpop.f32.mrb[108].mxu1 }
0x14fd   :  { %v4740_v55 = vpop.f32.mrb[109].mxu1  ;;  %v15551_v46 = vadd.f32 %v10241_v47, %v9044_v6 }
0x14fe   :  { %v10242_v12 = vpop.f32.mrb[110].mxu1  ;;  %v15555_v60 = vadd.f32 %v9044_v6, %v4740_v55 }
0x14ff   :  { %v15553_v40 = vadd.f32 %v10242_v12, %v9044_v6  ;;  %v4743_v43 = vpop.f32.mrb[111].mxu1 }
0x1500   :  { %v15557_v14 = vadd.f32 %v9044_v6, %v4743_v43 }
0x1501   :  { %v15561_v8 = vpack.i.bf16 %v15553_v40, %v15551_v46  ;;  %v15565_v28 = vpack.c.bf16 %v15553_v40, %v15551_v46 }
0x1502   :  { %v15569_v31 = vpack.i.bf16 %v15557_v14, %v15555_v60  ;;  %v15573_v62 = vpack.c.bf16 %v15557_v14, %v15555_v60 }
0x1503   :  { %18281 = vst [vmem:[#allocation48_spill] sm:$0xff] %v15565_v28  ;;  %11457 = vrot.lane.b32.xlu1 %v15561_v8, %s12608_s16 }
0x1504   :  { %18282 = vst [vmem:[#allocation46_spill] sm:$0xff] %v15573_v62  ;;  %11452 = vrot.lane.b32.xlu0 %v15569_v31, %s12608_s16 }
0x1507   :  { %5230 = vrot.lane.b32.xlu1 %v15481_v41, %s12603_s27 }
0x1508   :  { %5228 = vrot.lane.b32.xlu0 %v15489_v27, %s12603_s27 }
0x150b   :  { %5234 = vrot.lane.b32.xlu1 %v15509_v54, %s12603_s27 }
0x150c   :  { %5232 = vrot.lane.b32.xlu0 %v15517_v23, %s12603_s27 }
0x150f   :  { %5238 = vrot.lane.b32.xlu1 %v15537_v61, %s12603_s27 }
0x1510   :  { %5236 = vrot.lane.b32.xlu0 %v15545_v52, %s12603_s27 }
0x1513   :  { %11467 = vrot.lane.b32.xlu1 %v15477_v37, %s12609_s17 }
0x1514   :  { %11462 = vrot.lane.b32.xlu0 %v15486_v15, %s12609_s17 }
0x1517   :  { %5242 = vrot.lane.b32.xlu1 %v15565_v28, %s12603_s27 }
0x1518   :  { %5240 = vrot.lane.b32.xlu0 %v15573_v62, %s12603_s27 }
0x1527   :  { %v11428_v6 = vpop.permute.xlu1 %11427 }
0x1528   :  { %v11423_v29 = vpop.permute.xlu0 %11422  ;;  %v11430_v10 = vunpack.i.h.bf16 %v11428_v6  ;;  %v11429_v1 = vunpack.i.l.bf16 %v11428_v6 }
0x1529   :  { %v11425_v5 = vunpack.i.h.bf16 %v11423_v29  ;;  %v11424_v38 = vunpack.i.l.bf16 %v11423_v29 }
0x152a   :  { %v10900_v13 = vpack.c.bf16 %v11430_v10, %v11429_v1 }
0x152b   :  { %v10894_v39 = vpack.c.bf16 %v11425_v5, %v11424_v38 }
0x152d   :  { %10896 = vmatprep.subr.msk.bf16.mxu0 %vm13178_vm4, %v10894_v39 }
0x152e   :  { %10899 = vmatpush3.bf16.xpose.msk.msra.mxu0 %vm13178_vm4, %v10894_v39 }
0x152f   :  { %10902 = vmatprep.subr.msk.bf16.mxu0 %vm13178_vm4, %v10900_v13 }
0x1536   :  { %10905 = vmatpush3.bf16.xpose.msk.msra.mxu0 %vm13178_vm4, %v10900_v13 }
0x1538   :  { %v11433_v50 = vpop.permute.xlu1 %11432 }
0x1539   :  { %v11435_v16 = vunpack.i.h.bf16 %v11433_v50  ;;  %v11434_v57 = vunpack.i.l.bf16 %v11433_v50 }
0x153b   :  { %v10906_v47 = vpack.c.bf16 %v11435_v16, %v11434_v57 }
0x153c   :  { %v11438_v55 = vpop.permute.xlu1 %11437 }
0x153d   :  { %v11440_v12 = vunpack.i.h.bf16 %v11438_v55  ;;  %v11439_v43 = vunpack.i.l.bf16 %v11438_v55  ;;  %10908 = vmatprep.subr.msk.bf16.mxu0 %vm13178_vm4, %v10906_v47 }
0x153e   :  { %10911 = vmatpush3.bf16.xpose.msk.msra.mxu0 %vm13178_vm4, %v10906_v47 }
0x153f   :  { %v10912_v6 = vpack.c.bf16 %v11440_v12, %v11439_v43 }
0x1541   :  { %10914 = vmatprep.subr.msk.bf16.mxu0 %vm13178_vm4, %v10912_v6 }
0x1546   :  { %10917 = vmatpush3.bf16.xpose.msk.msra.mxu0 %vm13178_vm4, %v10912_v6 }
0x1565   :  { %v11448_v29 = vpop.permute.xlu1 %11447 }
0x1566   :  { %v11443_v10 = vpop.permute.xlu0 %11442  ;;  %v11450_v1 = vunpack.i.h.bf16 %v11448_v29  ;;  %v11449_v5 = vunpack.i.l.bf16 %v11448_v29 }
0x1567   :  { %v11445_v38 = vunpack.i.h.bf16 %v11443_v10  ;;  %v11444_v39 = vunpack.i.l.bf16 %v11443_v10 }
0x1568   :  { %v10924_v50 = vpack.c.bf16 %v11450_v1, %v11449_v5 }
0x1569   :  { %v10918_v13 = vpack.c.bf16 %v11445_v38, %v11444_v39 }
0x156b   :  { %10920 = vmatprep.subr.msk.bf16.mxu0 %vm13178_vm4, %v10918_v13 }
0x156c   :  { %10923 = vmatpush3.bf16.xpose.msk.msra.mxu0 %vm13178_vm4, %v10918_v13 }
0x156d   :  { %10926 = vmatprep.subr.msk.bf16.mxu0 %vm13178_vm4, %v10924_v50 }
0x1574   :  { %10929 = vmatpush3.bf16.xpose.msk.msra.mxu0 %vm13178_vm4, %v10924_v50  ;;  %v15632_v50 = vmul.f32 0.35355338, %v15471_v4  ;;  %v15647_v4 = vmul.f32 0.35355338, %v15499_v36 }
0x1575   :  { %v11458_v16 = vpop.permute.xlu1 %11457 }
0x1576   :  { %v11453_v57 = vpop.permute.xlu0 %11452  ;;  %v11460_v47 = vunpack.i.h.bf16 %v11458_v16  ;;  %v11459_v55 = vunpack.i.l.bf16 %v11458_v16 }
0x1577   :  { %v11455_v12 = vunpack.i.h.bf16 %v11453_v57  ;;  %v11454_v43 = vunpack.i.l.bf16 %v11453_v57  ;;  %v15635_v57 = vmul.f32 0.35355338, %v15467_v35 }
0x1578   :  { %v10936_v10 = vpack.c.bf16 %v11460_v47, %v11459_v55  ;;  %v15642_v47 = vmul.f32 0.35355338, %v15469_v26  ;;  %v15657_v26 = vmul.f32 0.35355338, %v15495_v20  ;;  %v15679_v20 = vmul.f32 0.35355338, %v15529_v24 }
0x1579   :  { %v10930_v6 = vpack.c.bf16 %v11455_v12, %v11454_v43  ;;  %v5231_v1 = vpop.permute.xlu1 %5230  ;;  %v15654_v12 = vmul.f32 0.35355338, %v15501_v22  ;;  %v15667_v22 = vmul.f32 0.35355338, %v15527_v58  ;;  %v15689_v58 = vmul.f32 0.35355338, %v15525_v9 }
0x157a   :  { %v5229_v29 = vpop.permute.xlu0 %5228  ;;  %v15702_v24 = vmul.f32 0.35355338, %v15551_v46  ;;  %v15709_v9 = vmul.f32 0.35355338, %v15553_v40  ;;  %v15721_v46 = vld [vmem:[%s17912_s2] sm:$0xff] }
0x157b   :  { %10932 = vmatprep.subr.msk.bf16.mxu0 %vm13178_vm4, %v10930_v6  ;;  %10299 = vmatprep.subr.bf16.mxu1 %v5229_v29  ;;  %18285 = vst [vmem:[#allocation47_spill] sm:$0xff] %v15721_v46 }
0x157c   :  { %10300 = vmatpush3.bf16.msra.mxu1 %v5229_v29  ;;  %10935 = vmatpush3.bf16.xpose.msk.msra.mxu0 %vm13178_vm4, %v10930_v6  ;;  %v15664_v29 = vmul.f32 0.35355338, %v15497_v11  ;;  %v15682_v11 = vmul.f32 0.35355338, %v15523_v25  ;;  %v15699_v25 = vmul.f32 0.35355338, %v15557_v14 }
0x157d   :  { %10301 = vmatprep.subr.bf16.mxu1 %v5231_v1  ;;  %10938 = vmatprep.subr.msk.bf16.mxu0 %vm13178_vm4, %v10936_v10  ;;  %v5235_v38 = vpop.permute.xlu1 %5234 }
0x157e   :  { %v5233_v5 = vpop.permute.xlu0 %5232 }
0x1580   :  { %10302 = vmatpush3.bf16.msra.mxu1 %v5231_v1  ;;  %v15692_v1 = vmul.f32 0.35355338, %v15555_v60  ;;  %v15716_v60 = vld [vmem:[%s17912_s2 + $0x8] sm:$0xff] }
0x1581   :  { %10303 = vmatprep.subr.bf16.mxu1 %v5233_v5  ;;  %v5239_v13 = vpop.permute.xlu1 %5238  ;;  %18284 = vst [vmem:[#allocation49_spill] sm:$0xff] %v15716_v60 }
0x1582   :  { %v5237_v39 = vpop.permute.xlu0 %5236 }
0x1584   :  { %10304 = vmatpush3.bf16.msra.mxu1 %v5233_v5  ;;  %10941 = vmatpush3.bf16.xpose.msk.msra.mxu0 %vm13178_vm4, %v10936_v10 }
0x1585   :  { %10305 = vmatprep.subr.bf16.mxu1 %v5235_v38  ;;  %v15644_v55 = vpop.permute.xlu1 %11467 }
0x1586   :  { %v11463_v16 = vpop.permute.xlu0 %11462 }
0x1587   :  { %v11465_v43 = vunpack.i.h.bf16 %v11463_v16  ;;  %v11464_v6 = vunpack.i.l.bf16 %v11463_v16 }
0x1588   :  { %10306 = vmatpush3.bf16.msra.mxu1 %v5235_v38 }
0x1589   :  { %10307 = vmatprep.subr.bf16.mxu1 %v5237_v39  ;;  %v5243_v36 = vpop.permute.xlu1 %5242  ;;  %v15669_v10 = vpack.c.bf16 %v11465_v43, %v11464_v6  ;;  %v15742_v43 = vld [vmem:[%s17912_s2 + $0x10] sm:$0xff] }
0x158a   :  { %v5241_v35 = vpop.permute.xlu0 %5240  ;;  %18287 = vst [vmem:[#allocation50_spill] sm:$0xff] %v15742_v43 }
0x158b   :  { %10276 = vmatmul.mubr.msk.f32.vlgmr.msra.gmra.mrb[112].mxu0 %vm731_vm3, %v15632_v50 }
0x158c   :  { %10308 = vmatpush3.bf16.msra.mxu1 %v5237_v39  ;;  %10278 = vmatprep.mubr.msk.f32.mxu0 %vm731_vm3, %v15635_v57  ;;  %v15732_v39 = vld [vmem:[%s17912_s2 + $0x18] sm:$0xff] }
0x158d   :  { %10309 = vmatprep.subr.bf16.mxu1 %v5239_v13  ;;  %18286 = vst [vmem:[#allocation37_spill] sm:$0xff] %v15732_v39 }
0x158f   :  { %10279 = vmatmul.mubr.msk.f32.gmra.mrb[114].mxu0 %vm731_vm3, %v15642_v47 }
0x1590   :  { %10310 = vmatpush3.bf16.msra.mxu1 %v5239_v13  ;;  %10281 = vmatprep.mubr.msk.f32.mxu0 %vm731_vm3, %v15647_v4 }
0x1591   :  { %10311 = vmatprep.subr.bf16.mxu1 %v5241_v35 }
0x1593   :  { %10282 = vmatmul.mubr.msk.f32.gmra.mrb[116].mxu0 %vm731_vm3, %v15654_v12 }
0x1594   :  { %10312 = vmatpush3.bf16.msra.mxu1 %v5241_v35  ;;  %10284 = vmatprep.mubr.msk.f32.mxu0 %vm731_vm3, %v15657_v26 }
0x1595   :  { %10313 = vmatprep.subr.bf16.mxu1 %v5243_v36 }
0x1597   :  { %10285 = vmatmul.mubr.msk.f32.gmra.mrb[118].mxu0 %vm731_vm3, %v15664_v29 }
0x1598   :  { %10314 = vmatpush3.bf16.msra.mxu1 %v5243_v36  ;;  %10287 = vmatprep.mubr.msk.f32.mxu0 %vm731_vm3, %v15667_v22 }
0x1599   :  { %10944 = vmatprep.subr.msk.bf16.mxu1 %vm13178_vm4, %v15669_v10 }
0x159b   :  { %10288 = vmatmul.mubr.msk.f32.gmra.mrb[120].mxu0 %vm731_vm3, %v15679_v20 }
0x159c   :  { %10290 = vmatprep.mubr.msk.f32.mxu0 %vm731_vm3, %v15682_v11 }
0x159f   :  { %10291 = vmatmul.mubr.msk.f32.gmra.mrb[122].mxu0 %vm731_vm3, %v15689_v58 }
0x15a0   :  { %10293 = vmatprep.mubr.msk.f32.mxu0 %vm731_vm3, %v15692_v1 }
0x15a3   :  { %10294 = vmatmul.mubr.msk.f32.gmra.mrb[124].mxu0 %vm731_vm3, %v15699_v25 }
0x15a4   :  { %10296 = vmatprep.mubr.msk.f32.mxu0 %vm731_vm3, %v15702_v24 }
0x15a7   :  { %10297 = vmatmul.mubr.msk.f32.gmra.mrb[126].mxu0 %vm731_vm3, %v15709_v9 }
0x165e   :  { %v10277_v14 = vpop.f32.mrb[112].mxu0 }
0x165f   :  { %v15724_v5 = vadd.f32 %v10277_v14, %v15716_v60  ;;  %v4989_v38 = vpop.f32.mrb[113].mxu0 }
0x1660   :  { %v15727_v40 = vadd.f32 %v4989_v38, %v15721_v46 }
0x1661   :  { %5070 = vmax.xlane.f32.xlu1 %v15724_v5 }
0x1662   :  { %v10280_v13 = vpop.f32.mrb[114].mxu0  ;;  %5068 = vmax.xlane.f32.xlu0 %v15727_v40 }
0x1663   :  { %v15737_v16 = vadd.f32 %v10280_v13, %v15732_v39  ;;  %v4999_v35 = vpop.f32.mrb[115].mxu0 }
0x1664   :  { %v15746_v14 = vadd.f32 %v4999_v35, %v15742_v43  ;;  %v15756_v35 = vld [vmem:[%s17912_s2 + $0x28] sm:$0xff] }
0x1665   :  { %18288 = vst [vmem:[#allocation36_spill] sm:$0xff] %v15756_v35 }
0x1666   :  { %v10283_v6 = vpop.f32.mrb[116].mxu0  ;;  %5074 = vmax.xlane.f32.xlu0 %v15737_v16 }
0x1667   :  { %v5009_v36 = vpop.f32.mrb[117].mxu0  ;;  %v15759_v32 = vadd.f32 %v10283_v6, %v15756_v35  ;;  %v15778_v6 = vld [vmem:[%s17912_s2 + $0x20] sm:$0xff] }
0x1668   :  { %18291 = vst [vmem:[#allocation52_spill] sm:$0xff] %v15778_v6  ;;  %v15785_v48 = vadd.f32 %v5009_v36, %v15778_v6  ;;  %v15813_v6 = vld [vmem:[%s17912_s2 + $0x40] sm:$0xff] }
0x1669   :  { %18295 = vst [vmem:[#allocation56_spill] sm:$0xff] %v15813_v6 }
0x166a   :  { %v10286_v38 = vpop.f32.mrb[118].mxu0  ;;  %5072 = vmax.xlane.f32.xlu0 %v15746_v14 }
0x166b   :  { %v5019_v59 = vpop.f32.mrb[119].mxu0  ;;  %v15768_v30 = vadd.f32 %v10286_v38, %v15764_v49  ;;  %v15790_v38 = vld [vmem:[%s17912_s2 + $0x58] sm:$0xff] }
0x166c   :  { %18292 = vst [vmem:[#allocation55_spill] sm:$0xff] %v15790_v38  ;;  %v15803_v36 = vadd.f32 %v5019_v59, %v15795_v3  ;;  %v15826_v3 = vld [vmem:[%s17912_s2 + $0x78] sm:$0xff] }
0x166d   :  { %18296 = vst [vmem:[#allocation59_spill] sm:$0xff] %v15826_v3 }
0x166e   :  { %v10289_v45 = vpop.f32.mrb[120].mxu0 }
0x166f   :  { %v5029_v13 = vpop.f32.mrb[121].mxu0  ;;  %v15782_v2 = vadd.f32 %v10289_v45, %v15773_v42 }
0x1670   :  { %v15821_v59 = vadd.f32 %v5029_v13, %v15813_v6  ;;  %v15844_v6 = vld [vmem:[%s17912_s2 + $0x60] sm:$0xff] }
0x1671   :  { %18298 = vst [vmem:[#allocation62_spill] sm:$0xff] %v15844_v6 }
0x1672   :  { %11477 = vrot.lane.b32.xlu1 %v15505_v33, %s12609_s17  ;;  %v10292_v18 = vpop.f32.mrb[122].mxu0 }
0x1673   :  { %v5039_v51 = vpop.f32.mrb[123].mxu0  ;;  %v15800_v45 = vadd.f32 %v10292_v18, %v15790_v38  ;;  %v15831_v38 = vld [vmem:[%s17912_s2 + $0x50] sm:$0xff] }
0x1674   :  { %18297 = vst [vmem:[#allocation57_spill] sm:$0xff] %v15831_v38  ;;  %v15839_v13 = vadd.f32 %v5039_v51, %v15831_v38 }
0x1676   :  { %v10295_v34 = vpop.f32.mrb[124].mxu0 }
0x1677   :  { %v5049_v19 = vpop.f32.mrb[125].mxu0  ;;  %v15818_v18 = vadd.f32 %v10295_v34, %v15808_v44 }
0x1678   :  { %v15849_v44 = vadd.f32 %v5049_v19, %v15844_v6 }
0x167a   :  { %v10298_v17 = vpop.f32.mrb[126].mxu0 }
0x167b   :  { %v5059_v56 = vpop.f32.mrb[127].mxu0  ;;  %v15836_v34 = vadd.f32 %v10298_v17, %v15826_v3  ;;  %v15854_v17 = vld [vmem:[%s17912_s2 + $0x70] sm:$0xff] }
0x167c   :  { %18299 = vst [vmem:[#allocation60_spill] sm:$0xff] %v15854_v17  ;;  %v15858_v51 = vadd.f32 %v5059_v56, %v15854_v17 }
0x1680   :  { %11472 = vrot.lane.b32.xlu0 %v15513_v53, %s12609_s17 }
0x1696   :  { %5078 = vmax.xlane.f32.xlu1 %v15759_v32 }
0x169a   :  { %5082 = vmax.xlane.f32.xlu1 %v15768_v30 }
0x169e   :  { %5086 = vmax.xlane.f32.xlu1 %v15782_v2 }
0x169f   :  { %5076 = vmax.xlane.f32.xlu0 %v15785_v48 }
0x16a2   :  { %5090 = vmax.xlane.f32.xlu1 %v15800_v45 }
0x16a3   :  { %5080 = vmax.xlane.f32.xlu0 %v15803_v36 }
0x16a6   :  { %5094 = vmax.xlane.f32.xlu1 %v15818_v18 }
0x16a7   :  { %5084 = vmax.xlane.f32.xlu0 %v15821_v59 }
0x16aa   :  { %5098 = vmax.xlane.f32.xlu1 %v15836_v34 }
0x16ab   :  { %5088 = vmax.xlane.f32.xlu0 %v15839_v13 }
0x16af   :  { %5092 = vmax.xlane.f32.xlu0 %v15849_v44 }
0x16b3   :  { %5096 = vmax.xlane.f32.xlu0 %v15858_v51 }
0x16ee   :  { %v5071_v38 = vpop.xlane.xlu1 %5070 }
0x16ef   :  { %v5101_v3 = vsub.f32 %v15724_v5, %v5071_v38  ;;  %v5069_v42 = vpop.xlane.xlu0 %5068 }
0x16f0   :  { %v5100_v49 = vsub.f32 %v15727_v40, %v5069_v42 }
0x16f1   :  { %v5118_v19 = vmul.f32 1.442695, %v5101_v3 }
0x16f2   :  { %v5116_v6 = vmul.f32 1.442695, %v5100_v49  ;;  %v15881_v49 = vpop.permute.xlu1 %11477 }
0x16f3   :  { %12146 = vpow2.f32 %v5118_v19  ;;  %v5075_v35 = vpop.xlane.xlu0 %5074 }
0x16f4   :  { %12148 = vpow2.f32 %v5116_v6  ;;  %v5103_v53 = vsub.f32 %v15737_v16, %v5075_v35 }
0x16f6   :  { %v5122_v33 = vmul.f32 1.442695, %v5103_v53 }
0x16f7   :  { %v5073_v43 = vpop.xlane.xlu0 %5072 }
0x16f8   :  { %12150 = vpow2.f32 %v5122_v33  ;;  %v5102_v56 = vsub.f32 %v15746_v14, %v5073_v43 }
0x16fa   :  { %v5120_v17 = vmul.f32 1.442695, %v5102_v56 }
0x16fb   :  { %v15883_v40 = vpop.permute.xlu0 %11472 }
0x16fc   :  { %12152 = vpow2.f32 %v5120_v17 }
0x16fd   :  { %v15865_v39 = vpop.eup %12146 }
0x16fe   :  { %v15867_v5 = vpop.eup %12148  ;;  %5150 = vadd.xlane.f32.xlu0 %v15865_v39 }
0x16ff   :  { %5148 = vadd.xlane.f32.xlu1 %v15867_v5 }
0x1702   :  { %v15871_v3 = vpop.eup %12150 }
0x1703   :  { %5154 = vadd.xlane.f32.xlu1 %v15871_v3 }
0x1706   :  { %v15874_v42 = vpop.eup %12152 }
0x1707   :  { %5152 = vadd.xlane.f32.xlu1 %v15874_v42 }
0x1714   :  { %11482 = vrot.lane.b32.xlu0 %v15541_v21, %s12609_s17 }
0x1718   :  { %11487 = vrot.lane.b32.xlu1 %v15533_v63, %s12609_s17 }
0x1723   :  { %v5079_v33 = vpop.xlane.xlu1 %5078 }
0x1724   :  { %v5105_v16 = vsub.f32 %v15759_v32, %v5079_v33 }
0x1726   :  { %v5126_v14 = vmul.f32 1.442695, %v5105_v16 }
0x1727   :  { %v5083_v53 = vpop.xlane.xlu1 %5082 }
0x1728   :  { %v5107_v35 = vsub.f32 %v15768_v30, %v5083_v53  ;;  %12154 = vpow2.f32 %v5126_v14 }
0x172a   :  { %v5130_v63 = vmul.f32 1.442695, %v5107_v35 }
0x172b   :  { %v5087_v43 = vpop.xlane.xlu1 %5086 }
0x172c   :  { %v5077_v6 = vpop.xlane.xlu0 %5076  ;;  %v5109_v38 = vsub.f32 %v15782_v2, %v5087_v43 }
0x172d   :  { %v5104_v17 = vsub.f32 %v15785_v48, %v5077_v6 }
0x172e   :  { %v5134_v46 = vmul.f32 1.442695, %v5109_v38 }
0x172f   :  { %v5124_v19 = vmul.f32 1.442695, %v5104_v17  ;;  %v5091_v56 = vpop.xlane.xlu1 %5090 }
0x1730   :  { %v5081_v21 = vpop.xlane.xlu0 %5080  ;;  %v5111_v30 = vsub.f32 %v15800_v45, %v5091_v56 }
0x1731   :  { %12156 = vpow2.f32 %v5124_v19  ;;  %v5106_v60 = vsub.f32 %v15803_v36, %v5081_v21 }
0x1732   :  { %12158 = vpow2.f32 %v5130_v63  ;;  %v5138_v43 = vmul.f32 1.442695, %v5111_v30  ;;  %v15893_v35 = vpop.eup %12154 }
0x1733   :  { %v5128_v32 = vmul.f32 1.442695, %v5106_v60  ;;  %v5095_v33 = vpop.xlane.xlu1 %5094  ;;  %12160 = vpow2.f32 %v5134_v46 }
0x1734   :  { %v5085_v16 = vpop.xlane.xlu0 %5084  ;;  %v5113_v63 = vsub.f32 %v15818_v18, %v5095_v33 }
0x1735   :  { %v5108_v2 = vsub.f32 %v15821_v59, %v5085_v16  ;;  %12162 = vpow2.f32 %v5128_v32 }
0x1736   :  { %v5142_v17 = vmul.f32 1.442695, %v5113_v63 }
0x1737   :  { %v5132_v53 = vmul.f32 1.442695, %v5108_v2  ;;  %v5099_v6 = vpop.xlane.xlu1 %5098 }
0x1738   :  { %v5089_v48 = vpop.xlane.xlu0 %5088  ;;  %v5115_v45 = vsub.f32 %v15836_v34, %v5099_v6 }
0x1739   :  { %12164 = vpow2.f32 %v5132_v53  ;;  %v5110_v14 = vsub.f32 %v15839_v13, %v5089_v48 }
0x173a   :  { %12166 = vpow2.f32 %v5138_v43  ;;  %v5146_v19 = vmul.f32 1.442695, %v5115_v45 }
0x173b   :  { %v15895_v21 = vpop.eup %12156  ;;  %v5136_v60 = vmul.f32 1.442695, %v5110_v14 }
0x173c   :  { %5158 = vadd.xlane.f32.xlu1 %v15893_v35  ;;  %5156 = vadd.xlane.f32.xlu0 %v15895_v21  ;;  %v5093_v46 = vpop.xlane.xlu0 %5092  ;;  %v15902_v59 = vpop.eup %12158 }
0x173d   :  { %v5112_v36 = vsub.f32 %v15849_v44, %v5093_v46  ;;  %v15904_v13 = vpop.eup %12160  ;;  %12168 = vpow2.f32 %v5136_v60 }
0x173f   :  { %v5140_v38 = vmul.f32 1.442695, %v5112_v36  ;;  %v15909_v32 = vpop.eup %12162 }
0x1740   :  { %5166 = vadd.xlane.f32.xlu1 %v15904_v13  ;;  %5162 = vadd.xlane.f32.xlu0 %v15902_v59  ;;  %v5097_v18 = vpop.xlane.xlu0 %5096 }
0x1741   :  { %12170 = vpow2.f32 %v5140_v38  ;;  %v5114_v56 = vsub.f32 %v15858_v51, %v5097_v18  ;;  %v11470_v18 = vunpack.i.h.bf16 %v15644_v55 }
0x1742   :  { %12172 = vpow2.f32 %v5142_v17 }
0x1743   :  { %v15911_v34 = vpop.eup %12164  ;;  %12174 = vpow2.f32 %v5146_v19  ;;  %v5144_v44 = vmul.f32 1.442695, %v5114_v56  ;;  %v11469_v19 = vunpack.i.l.bf16 %v15644_v55  ;;  %v11480_v55 = vunpack.i.h.bf16 %v15881_v49 }
0x1744   :  { %5160 = vadd.xlane.f32.xlu0 %v15909_v32  ;;  %5164 = vadd.xlane.f32.xlu1 %v15911_v34  ;;  %v15915_v33 = vpop.eup %12166 }
0x1745   :  { %12176 = vpow2.f32 %v5144_v44 }
0x1747   :  { %v15918_v16 = vpop.eup %12168 }
0x1748   :  { %5170 = vadd.xlane.f32.xlu1 %v15915_v33 }
0x174b   :  { %v15920_v30 = vpop.eup %12170 }
0x174c   :  { %5168 = vadd.xlane.f32.xlu1 %v15918_v16  ;;  %5172 = vadd.xlane.f32.xlu0 %v15920_v30  ;;  %v15924_v51 = vpop.eup %12172 }
0x174d   :  { %v15926_v2 = vpop.eup %12174 }
0x174f   :  { %v15930_v53 = vpop.eup %12176 }
0x1750   :  { %5174 = vadd.xlane.f32.xlu1 %v15924_v51  ;;  %5178 = vadd.xlane.f32.xlu0 %v15926_v2 }
0x1754   :  { %5176 = vadd.xlane.f32.xlu0 %v15930_v53 }
0x1761   :  { %11497 = vrot.lane.b32.xlu1 %v15561_v8, %s12609_s17 }
0x1765   :  { %5367 = vrot.lane.b32.xlu1 %v15632_v50, %s12610_s1 }
0x1769   :  { %5371 = vrot.lane.b32.xlu1 %v15642_v47, %s12610_s1 }
0x176a   :  { %11492 = vrot.lane.b32.xlu0 %v15569_v31, %s12609_s17 }
0x176d   :  { %5375 = vrot.lane.b32.xlu1 %v15654_v12, %s12610_s1 }
0x176e   :  { %5365 = vrot.lane.b32.xlu0 %v15473_v7, %s12610_s1 }
0x1771   :  { %5379 = vrot.lane.b32.xlu1 %v15664_v29, %s12610_s1 }
0x1772   :  { %5369 = vrot.lane.b32.xlu0 %v15635_v57, %s12610_s1 }
0x1775   :  { %5383 = vrot.lane.b32.xlu1 %v15679_v20, %s12610_s1 }
0x1776   :  { %5373 = vrot.lane.b32.xlu0 %v15647_v4, %s12610_s1 }
0x1779   :  { %5387 = vrot.lane.b32.xlu1 %v15689_v58, %s12610_s1 }
0x177a   :  { %5377 = vrot.lane.b32.xlu0 %v15657_v26, %s12610_s1 }
0x177d   :  { %5391 = vrot.lane.b32.xlu1 %v15699_v25, %s12610_s1 }
0x177e   :  { %5381 = vrot.lane.b32.xlu0 %v15667_v22, %s12610_s1 }
0x1781   :  { %5395 = vrot.lane.b32.xlu1 %v15709_v9, %s12610_s1 }
0x1782   :  { %5385 = vrot.lane.b32.xlu0 %v15682_v11, %s12610_s1 }
0x1785   :  { %5792 = vrot.lane.b32.xlu1 %v15481_v41, %s12611_s12 }
0x1786   :  { %5389 = vrot.lane.b32.xlu0 %v15692_v1, %s12610_s1 }
0x1789   :  { %5796 = vrot.lane.b32.xlu1 %v15509_v54, %s12611_s12 }
0x178a   :  { %5393 = vrot.lane.b32.xlu0 %v15702_v24, %s12610_s1 }
0x178b   :  { %v5151_v48 = vpop.xlane.xlu0 %5150 }
0x178c   :  { %12178 = vrcp.f32 %v5151_v48  ;;  %v5149_v43 = vpop.xlane.xlu1 %5148  ;;  %v11475_v48 = vunpack.i.h.bf16 %v15883_v40 }
0x178d   :  { %12180 = vrcp.f32 %v5149_v43  ;;  %5800 = vrot.lane.b32.xlu1 %v15537_v61, %s12611_s12  ;;  %v11474_v43 = vunpack.i.l.bf16 %v15883_v40 }
0x178e   :  { %5790 = vrot.lane.b32.xlu0 %v15489_v27, %s12611_s12 }
0x1790   :  { %v5155_v14 = vpop.xlane.xlu1 %5154 }
0x1791   :  { %5804 = vrot.lane.b32.xlu1 %v15565_v28, %s12611_s12  ;;  %12182 = vrcp.f32 %v5155_v14  ;;  %v10954_v14 = vpack.c.bf16 %v11475_v48, %v11474_v43 }
0x1792   :  { %5794 = vrot.lane.b32.xlu0 %v15517_v23, %s12611_s12 }
0x1794   :  { %v5153_v6 = vpop.xlane.xlu1 %5152 }
0x1795   :  { %12184 = vrcp.f32 %v5153_v6  ;;  %11507 = vrot.lane.b32.xlu1 %v15477_v37, %s12612_s4 }
0x1796   :  { %v12179_v63 = vpop.eup %12178  ;;  %5798 = vrot.lane.b32.xlu0 %v15545_v52, %s12611_s12 }
0x1797   :  { %v12181_v60 = vpop.eup %12180  ;;  %v5197_v46 = vmul.f32 %v12179_v63, %v15865_v39 }
0x1798   :  { %v5196_v45 = vmul.f32 %v12181_v60, %v15867_v5  ;;  %v10948_v5 = vpack.c.bf16 %v11470_v18, %v11469_v19  ;;  %v11488_v60 = vpop.permute.xlu1 %11487 }
0x179a   :  { %5802 = vrot.lane.b32.xlu0 %v15573_v62, %s12611_s12  ;;  %v5212_v36 = vpack.c.bf16 %v5197_v46, %v5196_v45  ;;  %v11490_v46 = vunpack.i.h.bf16 %v11488_v60 }
0x179b   :  { %v12183_v38 = vpop.eup %12182 }
0x179c   :  { %10315 = vmatprep.mubr.bf16.mxu1 %v5212_v36  ;;  %v5199_v56 = vmul.f32 %v12183_v38, %v15871_v3  ;;  %v11479_v3 = vunpack.i.l.bf16 %v15881_v49  ;;  %v11489_v49 = vunpack.i.l.bf16 %v11488_v60 }
0x179e   :  { %11502 = vrot.lane.b32.xlu0 %v15486_v15, %s12612_s4  ;;  %v10972_v45 = vpack.c.bf16 %v11490_v46, %v11489_v49 }
0x179f   :  { %v12185_v17 = vpop.eup %12184 }
0x17a0   :  { %v5198_v39 = vmul.f32 %v12185_v17, %v15874_v42  ;;  %v10960_v42 = vpack.c.bf16 %v11480_v55, %v11479_v3 }
0x17a2   :  { %v5213_v44 = vpack.c.bf16 %v5199_v56, %v5198_v39 }
0x17a4   :  { %10316 = vmatmul.mubr.bf16.vlgmr.msra.gmra.mrb[112].mxu1 %v5213_v44 }
0x17a5   :  { %10947 = vmatpush3.bf16.xpose.msk.msra.mxu1 %vm13178_vm4, %v15669_v10  ;;  %v11483_v10 = vpop.permute.xlu0 %11482 }
0x17a6   :  { %10950 = vmatprep.subr.msk.bf16.mxu1 %vm13178_vm4, %v10948_v5  ;;  %v11485_v40 = vunpack.i.h.bf16 %v11483_v10  ;;  %v11484_v6 = vunpack.i.l.bf16 %v11483_v10 }
0x17a8   :  { %v10966_v63 = vpack.c.bf16 %v11485_v40, %v11484_v6 }
0x17ad   :  { %10953 = vmatpush3.bf16.xpose.msk.msra.mxu1 %vm13178_vm4, %v10948_v5 }
0x17ae   :  { %10956 = vmatprep.subr.msk.bf16.mxu1 %vm13178_vm4, %v10954_v14 }
0x17b5   :  { %10959 = vmatpush3.bf16.xpose.msk.msra.mxu1 %vm13178_vm4, %v10954_v14 }
0x17b6   :  { %10962 = vmatprep.subr.msk.bf16.mxu1 %vm13178_vm4, %v10960_v42 }
0x17bd   :  { %10965 = vmatpush3.bf16.xpose.msk.msra.mxu1 %vm13178_vm4, %v10960_v42 }
0x17be   :  { %10968 = vmatprep.subr.msk.bf16.mxu1 %vm13178_vm4, %v10966_v63 }
0x17c5   :  { %10971 = vmatpush3.bf16.xpose.msk.msra.mxu1 %vm13178_vm4, %v10966_v63 }
0x17c6   :  { %10974 = vmatprep.subr.msk.bf16.mxu1 %vm13178_vm4, %v10972_v45 }
0x17c9   :  { %v5159_v36 = vpop.xlane.xlu1 %5158  ;;  %v5157_v38 = vpop.xlane.xlu0 %5156 }
0x17ca   :  { %12186 = vrcp.f32 %v5159_v36 }
0x17cb   :  { %12188 = vrcp.f32 %v5157_v38 }
0x17cd   :  { %10977 = vmatpush3.bf16.xpose.msk.msra.mxu1 %vm13178_vm4, %v10972_v45  ;;  %v5167_v17 = vpop.xlane.xlu1 %5166  ;;  %v5163_v18 = vpop.xlane.xlu0 %5162 }
0x17ce   :  { %12190 = vrcp.f32 %v5167_v17 }
0x17cf   :  { %12192 = vrcp.f32 %v5163_v18 }
0x17d1   :  { %v5165_v19 = vpop.xlane.xlu1 %5164  ;;  %v5161_v56 = vpop.xlane.xlu0 %5160 }
0x17d2   :  { %12194 = vrcp.f32 %v5165_v19 }
0x17d3   :  { %12196 = vrcp.f32 %v5161_v56 }
0x17d4   :  { %v12187_v39 = vpop.eup %12186 }
0x17d5   :  { %v12189_v44 = vpop.eup %12188  ;;  %v5171_v5 = vpop.xlane.xlu1 %5170  ;;  %v5201_v48 = vmul.f32 %v12187_v39, %v15893_v35 }
0x17d6   :  { %v5200_v43 = vmul.f32 %v12189_v44, %v15895_v21  ;;  %12198 = vrcp.f32 %v5171_v5 }
0x17d8   :  { %v5214_v14 = vpack.c.bf16 %v5201_v48, %v5200_v43  ;;  %v12191_v42 = vpop.eup %12190 }
0x17d9   :  { %v5169_v55 = vpop.xlane.xlu1 %5168  ;;  %v5173_v3 = vpop.xlane.xlu0 %5172  ;;  %v5205_v49 = vmul.f32 %v12191_v42, %v15904_v13 }
0x17da   :  { %12200 = vrcp.f32 %v5169_v55  ;;  %10319 = vmatprep.mubr.bf16.mxu1 %v5214_v14  ;;  %v12193_v10 = vpop.eup %12192 }
0x17db   :  { %12202 = vrcp.f32 %v5173_v3  ;;  %v5203_v21 = vmul.f32 %v12193_v10, %v15902_v59 }
0x17dc   :  { %v12195_v40 = vpop.eup %12194 }
0x17dd   :  { %v12197_v6 = vpop.eup %12196  ;;  %v5175_v63 = vpop.xlane.xlu1 %5174  ;;  %v5204_v46 = vmul.f32 %v12195_v40, %v15911_v34 }
0x17de   :  { %v5179_v60 = vpop.xlane.xlu0 %5178  ;;  %12204 = vrcp.f32 %v5175_v63  ;;  %v5202_v35 = vmul.f32 %v12197_v6, %v15909_v32 }
0x17df   :  { %v5216_v45 = vpack.c.bf16 %v5205_v49, %v5204_v46  ;;  %12206 = vrcp.f32 %v5179_v60 }
0x17e0   :  { %v5215_v36 = vpack.c.bf16 %v5203_v21, %v5202_v35  ;;  %v12199_v18 = vpop.eup %12198 }
0x17e1   :  { %v11498_v38 = vpop.permute.xlu1 %11497  ;;  %v5207_v13 = vmul.f32 %v12199_v18, %v15915_v33 }
0x17e2   :  { %v5177_v17 = vpop.xlane.xlu0 %5176  ;;  %10320 = vmatmul.mubr.bf16.gmra.mrb[116].mxu1 %v5215_v36  ;;  %v11500_v32 = vunpack.i.h.bf16 %v11498_v38  ;;  %v11499_v5 = vunpack.i.l.bf16 %v11498_v38 }
0x17e3   :  { %12208 = vrcp.f32 %v5177_v17  ;;  %10323 = vmatprep.mubr.bf16.mxu1 %v5216_v45 }
0x17e4   :  { %v12201_v19 = vpop.eup %12200  ;;  %v10984_v63 = vpack.c.bf16 %v11500_v32, %v11499_v5 }
0x17e5   :  { %v5368_v56 = vpop.permute.xlu1 %5367  ;;  %v5206_v34 = vmul.f32 %v12201_v19, %v15918_v16  ;;  %v12203_v44 = vpop.eup %12202 }
0x17e6   :  { %v11493_v39 = vpop.permute.xlu0 %11492  ;;  %v5208_v10 = vmul.f32 %v12203_v44, %v15920_v30 }
0x17e7   :  { %v11495_v59 = vunpack.i.h.bf16 %v11493_v39  ;;  %v11494_v48 = vunpack.i.l.bf16 %v11493_v39  ;;  %v5217_v43 = vpack.c.bf16 %v5207_v13, %v5206_v34 }
0x17e8   :  { %v12205_v14 = vpop.eup %12204 }
0x17e9   :  { %v10978_v55 = vpack.c.bf16 %v11495_v59, %v11494_v48  ;;  %v5372_v3 = vpop.permute.xlu1 %5371  ;;  %v5209_v40 = vmul.f32 %v12205_v14, %v15924_v51  ;;  %v12207_v6 = vpop.eup %12206 }
0x17ea   :  { %v5366_v42 = vpop.permute.xlu0 %5365  ;;  %10324 = vmatmul.mubr.bf16.gmra.mrb[120].mxu1 %v5217_v43  ;;  %v5211_v51 = vmul.f32 %v12207_v6, %v15926_v2 }
0x17eb   :  { %10980 = vmatprep.subr.msk.bf16.mxu1 %vm13178_vm4, %v10978_v55  ;;  %v5218_v33 = vpack.c.bf16 %v5209_v40, %v5208_v10 }
0x17ec   :  { %10983 = vmatpush3.bf16.xpose.msk.msra.mxu1 %vm13178_vm4, %v10978_v55 }
0x17ed   :  { %v12209_v16 = vpop.eup %12208  ;;  %10986 = vmatprep.subr.msk.bf16.mxu1 %vm13178_vm4, %v10984_v63  ;;  %v5376_v60 = vpop.permute.xlu1 %5375  ;;  %10327 = vmatprep.mubr.bf16.mxu1 %v5218_v33 }
0x17ee   :  { %v5370_v46 = vpop.permute.xlu0 %5369  ;;  %v5210_v30 = vmul.f32 %v12209_v16, %v15930_v53 }
0x17f0   :  { %v5219_v49 = vpack.c.bf16 %v5211_v51, %v5210_v30 }
0x17f1   :  { %v5380_v35 = vpop.permute.xlu1 %5379 }
0x17f2   :  { %v5374_v21 = vpop.permute.xlu0 %5373  ;;  %10328 = vmatmul.mubr.bf16.gmra.mrb[124].mxu1 %v5219_v49 }
0x17f3   :  { %10363 = vmatprep.mubr.msk.f32.mxu1 %vm731_vm3, %v5366_v42 }
0x17f4   :  { %10989 = vmatpush3.bf16.xpose.msk.msra.mxu1 %vm13178_vm4, %v10984_v63 }
0x17f5   :  { %v5384_v45 = vpop.permute.xlu1 %5383 }
0x17f6   :  { %v5378_v36 = vpop.permute.xlu0 %5377 }
0x17f9   :  { %v5388_v38 = vpop.permute.xlu1 %5387 }
0x17fa   :  { %v5382_v17 = vpop.permute.xlu0 %5381 }
0x17fb   :  { %10364 = vmatmul.mubr.msk.f32.vlgmr.msra.gmra.mrb[128].mxu1 %vm731_vm3, %v5368_v56 }
0x17fc   :  { %10366 = vmatprep.mubr.msk.f32.mxu1 %vm731_vm3, %v5370_v46 }
0x17fd   :  { %v5392_v2 = vpop.permute.xlu1 %5391 }
0x17fe   :  { %v5386_v53 = vpop.permute.xlu0 %5385 }
0x17ff   :  { %10367 = vmatmul.mubr.msk.f32.gmra.mrb[130].mxu1 %vm731_vm3, %v5372_v3 }
0x1800   :  { %10369 = vmatprep.mubr.msk.f32.mxu1 %vm731_vm3, %v5374_v21 }
0x1801   :  { %v5396_v19 = vpop.permute.xlu1 %5395 }
0x1802   :  { %v5390_v18 = vpop.permute.xlu0 %5389 }
0x1803   :  { %10370 = vmatmul.mubr.msk.f32.gmra.mrb[132].mxu1 %vm731_vm3, %v5376_v60 }
0x1804   :  { %10372 = vmatprep.mubr.msk.f32.mxu1 %vm731_vm3, %v5378_v36 }
0x1805   :  { %v5793_v34 = vpop.permute.xlu1 %5792 }
0x1806   :  { %v5394_v39 = vpop.permute.xlu0 %5393 }
0x1807   :  { %10373 = vmatmul.mubr.msk.f32.gmra.mrb[134].mxu1 %vm731_vm3, %v5380_v35 }
0x1808   :  { %10375 = vmatprep.mubr.msk.f32.mxu1 %vm731_vm3, %v5382_v17  ;;  %v18316_v17 = vld [vmem:[#allocation49_spill] sm:$0xff] }
0x1809   :  { %v5797_v44 = vpop.permute.xlu1 %5796 }
0x180a   :  { %v5791_v56 = vpop.permute.xlu0 %5790 }
0x180b   :  { %10376 = vmatmul.mubr.msk.f32.gmra.mrb[136].mxu1 %vm731_vm3, %v5384_v45  ;;  %10387 = vmatprep.subr.bf16.mxu0 %v5791_v56 }
0x180c   :  { %10378 = vmatprep.mubr.msk.f32.mxu1 %vm731_vm3, %v5386_v53  ;;  %10388 = vmatpush3.bf16.msra.mxu0 %v5791_v56  ;;  %v18318_v56 = vld [vmem:[#allocation37_spill] sm:$0xff] }
0x180d   :  { %10389 = vmatprep.subr.bf16.mxu0 %v5793_v34  ;;  %v5801_v59 = vpop.permute.xlu1 %5800 }
0x180e   :  { %v5795_v13 = vpop.permute.xlu0 %5794 }
0x180f   :  { %10379 = vmatmul.mubr.msk.f32.gmra.mrb[138].mxu1 %vm731_vm3, %v5388_v38 }
0x1810   :  { %10381 = vmatprep.mubr.msk.f32.mxu1 %vm731_vm3, %v5390_v18  ;;  %10390 = vmatpush3.bf16.msra.mxu0 %v5793_v34  ;;  %v18317_v18 = vld [vmem:[#allocation47_spill] sm:$0xff] }
0x1811   :  { %10391 = vmatprep.subr.bf16.mxu0 %v5795_v13  ;;  %v5805_v55 = vpop.permute.xlu1 %5804 }
0x1812   :  { %v5799_v32 = vpop.permute.xlu0 %5798 }
0x1813   :  { %10382 = vmatmul.mubr.msk.f32.gmra.mrb[140].mxu1 %vm731_vm3, %v5392_v2 }
0x1814   :  { %10384 = vmatprep.mubr.msk.f32.mxu1 %vm731_vm3, %v5394_v39  ;;  %10392 = vmatpush3.bf16.msra.mxu0 %v5795_v13 }
0x1815   :  { %10393 = vmatprep.subr.bf16.mxu0 %v5797_v44 }
0x1816   :  { %v5803_v5 = vpop.permute.xlu0 %5802 }
0x1817   :  { %10385 = vmatmul.mubr.msk.f32.gmra.mrb[142].mxu1 %vm731_vm3, %v5396_v19 }
0x1818   :  { %10394 = vmatpush3.bf16.msra.mxu0 %v5797_v44 }
0x1819   :  { %10395 = vmatprep.subr.bf16.mxu0 %v5799_v32 }
0x181a   :  { %v11503_v48 = vpop.permute.xlu0 %11502 }
0x181b   :  { %v11505_v43 = vunpack.i.h.bf16 %v11503_v48  ;;  %v11504_v14 = vunpack.i.l.bf16 %v11503_v48 }
0x181c   :  { %10396 = vmatpush3.bf16.msra.mxu0 %v5799_v32 }
0x181d   :  { %10397 = vmatprep.subr.bf16.mxu0 %v5801_v59  ;;  %v16058_v3 = vpack.c.bf16 %v11505_v43, %v11504_v14 }
0x1820   :  { %10398 = vmatpush3.bf16.msra.mxu0 %v5801_v59 }
0x1821   :  { %10399 = vmatprep.subr.bf16.mxu0 %v5803_v5 }
0x1824   :  { %10400 = vmatpush3.bf16.msra.mxu0 %v5803_v5  ;;  %v18319_v5 = vld [vmem:[#allocation50_spill] sm:$0xff] }
0x1825   :  { %10401 = vmatprep.subr.bf16.mxu0 %v5805_v55 }
0x1828   :  { %10402 = vmatpush3.bf16.msra.mxu0 %v5805_v55 }
0x1829   :  { %10992 = vmatprep.subr.msk.bf16.mxu0 %vm13178_vm4, %v16058_v3 }
0x1877   :  { %v16063_v42 = vpop.f32.mrb[112].mxu1 }
0x1878   :  { %18300 = vst [vmem:[#allocation63_spill] sm:$0xff] %v16063_v42  ;;  %v16065_v10 = vpop.f32.mrb[113].mxu1 }
0x1879   :  { %18301 = vst [vmem:[#allocation61_spill] sm:$0xff] %v16065_v10  ;;  %v16067_v40 = vpop.f32.mrb[114].mxu1 }
0x187a   :  { %18302 = vst [vmem:[#allocation66_spill] sm:$0xff] %v16067_v40  ;;  %v16069_v6 = vpop.f32.mrb[115].mxu1 }
0x187b   :  { %18303 = vst [vmem:[#allocation64_spill] sm:$0xff] %v16069_v6 }
0x18b5   :  { %v16071_v63 = vpop.f32.mrb[116].mxu1 }
0x18b6   :  { %18304 = vst [vmem:[#allocation67_spill] sm:$0xff] %v16071_v63  ;;  %v16073_v33 = vpop.f32.mrb[117].mxu1  ;;  %v18327_v63 = vld [vmem:[#allocation53_spill] sm:$0xff] }
0x18b7   :  { %18305 = vst [vmem:[#allocation65_spill] sm:$0xff] %v16073_v33  ;;  %v16075_v16 = vpop.f32.mrb[118].mxu1  ;;  %v18326_v33 = vld [vmem:[#allocation55_spill] sm:$0xff] }
0x18b8   :  { %18306 = vst [vmem:[#allocation12_spill] sm:$0xff] %v16075_v16  ;;  %v16077_v60 = vpop.f32.mrb[119].mxu1 }
0x18b9   :  { %18307 = vst [vmem:[#allocation11_spill] sm:$0xff] %v16077_v60 }
0x18bd   :  { %v16079_v46 = vpop.f32.mrb[120].mxu1 }
0x18be   :  { %18308 = vst [vmem:[#allocation14_spill] sm:$0xff] %v16079_v46  ;;  %v16081_v30 = vpop.f32.mrb[121].mxu1  ;;  %v18325_v46 = vld [vmem:[#allocation52_spill] sm:$0xff] }
0x18bf   :  { %18309 = vst [vmem:[#allocation13_spill] sm:$0xff] %v16081_v30  ;;  %v16083_v51 = vpop.f32.mrb[122].mxu1  ;;  %v18324_v30 = vld [vmem:[#allocation54_spill] sm:$0xff] }
0x18c0   :  { %18310 = vst [vmem:[#allocation16_spill] sm:$0xff] %v16083_v51  ;;  %v16085_v49 = vpop.f32.mrb[123].mxu1 }
0x18c1   :  { %18311 = vst [vmem:[#allocation15_spill] sm:$0xff] %v16085_v49 }
0x18c5   :  { %v16087_v35 = vpop.f32.mrb[124].mxu1 }
0x18c6   :  { %18312 = vst [vmem:[#allocation18_spill] sm:$0xff] %v16087_v35  ;;  %v16089_v21 = vpop.f32.mrb[125].mxu1  ;;  %v18322_v35 = vld [vmem:[#allocation36_spill] sm:$0xff] }
0x18c7   :  { %18313 = vst [vmem:[#allocation17_spill] sm:$0xff] %v16089_v21  ;;  %v16091_v45 = vpop.f32.mrb[126].mxu1 }
0x18c8   :  { %18314 = vst [vmem:[#allocation20_spill] sm:$0xff] %v16091_v45  ;;  %v16093_v36 = vpop.f32.mrb[127].mxu1 }
0x18c9   :  { %18315 = vst [vmem:[#allocation19_spill] sm:$0xff] %v16093_v36 }
0x18ce   :  { %v10365_v38 = vpop.f32.mrb[128].mxu1 }
0x18cf   :  { %v5565_v53 = vadd.f32 %v10365_v38, %v18316_v17  ;;  %v5559_v2 = vpop.f32.mrb[129].mxu1  ;;  %v18320_v38 = vld [vmem:[#allocation41_spill] sm:$0xff] }
0x18d0   :  { %v5560_v19 = vadd.f32 %v5559_v2, %v18317_v18 }
0x18d1   :  { %5640 = vmax.xlane.f32.xlu1 %v5565_v53 }
0x18d2   :  { %v10368_v39 = vpop.f32.mrb[130].mxu1  ;;  %5638 = vmax.xlane.f32.xlu0 %v5560_v19 }
0x18d3   :  { %v5575_v34 = vadd.f32 %v10368_v39, %v18318_v56  ;;  %v5569_v13 = vpop.f32.mrb[131].mxu1  ;;  %v18321_v56 = vld [vmem:[#allocation39_spill] sm:$0xff] }
0x18d4   :  { %v5570_v59 = vadd.f32 %v5569_v13, %v18319_v5  ;;  %v18323_v13 = vld [vmem:[#allocation51_spill] sm:$0xff] }
0x18d6   :  { %v10371_v44 = vpop.f32.mrb[132].mxu1  ;;  %5644 = vmax.xlane.f32.xlu0 %v5575_v34 }
0x18d7   :  { %v5579_v32 = vpop.f32.mrb[133].mxu1  ;;  %v5585_v45 = vadd.f32 %v10371_v44, %v18322_v35  ;;  %v18328_v35 = vld [vmem:[#allocation58_spill] sm:$0xff] }
0x18d8   :  { %v5580_v51 = vadd.f32 %v5579_v32, %v18325_v46  ;;  %v18330_v46 = vld [vmem:[#allocation59_spill] sm:$0xff] }
0x18da   :  { %v10374_v48 = vpop.f32.mrb[134].mxu1  ;;  %5642 = vmax.xlane.f32.xlu0 %v5570_v59 }
0x18db   :  { %v5589_v43 = vpop.f32.mrb[135].mxu1  ;;  %v16105_v5 = vadd.f32 %v10374_v48, %v18323_v13  ;;  %v18329_v48 = vld [vmem:[#allocation56_spill] sm:$0xff] }
0x18dc   :  { %v5590_v16 = vadd.f32 %v5589_v43, %v18327_v63  ;;  %v18332_v63 = vld [vmem:[#allocation62_spill] sm:$0xff] }
0x18de   :  { %v10377_v14 = vpop.f32.mrb[136].mxu1 }
0x18df   :  { %v5599_v55 = vpop.f32.mrb[137].mxu1  ;;  %v16109_v49 = vadd.f32 %v10377_v14, %v18324_v30  ;;  %v18333_v14 = vld [vmem:[#allocation60_spill] sm:$0xff] }
0x18e0   :  { %v16122_v13 = vadd.f32 %v5599_v55, %v18329_v48 }
0x18e2   :  { %11517 = vrot.lane.b32.xlu1 %v18320_v38, %s12612_s4  ;;  %v10380_v17 = vpop.f32.mrb[138].mxu1 }
0x18e3   :  { %v5609_v2 = vpop.f32.mrb[139].mxu1  ;;  %v16114_v60 = vadd.f32 %v10380_v17, %v18326_v33  ;;  %v18331_v33 = vld [vmem:[#allocation57_spill] sm:$0xff]  ;;  %v16142_v17 = vpop.permute.xlu1 %11507 }
0x18e4   :  { %v16130_v32 = vadd.f32 %v5609_v2, %v18331_v33 }
0x18e6   :  { %v10383_v18 = vpop.f32.mrb[140].mxu1 }
0x18e7   :  { %v5619_v21 = vpop.f32.mrb[141].mxu1  ;;  %v16119_v44 = vadd.f32 %v10383_v18, %v18328_v35 }
0x18e8   :  { %v16135_v43 = vadd.f32 %v5619_v21, %v18332_v63 }
0x18ea   :  { %v10386_v36 = vpop.f32.mrb[142].mxu1 }
0x18eb   :  { %v5629_v39 = vpop.f32.mrb[143].mxu1  ;;  %v16127_v30 = vadd.f32 %v10386_v36, %v18330_v46 }
0x18ec   :  { %v16139_v55 = vadd.f32 %v5629_v39, %v18333_v14 }
0x18f0   :  { %11512 = vrot.lane.b32.xlu0 %v18321_v56, %s12612_s4 }
0x1906   :  { %5648 = vmax.xlane.f32.xlu1 %v5585_v45 }
0x190a   :  { %5652 = vmax.xlane.f32.xlu1 %v16105_v5 }
0x190e   :  { %5656 = vmax.xlane.f32.xlu1 %v16109_v49 }
0x190f   :  { %5646 = vmax.xlane.f32.xlu0 %v5580_v51 }
0x1912   :  { %5660 = vmax.xlane.f32.xlu1 %v16114_v60 }
0x1913   :  { %5650 = vmax.xlane.f32.xlu0 %v5590_v16 }
0x1916   :  { %5664 = vmax.xlane.f32.xlu1 %v16119_v44 }
0x1917   :  { %5654 = vmax.xlane.f32.xlu0 %v16122_v13 }
0x191a   :  { %5668 = vmax.xlane.f32.xlu1 %v16127_v30 }
0x191b   :  { %5658 = vmax.xlane.f32.xlu0 %v16130_v32 }
0x191f   :  { %5662 = vmax.xlane.f32.xlu0 %v16135_v43 }
0x1923   :  { %5666 = vmax.xlane.f32.xlu0 %v16139_v55 }
0x195e   :  { %v5641_v36 = vpop.xlane.xlu1 %5640 }
0x195f   :  { %v5671_v18 = vsub.f32 %v5565_v53, %v5641_v36  ;;  %v5639_v2 = vpop.xlane.xlu0 %5638 }
0x1960   :  { %v5670_v35 = vsub.f32 %v5560_v19, %v5639_v2 }
0x1961   :  { %v5688_v48 = vmul.f32 1.442695, %v5671_v18 }
0x1962   :  { %v5686_v46 = vmul.f32 1.442695, %v5670_v35 }
0x1963   :  { %12210 = vpow2.f32 %v5688_v48  ;;  %v5645_v33 = vpop.xlane.xlu0 %5644 }
0x1964   :  { %12212 = vpow2.f32 %v5686_v46  ;;  %v5673_v21 = vsub.f32 %v5575_v34, %v5645_v33  ;;  %v16160_v34 = vpop.permute.xlu1 %11517 }
0x1965   :  { %18336 = vst [vmem:[#allocation22_spill] sm:$0xff] %v16160_v34 }
0x1966   :  { %v5692_v63 = vmul.f32 1.442695, %v5673_v21 }
0x1967   :  { %v5643_v10 = vpop.xlane.xlu0 %5642 }
0x1968   :  { %12214 = vpow2.f32 %v5692_v63  ;;  %v5672_v6 = vsub.f32 %v5570_v59, %v5643_v10  ;;  %v18334_v10 = vld [vmem:[#allocation45_spill] sm:$0xff] }
0x196a   :  { %v5690_v39 = vmul.f32 1.442695, %v5672_v6  ;;  %v18335_v6 = vld [vmem:[#allocation44_spill] sm:$0xff] }
0x196b   :  { %v16162_v18 = vpop.permute.xlu0 %11512 }
0x196c   :  { %12216 = vpow2.f32 %v5690_v39  ;;  %18337 = vst [vmem:[#allocation21_spill] sm:$0xff] %v16162_v18 }
0x196d   :  { %v16144_v14 = vpop.eup %12210 }
0x196e   :  { %v16146_v42 = vpop.eup %12212  ;;  %5720 = vadd.xlane.f32.xlu0 %v16144_v14 }
0x196f   :  { %5718 = vadd.xlane.f32.xlu1 %v16146_v42 }
0x1972   :  { %v16150_v53 = vpop.eup %12214 }
0x1973   :  { %5724 = vadd.xlane.f32.xlu1 %v16150_v53 }
0x1976   :  { %v16153_v19 = vpop.eup %12216 }
0x1977   :  { %5722 = vadd.xlane.f32.xlu1 %v16153_v19 }
0x1984   :  { %11522 = vrot.lane.b32.xlu0 %v18334_v10, %s12612_s4 }
0x1988   :  { %11527 = vrot.lane.b32.xlu1 %v18335_v6, %s12612_s4 }
0x1993   :  { %v5649_v59 = vpop.xlane.xlu1 %5648 }
0x1994   :  { %v5675_v2 = vsub.f32 %v5585_v45, %v5649_v59 }
0x1996   :  { %v5696_v48 = vmul.f32 1.442695, %v5675_v2 }
0x1997   :  { %v5653_v36 = vpop.xlane.xlu1 %5652 }
0x1998   :  { %v5677_v46 = vsub.f32 %v16105_v5, %v5653_v36  ;;  %12218 = vpow2.f32 %v5696_v48 }
0x199a   :  { %v5700_v10 = vmul.f32 1.442695, %v5677_v46 }
0x199b   :  { %v5657_v35 = vpop.xlane.xlu1 %5656 }
0x199c   :  { %v5647_v33 = vpop.xlane.xlu0 %5646  ;;  %v5679_v21 = vsub.f32 %v16109_v49, %v5657_v35 }
0x199d   :  { %v5674_v63 = vsub.f32 %v5580_v51, %v5647_v33 }
0x199e   :  { %v5704_v56 = vmul.f32 1.442695, %v5679_v21 }
0x199f   :  { %v5694_v39 = vmul.f32 1.442695, %v5674_v63  ;;  %v5661_v40 = vpop.xlane.xlu1 %5660 }
0x19a0   :  { %v5651_v6 = vpop.xlane.xlu0 %5650  ;;  %v5681_v59 = vsub.f32 %v16114_v60, %v5661_v40 }
0x19a1   :  { %12220 = vpow2.f32 %v5694_v39  ;;  %v5676_v38 = vsub.f32 %v5590_v16, %v5651_v6 }
0x19a2   :  { %12222 = vpow2.f32 %v5700_v10  ;;  %v5708_v49 = vmul.f32 1.442695, %v5681_v59  ;;  %v16169_v35 = vpop.eup %12218 }
0x19a3   :  { %v5698_v34 = vmul.f32 1.442695, %v5676_v38  ;;  %v5665_v18 = vpop.xlane.xlu1 %5664  ;;  %12224 = vpow2.f32 %v5704_v56 }
0x19a4   :  { %v5655_v45 = vpop.xlane.xlu0 %5654  ;;  %v5683_v38 = vsub.f32 %v16119_v44, %v5665_v18 }
0x19a5   :  { %v5678_v5 = vsub.f32 %v16122_v13, %v5655_v45  ;;  %12226 = vpow2.f32 %v5698_v34 }
0x19a6   :  { %v5712_v34 = vmul.f32 1.442695, %v5683_v38 }
0x19a7   :  { %v5702_v36 = vmul.f32 1.442695, %v5678_v5  ;;  %v5669_v48 = vpop.xlane.xlu1 %5668 }
0x19a8   :  { %v5659_v51 = vpop.xlane.xlu0 %5658  ;;  %v5685_v60 = vsub.f32 %v16127_v30, %v5669_v48 }
0x19a9   :  { %12228 = vpow2.f32 %v5702_v36  ;;  %v5680_v2 = vsub.f32 %v16130_v32, %v5659_v51 }
0x19aa   :  { %12230 = vpow2.f32 %v5708_v49  ;;  %v5716_v18 = vmul.f32 1.442695, %v5685_v60 }
0x19ab   :  { %v16171_v16 = vpop.eup %12220  ;;  %v5706_v10 = vmul.f32 1.442695, %v5680_v2 }
0x19ac   :  { %5728 = vadd.xlane.f32.xlu1 %v16169_v35  ;;  %5726 = vadd.xlane.f32.xlu0 %v16171_v16  ;;  %v5663_v40 = vpop.xlane.xlu0 %5662  ;;  %v16178_v13 = vpop.eup %12222 }
0x19ad   :  { %v5682_v56 = vsub.f32 %v16135_v43, %v5663_v40  ;;  %v16180_v32 = vpop.eup %12224  ;;  %12232 = vpow2.f32 %v5706_v10 }
0x19af   :  { %v5710_v6 = vmul.f32 1.442695, %v5682_v56  ;;  %v16185_v33 = vpop.eup %12226 }
0x19b0   :  { %5736 = vadd.xlane.f32.xlu1 %v16180_v32  ;;  %5732 = vadd.xlane.f32.xlu0 %v16178_v13  ;;  %v5667_v44 = vpop.xlane.xlu0 %5666 }
0x19b1   :  { %12234 = vpow2.f32 %v5710_v6  ;;  %v5684_v46 = vsub.f32 %v16139_v55, %v5667_v44  ;;  %v11509_v6 = vunpack.i.l.bf16 %v16142_v17 }
0x19b2   :  { %12236 = vpow2.f32 %v5712_v34 }
0x19b3   :  { %v16187_v30 = vpop.eup %12228  ;;  %12238 = vpow2.f32 %v5716_v18  ;;  %v5714_v43 = vmul.f32 1.442695, %v5684_v46 }
0x19b4   :  { %5730 = vadd.xlane.f32.xlu0 %v16185_v33  ;;  %5734 = vadd.xlane.f32.xlu1 %v16187_v30  ;;  %v16191_v21 = vpop.eup %12230 }
0x19b5   :  { %12240 = vpow2.f32 %v5714_v43 }
0x19b7   :  { %v16194_v63 = vpop.eup %12232 }
0x19b8   :  { %5740 = vadd.xlane.f32.xlu1 %v16191_v21 }
0x19bb   :  { %v16196_v39 = vpop.eup %12234 }
0x19bc   :  { %5738 = vadd.xlane.f32.xlu1 %v16194_v63  ;;  %5742 = vadd.xlane.f32.xlu0 %v16196_v39  ;;  %v16200_v55 = vpop.eup %12236 }
0x19bd   :  { %v16202_v45 = vpop.eup %12238 }
0x19bf   :  { %v16206_v59 = vpop.eup %12240 }
0x19c0   :  { %5744 = vadd.xlane.f32.xlu1 %v16200_v55  ;;  %5748 = vadd.xlane.f32.xlu0 %v16202_v45 }
0x19c4   :  { %5746 = vadd.xlane.f32.xlu0 %v16206_v59 }
0x19d1   :  { %11537 = vrot.lane.b32.xlu1 %v15561_v8, %s12612_s4 }
0x19d5   :  { %5929 = vrot.lane.b32.xlu1 %v15632_v50, %s12613_s13 }
0x19d9   :  { %5933 = vrot.lane.b32.xlu1 %v15642_v47, %s12613_s13 }
0x19da   :  { %11532 = vrot.lane.b32.xlu0 %v15569_v31, %s12612_s4 }
0x19dd   :  { %5937 = vrot.lane.b32.xlu1 %v15654_v12, %s12613_s13 }
0x19de   :  { %5927 = vrot.lane.b32.xlu0 %v15473_v7, %s12613_s13 }
0x19e1   :  { %5941 = vrot.lane.b32.xlu1 %v15664_v29, %s12613_s13 }
0x19e2   :  { %5931 = vrot.lane.b32.xlu0 %v15635_v57, %s12613_s13 }
0x19e5   :  { %5945 = vrot.lane.b32.xlu1 %v15679_v20, %s12613_s13 }
0x19e6   :  { %5935 = vrot.lane.b32.xlu0 %v15647_v4, %s12613_s13 }
0x19e9   :  { %5949 = vrot.lane.b32.xlu1 %v15689_v58, %s12613_s13 }
0x19ea   :  { %5939 = vrot.lane.b32.xlu0 %v15657_v26, %s12613_s13 }
0x19ed   :  { %5953 = vrot.lane.b32.xlu1 %v15699_v25, %s12613_s13 }
0x19ee   :  { %5943 = vrot.lane.b32.xlu0 %v15667_v22, %s12613_s13 }
0x19f1   :  { %5957 = vrot.lane.b32.xlu1 %v15709_v9, %s12613_s13 }
0x19f2   :  { %5947 = vrot.lane.b32.xlu0 %v15682_v11, %s12613_s13 }
0x19f5   :  { %6354 = vrot.lane.b32.xlu1 %v15481_v41, %s12614_s14 }
0x19f6   :  { %5951 = vrot.lane.b32.xlu0 %v15692_v1, %s12613_s13 }
0x19f9   :  { %6358 = vrot.lane.b32.xlu1 %v15509_v54, %s12614_s14 }
0x19fa   :  { %5955 = vrot.lane.b32.xlu0 %v15702_v24, %s12613_s13 }
0x19fb   :  { %v5721_v5 = vpop.xlane.xlu0 %5720 }
0x19fc   :  { %12242 = vrcp.f32 %v5721_v5  ;;  %v5719_v36 = vpop.xlane.xlu1 %5718 }
0x19fd   :  { %12244 = vrcp.f32 %v5719_v36  ;;  %6362 = vrot.lane.b32.xlu1 %v15537_v61, %s12614_s14 }
0x19fe   :  { %6352 = vrot.lane.b32.xlu0 %v15489_v27, %s12614_s14 }
0x1a00   :  { %v5725_v51 = vpop.xlane.xlu1 %5724 }
0x1a01   :  { %6366 = vrot.lane.b32.xlu1 %v15565_v28, %s12614_s14  ;;  %12246 = vrcp.f32 %v5725_v51 }
0x1a02   :  { %6356 = vrot.lane.b32.xlu0 %v15517_v23, %s12614_s14 }
0x1a04   :  { %v5723_v49 = vpop.xlane.xlu1 %5722 }
0x1a05   :  { %12248 = vrcp.f32 %v5723_v49  ;;  %11547 = vrot.lane.b32.xlu1 %v15477_v37, %s12615_s15  ;;  %v11510_v37 = vunpack.i.h.bf16 %v16142_v17  ;;  %v18339_v17 = vld [vmem:[#allocation22_spill] sm:$0xff] }
0x1a06   :  { %v12243_v2 = vpop.eup %12242  ;;  %6360 = vrot.lane.b32.xlu0 %v15545_v52, %s12614_s14 }
0x1a07   :  { %v12245_v48 = vpop.eup %12244  ;;  %v5767_v38 = vmul.f32 %v12243_v2, %v16144_v14 }
0x1a08   :  { %v5766_v10 = vmul.f32 %v12245_v48, %v16146_v42  ;;  %v10996_v42 = vpack.c.bf16 %v11510_v37, %v11509_v6  ;;  %v11528_v2 = vpop.permute.xlu1 %11527 }
0x1a09   :  { %v11530_v48 = vunpack.i.h.bf16 %v11528_v2 }
0x1a0a   :  { %6364 = vrot.lane.b32.xlu0 %v15573_v62, %s12614_s14  ;;  %v5782_v40 = vpack.c.bf16 %v5767_v38, %v5766_v10  ;;  %v11529_v38 = vunpack.i.l.bf16 %v11528_v2 }
0x1a0b   :  { %v12247_v60 = vpop.eup %12246 }
0x1a0c   :  { %10403 = vmatprep.mubr.bf16.mxu0 %v5782_v40  ;;  %v5769_v34 = vmul.f32 %v12247_v60, %v16150_v53  ;;  %v11520_v53 = vunpack.i.h.bf16 %v18339_v17  ;;  %v11020_v10 = vpack.c.bf16 %v11530_v48, %v11529_v38 }
0x1a0e   :  { %11542 = vrot.lane.b32.xlu0 %v15486_v15, %s12615_s15  ;;  %v18338_v15 = vld [vmem:[#allocation21_spill] sm:$0xff] }
0x1a0f   :  { %v12249_v56 = vpop.eup %12248  ;;  %v11515_v18 = vunpack.i.h.bf16 %v18338_v15  ;;  %v11514_v46 = vunpack.i.l.bf16 %v18338_v15 }
0x1a10   :  { %v5768_v14 = vmul.f32 %v12249_v56, %v16153_v19  ;;  %v11519_v19 = vunpack.i.l.bf16 %v18339_v17 }
0x1a11   :  { %v11002_v43 = vpack.c.bf16 %v11515_v18, %v11514_v46 }
0x1a12   :  { %v5783_v44 = vpack.c.bf16 %v5769_v34, %v5768_v14  ;;  %v11008_v5 = vpack.c.bf16 %v11520_v53, %v11519_v19 }
0x1a14   :  { %10404 = vmatmul.mubr.bf16.vlgmr.msra.gmra.mrb[128].mxu0 %v5783_v44 }
0x1a15   :  { %10995 = vmatpush3.bf16.xpose.msk.msra.mxu0 %vm13178_vm4, %v16058_v3  ;;  %v11523_v3 = vpop.permute.xlu0 %11522 }
0x1a16   :  { %10998 = vmatprep.subr.msk.bf16.mxu0 %vm13178_vm4, %v10996_v42  ;;  %v11525_v36 = vunpack.i.h.bf16 %v11523_v3  ;;  %v11524_v51 = vunpack.i.l.bf16 %v11523_v3 }
0x1a18   :  { %v11014_v49 = vpack.c.bf16 %v11525_v36, %v11524_v51 }
0x1a1d   :  { %11001 = vmatpush3.bf16.xpose.msk.msra.mxu0 %vm13178_vm4, %v10996_v42 }
0x1a1e   :  { %11004 = vmatprep.subr.msk.bf16.mxu0 %vm13178_vm4, %v11002_v43 }
0x1a25   :  { %11007 = vmatpush3.bf16.xpose.msk.msra.mxu0 %vm13178_vm4, %v11002_v43 }
0x1a26   :  { %11010 = vmatprep.subr.msk.bf16.mxu0 %vm13178_vm4, %v11008_v5 }
0x1a2d   :  { %11013 = vmatpush3.bf16.xpose.msk.msra.mxu0 %vm13178_vm4, %v11008_v5 }
0x1a2e   :  { %11016 = vmatprep.subr.msk.bf16.mxu0 %vm13178_vm4, %v11014_v49 }
0x1a35   :  { %11019 = vmatpush3.bf16.xpose.msk.msra.mxu0 %vm13178_vm4, %v11014_v49 }
0x1a36   :  { %11022 = vmatprep.subr.msk.bf16.mxu0 %vm13178_vm4, %v11020_v10 }
0x1a39   :  { %v5729_v40 = vpop.xlane.xlu1 %5728  ;;  %v5727_v60 = vpop.xlane.xlu0 %5726 }
0x1a3a   :  { %12250 = vrcp.f32 %v5729_v40 }
0x1a3b   :  { %12252 = vrcp.f32 %v5727_v60 }
0x1a3d   :  { %11025 = vmatpush3.bf16.xpose.msk.msra.mxu0 %vm13178_vm4, %v11020_v10  ;;  %v5737_v56 = vpop.xlane.xlu1 %5736  ;;  %v5733_v37 = vpop.xlane.xlu0 %5732 }
0x1a3e   :  { %12254 = vrcp.f32 %v5737_v56 }
0x1a3f   :  { %12256 = vrcp.f32 %v5733_v37 }
0x1a41   :  { %v5735_v6 = vpop.xlane.xlu1 %5734  ;;  %v5731_v34 = vpop.xlane.xlu0 %5730 }
0x1a42   :  { %12258 = vrcp.f32 %v5735_v6 }
0x1a43   :  { %12260 = vrcp.f32 %v5731_v34 }
0x1a44   :  { %v12251_v14 = vpop.eup %12250 }
0x1a45   :  { %v12253_v44 = vpop.eup %12252  ;;  %v5741_v42 = vpop.xlane.xlu1 %5740  ;;  %v5771_v15 = vmul.f32 %v12251_v14, %v16169_v35 }
0x1a46   :  { %v5770_v18 = vmul.f32 %v12253_v44, %v16171_v16  ;;  %12262 = vrcp.f32 %v5741_v42 }
0x1a48   :  { %v5784_v46 = vpack.c.bf16 %v5771_v15, %v5770_v18  ;;  %v12255_v53 = vpop.eup %12254 }
0x1a49   :  { %v5739_v43 = vpop.xlane.xlu1 %5738  ;;  %v5743_v17 = vpop.xlane.xlu0 %5742  ;;  %v5775_v2 = vmul.f32 %v12255_v53, %v16180_v32 }
0x1a4a   :  { %12264 = vrcp.f32 %v5739_v43  ;;  %10407 = vmatprep.mubr.bf16.mxu0 %v5784_v46  ;;  %v12257_v19 = vpop.eup %12256 }
0x1a4b   :  { %12266 = vrcp.f32 %v5743_v17  ;;  %v5773_v16 = vmul.f32 %v12257_v19, %v16178_v13 }
0x1a4c   :  { %v12259_v5 = vpop.eup %12258 }
0x1a4d   :  { %v12261_v3 = vpop.eup %12260  ;;  %v5745_v36 = vpop.xlane.xlu1 %5744  ;;  %v5774_v49 = vmul.f32 %v12259_v5, %v16187_v30 }
0x1a4e   :  { %v5749_v51 = vpop.xlane.xlu0 %5748  ;;  %12268 = vrcp.f32 %v5745_v36  ;;  %v5772_v35 = vmul.f32 %v12261_v3, %v16185_v33 }
0x1a4f   :  { %v5786_v48 = vpack.c.bf16 %v5775_v2, %v5774_v49  ;;  %12270 = vrcp.f32 %v5749_v51 }
0x1a50   :  { %v5785_v38 = vpack.c.bf16 %v5773_v16, %v5772_v35  ;;  %v12263_v60 = vpop.eup %12262 }
0x1a51   :  { %v11538_v10 = vpop.permute.xlu1 %11537  ;;  %v5777_v32 = vmul.f32 %v12263_v60, %v16191_v21 }
0x1a52   :  { %v5747_v40 = vpop.xlane.xlu0 %5746  ;;  %10408 = vmatmul.mubr.bf16.gmra.mrb[132].mxu0 %v5785_v38  ;;  %v11540_v33 = vunpack.i.h.bf16 %v11538_v10  ;;  %v11539_v14 = vunpack.i.l.bf16 %v11538_v10 }
0x1a53   :  { %12272 = vrcp.f32 %v5747_v40  ;;  %10411 = vmatprep.mubr.bf16.mxu0 %v5786_v48 }
0x1a54   :  { %v12265_v56 = vpop.eup %12264  ;;  %v11032_v5 = vpack.c.bf16 %v11540_v33, %v11539_v14 }
0x1a55   :  { %v5930_v37 = vpop.permute.xlu1 %5929  ;;  %v5776_v30 = vmul.f32 %v12265_v56, %v16194_v63  ;;  %v12267_v34 = vpop.eup %12266 }
0x1a56   :  { %v11533_v6 = vpop.permute.xlu0 %11532  ;;  %v5778_v17 = vmul.f32 %v12267_v34, %v16196_v39 }
0x1a57   :  { %v11535_v13 = vunpack.i.h.bf16 %v11533_v6  ;;  %v11534_v44 = vunpack.i.l.bf16 %v11533_v6  ;;  %v5787_v42 = vpack.c.bf16 %v5777_v32, %v5776_v30 }
0x1a58   :  { %v12269_v15 = vpop.eup %12268 }
0x1a59   :  { %v11026_v18 = vpack.c.bf16 %v11535_v13, %v11534_v44  ;;  %v5934_v46 = vpop.permute.xlu1 %5933  ;;  %v5779_v53 = vmul.f32 %v12269_v15, %v16200_v55  ;;  %v12271_v19 = vpop.eup %12270 }
0x1a5a   :  { %v5928_v43 = vpop.permute.xlu0 %5927  ;;  %10412 = vmatmul.mubr.bf16.gmra.mrb[136].mxu0 %v5787_v42  ;;  %v5781_v55 = vmul.f32 %v12271_v19, %v16202_v45 }
0x1a5b   :  { %11028 = vmatprep.subr.msk.bf16.mxu0 %vm13178_vm4, %v11026_v18  ;;  %v5788_v21 = vpack.c.bf16 %v5779_v53, %v5778_v17 }
0x1a5c   :  { %11031 = vmatpush3.bf16.xpose.msk.msra.mxu0 %vm13178_vm4, %v11026_v18 }
0x1a5d   :  { %v12273_v63 = vpop.eup %12272  ;;  %11034 = vmatprep.subr.msk.bf16.mxu0 %vm13178_vm4, %v11032_v5  ;;  %v5938_v3 = vpop.permute.xlu1 %5937  ;;  %10415 = vmatprep.mubr.bf16.mxu0 %v5788_v21 }
0x1a5e   :  { %v5932_v36 = vpop.permute.xlu0 %5931  ;;  %v5780_v39 = vmul.f32 %v12273_v63, %v16206_v59 }
0x1a60   :  { %v5789_v51 = vpack.c.bf16 %v5781_v55, %v5780_v39 }
0x1a61   :  { %v5942_v49 = vpop.permute.xlu1 %5941 }
0x1a62   :  { %v5936_v2 = vpop.permute.xlu0 %5935  ;;  %10416 = vmatmul.mubr.bf16.gmra.mrb[140].mxu0 %v5789_v51 }
0x1a63   :  { %10451 = vmatprep.mubr.msk.f32.mxu0 %vm731_vm3, %v5928_v43 }
0x1a64   :  { %11037 = vmatpush3.bf16.xpose.msk.msra.mxu0 %vm13178_vm4, %v11032_v5 }
0x1a65   :  { %v5946_v35 = vpop.permute.xlu1 %5945 }
0x1a66   :  { %v5940_v16 = vpop.permute.xlu0 %5939 }
0x1a69   :  { %v5950_v48 = vpop.permute.xlu1 %5949 }
0x1a6a   :  { %v5944_v38 = vpop.permute.xlu0 %5943 }
0x1a6b   :  { %10452 = vmatmul.mubr.msk.f32.vlgmr.msra.gmra.mrb[144].mxu0 %vm731_vm3, %v5930_v37 }
0x1a6c   :  { %10454 = vmatprep.mubr.msk.f32.mxu0 %vm731_vm3, %v5932_v36 }
0x1a6d   :  { %v5954_v45 = vpop.permute.xlu1 %5953 }
0x1a6e   :  { %v5948_v59 = vpop.permute.xlu0 %5947 }
0x1a6f   :  { %10455 = vmatmul.mubr.msk.f32.gmra.mrb[146].mxu0 %vm731_vm3, %v5934_v46 }
0x1a70   :  { %10457 = vmatprep.mubr.msk.f32.mxu0 %vm731_vm3, %v5936_v2  ;;  %v18356_v2 = vld [vmem:[#allocation41_spill] sm:$0xff] }
0x1a71   :  { %v5958_v40 = vpop.permute.xlu1 %5957 }
0x1a72   :  { %v5952_v10 = vpop.permute.xlu0 %5951 }
0x1a73   :  { %10458 = vmatmul.mubr.msk.f32.gmra.mrb[148].mxu0 %vm731_vm3, %v5938_v3 }
0x1a74   :  { %10460 = vmatprep.mubr.msk.f32.mxu0 %vm731_vm3, %v5940_v16 }
0x1a75   :  { %v6355_v37 = vpop.permute.xlu1 %6354 }
0x1a76   :  { %v5956_v60 = vpop.permute.xlu0 %5955 }
0x1a77   :  { %10461 = vmatmul.mubr.msk.f32.gmra.mrb[150].mxu0 %vm731_vm3, %v5942_v49 }
0x1a78   :  { %10463 = vmatprep.mubr.msk.f32.mxu0 %vm731_vm3, %v5944_v38 }
0x1a79   :  { %v6359_v30 = vpop.permute.xlu1 %6358 }
0x1a7a   :  { %v6353_v56 = vpop.permute.xlu0 %6352 }
0x1a7b   :  { %10464 = vmatmul.mubr.msk.f32.gmra.mrb[152].mxu0 %vm731_vm3, %v5946_v35  ;;  %10475 = vmatprep.subr.bf16.mxu1 %v6353_v56 }
0x1a7c   :  { %10466 = vmatprep.mubr.msk.f32.mxu0 %vm731_vm3, %v5948_v59  ;;  %10476 = vmatpush3.bf16.msra.mxu1 %v6353_v56  ;;  %v16395_v56 = vld [vmem:[%s17912_s2] sm:$0xff] }
0x1a7d   :  { %10477 = vmatprep.subr.bf16.mxu1 %v6355_v37  ;;  %v6363_v33 = vpop.permute.xlu1 %6362 }
0x1a7e   :  { %v6357_v6 = vpop.permute.xlu0 %6356 }
0x1a7f   :  { %10467 = vmatmul.mubr.msk.f32.gmra.mrb[154].mxu0 %vm731_vm3, %v5950_v48 }
0x1a80   :  { %10469 = vmatprep.mubr.msk.f32.mxu0 %vm731_vm3, %v5952_v10  ;;  %10478 = vmatpush3.bf16.msra.mxu1 %v6355_v37 }
0x1a81   :  { %10479 = vmatprep.subr.bf16.mxu1 %v6357_v6  ;;  %v6367_v42 = vpop.permute.xlu1 %6366 }
0x1a82   :  { %v6361_v32 = vpop.permute.xlu0 %6360 }
0x1a83   :  { %10470 = vmatmul.mubr.msk.f32.gmra.mrb[156].mxu0 %vm731_vm3, %v5954_v45 }
0x1a84   :  { %10472 = vmatprep.mubr.msk.f32.mxu0 %vm731_vm3, %v5956_v60  ;;  %10480 = vmatpush3.bf16.msra.mxu1 %v6357_v6  ;;  %v16390_v60 = vld [vmem:[%s17912_s2 + $0x8] sm:$0xff] }
0x1a85   :  { %10481 = vmatprep.subr.bf16.mxu1 %v6359_v30 }
0x1a86   :  { %v6365_v34 = vpop.permute.xlu0 %6364 }
0x1a87   :  { %10473 = vmatmul.mubr.msk.f32.gmra.mrb[158].mxu0 %vm731_vm3, %v5958_v40 }
0x1a88   :  { %10482 = vmatpush3.bf16.msra.mxu1 %v6359_v30 }
0x1a89   :  { %10483 = vmatprep.subr.bf16.mxu1 %v6361_v32 }
0x1a8a   :  { %v11543_v14 = vpop.permute.xlu0 %11542 }
0x1a8b   :  { %v11545_v13 = vunpack.i.h.bf16 %v11543_v14  ;;  %v11544_v44 = vunpack.i.l.bf16 %v11543_v14 }
0x1a8c   :  { %10484 = vmatpush3.bf16.msra.mxu1 %v6361_v32 }
0x1a8d   :  { %10485 = vmatprep.subr.bf16.mxu1 %v6363_v33  ;;  %v16334_v15 = vpack.c.bf16 %v11545_v13, %v11544_v44  ;;  %v16416_v44 = vld [vmem:[%s17912_s2 + $0x10] sm:$0xff] }
0x1a90   :  { %10486 = vmatpush3.bf16.msra.mxu1 %v6363_v33 }
0x1a91   :  { %10487 = vmatprep.subr.bf16.mxu1 %v6365_v34 }
0x1a94   :  { %10488 = vmatpush3.bf16.msra.mxu1 %v6365_v34  ;;  %v16406_v34 = vld [vmem:[%s17912_s2 + $0x18] sm:$0xff] }
0x1a95   :  { %10489 = vmatprep.subr.bf16.mxu1 %v6367_v42 }
0x1a98   :  { %10490 = vmatpush3.bf16.msra.mxu1 %v6367_v42 }
0x1a99   :  { %11040 = vmatprep.subr.msk.bf16.mxu1 %vm13178_vm4, %v16334_v15 }
0x1ae7   :  { %v16339_v18 = vpop.f32.mrb[128].mxu0 }
0x1ae8   :  { %18340 = vst [vmem:[#allocation24_spill] sm:$0xff] %v16339_v18  ;;  %v16341_v46 = vpop.f32.mrb[129].mxu0  ;;  %v16535_v18 = vpop.permute.xlu1 %11547 }
0x1ae9   :  { %18341 = vst [vmem:[#allocation23_spill] sm:$0xff] %v16341_v46  ;;  %v16343_v43 = vpop.f32.mrb[130].mxu0  ;;  %v16518_v46 = vld [vmem:[%s17912_s2 + $0x60] sm:$0xff] }
0x1aea   :  { %18342 = vst [vmem:[#allocation26_spill] sm:$0xff] %v16343_v43  ;;  %v16347_v53 = vpop.f32.mrb[131].mxu0  ;;  %18366 = vst [vmem:[#allocation22_spill] sm:$0xff] %v16518_v46 }
0x1aeb   :  { %18343 = vst [vmem:[#allocation25_spill] sm:$0xff] %v16347_v53 }
0x1b25   :  { %v16351_v5 = vpop.f32.mrb[132].mxu0 }
0x1b26   :  { %18344 = vst [vmem:[#allocation31_spill] sm:$0xff] %v16351_v5  ;;  %v16353_v21 = vpop.f32.mrb[133].mxu0  ;;  %v16500_v5 = vld [vmem:[%s17912_s2 + $0x78] sm:$0xff] }
0x1b27   :  { %18345 = vst [vmem:[#allocation29_spill] sm:$0xff] %v16353_v21  ;;  %v16355_v63 = vpop.f32.mrb[134].mxu0  ;;  %v16482_v21 = vld [vmem:[%s17912_s2 + $0x68] sm:$0xff]  ;;  %18364 = vst [vmem:[#allocation60_spill] sm:$0xff] %v16500_v5 }
0x1b28   :  { %18346 = vst [vmem:[#allocation35_spill] sm:$0xff] %v16355_v63  ;;  %v16359_v36 = vpop.f32.mrb[135].mxu0  ;;  %18362 = vst [vmem:[#allocation57_spill] sm:$0xff] %v16482_v21  ;;  %v16505_v63 = vld [vmem:[%s17912_s2 + $0x50] sm:$0xff] }
0x1b29   :  { %18347 = vst [vmem:[#allocation49_spill] sm:$0xff] %v16359_v36  ;;  %v16487_v36 = vld [vmem:[%s17912_s2 + $0x40] sm:$0xff]  ;;  %18365 = vst [vmem:[#allocation21_spill] sm:$0xff] %v16505_v63 }
0x1b2a   :  { %18363 = vst [vmem:[#allocation62_spill] sm:$0xff] %v16487_v36 }
0x1b2d   :  { %v16363_v55 = vpop.f32.mrb[136].mxu0 }
0x1b2e   :  { %18348 = vst [vmem:[#allocation47_spill] sm:$0xff] %v16363_v55  ;;  %v16365_v51 = vpop.f32.mrb[137].mxu0 }
0x1b2f   :  { %18349 = vst [vmem:[#allocation37_spill] sm:$0xff] %v16365_v51  ;;  %v16367_v49 = vpop.f32.mrb[138].mxu0 }
0x1b30   :  { %18350 = vst [vmem:[#allocation50_spill] sm:$0xff] %v16367_v49  ;;  %v16371_v35 = vpop.f32.mrb[139].mxu0  ;;  %v16469_v49 = vld [vmem:[%s17912_s2 + $0x30] sm:$0xff] }
0x1b31   :  { %18351 = vst [vmem:[#allocation36_spill] sm:$0xff] %v16371_v35  ;;  %18361 = vst [vmem:[#allocation59_spill] sm:$0xff] %v16469_v49 }
0x1b35   :  { %v16375_v48 = vpop.f32.mrb[140].mxu0 }
0x1b36   :  { %18352 = vst [vmem:[#allocation51_spill] sm:$0xff] %v16375_v48  ;;  %v16377_v38 = vpop.f32.mrb[141].mxu0  ;;  %v18357_v48 = vld [vmem:[#allocation39_spill] sm:$0xff] }
0x1b37   :  { %18353 = vst [vmem:[#allocation54_spill] sm:$0xff] %v16377_v38  ;;  %v16379_v59 = vpop.f32.mrb[142].mxu0 }
0x1b38   :  { %18354 = vst [vmem:[#allocation52_spill] sm:$0xff] %v16379_v59  ;;  %v16383_v10 = vpop.f32.mrb[143].mxu0 }
0x1b39   :  { %18355 = vst [vmem:[#allocation55_spill] sm:$0xff] %v16383_v10 }
0x1b3e   :  { %v10453_v37 = vpop.f32.mrb[144].mxu0 }
0x1b3f   :  { %v16398_v6 = vadd.f32 %v10453_v37, %v16390_v60  ;;  %v6121_v30 = vpop.f32.mrb[145].mxu0 }
0x1b40   :  { %v16401_v32 = vadd.f32 %v6121_v30, %v16395_v56 }
0x1b41   :  { %6202 = vmax.xlane.f32.xlu1 %v16398_v6 }
0x1b42   :  { %v10456_v33 = vpop.f32.mrb[146].mxu0  ;;  %6200 = vmax.xlane.f32.xlu0 %v16401_v32 }
0x1b43   :  { %v16411_v14 = vadd.f32 %v10456_v33, %v16406_v34  ;;  %v6131_v13 = vpop.f32.mrb[147].mxu0 }
0x1b44   :  { %v16420_v30 = vadd.f32 %v6131_v13, %v16416_v44  ;;  %v16430_v13 = vld [vmem:[%s17912_s2 + $0x28] sm:$0xff] }
0x1b46   :  { %v10459_v42 = vpop.f32.mrb[148].mxu0  ;;  %6206 = vmax.xlane.f32.xlu0 %v16411_v14 }
0x1b47   :  { %v6141_v37 = vpop.f32.mrb[149].mxu0  ;;  %v16433_v59 = vadd.f32 %v10459_v42, %v16430_v13  ;;  %v16452_v42 = vld [vmem:[%s17912_s2 + $0x20] sm:$0xff] }
0x1b48   :  { %18359 = vst [vmem:[#allocation58_spill] sm:$0xff] %v16452_v42  ;;  %v16459_v55 = vadd.f32 %v6141_v37, %v16452_v42 }
0x1b4a   :  { %v10462_v40 = vpop.f32.mrb[150].mxu0  ;;  %6204 = vmax.xlane.f32.xlu0 %v16420_v30 }
0x1b4b   :  { %v6151_v45 = vpop.f32.mrb[151].mxu0 }
0x1b4c   :  { %v16477_v37 = vadd.f32 %v6151_v45, %v16469_v49 }
0x1b4e   :  { %v10465_v16 = vpop.f32.mrb[152].mxu0 }
0x1b4f   :  { %v6161_v33 = vpop.f32.mrb[153].mxu0 }
0x1b50   :  { %v16495_v45 = vadd.f32 %v6161_v33, %v16487_v36 }
0x1b52   :  { %11557 = vrot.lane.b32.xlu1 %v18356_v2, %s12615_s15  ;;  %v10468_v39 = vpop.f32.mrb[154].mxu0  ;;  %v16438_v2 = vld [vmem:[%s17912_s2 + $0x38] sm:$0xff] }
0x1b53   :  { %v6171_v3 = vpop.f32.mrb[155].mxu0  ;;  %v16442_v51 = vadd.f32 %v10462_v40, %v16438_v2  ;;  %v16464_v40 = vld [vmem:[%s17912_s2 + $0x58] sm:$0xff] }
0x1b54   :  { %18360 = vst [vmem:[#allocation56_spill] sm:$0xff] %v16464_v40  ;;  %v16513_v33 = vadd.f32 %v6171_v3, %v16505_v63 }
0x1b56   :  { %v10471_v19 = vpop.f32.mrb[156].mxu0 }
0x1b57   :  { %v6181_v17 = vpop.f32.mrb[157].mxu0 }
0x1b58   :  { %v16523_v53 = vadd.f32 %v6181_v17, %v16518_v46 }
0x1b5a   :  { %v10474_v38 = vpop.f32.mrb[158].mxu0 }
0x1b5b   :  { %v6191_v10 = vpop.f32.mrb[159].mxu0 }
0x1b60   :  { %11552 = vrot.lane.b32.xlu0 %v18357_v48, %s12615_s15  ;;  %v16447_v48 = vld [vmem:[%s17912_s2 + $0x48] sm:$0xff] }
0x1b61   :  { %18358 = vst [vmem:[#allocation53_spill] sm:$0xff] %v16447_v48  ;;  %v16456_v35 = vadd.f32 %v10465_v16, %v16447_v48  ;;  %v16474_v16 = vadd.f32 %v10468_v39, %v16464_v40  ;;  %v16492_v39 = vadd.f32 %v10471_v19, %v16482_v21  ;;  %v16510_v19 = vadd.f32 %v10474_v38, %v16500_v5  ;;  %v16528_v38 = vld [vmem:[%s17912_s2 + $0x70] sm:$0xff] }
0x1b62   :  { %18367 = vst [vmem:[#allocation41_spill] sm:$0xff] %v16528_v38  ;;  %v16532_v3 = vadd.f32 %v6191_v10, %v16528_v38 }
0x1b76   :  { %6210 = vmax.xlane.f32.xlu1 %v16433_v59 }
0x1b7a   :  { %6214 = vmax.xlane.f32.xlu1 %v16442_v51 }
0x1b7e   :  { %6218 = vmax.xlane.f32.xlu1 %v16456_v35 }
0x1b7f   :  { %6208 = vmax.xlane.f32.xlu0 %v16459_v55 }
0x1b82   :  { %6222 = vmax.xlane.f32.xlu1 %v16474_v16 }
0x1b83   :  { %6212 = vmax.xlane.f32.xlu0 %v16477_v37 }
0x1b86   :  { %6226 = vmax.xlane.f32.xlu1 %v16492_v39 }
0x1b87   :  { %6216 = vmax.xlane.f32.xlu0 %v16495_v45 }
0x1b8a   :  { %6230 = vmax.xlane.f32.xlu1 %v16510_v19 }
0x1b8b   :  { %6220 = vmax.xlane.f32.xlu0 %v16513_v33 }
0x1b8f   :  { %6224 = vmax.xlane.f32.xlu0 %v16523_v53 }
0x1b93   :  { %6228 = vmax.xlane.f32.xlu0 %v16532_v3 }
0x1bce   :  { %v6203_v43 = vpop.xlane.xlu1 %6202 }
0x1bcf   :  { %v6233_v62 = vsub.f32 %v16398_v6, %v6203_v43  ;;  %v6201_v28 = vpop.xlane.xlu0 %6200 }
0x1bd0   :  { %v6232_v17 = vsub.f32 %v16401_v32, %v6201_v28  ;;  %v18368_v28 = vld [vmem:[#allocation45_spill] sm:$0xff] }
0x1bd1   :  { %v6250_v52 = vmul.f32 1.442695, %v6233_v62  ;;  %v18369_v62 = vld [vmem:[#allocation44_spill] sm:$0xff] }
0x1bd2   :  { %v6248_v61 = vmul.f32 1.442695, %v6232_v17 }
0x1bd3   :  { %12274 = vpow2.f32 %v6250_v52  ;;  %v6207_v46 = vpop.xlane.xlu0 %6206 }
0x1bd4   :  { %12276 = vpow2.f32 %v6248_v61  ;;  %v6235_v5 = vsub.f32 %v16411_v14, %v6207_v46  ;;  %v16557_v46 = vpop.permute.xlu1 %11557 }
0x1bd6   :  { %v6254_v63 = vmul.f32 1.442695, %v6235_v5 }
0x1bd7   :  { %v6205_v10 = vpop.xlane.xlu0 %6204 }
0x1bd8   :  { %12278 = vpow2.f32 %v6254_v63  ;;  %v6234_v38 = vsub.f32 %v16420_v30, %v6205_v10 }
0x1bda   :  { %v6252_v21 = vmul.f32 1.442695, %v6234_v38 }
0x1bdb   :  { %v16559_v63 = vpop.permute.xlu0 %11552 }
0x1bdc   :  { %12280 = vpow2.f32 %v6252_v21 }
0x1bdd   :  { %v16541_v36 = vpop.eup %12274 }
0x1bde   :  { %v16543_v43 = vpop.eup %12276  ;;  %6282 = vadd.xlane.f32.xlu0 %v16541_v36 }
0x1bdf   :  { %6280 = vadd.xlane.f32.xlu1 %v16543_v43 }
0x1be2   :  { %v16547_v52 = vpop.eup %12278 }
0x1be3   :  { %6286 = vadd.xlane.f32.xlu1 %v16547_v52 }
0x1be6   :  { %v16550_v61 = vpop.eup %12280 }
0x1be7   :  { %6284 = vadd.xlane.f32.xlu1 %v16550_v61 }
0x1bf4   :  { %11562 = vrot.lane.b32.xlu0 %v18368_v28, %s12615_s15 }
0x1bf8   :  { %11567 = vrot.lane.b32.xlu1 %v18369_v62, %s12615_s15 }
0x1c03   :  { %v6211_v5 = vpop.xlane.xlu1 %6210 }
0x1c04   :  { %v6237_v6 = vsub.f32 %v16433_v59, %v6211_v5 }
0x1c06   :  { %v6258_v14 = vmul.f32 1.442695, %v6237_v6 }
0x1c07   :  { %v6215_v21 = vpop.xlane.xlu1 %6214 }
0x1c08   :  { %v6239_v30 = vsub.f32 %v16442_v51, %v6215_v21  ;;  %12282 = vpow2.f32 %v6258_v14 }
0x1c0a   :  { %v6262_v62 = vmul.f32 1.442695, %v6239_v30 }
0x1c0b   :  { %v6219_v32 = vpop.xlane.xlu1 %6218 }
0x1c0c   :  { %v6209_v38 = vpop.xlane.xlu0 %6208  ;;  %v6241_v17 = vsub.f32 %v16456_v35, %v6219_v32 }
0x1c0d   :  { %v6236_v10 = vsub.f32 %v16459_v55, %v6209_v38 }
0x1c0e   :  { %v6266_v48 = vmul.f32 1.442695, %v6241_v17 }
0x1c0f   :  { %v6256_v28 = vmul.f32 1.442695, %v6236_v10  ;;  %v6223_v40 = vpop.xlane.xlu1 %6222 }
0x1c10   :  { %v6213_v49 = vpop.xlane.xlu0 %6212  ;;  %v6243_v51 = vsub.f32 %v16474_v16, %v6223_v40 }
0x1c11   :  { %12284 = vpow2.f32 %v6256_v28  ;;  %v6238_v42 = vsub.f32 %v16477_v37, %v6213_v49 }
0x1c12   :  { %12286 = vpow2.f32 %v6262_v62  ;;  %v6270_v32 = vmul.f32 1.442695, %v6243_v51  ;;  %v16569_v30 = vpop.eup %12282 }
0x1c13   :  { %v6260_v59 = vmul.f32 1.442695, %v6238_v42  ;;  %v6227_v5 = vpop.xlane.xlu1 %6226  ;;  %12288 = vpow2.f32 %v6266_v48 }
0x1c14   :  { %v6217_v6 = vpop.xlane.xlu0 %6216  ;;  %v6245_v42 = vsub.f32 %v16492_v39, %v6227_v5 }
0x1c15   :  { %v6240_v35 = vsub.f32 %v16495_v45, %v6217_v6  ;;  %12290 = vpow2.f32 %v6260_v59 }
0x1c16   :  { %v6274_v10 = vmul.f32 1.442695, %v6245_v42 }
0x1c17   :  { %v6264_v21 = vmul.f32 1.442695, %v6240_v35  ;;  %v6231_v38 = vpop.xlane.xlu1 %6230 }
0x1c18   :  { %v6221_v55 = vpop.xlane.xlu0 %6220  ;;  %v6247_v40 = vsub.f32 %v16510_v19, %v6231_v38 }
0x1c19   :  { %12292 = vpow2.f32 %v6264_v21  ;;  %v6242_v14 = vsub.f32 %v16513_v33, %v6221_v55 }
0x1c1a   :  { %12294 = vpow2.f32 %v6270_v32  ;;  %v6278_v28 = vmul.f32 1.442695, %v6247_v40 }
0x1c1b   :  { %v16571_v49 = vpop.eup %12284  ;;  %v6268_v37 = vmul.f32 1.442695, %v6242_v14 }
0x1c1c   :  { %6290 = vadd.xlane.f32.xlu1 %v16569_v30  ;;  %6288 = vadd.xlane.f32.xlu0 %v16571_v49  ;;  %v6225_v48 = vpop.xlane.xlu0 %6224  ;;  %v16578_v45 = vpop.eup %12286 }
0x1c1d   :  { %v6244_v16 = vsub.f32 %v16523_v53, %v6225_v48  ;;  %v16580_v33 = vpop.eup %12288  ;;  %12296 = vpow2.f32 %v6268_v37 }
0x1c1f   :  { %v6272_v17 = vmul.f32 1.442695, %v6244_v16  ;;  %v16585_v59 = vpop.eup %12290 }
0x1c20   :  { %6298 = vadd.xlane.f32.xlu1 %v16580_v33  ;;  %6294 = vadd.xlane.f32.xlu0 %v16578_v45  ;;  %v6229_v39 = vpop.xlane.xlu0 %6228 }
0x1c21   :  { %12298 = vpow2.f32 %v6272_v17  ;;  %v6246_v62 = vsub.f32 %v16532_v3, %v6229_v39 }
0x1c22   :  { %12300 = vpow2.f32 %v6274_v10 }
0x1c23   :  { %v16587_v19 = vpop.eup %12292  ;;  %12302 = vpow2.f32 %v6278_v28  ;;  %v6276_v53 = vmul.f32 1.442695, %v6246_v62 }
0x1c24   :  { %6292 = vadd.xlane.f32.xlu0 %v16585_v59  ;;  %6296 = vadd.xlane.f32.xlu1 %v16587_v19  ;;  %v16591_v5 = vpop.eup %12294 }
0x1c25   :  { %12304 = vpow2.f32 %v6276_v53 }
0x1c27   :  { %v16594_v6 = vpop.eup %12296 }
0x1c28   :  { %6302 = vadd.xlane.f32.xlu1 %v16591_v5 }
0x1c2b   :  { %v16596_v51 = vpop.eup %12298 }
0x1c2c   :  { %6300 = vadd.xlane.f32.xlu1 %v16594_v6  ;;  %6304 = vadd.xlane.f32.xlu0 %v16596_v51  ;;  %v16600_v3 = vpop.eup %12300 }
0x1c2d   :  { %v16602_v35 = vpop.eup %12302 }
0x1c2f   :  { %v16606_v21 = vpop.eup %12304 }
0x1c30   :  { %6306 = vadd.xlane.f32.xlu1 %v16600_v3  ;;  %6310 = vadd.xlane.f32.xlu0 %v16602_v35 }
0x1c34   :  { %6308 = vadd.xlane.f32.xlu0 %v16606_v21 }
0x1c41   :  { %11577 = vrot.lane.b32.xlu1 %v15561_v8, %s12615_s15 }
0x1c45   :  { %6491 = vrot.lane.b32.xlu1 %v15632_v50, %s12616_s24 }
0x1c49   :  { %6495 = vrot.lane.b32.xlu1 %v15642_v47, %s12616_s24 }
0x1c4a   :  { %11572 = vrot.lane.b32.xlu0 %v15569_v31, %s12615_s15 }
0x1c4d   :  { %6499 = vrot.lane.b32.xlu1 %v15654_v12, %s12616_s24 }
0x1c4e   :  { %6489 = vrot.lane.b32.xlu0 %v15473_v7, %s12616_s24 }
0x1c51   :  { %6503 = vrot.lane.b32.xlu1 %v15664_v29, %s12616_s24  ;;  %v11550_v29 = vunpack.i.h.bf16 %v16535_v18 }
0x1c52   :  { %6493 = vrot.lane.b32.xlu0 %v15635_v57, %s12616_s24 }
0x1c55   :  { %6507 = vrot.lane.b32.xlu1 %v15679_v20, %s12616_s24 }
0x1c56   :  { %6497 = vrot.lane.b32.xlu0 %v15647_v4, %s12616_s24 }
0x1c59   :  { %6511 = vrot.lane.b32.xlu1 %v15689_v58, %s12616_s24 }
0x1c5a   :  { %6501 = vrot.lane.b32.xlu0 %v15657_v26, %s12616_s24 }
0x1c5d   :  { %6515 = vrot.lane.b32.xlu1 %v15699_v25, %s12616_s24 }
0x1c5e   :  { %6505 = vrot.lane.b32.xlu0 %v15667_v22, %s12616_s24 }
0x1c61   :  { %6519 = vrot.lane.b32.xlu1 %v15709_v9, %s12616_s24  ;;  %v11559_v9 = vunpack.i.l.bf16 %v16557_v46 }
0x1c62   :  { %6509 = vrot.lane.b32.xlu0 %v15682_v11, %s12616_s24 }
0x1c65   :  { %6916 = vrot.lane.b32.xlu1 %v15481_v41, %s12617_s0 }
0x1c66   :  { %6513 = vrot.lane.b32.xlu0 %v15692_v1, %s12616_s24  ;;  %v11554_v1 = vunpack.i.l.bf16 %v16559_v63 }
0x1c6a   :  { %6517 = vrot.lane.b32.xlu0 %v15702_v24, %s12616_s24  ;;  %v11560_v24 = vunpack.i.h.bf16 %v16557_v46 }
0x1c6b   :  { %v6283_v7 = vpop.xlane.xlu0 %6282 }
0x1c6c   :  { %12306 = vrcp.f32 %v6283_v7  ;;  %v6281_v8 = vpop.xlane.xlu1 %6280 }
0x1c6d   :  { %12308 = vrcp.f32 %v6281_v8 }
0x1c6e   :  { %6914 = vrot.lane.b32.xlu0 %v15489_v27, %s12617_s0 }
0x1c70   :  { %v6287_v31 = vpop.xlane.xlu1 %6286 }
0x1c71   :  { %12310 = vrcp.f32 %v6287_v31 }
0x1c72   :  { %6918 = vrot.lane.b32.xlu0 %v15517_v23, %s12617_s0  ;;  %v11549_v23 = vunpack.i.l.bf16 %v16535_v18  ;;  %v11056_v18 = vpack.c.bf16 %v11560_v24, %v11559_v9 }
0x1c74   :  { %v6285_v50 = vpop.xlane.xlu1 %6284  ;;  %v11044_v58 = vpack.c.bf16 %v11550_v29, %v11549_v23 }
0x1c75   :  { %12312 = vrcp.f32 %v6285_v50 }
0x1c76   :  { %v12307_v41 = vpop.eup %12306  ;;  %6920 = vrot.lane.b32.xlu0 %v15509_v54, %s12617_s0  ;;  %v11555_v54 = vunpack.i.h.bf16 %v16559_v63 }
0x1c77   :  { %v12309_v57 = vpop.eup %12308  ;;  %v6329_v47 = vmul.f32 %v12307_v41, %v16541_v36 }
0x1c78   :  { %v6328_v4 = vmul.f32 %v12309_v57, %v16543_v43  ;;  %v11050_v25 = vpack.c.bf16 %v11555_v54, %v11554_v1 }
0x1c7a   :  { %v6344_v12 = vpack.c.bf16 %v6329_v47, %v6328_v4 }
0x1c7b   :  { %v12311_v26 = vpop.eup %12310 }
0x1c7c   :  { %10491 = vmatprep.mubr.bf16.mxu1 %v6344_v12  ;;  %v6331_v22 = vmul.f32 %v12311_v26, %v16547_v52 }
0x1c7f   :  { %v12313_v27 = vpop.eup %12312 }
0x1c80   :  { %v6330_v20 = vmul.f32 %v12313_v27, %v16550_v61  ;;  %v11568_v61 = vpop.permute.xlu1 %11567 }
0x1c81   :  { %v11570_v63 = vunpack.i.h.bf16 %v11568_v61  ;;  %v11569_v46 = vunpack.i.l.bf16 %v11568_v61 }
0x1c82   :  { %v6345_v11 = vpack.c.bf16 %v6331_v22, %v6330_v20 }
0x1c83   :  { %v11068_v55 = vpack.c.bf16 %v11570_v63, %v11569_v46 }
0x1c84   :  { %10492 = vmatmul.mubr.bf16.vlgmr.msra.gmra.mrb[144].mxu1 %v6345_v11 }
0x1c85   :  { %11043 = vmatpush3.bf16.xpose.msk.msra.mxu1 %vm13178_vm4, %v16334_v15  ;;  %v11563_v15 = vpop.permute.xlu0 %11562 }
0x1c86   :  { %11046 = vmatprep.subr.msk.bf16.mxu1 %vm13178_vm4, %v11044_v58  ;;  %v11565_v36 = vunpack.i.h.bf16 %v11563_v15  ;;  %v11564_v43 = vunpack.i.l.bf16 %v11563_v15 }
0x1c88   :  { %v11062_v52 = vpack.c.bf16 %v11565_v36, %v11564_v43 }
0x1c8d   :  { %11049 = vmatpush3.bf16.xpose.msk.msra.mxu1 %vm13178_vm4, %v11044_v58 }
0x1c8e   :  { %11052 = vmatprep.subr.msk.bf16.mxu1 %vm13178_vm4, %v11050_v25 }
0x1c95   :  { %11055 = vmatpush3.bf16.xpose.msk.msra.mxu1 %vm13178_vm4, %v11050_v25 }
0x1c96   :  { %11058 = vmatprep.subr.msk.bf16.mxu1 %vm13178_vm4, %v11056_v18 }
0x1c9d   :  { %11061 = vmatpush3.bf16.xpose.msk.msra.mxu1 %vm13178_vm4, %v11056_v18 }
0x1c9e   :  { %11064 = vmatprep.subr.msk.bf16.mxu1 %vm13178_vm4, %v11062_v52 }
0x1ca5   :  { %11067 = vmatpush3.bf16.xpose.msk.msra.mxu1 %vm13178_vm4, %v11062_v52 }
0x1ca6   :  { %11070 = vmatprep.subr.msk.bf16.mxu1 %vm13178_vm4, %v11068_v55 }
0x1ca9   :  { %v6291_v32 = vpop.xlane.xlu1 %6290  ;;  %v6289_v14 = vpop.xlane.xlu0 %6288 }
0x1caa   :  { %12314 = vrcp.f32 %v6291_v32 }
0x1cab   :  { %12316 = vrcp.f32 %v6289_v14 }
0x1cad   :  { %11073 = vmatpush3.bf16.xpose.msk.msra.mxu1 %vm13178_vm4, %v11068_v55  ;;  %v6299_v38 = vpop.xlane.xlu1 %6298  ;;  %v6295_v42 = vpop.xlane.xlu0 %6294 }
0x1cae   :  { %12318 = vrcp.f32 %v6299_v38 }
0x1caf   :  { %12320 = vrcp.f32 %v6295_v42 }
0x1cb1   :  { %v6297_v37 = vpop.xlane.xlu1 %6296  ;;  %v6293_v48 = vpop.xlane.xlu0 %6292 }
0x1cb2   :  { %12322 = vrcp.f32 %v6297_v37 }
0x1cb3   :  { %12324 = vrcp.f32 %v6293_v48 }
0x1cb4   :  { %v12315_v40 = vpop.eup %12314 }
0x1cb5   :  { %v12317_v16 = vpop.eup %12316  ;;  %v6303_v17 = vpop.xlane.xlu1 %6302  ;;  %v6333_v10 = vmul.f32 %v12315_v40, %v16569_v30 }
0x1cb6   :  { %v6332_v39 = vmul.f32 %v12317_v16, %v16571_v49  ;;  %12326 = vrcp.f32 %v6303_v17 }
0x1cb8   :  { %v6346_v28 = vpack.c.bf16 %v6333_v10, %v6332_v39  ;;  %v12319_v7 = vpop.eup %12318 }
0x1cb9   :  { %v6301_v62 = vpop.xlane.xlu1 %6300  ;;  %v6305_v53 = vpop.xlane.xlu0 %6304  ;;  %v6337_v4 = vmul.f32 %v12319_v7, %v16580_v33 }
0x1cba   :  { %12328 = vrcp.f32 %v6301_v62  ;;  %10495 = vmatprep.mubr.bf16.mxu1 %v6346_v28  ;;  %v12321_v8 = vpop.eup %12320 }
0x1cbb   :  { %12330 = vrcp.f32 %v6305_v53  ;;  %v6335_v49 = vmul.f32 %v12321_v8, %v16578_v45 }
0x1cbc   :  { %v12323_v31 = vpop.eup %12322 }
0x1cbd   :  { %v12325_v50 = vpop.eup %12324  ;;  %v6307_v41 = vpop.xlane.xlu1 %6306  ;;  %v6336_v47 = vmul.f32 %v12323_v31, %v16587_v19 }
0x1cbe   :  { %v6311_v57 = vpop.xlane.xlu0 %6310  ;;  %12332 = vrcp.f32 %v6307_v41  ;;  %v6334_v30 = vmul.f32 %v12325_v50, %v16585_v59 }
0x1cbf   :  { %v6348_v12 = vpack.c.bf16 %v6337_v4, %v6336_v47  ;;  %12334 = vrcp.f32 %v6311_v57 }
0x1cc0   :  { %v6347_v26 = vpack.c.bf16 %v6335_v49, %v6334_v30  ;;  %v12327_v23 = vpop.eup %12326 }
0x1cc1   :  { %v11578_v27 = vpop.permute.xlu1 %11577  ;;  %v6339_v33 = vmul.f32 %v12327_v23, %v16591_v5 }
0x1cc2   :  { %v6309_v29 = vpop.xlane.xlu0 %6308  ;;  %10496 = vmatmul.mubr.bf16.gmra.mrb[148].mxu1 %v6347_v26  ;;  %v11580_v59 = vunpack.i.h.bf16 %v11578_v27  ;;  %v11579_v54 = vunpack.i.l.bf16 %v11578_v27 }
0x1cc3   :  { %12336 = vrcp.f32 %v6309_v29  ;;  %10499 = vmatprep.mubr.bf16.mxu1 %v6348_v12 }
0x1cc4   :  { %v12329_v22 = vpop.eup %12328  ;;  %v11080_v61 = vpack.c.bf16 %v11580_v59, %v11579_v54 }
0x1cc5   :  { %v6492_v20 = vpop.permute.xlu1 %6491  ;;  %v6338_v19 = vmul.f32 %v12329_v22, %v16594_v6  ;;  %v12331_v58 = vpop.eup %12330 }
0x1cc6   :  { %v11573_v11 = vpop.permute.xlu0 %11572  ;;  %v6340_v36 = vmul.f32 %v12331_v58, %v16596_v51 }
0x1cc7   :  { %v11575_v45 = vunpack.i.h.bf16 %v11573_v11  ;;  %v11574_v1 = vunpack.i.l.bf16 %v11573_v11  ;;  %v6349_v25 = vpack.c.bf16 %v6339_v33, %v6338_v19 }
0x1cc8   :  { %v12333_v24 = vpop.eup %12332 }
0x1cc9   :  { %v11074_v9 = vpack.c.bf16 %v11575_v45, %v11574_v1  ;;  %v6496_v18 = vpop.permute.xlu1 %6495  ;;  %v6341_v43 = vmul.f32 %v12333_v24, %v16600_v3  ;;  %v12335_v52 = vpop.eup %12334 }
0x1cca   :  { %v6490_v15 = vpop.permute.xlu0 %6489  ;;  %10500 = vmatmul.mubr.bf16.gmra.mrb[152].mxu1 %v6349_v25  ;;  %v6343_v3 = vmul.f32 %v12335_v52, %v16602_v35 }
0x1ccb   :  { %11076 = vmatprep.subr.msk.bf16.mxu1 %vm13178_vm4, %v11074_v9  ;;  %v6350_v5 = vpack.c.bf16 %v6341_v43, %v6340_v36 }
0x1ccc   :  { %11079 = vmatpush3.bf16.xpose.msk.msra.mxu1 %vm13178_vm4, %v11074_v9 }
0x1ccd   :  { %v12337_v6 = vpop.eup %12336  ;;  %11082 = vmatprep.subr.msk.bf16.mxu1 %vm13178_vm4, %v11080_v61  ;;  %v6500_v63 = vpop.permute.xlu1 %6499  ;;  %10503 = vmatprep.mubr.bf16.mxu1 %v6350_v5 }
0x1cce   :  { %v6494_v46 = vpop.permute.xlu0 %6493  ;;  %v6342_v51 = vmul.f32 %v12337_v6, %v16606_v21 }
0x1cd0   :  { %v6351_v55 = vpack.c.bf16 %v6343_v3, %v6342_v51  ;;  %v18372_v3 = vld [vmem:[#allocation59_spill] sm:$0xff] }
0x1cd1   :  { %v6504_v32 = vpop.permute.xlu1 %6503 }
0x1cd2   :  { %v6498_v14 = vpop.permute.xlu0 %6497  ;;  %10504 = vmatmul.mubr.bf16.gmra.mrb[156].mxu1 %v6351_v55  ;;  %v18373_v55 = vld [vmem:[#allocation56_spill] sm:$0xff] }
0x1cd3   :  { %10539 = vmatprep.mubr.msk.f32.mxu1 %vm731_vm3, %v6490_v15 }
0x1cd4   :  { %11085 = vmatpush3.bf16.xpose.msk.msra.mxu1 %vm13178_vm4, %v11080_v61 }
0x1cd5   :  { %v6508_v38 = vpop.permute.xlu1 %6507 }
0x1cd6   :  { %v6502_v42 = vpop.permute.xlu0 %6501 }
0x1cd9   :  { %v6512_v37 = vpop.permute.xlu1 %6511 }
0x1cda   :  { %v6506_v48 = vpop.permute.xlu0 %6505 }
0x1cdb   :  { %10540 = vmatmul.mubr.msk.f32.vlgmr.msra.gmra.mrb[160].mxu1 %vm731_vm3, %v6492_v20 }
0x1cdc   :  { %10542 = vmatprep.mubr.msk.f32.mxu1 %vm731_vm3, %v6494_v46 }
0x1cdd   :  { %v6516_v35 = vpop.permute.xlu1 %6515 }
0x1cde   :  { %v6510_v21 = vpop.permute.xlu0 %6509 }
0x1cdf   :  { %10543 = vmatmul.mubr.msk.f32.gmra.mrb[162].mxu1 %vm731_vm3, %v6496_v18 }
0x1ce0   :  { %10545 = vmatprep.mubr.msk.f32.mxu1 %vm731_vm3, %v6498_v14  ;;  %v18374_v14 = vld [vmem:[#allocation62_spill] sm:$0xff] }
0x1ce1   :  { %v6520_v0 = vpop.permute.xlu1 %6519 }
0x1ce2   :  { %v6514_v40 = vpop.permute.xlu0 %6513 }
0x1ce3   :  { %10546 = vmatmul.mubr.msk.f32.gmra.mrb[164].mxu1 %vm731_vm3, %v6500_v63 }
0x1ce4   :  { %10548 = vmatprep.mubr.msk.f32.mxu1 %vm731_vm3, %v6502_v42 }
0x1ce5   :  { %v6917_v10 = vpop.permute.xlu1 %6916 }
0x1ce6   :  { %v6518_v16 = vpop.permute.xlu0 %6517 }
0x1ce7   :  { %10549 = vmatmul.mubr.msk.f32.gmra.mrb[166].mxu1 %vm731_vm3, %v6504_v32 }
0x1ce8   :  { %10551 = vmatprep.mubr.msk.f32.mxu1 %vm731_vm3, %v6506_v48 }
0x1cea   :  { %v6915_v17 = vpop.permute.xlu0 %6914 }
0x1ceb   :  { %10552 = vmatmul.mubr.msk.f32.gmra.mrb[168].mxu1 %vm731_vm3, %v6508_v38  ;;  %10563 = vmatprep.subr.bf16.mxu0 %v6915_v17 }
0x1cec   :  { %10554 = vmatprep.mubr.msk.f32.mxu1 %vm731_vm3, %v6510_v21  ;;  %10564 = vmatpush3.bf16.msra.mxu0 %v6915_v17 }
0x1ced   :  { %10565 = vmatprep.subr.bf16.mxu0 %v6917_v10 }
0x1cee   :  { %v6919_v39 = vpop.permute.xlu0 %6918 }
0x1cef   :  { %10555 = vmatmul.mubr.msk.f32.gmra.mrb[170].mxu1 %vm731_vm3, %v6512_v37  ;;  %v18375_v37 = vld [vmem:[#allocation57_spill] sm:$0xff] }
0x1cf0   :  { %10557 = vmatprep.mubr.msk.f32.mxu1 %vm731_vm3, %v6514_v40  ;;  %10566 = vmatpush3.bf16.msra.mxu0 %v6917_v10 }
0x1cf1   :  { %10567 = vmatprep.subr.bf16.mxu0 %v6919_v39 }
0x1cf2   :  { %v6921_v28 = vpop.permute.xlu0 %6920 }
0x1cf3   :  { %10558 = vmatmul.mubr.msk.f32.gmra.mrb[172].mxu1 %vm731_vm3, %v6516_v35  ;;  %v18376_v35 = vld [vmem:[#allocation21_spill] sm:$0xff] }
0x1cf4   :  { %10560 = vmatprep.mubr.msk.f32.mxu1 %vm731_vm3, %v6518_v16  ;;  %10568 = vmatpush3.bf16.msra.mxu0 %v6919_v39  ;;  %v18377_v16 = vld [vmem:[#allocation60_spill] sm:$0xff]  ;;  %v18378_v39 = vld [vmem:[#allocation22_spill] sm:$0xff] }
0x1cf5   :  { %10569 = vmatprep.subr.bf16.mxu0 %v6921_v28 }
0x1cf7   :  { %10561 = vmatmul.mubr.msk.f32.gmra.mrb[174].mxu1 %vm731_vm3, %v6520_v0 }
0x1cf8   :  { %10570 = vmatpush3.bf16.msra.mxu0 %v6921_v28 }
0x1d57   :  { %v16722_v62 = vpop.f32.mrb[144].mxu1 }
0x1d58   :  { %v16724_v53 = vpop.f32.mrb[145].mxu1 }
0x1d59   :  { %v16726_v7 = vpop.f32.mrb[146].mxu1 }
0x1d5a   :  { %v11596_v8 = vpack.i.bf16 %v16726_v7, %v16722_v62  ;;  %v16730_v31 = vpop.f32.mrb[147].mxu1 }
0x1d5b   :  { %v11591_v50 = vpack.i.bf16 %v16730_v31, %v16724_v53 }
0x1d95   :  { %v16734_v41 = vpop.f32.mrb[148].mxu1 }
0x1d96   :  { %v16736_v57 = vpop.f32.mrb[149].mxu1 }
0x1d97   :  { %v16738_v47 = vpop.f32.mrb[150].mxu1 }
0x1d98   :  { %v11626_v4 = vpack.i.bf16 %v16738_v47, %v16734_v41  ;;  %v16742_v30 = vpop.f32.mrb[151].mxu1 }
0x1d99   :  { %v11621_v49 = vpack.i.bf16 %v16742_v30, %v16736_v57 }
0x1d9d   :  { %v16746_v12 = vpop.f32.mrb[152].mxu1 }
0x1d9e   :  { %v16748_v26 = vpop.f32.mrb[153].mxu1 }
0x1d9f   :  { %v16750_v27 = vpop.f32.mrb[154].mxu1 }
0x1da0   :  { %v11656_v29 = vpack.i.bf16 %v16750_v27, %v16746_v12  ;;  %v16754_v23 = vpop.f32.mrb[155].mxu1  ;;  %v18403_v12 = vld [vmem:[#allocation51_spill] sm:$0xff] }
0x1da1   :  { %v11651_v22 = vpack.i.bf16 %v16754_v23, %v16748_v26  ;;  %v18405_v26 = vld [vmem:[#allocation55_spill] sm:$0xff]  ;;  %v18406_v23 = vld [vmem:[#allocation54_spill] sm:$0xff] }
0x1da5   :  { %v16758_v20 = vpop.f32.mrb[156].mxu1 }
0x1da6   :  { %v16760_v11 = vpop.f32.mrb[157].mxu1 }
0x1da7   :  { %v16762_v19 = vpop.f32.mrb[158].mxu1 }
0x1da8   :  { %v11686_v33 = vpack.i.bf16 %v16762_v19, %v16758_v20  ;;  %v16766_v58 = vpop.f32.mrb[159].mxu1 }
0x1da9   :  { %v11681_v59 = vpack.i.bf16 %v16766_v58, %v16760_v11  ;;  %v18409_v58 = vld [vmem:[#allocation63_spill] sm:$0xff] }
0x1dae   :  { %v10541_v54 = vpop.f32.mrb[160].mxu1 }
0x1daf   :  { %v6689_v45 = vadd.f32 %v10541_v54, %v16390_v60  ;;  %v6683_v1 = vpop.f32.mrb[161].mxu1  ;;  %v18379_v54 = vld [vmem:[#allocation41_spill] sm:$0xff] }
0x1db0   :  { %v6684_v25 = vadd.f32 %v6683_v1, %v16395_v56  ;;  %v18370_v56 = vld [vmem:[#allocation58_spill] sm:$0xff] }
0x1db1   :  { %6764 = vmax.xlane.f32.xlu1 %v6689_v45 }
0x1db2   :  { %v10544_v24 = vpop.f32.mrb[162].mxu1  ;;  %6762 = vmax.xlane.f32.xlu0 %v6684_v25 }
0x1db3   :  { %v6699_v9 = vadd.f32 %v10544_v24, %v16406_v34  ;;  %v6693_v18 = vpop.f32.mrb[163].mxu1  ;;  %v18371_v34 = vld [vmem:[#allocation53_spill] sm:$0xff]  ;;  %v18380_v24 = vld [vmem:[#allocation42_spill] sm:$0xff] }
0x1db4   :  { %v6694_v52 = vadd.f32 %v6693_v18, %v16416_v44  ;;  %v18381_v18 = vld [vmem:[#allocation43_spill] sm:$0xff] }
0x1db6   :  { %v10547_v15 = vpop.f32.mrb[164].mxu1  ;;  %6768 = vmax.xlane.f32.xlu0 %v6699_v9 }
0x1db7   :  { %v6709_v36 = vadd.f32 %v10547_v15, %v16430_v13  ;;  %v6703_v43 = vpop.f32.mrb[165].mxu1 }
0x1db8   :  { %v6704_v6 = vadd.f32 %v6703_v43, %v18370_v56 }
0x1db9   :  { %6772 = vmax.xlane.f32.xlu1 %v6709_v36 }
0x1dba   :  { %v10550_v61 = vpop.f32.mrb[166].mxu1  ;;  %6766 = vmax.xlane.f32.xlu0 %v6694_v52 }
0x1dbb   :  { %v6719_v60 = vadd.f32 %v10550_v61, %v16438_v2  ;;  %v6713_v5 = vpop.f32.mrb[167].mxu1 }
0x1dbc   :  { %v6714_v13 = vadd.f32 %v6713_v5, %v18372_v3 }
0x1dbd   :  { %6776 = vmax.xlane.f32.xlu1 %v6719_v60 }
0x1dbe   :  { %v10553_v63 = vpop.f32.mrb[168].mxu1  ;;  %6770 = vmax.xlane.f32.xlu0 %v6704_v6 }
0x1dbf   :  { %v16778_v46 = vadd.f32 %v10553_v63, %v18371_v34  ;;  %v6723_v51 = vpop.f32.mrb[169].mxu1 }
0x1dc0   :  { %v16786_v38 = vadd.f32 %v6723_v51, %v18374_v14 }
0x1dc1   :  { %6780 = vmax.xlane.f32.xlu1 %v16778_v46 }
0x1dc2   :  { %v10556_v44 = vpop.f32.mrb[170].mxu1  ;;  %6774 = vmax.xlane.f32.xlu0 %v6714_v13 }
0x1dc3   :  { %v16783_v32 = vadd.f32 %v10556_v44, %v18373_v55  ;;  %v6733_v2 = vpop.f32.mrb[171].mxu1 }
0x1dc4   :  { %v16794_v40 = vadd.f32 %v6733_v2, %v18376_v35 }
0x1dc5   :  { %6784 = vmax.xlane.f32.xlu1 %v16783_v32 }
0x1dc6   :  { %v10559_v42 = vpop.f32.mrb[172].mxu1  ;;  %6778 = vmax.xlane.f32.xlu0 %v16786_v38 }
0x1dc7   :  { %v16791_v48 = vadd.f32 %v10559_v42, %v18375_v37  ;;  %v6743_v21 = vpop.f32.mrb[173].mxu1 }
0x1dc8   :  { %v16802_v28 = vadd.f32 %v6743_v21, %v18378_v39 }
0x1dc9   :  { %6788 = vmax.xlane.f32.xlu1 %v16791_v48 }
0x1dca   :  { %v10562_v0 = vpop.f32.mrb[174].mxu1  ;;  %6782 = vmax.xlane.f32.xlu0 %v16794_v40 }
0x1dcb   :  { %v16799_v17 = vadd.f32 %v10562_v0, %v18377_v16  ;;  %v6753_v10 = vpop.f32.mrb[175].mxu1 }
0x1dcc   :  { %v16807_v1 = vadd.f32 %v6753_v10, %v18379_v54 }
0x1dcd   :  { %6792 = vmax.xlane.f32.xlu1 %v16799_v17 }
0x1dce   :  { %6786 = vmax.xlane.f32.xlu0 %v16802_v28 }
0x1dd2   :  { %6790 = vmax.xlane.f32.xlu0 %v16807_v1 }
0x1dde   :  { %6924 = vrot.lane.b32.xlu1 %v18380_v24, %s12617_s0 }
0x1de8   :  { %6922 = vrot.lane.b32.xlu0 %v18381_v18, %s12617_s0 }
0x1e3e   :  { %v6765_v15 = vpop.xlane.xlu1 %6764 }
0x1e3f   :  { %v6795_v43 = vsub.f32 %v6689_v45, %v6765_v15  ;;  %v6763_v61 = vpop.xlane.xlu0 %6762 }
0x1e40   :  { %v6794_v5 = vsub.f32 %v6684_v25, %v6763_v61 }
0x1e41   :  { %v6812_v56 = vmul.f32 1.442695, %v6795_v43 }
0x1e42   :  { %v6810_v63 = vmul.f32 1.442695, %v6794_v5 }
0x1e43   :  { %12338 = vpow2.f32 %v6812_v56  ;;  %v6769_v34 = vpop.xlane.xlu0 %6768 }
0x1e44   :  { %v6797_v51 = vsub.f32 %v6699_v9, %v6769_v34  ;;  %12340 = vpow2.f32 %v6810_v63 }
0x1e46   :  { %v6816_v3 = vmul.f32 1.442695, %v6797_v51  ;;  %v6773_v44 = vpop.xlane.xlu1 %6772 }
0x1e47   :  { %v6799_v55 = vsub.f32 %v6709_v36, %v6773_v44  ;;  %v6767_v2 = vpop.xlane.xlu0 %6766 }
0x1e48   :  { %v6796_v14 = vsub.f32 %v6694_v52, %v6767_v2  ;;  %12342 = vpow2.f32 %v6816_v3  ;;  %v18383_v2 = vld [vmem:[#allocation46_spill] sm:$0xff] }
0x1e49   :  { %v6820_v42 = vmul.f32 1.442695, %v6799_v55  ;;  %v18382_v55 = vld [vmem:[#allocation48_spill] sm:$0xff] }
0x1e4a   :  { %v6814_v37 = vmul.f32 1.442695, %v6796_v14  ;;  %v6777_v21 = vpop.xlane.xlu1 %6776 }
0x1e4b   :  { %12344 = vpow2.f32 %v6820_v42  ;;  %v6801_v35 = vsub.f32 %v6719_v60, %v6777_v21  ;;  %v6771_v45 = vpop.xlane.xlu0 %6770 }
0x1e4c   :  { %v6798_v0 = vsub.f32 %v6704_v6, %v6771_v45  ;;  %12346 = vpow2.f32 %v6814_v37 }
0x1e4d   :  { %v16814_v25 = vpop.eup %12338  ;;  %v6824_v16 = vmul.f32 1.442695, %v6801_v35 }
0x1e4e   :  { %v6781_v10 = vpop.xlane.xlu1 %6780  ;;  %6844 = vadd.xlane.f32.xlu1 %v16814_v25  ;;  %v6818_v9 = vmul.f32 1.442695, %v6798_v0  ;;  %v16817_v52 = vpop.eup %12340 }
0x1e4f   :  { %12348 = vpow2.f32 %v6824_v16  ;;  %v6775_v36 = vpop.xlane.xlu0 %6774  ;;  %v6803_v42 = vsub.f32 %v16778_v46, %v6781_v10 }
0x1e50   :  { %v6800_v39 = vsub.f32 %v6714_v13, %v6775_v36  ;;  %12350 = vpow2.f32 %v6818_v9 }
0x1e51   :  { %v6828_v35 = vmul.f32 1.442695, %v6803_v42 }
0x1e52   :  { %v6822_v54 = vmul.f32 1.442695, %v6800_v39  ;;  %6842 = vadd.xlane.f32.xlu1 %v16817_v52  ;;  %v6785_v60 = vpop.xlane.xlu1 %6784  ;;  %v16820_v6 = vpop.eup %12342 }
0x1e53   :  { %v6779_v24 = vpop.xlane.xlu0 %6778  ;;  %v6805_v37 = vsub.f32 %v16783_v32, %v6785_v60 }
0x1e54   :  { %12352 = vpow2.f32 %v6822_v54  ;;  %v6802_v14 = vsub.f32 %v16786_v38, %v6779_v24 }
0x1e55   :  { %v16822_v18 = vpop.eup %12344  ;;  %v6832_v0 = vmul.f32 1.442695, %v6805_v37 }
0x1e56   :  { %6852 = vadd.xlane.f32.xlu0 %v16822_v18  ;;  %6848 = vadd.xlane.f32.xlu1 %v16820_v6  ;;  %v16826_v43 = vpop.eup %12346  ;;  %v6789_v61 = vpop.xlane.xlu1 %6788  ;;  %v6826_v21 = vmul.f32 1.442695, %v6802_v14 }
0x1e57   :  { %v6783_v15 = vpop.xlane.xlu0 %6782  ;;  %v6807_v16 = vsub.f32 %v16791_v48, %v6789_v61  ;;  %v18384_v61 = vld [vmem:[#allocation26_spill] sm:$0xff] }
0x1e58   :  { %v6804_v45 = vsub.f32 %v16794_v40, %v6783_v15  ;;  %12354 = vpow2.f32 %v6826_v21 }
0x1e59   :  { %v16828_v13 = vpop.eup %12348  ;;  %12356 = vpow2.f32 %v6828_v35  ;;  %v6836_v39 = vmul.f32 1.442695, %v6807_v16 }
0x1e5a   :  { %6856 = vadd.xlane.f32.xlu0 %v16828_v13  ;;  %6846 = vadd.xlane.f32.xlu1 %v16826_v43  ;;  %v16832_v56 = vpop.eup %12350  ;;  %v6793_v34 = vpop.xlane.xlu1 %6792  ;;  %v6830_v9 = vmul.f32 1.442695, %v6804_v45  ;;  %12358 = vpow2.f32 %v6832_v0 }
0x1e5b   :  { %v6787_v5 = vpop.xlane.xlu0 %6786  ;;  %v6809_v38 = vsub.f32 %v16799_v17, %v6793_v34 }
0x1e5c   :  { %v6806_v36 = vsub.f32 %v16802_v28, %v6787_v5  ;;  %12360 = vpow2.f32 %v6830_v9  ;;  %v18385_v5 = vld [vmem:[#allocation24_spill] sm:$0xff] }
0x1e5d   :  { %12362 = vpow2.f32 %v6836_v39  ;;  %v6840_v10 = vmul.f32 1.442695, %v6809_v38  ;;  %v18386_v34 = vpack.i.bf16 %v18384_v61, %v18385_v5 }
0x1e5e   :  { %v16834_v63 = vpop.eup %12352  ;;  %6850 = vadd.xlane.f32.xlu1 %v16832_v56  ;;  %v6925_v44 = vpop.permute.xlu1 %6924  ;;  %v6834_v46 = vmul.f32 1.442695, %v6806_v36 }
0x1e5f   :  { %6854 = vadd.xlane.f32.xlu0 %v16834_v63  ;;  %v6791_v51 = vpop.xlane.xlu0 %6790 }
0x1e60   :  { %v6808_v32 = vsub.f32 %v16807_v1, %v6791_v51  ;;  %12364 = vpow2.f32 %v6834_v46  ;;  %v18387_v51 = vld [vmem:[#allocation25_spill] sm:$0xff] }
0x1e61   :  { %12366 = vpow2.f32 %v6840_v10 }
0x1e62   :  { %v6838_v40 = vmul.f32 1.442695, %v6808_v32  ;;  %v16850_v54 = vpop.eup %12354 }
0x1e63   :  { %v6923_v3 = vpop.permute.xlu0 %6922  ;;  %v16852_v60 = vpop.eup %12356 }
0x1e64   :  { %10571 = vmatprep.subr.bf16.mxu0 %v6923_v3  ;;  %12368 = vpow2.f32 %v6838_v40  ;;  %v16856_v48 = vpop.eup %12358 }
0x1e65   :  { %10572 = vmatpush3.bf16.msra.mxu0 %v6923_v3  ;;  %v18388_v3 = vld [vmem:[#allocation23_spill] sm:$0xff] }
0x1e66   :  { %10573 = vmatprep.subr.bf16.mxu0 %v6925_v44  ;;  %v16858_v17 = vpop.eup %12360 }
0x1e67   :  { %v16862_v28 = vpop.eup %12362 }
0x1e69   :  { %10574 = vmatpush3.bf16.msra.mxu0 %v6925_v44  ;;  %v18389_v44 = vpack.i.bf16 %v18387_v51, %v18388_v3 }
0x1e6a   :  { %v16864_v1 = vpop.eup %12364 }
0x1e6b   :  { %v16868_v24 = vpop.eup %12366 }
0x1e6e   :  { %v16870_v15 = vpop.eup %12368 }
0x1e6f   :  { %6928 = vrot.lane.b32.xlu1 %v18382_v55, %s12617_s0 }
0x1e75   :  { %6926 = vrot.lane.b32.xlu0 %v18383_v2, %s12617_s0 }
0x1e93   :  { %6858 = vadd.xlane.f32.xlu1 %v16850_v54 }
0x1e94   :  { %6860 = vadd.xlane.f32.xlu0 %v16852_v60 }
0x1e97   :  { %6864 = vadd.xlane.f32.xlu1 %v16856_v48 }
0x1e98   :  { %6862 = vadd.xlane.f32.xlu0 %v16858_v17 }
0x1e9b   :  { %6868 = vadd.xlane.f32.xlu1 %v16862_v28 }
0x1e9c   :  { %6866 = vadd.xlane.f32.xlu0 %v16864_v1 }
0x1e9f   :  { %6872 = vadd.xlane.f32.xlu1 %v16868_v24 }
0x1ea0   :  { %6870 = vadd.xlane.f32.xlu0 %v16870_v15 }
0x1eb0   :  { %11587 = vrot.lane.b32.xlu1 %v18386_v34, %s12607_s18 }
0x1eb4   :  { %11592 = vrot.lane.b32.xlu1 %v11591_v50, %s12618_s25 }
0x1eb6   :  { %11582 = vrot.lane.b32.xlu0 %v18389_v44, %s12607_s18 }
0x1eb8   :  { %11597 = vrot.lane.b32.xlu1 %v11596_v8, %s12618_s25 }
0x1edb   :  { %v6845_v55 = vpop.xlane.xlu1 %6844 }
0x1edc   :  { %12370 = vrcp.f32 %v6845_v55 }
0x1edf   :  { %v6843_v2 = vpop.xlane.xlu1 %6842 }
0x1ee0   :  { %12372 = vrcp.f32 %v6843_v2 }
0x1ee3   :  { %v6849_v14 = vpop.xlane.xlu1 %6848  ;;  %v6853_v42 = vpop.xlane.xlu0 %6852 }
0x1ee4   :  { %12374 = vrcp.f32 %v6849_v14 }
0x1ee6   :  { %v12371_v31 = vpop.eup %12370 }
0x1ee7   :  { %v6847_v37 = vpop.xlane.xlu1 %6846  ;;  %v6857_v53 = vpop.xlane.xlu0 %6856  ;;  %v6891_v45 = vmul.f32 %v12371_v31, %v16814_v25 }
0x1ee8   :  { %12376 = vrcp.f32 %v6847_v37 }
0x1ee9   :  { %12378 = vrcp.f32 %v6853_v42 }
0x1eea   :  { %v12373_v50 = vpop.eup %12372 }
0x1eeb   :  { %v6851_v21 = vpop.xlane.xlu1 %6850  ;;  %v6890_v35 = vmul.f32 %v12373_v50, %v16817_v52 }
0x1eec   :  { %12380 = vrcp.f32 %v6851_v21  ;;  %v6855_v62 = vpop.xlane.xlu0 %6854 }
0x1eed   :  { %v6906_v7 = vpack.c.bf16 %v6891_v45, %v6890_v35  ;;  %12382 = vrcp.f32 %v6855_v62 }
0x1eee   :  { %12384 = vrcp.f32 %v6857_v53  ;;  %v12375_v0 = vpop.eup %12374 }
0x1eef   :  { %10579 = vmatprep.mubr.bf16.mxu0 %v6906_v7  ;;  %v6929_v9 = vpop.permute.xlu1 %6928  ;;  %v6893_v52 = vmul.f32 %v12375_v0, %v16820_v6 }
0x1ef0   :  { %v6927_v8 = vpop.permute.xlu0 %6926 }
0x1ef1   :  { %10575 = vmatprep.subr.bf16.mxu0 %v6927_v8 }
0x1ef2   :  { %v12377_v16 = vpop.eup %12376  ;;  %10576 = vmatpush3.bf16.msra.mxu0 %v6927_v8 }
0x1ef3   :  { %v6892_v36 = vmul.f32 %v12377_v16, %v16826_v43  ;;  %10577 = vmatprep.subr.bf16.mxu0 %v6929_v9  ;;  %v12379_v39 = vpop.eup %12378 }
0x1ef4   :  { %v6895_v32 = vmul.f32 %v12379_v39, %v16822_v18 }
0x1ef5   :  { %v6907_v25 = vpack.c.bf16 %v6893_v52, %v6892_v36 }
0x1ef6   :  { %v12381_v38 = vpop.eup %12380  ;;  %10578 = vmatpush3.bf16.msra.mxu0 %v6929_v9 }
0x1ef7   :  { %v6894_v46 = vmul.f32 %v12381_v38, %v16832_v56  ;;  %v12383_v10 = vpop.eup %12382 }
0x1ef8   :  { %v12385_v61 = vpop.eup %12384  ;;  %v6896_v5 = vmul.f32 %v12383_v10, %v16834_v63 }
0x1ef9   :  { %10580 = vmatmul.mubr.bf16.vlgmr.msra.gmra.mrb[160].mxu0 %v6907_v25  ;;  %v6908_v40 = vpack.c.bf16 %v6895_v32, %v6894_v46  ;;  %v6897_v43 = vmul.f32 %v12385_v61, %v16828_v13  ;;  %v18390_v25 = vld [vmem:[#allocation35_spill] sm:$0xff]  ;;  %v18394_v61 = vld [vmem:[#allocation29_spill] sm:$0xff] }
0x1efa   :  { %v18391_v46 = vld [vmem:[#allocation31_spill] sm:$0xff] }
0x1efb   :  { %10583 = vmatprep.mubr.bf16.mxu0 %v6908_v40  ;;  %v6909_v34 = vpack.c.bf16 %v6897_v43, %v6896_v5  ;;  %v18392_v32 = vpack.i.bf16 %v18390_v25, %v18391_v46  ;;  %v18393_v40 = vld [vmem:[#allocation49_spill] sm:$0xff] }
0x1efc   :  { %v18395_v5 = vpack.i.bf16 %v18393_v40, %v18394_v61 }
0x1f01   :  { %10584 = vmatmul.mubr.bf16.gmra.mrb[164].mxu0 %v6909_v34 }
0x1f20   :  { %v6859_v51 = vpop.xlane.xlu1 %6858 }
0x1f21   :  { %12386 = vrcp.f32 %v6859_v51  ;;  %v6861_v6 = vpop.xlane.xlu0 %6860 }
0x1f22   :  { %12388 = vrcp.f32 %v6861_v6 }
0x1f24   :  { %v6865_v3 = vpop.xlane.xlu1 %6864 }
0x1f25   :  { %12390 = vrcp.f32 %v6865_v3  ;;  %v6863_v56 = vpop.xlane.xlu0 %6862  ;;  %v18396_v3 = vld [vmem:[#allocation50_spill] sm:$0xff] }
0x1f26   :  { %12392 = vrcp.f32 %v6863_v56  ;;  %v18397_v56 = vld [vmem:[#allocation47_spill] sm:$0xff] }
0x1f28   :  { %v6869_v18 = vpop.xlane.xlu1 %6868 }
0x1f29   :  { %12394 = vrcp.f32 %v6869_v18  ;;  %v6867_v44 = vpop.xlane.xlu0 %6866  ;;  %v18398_v18 = vpack.i.bf16 %v18396_v3, %v18397_v56 }
0x1f2a   :  { %12396 = vrcp.f32 %v6867_v44  ;;  %v18399_v44 = vld [vmem:[#allocation36_spill] sm:$0xff] }
0x1f2b   :  { %v12387_v55 = vpop.eup %12386 }
0x1f2c   :  { %v12389_v2 = vpop.eup %12388  ;;  %v6873_v14 = vpop.xlane.xlu1 %6872  ;;  %v6898_v63 = vmul.f32 %v12387_v55, %v16850_v54  ;;  %v18400_v55 = vld [vmem:[#allocation37_spill] sm:$0xff] }
0x1f2d   :  { %12398 = vrcp.f32 %v6873_v14  ;;  %v6871_v13 = vpop.xlane.xlu0 %6870  ;;  %v6899_v42 = vmul.f32 %v12389_v2, %v16852_v60  ;;  %v18401_v2 = vpack.i.bf16 %v18399_v44, %v18400_v55 }
0x1f2e   :  { %12400 = vrcp.f32 %v6871_v13 }
0x1f2f   :  { %v12391_v37 = vpop.eup %12390  ;;  %v6910_v53 = vpack.c.bf16 %v6899_v42, %v6898_v63  ;;  %v18402_v63 = vld [vmem:[#allocation52_spill] sm:$0xff] }
0x1f30   :  { %v12393_v31 = vpop.eup %12392  ;;  %v6901_v50 = vmul.f32 %v12391_v37, %v16856_v48  ;;  %v18404_v27 = vpack.i.bf16 %v18402_v63, %v18403_v12  ;;  %v18414_v63 = vld [vmem:[#allocation11_spill] sm:$0xff] }
0x1f31   :  { %10587 = vmatprep.mubr.bf16.mxu0 %v6910_v53  ;;  %v6900_v21 = vmul.f32 %v12393_v31, %v16858_v17  ;;  %v11718_v17 = vld [vmem:[%s17917_s7 + $0x10] sm:$0xff]   ;;  %v11588_v31 = vpop.permute.xlu1 %11587 }
0x1f32   :  { %10595 = vmatprep.subr.bf16.mxu0 %v11718_v17 }
0x1f33   :  { %v12395_v35 = vpop.eup %12394  ;;  %v6911_v45 = vpack.c.bf16 %v6901_v50, %v6900_v21  ;;  %10596 = vmatpush3.bf16.msra.mxu0 %v11718_v17  ;;  %v11583_v21 = vpop.permute.xlu0 %11582 }
0x1f34   :  { %v12397_v62 = vpop.eup %12396  ;;  %v6903_v7 = vmul.f32 %v12395_v35, %v16862_v28  ;;  %v11719_v28 = vld [vmem:[%s17917_s7 + $0x18] sm:$0xff]  }
0x1f35   :  { %10588 = vmatmul.mubr.bf16.gmra.mrb[168].mxu0 %v6911_v45  ;;  %v6902_v54 = vmul.f32 %v12397_v62, %v16864_v1  ;;  %10597 = vmatprep.subr.bf16.mxu0 %v11719_v28  ;;  %v11593_v50 = vpop.permute.xlu1 %11592  ;;  %v11590_v45 = vunpack.i.h.bf16 %v11588_v31  ;;  %v11589_v62 = vunpack.i.l.bf16 %v11588_v31 }
0x1f36   :  { %v11595_v19 = vunpack.i.h.bf16 %v11593_v50 }
0x1f37   :  { %v12399_v8 = vpop.eup %12398  ;;  %v6912_v0 = vpack.c.bf16 %v6903_v7, %v6902_v54  ;;  %10598 = vmatpush3.bf16.msra.mxu0 %v11719_v28  ;;  %v11585_v7 = vunpack.i.h.bf16 %v11583_v21  ;;  %v11584_v54 = vunpack.i.l.bf16 %v11583_v21 }
0x1f38   :  { %v12401_v60 = vpop.eup %12400  ;;  %v6905_v16 = vmul.f32 %v12399_v8, %v16868_v24 }
0x1f39   :  { %10591 = vmatprep.mubr.bf16.mxu0 %v6912_v0  ;;  %v6904_v9 = vmul.f32 %v12401_v60, %v16870_v15  ;;  %v11598_v35 = vpop.permute.xlu1 %11597  ;;  %v18408_v0 = vld [vmem:[#allocation66_spill] sm:$0xff] }
0x1f3a   :  { %v11600_v8 = vunpack.i.h.bf16 %v11598_v35  ;;  %v11599_v20 = vunpack.i.l.bf16 %v11598_v35  ;;  %v7230_v11 = vsel %vm731_vm3, %v18408_v0, %v11590_v45 }
0x1f3b   :  { %v6913_v48 = vpack.c.bf16 %v6905_v16, %v6904_v9  ;;  %v18410_v16 = vld [vmem:[#allocation64_spill] sm:$0xff] }
0x1f3c   :  { %v7228_v9 = vsel %vm731_vm3, %v18410_v16, %v11585_v7 }
0x1f3d   :  { %10592 = vmatmul.mubr.bf16.gmra.mrb[172].mxu0 %v6913_v48  ;;  %v18411_v48 = vld [vmem:[#allocation61_spill] sm:$0xff]  ;;  %v7244_v25 = vsel %vm3132_vm5, %v7228_v9, %v11595_v19 }
0x1f3e   :  { %v7227_v17 = vsel %vm731_vm3, %v18411_v48, %v11584_v54 }
0x1fcc   :  { %v10581_v1 = vpop.f32.mrb[160].mxu0 }
0x1fcd   :  { %v6972_v36 = vpop.f32.mrb[161].mxu0 }
0x1fce   :  { %v10582_v24 = vpop.f32.mrb[162].mxu0 }
0x1fcf   :  { %v11606_v39 = vpack.i.bf16 %v10582_v24, %v10581_v1  ;;  %v6975_v52 = vpop.f32.mrb[163].mxu0 }
0x1fd0   :  { %v11601_v15 = vpack.i.bf16 %v6975_v52, %v6972_v36 }
0x1fd1   :  { %11607 = vrot.lane.b32.xlu1 %v11606_v39, %s12619_s19  ;;  %v7246_v39 = vsel %vm3132_vm5, %v7230_v11, %v11600_v8 }
0x1fd2   :  { %11602 = vrot.lane.b32.xlu0 %v11601_v15, %s12619_s19 }
0x1fd4   :  { %v10585_v38 = vpop.f32.mrb[164].mxu0 }
0x1fd5   :  { %11617 = vrot.lane.b32.xlu1 %v18392_v32, %s12607_s18  ;;  %v6988_v10 = vpop.f32.mrb[165].mxu0 }
0x1fd6   :  { %11612 = vrot.lane.b32.xlu0 %v18395_v5, %s12607_s18  ;;  %v10586_v43 = vpop.f32.mrb[166].mxu0 }
0x1fd7   :  { %v11636_v34 = vpack.i.bf16 %v10586_v43, %v10585_v38  ;;  %v6991_v51 = vpop.f32.mrb[167].mxu0 }
0x1fd8   :  { %v11631_v6 = vpack.i.bf16 %v6991_v51, %v6988_v10 }
0x1fd9   :  { %11627 = vrot.lane.b32.xlu1 %v11626_v4, %s12618_s25 }
0x1fda   :  { %11622 = vrot.lane.b32.xlu0 %v11621_v49, %s12618_s25 }
0x1fdd   :  { %11637 = vrot.lane.b32.xlu1 %v11636_v34, %s12619_s19 }
0x1fde   :  { %11632 = vrot.lane.b32.xlu0 %v11631_v6, %s12619_s19 }
0x1fe1   :  { %11647 = vrot.lane.b32.xlu1 %v18398_v18, %s12607_s18 }
0x1fe2   :  { %11642 = vrot.lane.b32.xlu0 %v18401_v2, %s12607_s18 }
0x1fe5   :  { %11657 = vrot.lane.b32.xlu1 %v11656_v29, %s12618_s25 }
0x1fe6   :  { %11652 = vrot.lane.b32.xlu0 %v11651_v22, %s12618_s25  ;;  %v18407_v22 = vpack.i.bf16 %v18405_v26, %v18406_v23 }
0x2008   :  { %v10589_v41 = vpop.f32.mrb[168].mxu0 }
0x2009   :  { %v7004_v57 = vpop.f32.mrb[169].mxu0 }
0x200a   :  { %v10590_v47 = vpop.f32.mrb[170].mxu0 }
0x200b   :  { %v11666_v4 = vpack.i.bf16 %v10590_v47, %v10589_v41  ;;  %v7007_v30 = vpop.f32.mrb[171].mxu0  ;;  %v18412_v47 = vld [vmem:[#allocation12_spill] sm:$0xff] }
0x200c   :  { %v11661_v49 = vpack.i.bf16 %v7007_v30, %v7004_v57  ;;  %v18413_v30 = vld [vmem:[#allocation67_spill] sm:$0xff] }
0x200d   :  { %11667 = vrot.lane.b32.xlu1 %v11666_v4, %s12619_s19 }
0x200e   :  { %11662 = vrot.lane.b32.xlu0 %v11661_v49, %s12619_s19 }
0x2010   :  { %v10593_v14 = vpop.f32.mrb[172].mxu0 }
0x2011   :  { %11677 = vrot.lane.b32.xlu1 %v18404_v27, %s12607_s18  ;;  %v7020_v29 = vpop.f32.mrb[173].mxu0  ;;  %v18415_v27 = vld [vmem:[#allocation65_spill] sm:$0xff] }
0x2012   :  { %11672 = vrot.lane.b32.xlu0 %v18407_v22, %s12607_s18  ;;  %v10594_v13 = vpop.f32.mrb[174].mxu0 }
0x2013   :  { %v11696_v42 = vpack.i.bf16 %v10594_v13, %v10593_v14  ;;  %v7023_v37 = vpop.f32.mrb[175].mxu0 }
0x2014   :  { %v11691_v53 = vpack.i.bf16 %v7023_v37, %v7020_v29 }
0x2015   :  { %11687 = vrot.lane.b32.xlu1 %v11686_v33, %s12618_s25  ;;  %v11594_v33 = vunpack.i.l.bf16 %v11593_v50 }
0x2016   :  { %11682 = vrot.lane.b32.xlu0 %v11681_v59, %s12618_s25  ;;  %v7229_v59 = vsel %vm731_vm3, %v18409_v58, %v11589_v62 }
0x2017   :  { %v7245_v24 = vsel %vm3132_vm5, %v7229_v59, %v11599_v20  ;;  %v7243_v38 = vsel %vm3132_vm5, %v7227_v17, %v11594_v33  ;;  %v18416_v17 = vld [vmem:[#allocation16_spill] sm:$0xff] }
0x2019   :  { %11697 = vrot.lane.b32.xlu1 %v11696_v42, %s12619_s19 }
0x201a   :  { %11692 = vrot.lane.b32.xlu0 %v11691_v53, %s12619_s19 }
0x2043   :  { %v11608_v60 = vpop.permute.xlu1 %11607 }
0x2044   :  { %v11610_v28 = vunpack.i.h.bf16 %v11608_v60  ;;  %v11609_v1 = vunpack.i.l.bf16 %v11608_v60  ;;  %v11603_v36 = vpop.permute.xlu0 %11602 }
0x2045   :  { %v11605_v52 = vunpack.i.h.bf16 %v11603_v36  ;;  %v11604_v15 = vunpack.i.l.bf16 %v11603_v36 }
0x2046   :  { %v7262_v46 = vsel %vm3149_vm6, %v7246_v39, %v11610_v28  ;;  %v7261_v32 = vsel %vm3149_vm6, %v7245_v24, %v11609_v1  ;;  %v18417_v1 = vld [vmem:[#allocation14_spill] sm:$0xff]  ;;  %v18418_v39 = vld [vmem:[#allocation15_spill] sm:$0xff] }
0x2047   :  { %v7276_v10 = vpack.c.bf16 %v7262_v46, %v7261_v32  ;;  %v7259_v40 = vsel %vm3149_vm6, %v7243_v38, %v11604_v15  ;;  %v7260_v61 = vsel %vm3149_vm6, %v7244_v25, %v11605_v52  ;;  %v11618_v5 = vpop.permute.xlu1 %11617  ;;  %v18419_v15 = vld [vmem:[#allocation13_spill] sm:$0xff] }
0x2048   :  { %v7275_v43 = vpack.c.bf16 %v7260_v61, %v7259_v40  ;;  %v11613_v34 = vpop.permute.xlu0 %11612  ;;  %v11620_v51 = vunpack.i.h.bf16 %v11618_v5  ;;  %v11619_v6 = vunpack.i.l.bf16 %v11618_v5 }
0x2049   :  { %v11615_v56 = vunpack.i.h.bf16 %v11613_v34  ;;  %v11614_v18 = vunpack.i.l.bf16 %v11613_v34 }
0x204a   :  { %10599 = vmatprep.mubr.msk.bf16.mxu0 %vm243_vm2, %v7275_v43  ;;  %v7234_v4 = vsel %vm731_vm3, %v18412_v47, %v11620_v51  ;;  %v7233_v49 = vsel %vm731_vm3, %v18413_v30, %v11619_v6 }
0x204b   :  { %v11628_v3 = vpop.permute.xlu1 %11627  ;;  %10600 = vmatmul.mubr.msk.bf16.vlgmr.msra.gmra.mrb[176].mxu0 %vm243_vm2, %v7276_v10  ;;  %v7232_v12 = vsel %vm731_vm3, %v18414_v63, %v11615_v56  ;;  %v7231_v29 = vsel %vm731_vm3, %v18415_v27, %v11614_v18 }
0x204c   :  { %v11623_v44 = vpop.permute.xlu0 %11622  ;;  %v11630_v55 = vunpack.i.h.bf16 %v11628_v3  ;;  %v11629_v2 = vunpack.i.l.bf16 %v11628_v3 }
0x204d   :  { %v11625_v41 = vunpack.i.h.bf16 %v11623_v44  ;;  %v11624_v57 = vunpack.i.l.bf16 %v11623_v44 }
0x204e   :  { %v7249_v13 = vsel %vm3132_vm5, %v7233_v49, %v11629_v2  ;;  %v7250_v42 = vsel %vm3132_vm5, %v7234_v4, %v11630_v55 }
0x204f   :  { %v11638_v14 = vpop.permute.xlu1 %11637  ;;  %v7247_v31 = vsel %vm3132_vm5, %v7231_v29, %v11624_v57  ;;  %v7248_v50 = vsel %vm3132_vm5, %v7232_v12, %v11625_v41  ;;  %v18420_v29 = vld [vmem:[#allocation20_spill] sm:$0xff] }
0x2050   :  { %v11640_v26 = vunpack.i.h.bf16 %v11638_v14  ;;  %v11639_v23 = vunpack.i.l.bf16 %v11638_v14  ;;  %v11633_v22 = vpop.permute.xlu0 %11632 }
0x2051   :  { %v11635_v37 = vunpack.i.h.bf16 %v11633_v22  ;;  %v11634_v53 = vunpack.i.l.bf16 %v11633_v22 }
0x2052   :  { %v7266_v21 = vsel %vm3149_vm6, %v7250_v42, %v11640_v26  ;;  %v7265_v35 = vsel %vm3149_vm6, %v7249_v13, %v11639_v23  ;;  %v18421_v23 = vld [vmem:[#allocation18_spill] sm:$0xff]  ;;  %v18422_v42 = vld [vmem:[#allocation19_spill] sm:$0xff] }
0x2053   :  { %v7278_v45 = vpack.c.bf16 %v7266_v21, %v7265_v35  ;;  %v7263_v62 = vsel %vm3149_vm6, %v7247_v31, %v11634_v53  ;;  %v7264_v7 = vsel %vm3149_vm6, %v7248_v50, %v11635_v37  ;;  %v11648_v8 = vpop.permute.xlu1 %11647  ;;  %v18423_v53 = vld [vmem:[#allocation17_spill] sm:$0xff] }
0x2054   :  { %v7277_v54 = vpack.c.bf16 %v7264_v7, %v7263_v62  ;;  %v11643_v20 = vpop.permute.xlu0 %11642  ;;  %v11650_v33 = vunpack.i.h.bf16 %v11648_v8  ;;  %v11649_v0 = vunpack.i.l.bf16 %v11648_v8 }
0x2055   :  { %v11645_v58 = vunpack.i.h.bf16 %v11643_v20  ;;  %v11644_v59 = vunpack.i.l.bf16 %v11643_v20 }
0x2056   :  { %10603 = vmatprep.mubr.msk.bf16.mxu0 %vm243_vm2, %v7277_v54  ;;  %v7238_v28 = vsel %vm731_vm3, %v18416_v17, %v11650_v33  ;;  %v7237_v36 = vsel %vm731_vm3, %v18417_v1, %v11649_v0 }
0x2057   :  { %10604 = vmatmul.mubr.msk.bf16.gmra.mrb[180].mxu0 %vm243_vm2, %v7278_v45  ;;  %v11658_v19 = vpop.permute.xlu1 %11657  ;;  %v7236_v52 = vsel %vm731_vm3, %v18418_v39, %v11645_v58  ;;  %v7235_v38 = vsel %vm731_vm3, %v18419_v15, %v11644_v59 }
0x2058   :  { %v11653_v11 = vpop.permute.xlu0 %11652  ;;  %v11660_v60 = vunpack.i.h.bf16 %v11658_v19  ;;  %v11659_v16 = vunpack.i.l.bf16 %v11658_v19 }
0x2059   :  { %v11655_v9 = vunpack.i.h.bf16 %v11653_v11  ;;  %v11654_v48 = vunpack.i.l.bf16 %v11653_v11 }
0x205a   :  { %v7253_v10 = vsel %vm3132_vm5, %v7237_v36, %v11659_v16  ;;  %v7254_v40 = vsel %vm3132_vm5, %v7238_v28, %v11660_v60  ;;  %v17040_v60 = vld [vmem:[#allocation5 + $0xa] ss:$0 sm:$0xff]  ;;  %v18424_v36 = vld [vmem:[#allocation28_spill] sm:$0xff] }
0x205b   :  { %v7251_v43 = vsel %vm3132_vm5, %v7235_v38, %v11654_v48  ;;  %v7252_v34 = vsel %vm3132_vm5, %v7236_v52, %v11655_v9  ;;  %v18425_v52 = vld [vmem:[#allocation27_spill] sm:$0xff] }
0x207f   :  { %v11668_v24 = vpop.permute.xlu1 %11667 }
0x2080   :  { %v11670_v25 = vunpack.i.h.bf16 %v11668_v24  ;;  %v11669_v46 = vunpack.i.l.bf16 %v11668_v24  ;;  %v11663_v32 = vpop.permute.xlu0 %11662 }
0x2081   :  { %v11665_v61 = vunpack.i.h.bf16 %v11663_v32  ;;  %v11664_v5 = vunpack.i.l.bf16 %v11663_v32 }
0x2082   :  { %v7270_v51 = vsel %vm3149_vm6, %v7254_v40, %v11670_v25  ;;  %v7269_v6 = vsel %vm3149_vm6, %v7253_v10, %v11669_v46  ;;  %v18426_v25 = vld [vmem:[#allocation69_spill] sm:$0xff]  ;;  %v18427_v40 = vld [vmem:[#allocation68_spill] sm:$0xff] }
0x2083   :  { %v7280_v3 = vpack.c.bf16 %v7270_v51, %v7269_v6  ;;  %v7267_v56 = vsel %vm3149_vm6, %v7251_v43, %v11664_v5  ;;  %v7268_v18 = vsel %vm3149_vm6, %v7252_v34, %v11665_v61  ;;  %v11678_v44 = vpop.permute.xlu1 %11677 }
0x2084   :  { %v7279_v55 = vpack.c.bf16 %v7268_v18, %v7267_v56  ;;  %v11673_v2 = vpop.permute.xlu0 %11672  ;;  %v11680_v41 = vunpack.i.h.bf16 %v11678_v44  ;;  %v11679_v57 = vunpack.i.l.bf16 %v11678_v44  ;;  %v18428_v44 = vld [vmem:[#allocation71_spill] sm:$0xff] }
0x2085   :  { %v11675_v4 = vunpack.i.h.bf16 %v11673_v2  ;;  %v11674_v30 = vunpack.i.l.bf16 %v11673_v2 }
0x2086   :  { %10607 = vmatprep.mubr.msk.bf16.mxu0 %vm243_vm2, %v7279_v55  ;;  %v7242_v26 = vsel %vm731_vm3, %v18420_v29, %v11680_v41  ;;  %v7241_v22 = vsel %vm731_vm3, %v18421_v23, %v11679_v57  ;;  %v18429_v57 = vld [vmem:[#allocation70_spill] sm:$0xff] }
0x2087   :  { %v11688_v47 = vpop.permute.xlu1 %11687  ;;  %10608 = vmatmul.mubr.msk.bf16.gmra.mrb[184].mxu0 %vm243_vm2, %v7280_v3  ;;  %v7240_v37 = vsel %vm731_vm3, %v18422_v42, %v11675_v4  ;;  %v7239_v31 = vsel %vm731_vm3, %v18423_v53, %v11674_v30  ;;  %v18430_v4 = vld [vmem:[#allocation73_spill] sm:$0xff]  ;;  %v18432_v53 = vld [vmem:[#allocation74_spill] sm:$0xff] }
0x2088   :  { %v11683_v49 = vpop.permute.xlu0 %11682  ;;  %v11690_v14 = vunpack.i.h.bf16 %v11688_v47  ;;  %v11689_v63 = vunpack.i.l.bf16 %v11688_v47 }
0x2089   :  { %v11685_v12 = vunpack.i.h.bf16 %v11683_v49  ;;  %v11684_v27 = vunpack.i.l.bf16 %v11683_v49 }
0x208a   :  { %v7257_v45 = vsel %vm3132_vm5, %v7241_v22, %v11689_v63  ;;  %v7258_v62 = vsel %vm3132_vm5, %v7242_v26, %v11690_v14  ;;  %v18431_v14 = vld [vmem:[#allocation72_spill] sm:$0xff] }
0x208b   :  { %v11698_v13 = vpop.permute.xlu1 %11697  ;;  %v7255_v8 = vsel %vm3132_vm5, %v7239_v31, %v11684_v27  ;;  %v7256_v20 = vsel %vm3132_vm5, %v7240_v37, %v11685_v12 }
0x208c   :  { %v11700_v50 = vunpack.i.h.bf16 %v11698_v13  ;;  %v11699_v21 = vunpack.i.l.bf16 %v11698_v13  ;;  %v11693_v35 = vpop.permute.xlu0 %11692 }
0x208d   :  { %v11695_v7 = vunpack.i.h.bf16 %v11693_v35  ;;  %v11694_v54 = vunpack.i.l.bf16 %v11693_v35  ;;  %v18433_v35 = vld [vmem:[#allocation75_spill] sm:$0xff] }
0x208e   :  { %v7274_v19 = vsel %vm3149_vm6, %v7258_v62, %v11700_v50  ;;  %v7273_v33 = vsel %vm3149_vm6, %v7257_v45, %v11699_v21  ;;  %v18434_v62 = vld [vmem:[#allocation30_spill] sm:$0xff] }
0x208f   :  { %v7282_v0 = vpack.c.bf16 %v7274_v19, %v7273_v33  ;;  %v7271_v11 = vsel %vm3149_vm6, %v7255_v8, %v11694_v54  ;;  %v7272_v58 = vsel %vm3149_vm6, %v7256_v20, %v11695_v7  ;;  %v18435_v8 = vld [vmem:[#allocation32_spill] sm:$0xff] }
0x2090   :  { %v7281_v59 = vpack.c.bf16 %v7272_v58, %v7271_v11 }
0x2092   :  { %10611 = vmatprep.mubr.msk.bf16.mxu0 %vm243_vm2, %v7281_v59 }
0x2093   :  { %10612 = vmatmul.mubr.msk.bf16.gmra.mrb[188].mxu0 %vm243_vm2, %v7282_v0 }
0x211e   :  { %v10601_v16 = vpop.f32.mrb[176].mxu0 }
0x211f   :  { %v7363_v9 = vpop.f32.mrb[177].mxu0  ;;  %v7372_v48 = vadd.f32 %v10601_v16, %v17040_v60 }
0x2120   :  { %v7364_v17 = vadd.f32 %v17040_v60, %v7363_v9  ;;  %v10602_v28 = vpop.f32.mrb[178].mxu0 }
0x2121   :  { %v7366_v1 = vpop.f32.mrb[179].mxu0  ;;  %v17049_v15 = vadd.f32 %v7372_v48, %v18425_v52  ;;  %v7375_v38 = vadd.f32 %v10602_v28, %v17040_v60 }
0x2122   :  { %v17045_v24 = vadd.f32 %v7364_v17, %v18424_v36  ;;  %v7367_v39 = vadd.f32 %v17040_v60, %v7366_v1  ;;  %v18436_v17 = vld [vmem:[#allocation33_spill] sm:$0xff] }
0x2123   :  { %v17060_v61 = vadd.f32 %v7375_v38, %v18427_v40  ;;  %v7450_v5 = vsel %vm243_vm2, %v17049_v15, 0.0  ;;  %v18438_v38 = vld [vmem:[#allocation40_spill] sm:$0xff] }
0x2124   :  { %v17053_v46 = vadd.f32 %v7367_v39, %v18426_v25  ;;  %v7444_v32 = vsel %vm243_vm2, %v17045_v24, 0.0  ;;  %v18437_v39 = vld [vmem:[#allocation34_spill] sm:$0xff] }
0x2125   :  { %7445 = vadd.xlane.f32.xlu0 %v7444_v32  ;;  %v7453_v56 = vsel %vm243_vm2, %v17060_v61, 0.0 }
0x2126   :  { %v7447_v10 = vsel %vm243_vm2, %v17053_v46, 0.0 }
0x2127   :  { %7448 = vadd.xlane.f32.xlu1 %v7447_v10  ;;  %v18440_v10 = vld [vmem:[#allocation38_spill] sm:$0xff] }
0x2129   :  { %7451 = vadd.xlane.f32.xlu0 %v7450_v5 }
0x212a   :  { %v10605_v43 = vpop.f32.mrb[180].mxu0 }
0x212b   :  { %v7379_v34 = vpop.f32.mrb[181].mxu0  ;;  %v7388_v51 = vadd.f32 %v10605_v43, %v17040_v60 }
0x212c   :  { %v7380_v6 = vadd.f32 %v17040_v60, %v7379_v34  ;;  %v10606_v3 = vpop.f32.mrb[182].mxu0 }
0x212d   :  { %v7382_v18 = vpop.f32.mrb[183].mxu0  ;;  %7454 = vadd.xlane.f32.xlu0 %v7453_v56  ;;  %v7391_v2 = vadd.f32 %v10606_v3, %v17040_v60  ;;  %v17074_v47 = vadd.f32 %v7388_v51, %v18429_v57 }
0x212e   :  { %v17069_v55 = vadd.f32 %v7380_v6, %v18428_v44  ;;  %v7383_v41 = vadd.f32 %v17040_v60, %v7382_v18 }
0x212f   :  { %v17082_v63 = vadd.f32 %v7391_v2, %v18431_v14  ;;  %v7462_v27 = vsel %vm243_vm2, %v17074_v47, 0.0 }
0x2130   :  { %v17077_v30 = vadd.f32 %v7383_v41, %v18430_v4  ;;  %v7456_v49 = vsel %vm243_vm2, %v17069_v55, 0.0 }
0x2131   :  { %7457 = vadd.xlane.f32.xlu0 %v7456_v49  ;;  %v7465_v29 = vsel %vm243_vm2, %v17082_v63, 0.0 }
0x2132   :  { %v7459_v12 = vsel %vm243_vm2, %v17077_v30, 0.0 }
0x2133   :  { %7460 = vadd.xlane.f32.xlu1 %v7459_v12 }
0x2135   :  { %7463 = vadd.xlane.f32.xlu0 %v7462_v27 }
0x2137   :  { %7466 = vadd.xlane.f32.xlu1 %v7465_v29 }
0x215a   :  { %v10609_v26 = vpop.f32.mrb[184].mxu0 }
0x215b   :  { %v7395_v23 = vpop.f32.mrb[185].mxu0  ;;  %v7404_v22 = vadd.f32 %v10609_v26, %v17040_v60 }
0x215c   :  { %v7396_v13 = vadd.f32 %v17040_v60, %v7395_v23  ;;  %v10610_v42 = vpop.f32.mrb[186].mxu0 }
0x215d   :  { %v7398_v37 = vpop.f32.mrb[187].mxu0  ;;  %v7407_v50 = vadd.f32 %v10610_v42, %v17040_v60  ;;  %v17098_v45 = vadd.f32 %v7404_v22, %v18433_v35 }
0x215e   :  { %v17093_v31 = vadd.f32 %v7396_v13, %v18432_v53  ;;  %v7399_v21 = vadd.f32 %v17040_v60, %v7398_v37 }
0x215f   :  { %v17106_v20 = vadd.f32 %v7407_v50, %v18435_v8  ;;  %v7474_v33 = vsel %vm243_vm2, %v17098_v45, 0.0 }
0x2160   :  { %v17101_v7 = vadd.f32 %v7399_v21, %v18434_v62  ;;  %v7468_v54 = vsel %vm243_vm2, %v17093_v31, 0.0 }
0x2161   :  { %7469 = vadd.xlane.f32.xlu0 %v7468_v54  ;;  %v7477_v11 = vsel %vm243_vm2, %v17106_v20, 0.0 }
0x2162   :  { %v7471_v19 = vsel %vm243_vm2, %v17101_v7, 0.0 }
0x2163   :  { %7472 = vadd.xlane.f32.xlu1 %v7471_v19 }
0x2165   :  { %7475 = vadd.xlane.f32.xlu0 %v7474_v33 }
0x2166   :  { %v10613_v0 = vpop.f32.mrb[188].mxu0 }
0x2167   :  { %v7411_v58 = vpop.f32.mrb[189].mxu0  ;;  %7478 = vadd.xlane.f32.xlu1 %v7477_v11  ;;  %v7420_v59 = vadd.f32 %v10613_v0, %v17040_v60 }
0x2168   :  { %v7412_v16 = vadd.f32 %v17040_v60, %v7411_v58  ;;  %v10614_v9 = vpop.f32.mrb[190].mxu0 }
0x2169   :  { %v7414_v48 = vpop.f32.mrb[191].mxu0  ;;  %v7423_v1 = vadd.f32 %v10614_v9, %v17040_v60  ;;  %v17122_v52 = vadd.f32 %v7420_v59, %v18437_v39  ;;  %v11721_v39 = vld [vmem:[%s17918_s8 + $0x18] sm:$0xff]  }
0x216a   :  { %v17117_v28 = vadd.f32 %v7412_v16, %v18436_v17  ;;  %v7415_v36 = vadd.f32 %v17040_v60, %v7414_v48 }
0x216b   :  { %v17130_v40 = vadd.f32 %v7423_v1, %v18440_v10  ;;  %v7486_v60 = vsel %vm243_vm2, %v17122_v52, 0.0 }
0x216c   :  { %v17125_v25 = vadd.f32 %v7415_v36, %v18438_v38  ;;  %v7480_v32 = vsel %vm243_vm2, %v17117_v28, 0.0  ;;  %v11720_v36 = vld [vmem:[%s17918_s8 + $0x10] sm:$0xff]  }
0x216d   :  { %7481 = vadd.xlane.f32.xlu0 %v7480_v32  ;;  %18441 = vst [vmem:[#allocation45_spill] sm:$0xff] %v17130_v40  ;;  %v7489_v43 = vsel %vm243_vm2, %v17130_v40, 0.0  ;;  %10615 = vmatprep.subr.bf16.mxu1 %v11720_v36 }
0x216e   :  { %18439 = vst [vmem:[#allocation39_spill] sm:$0xff] %v17125_v25  ;;  %v7483_v5 = vsel %vm243_vm2, %v17125_v25, 0.0  ;;  %10616 = vmatpush3.bf16.msra.mxu1 %v11720_v36 }
0x216f   :  { %7484 = vadd.xlane.f32.xlu1 %v7483_v5  ;;  %10617 = vmatprep.subr.bf16.mxu1 %v11721_v39 }
0x2171   :  { %7487 = vadd.xlane.f32.xlu0 %v7486_v60 }
0x2172   :  { %10618 = vmatpush3.bf16.msra.mxu1 %v11721_v39 }
0x2173   :  { %7490 = vadd.xlane.f32.xlu1 %v7489_v43 }
0x21b2   :  { %v7446_v34 = vpop.xlane.xlu0 %7445 }
0x21b3   :  { %v7492_v51 = vmul.f32 0.03125, %v7446_v34 }
0x21b4   :  { %v7449_v6 = vpop.xlane.xlu1 %7448 }
0x21b5   :  { %v17139_v3 = vsub.f32 %v17045_v24, %v7492_v51  ;;  %v7493_v56 = vmul.f32 0.03125, %v7449_v6 }
0x21b6   :  { %v7452_v18 = vpop.xlane.xlu0 %7451 }
0x21b7   :  { %v17142_v44 = vsub.f32 %v17053_v46, %v7493_v56  ;;  %v7494_v2 = vmul.f32 0.03125, %v7452_v18  ;;  %v7524_v41 = vmul.f32 %v17139_v3, %v17139_v3 }
0x21b9   :  { %v17147_v57 = vsub.f32 %v17049_v15, %v7494_v2  ;;  %v7540_v4 = vsel %vm243_vm2, %v7524_v41, 0.0  ;;  %v7525_v49 = vmul.f32 %v17142_v44, %v17142_v44 }
0x21ba   :  { %7541 = vadd.xlane.f32.xlu0 %v7540_v4  ;;  %v7455_v14 = vpop.xlane.xlu0 %7454 }
0x21bb   :  { %v7495_v12 = vmul.f32 0.03125, %v7455_v14  ;;  %v7543_v27 = vsel %vm243_vm2, %v7525_v49, 0.0  ;;  %v7526_v29 = vmul.f32 %v17147_v57, %v17147_v57 }
0x21bc   :  { %7544 = vadd.xlane.f32.xlu1 %v7543_v27 }
0x21bd   :  { %v17156_v26 = vsub.f32 %v17060_v61, %v7495_v12  ;;  %v7546_v23 = vsel %vm243_vm2, %v7526_v29, 0.0 }
0x21be   :  { %7547 = vadd.xlane.f32.xlu0 %v7546_v23  ;;  %v7458_v22 = vpop.xlane.xlu0 %7457 }
0x21bf   :  { %v7496_v13 = vmul.f32 0.03125, %v7458_v22  ;;  %v7527_v42 = vmul.f32 %v17156_v26, %v17156_v26 }
0x21c0   :  { %v7461_v37 = vpop.xlane.xlu1 %7460 }
0x21c1   :  { %v17162_v53 = vsub.f32 %v17069_v55, %v7496_v13  ;;  %v7497_v50 = vmul.f32 0.03125, %v7461_v37  ;;  %v7549_v21 = vsel %vm243_vm2, %v7527_v42, 0.0 }
0x21c2   :  { %7550 = vadd.xlane.f32.xlu1 %v7549_v21  ;;  %v7464_v35 = vpop.xlane.xlu0 %7463 }
0x21c3   :  { %v17166_v62 = vsub.f32 %v17077_v30, %v7497_v50  ;;  %v7498_v54 = vmul.f32 0.03125, %v7464_v35  ;;  %v7528_v8 = vmul.f32 %v17162_v53, %v17162_v53 }
0x21c4   :  { %v7467_v19 = vpop.xlane.xlu1 %7466 }
0x21c5   :  { %v17171_v33 = vsub.f32 %v17074_v47, %v7498_v54  ;;  %v7499_v0 = vmul.f32 0.03125, %v7467_v19  ;;  %v7552_v11 = vsel %vm243_vm2, %v7528_v8, 0.0  ;;  %v7529_v58 = vmul.f32 %v17166_v62, %v17166_v62 }
0x21c6   :  { %7553 = vadd.xlane.f32.xlu0 %v7552_v11 }
0x21c7   :  { %v17177_v59 = vsub.f32 %v17082_v63, %v7499_v0  ;;  %v7555_v16 = vsel %vm243_vm2, %v7529_v58, 0.0  ;;  %v7530_v9 = vmul.f32 %v17171_v33, %v17171_v33 }
0x21c8   :  { %7556 = vadd.xlane.f32.xlu1 %v7555_v16 }
0x21c9   :  { %v7558_v48 = vsel %vm243_vm2, %v7530_v9, 0.0  ;;  %v7531_v17 = vmul.f32 %v17177_v59, %v17177_v59 }
0x21ca   :  { %7559 = vadd.xlane.f32.xlu0 %v7558_v48 }
0x21cb   :  { %v7561_v1 = vsel %vm243_vm2, %v7531_v17, 0.0 }
0x21cc   :  { %7562 = vadd.xlane.f32.xlu1 %v7561_v1 }
0x21ee   :  { %v7470_v38 = vpop.xlane.xlu0 %7469 }
0x21ef   :  { %v7500_v32 = vmul.f32 0.03125, %v7470_v38 }
0x21f0   :  { %v7473_v10 = vpop.xlane.xlu1 %7472 }
0x21f1   :  { %v17193_v5 = vsub.f32 %v17093_v31, %v7500_v32  ;;  %v7501_v60 = vmul.f32 0.03125, %v7473_v10 }
0x21f2   :  { %v7476_v43 = vpop.xlane.xlu0 %7475 }
0x21f3   :  { %v17196_v34 = vsub.f32 %v17101_v7, %v7501_v60  ;;  %v7502_v51 = vmul.f32 0.03125, %v7476_v43  ;;  %v7532_v6 = vmul.f32 %v17193_v5, %v17193_v5 }
0x21f4   :  { %v7479_v56 = vpop.xlane.xlu1 %7478 }
0x21f5   :  { %v17201_v18 = vsub.f32 %v17098_v45, %v7502_v51  ;;  %v7503_v2 = vmul.f32 0.03125, %v7479_v56  ;;  %v7564_v41 = vsel %vm243_vm2, %v7532_v6, 0.0  ;;  %v7533_v4 = vmul.f32 %v17196_v34, %v17196_v34 }
0x21f6   :  { %7565 = vadd.xlane.f32.xlu0 %v7564_v41 }
0x21f7   :  { %v17207_v49 = vsub.f32 %v17106_v20, %v7503_v2  ;;  %v7567_v14 = vsel %vm243_vm2, %v7533_v4, 0.0  ;;  %v7534_v12 = vmul.f32 %v17201_v18, %v17201_v18 }
0x21f8   :  { %7568 = vadd.xlane.f32.xlu1 %v7567_v14 }
0x21f9   :  { %v7570_v27 = vsel %vm243_vm2, %v7534_v12, 0.0  ;;  %v7535_v29 = vmul.f32 %v17207_v49, %v17207_v49 }
0x21fa   :  { %7571 = vadd.xlane.f32.xlu0 %v7570_v27  ;;  %v7482_v23 = vpop.xlane.xlu0 %7481 }
0x21fb   :  { %v7504_v22 = vmul.f32 0.03125, %v7482_v23  ;;  %v7573_v13 = vsel %vm243_vm2, %v7535_v29, 0.0 }
0x21fc   :  { %v7485_v42 = vpop.xlane.xlu1 %7484  ;;  %7574 = vadd.xlane.f32.xlu1 %v7573_v13 }
0x21fd   :  { %v17217_v37 = vsub.f32 %v17117_v28, %v7504_v22  ;;  %v7505_v50 = vmul.f32 0.03125, %v7485_v42  ;;  %v17240_v22 = vld [vmem:[#allocation5 + $0x8] ss:$0 sm:$0xff] }
0x21fe   :  { %v7488_v21 = vpop.xlane.xlu0 %7487 }
0x21ff   :  { %v17220_v35 = vsub.f32 %v17125_v25, %v7505_v50  ;;  %v7506_v54 = vmul.f32 0.03125, %v7488_v21  ;;  %v7536_v8 = vmul.f32 %v17217_v37, %v17217_v37 }
0x2200   :  { %v7491_v19 = vpop.xlane.xlu1 %7490 }
0x2201   :  { %v17225_v0 = vsub.f32 %v17122_v52, %v7506_v54  ;;  %v7507_v11 = vmul.f32 0.03125, %v7491_v19  ;;  %v7576_v58 = vsel %vm243_vm2, %v7536_v8, 0.0  ;;  %v7537_v16 = vmul.f32 %v17220_v35, %v17220_v35 }
0x2202   :  { %7577 = vadd.xlane.f32.xlu0 %v7576_v58 }
0x2203   :  { %v17231_v9 = vsub.f32 %v17130_v40, %v7507_v11  ;;  %v7579_v48 = vsel %vm243_vm2, %v7537_v16, 0.0  ;;  %v7538_v17 = vmul.f32 %v17225_v0, %v17225_v0 }
0x2204   :  { %7580 = vadd.xlane.f32.xlu1 %v7579_v48 }
0x2205   :  { %v7582_v1 = vsel %vm243_vm2, %v7538_v17, 0.0  ;;  %v7539_v36 = vmul.f32 %v17231_v9, %v17231_v9  ;;  %v17245_v17 = vld [vmem:[#allocation5 + $0x9] ss:$0 sm:$0xff] }
0x2206   :  { %7583 = vadd.xlane.f32.xlu0 %v7582_v1 }
0x2207   :  { %v7585_v39 = vsel %vm243_vm2, %v7539_v36, 0.0 }
0x2208   :  { %7586 = vadd.xlane.f32.xlu1 %v7585_v39 }
0x2247   :  { %v7542_v38 = vpop.xlane.xlu0 %7541 }
0x2248   :  { %v7588_v32 = vmul.f32 0.03125, %v7542_v38 }
0x2249   :  { %v7545_v10 = vpop.xlane.xlu1 %7544 }
0x224a   :  { %v7604_v60 = vadd.f32 1e-05, %v7588_v32  ;;  %v7589_v43 = vmul.f32 0.03125, %v7545_v10 }
0x224b   :  { %v7548_v51 = vpop.xlane.xlu0 %7547 }
0x224c   :  { %12402 = vrsqrt.f32 %v7604_v60  ;;  %v7605_v6 = vadd.f32 1e-05, %v7589_v43  ;;  %v7590_v56 = vmul.f32 0.03125, %v7548_v51 }
0x224e   :  { %12404 = vrsqrt.f32 %v7605_v6  ;;  %v7606_v2 = vadd.f32 1e-05, %v7590_v56 }
0x224f   :  { %v7551_v41 = vpop.xlane.xlu1 %7550 }
0x2250   :  { %12406 = vrsqrt.f32 %v7606_v2  ;;  %v7591_v4 = vmul.f32 0.03125, %v7551_v41 }
0x2252   :  { %v7607_v14 = vadd.f32 1e-05, %v7591_v4 }
0x2253   :  { %v7554_v12 = vpop.xlane.xlu0 %7553 }
0x2254   :  { %12408 = vrsqrt.f32 %v7607_v14  ;;  %v7592_v27 = vmul.f32 0.03125, %v7554_v12 }
0x2255   :  { %v7557_v29 = vpop.xlane.xlu1 %7556 }
0x2256   :  { %v12403_v23 = vpop.eup %12402  ;;  %v7608_v13 = vadd.f32 1e-05, %v7592_v27  ;;  %v7593_v42 = vmul.f32 0.03125, %v7557_v29 }
0x2257   :  { %v7636_v50 = vmul.f32 %v12403_v23, %v17139_v3  ;;  %v7560_v21 = vpop.xlane.xlu0 %7559 }
0x2258   :  { %v12405_v54 = vpop.eup %12404  ;;  %12410 = vrsqrt.f32 %v7608_v13  ;;  %v7609_v8 = vadd.f32 1e-05, %v7593_v42  ;;  %v7594_v19 = vmul.f32 0.03125, %v7560_v21 }
0x2259   :  { %v7637_v11 = vmul.f32 %v12405_v54, %v17142_v44  ;;  %v7563_v58 = vpop.xlane.xlu1 %7562  ;;  %v7656_v16 = vmul.f32 %v17240_v22, %v7636_v50 }
0x225a   :  { %v12407_v48 = vpop.eup %12406  ;;  %12412 = vrsqrt.f32 %v7609_v8  ;;  %v7610_v1 = vadd.f32 1e-05, %v7594_v19  ;;  %v7595_v36 = vmul.f32 0.03125, %v7563_v58 }
0x225b   :  { %v7638_v39 = vmul.f32 %v12407_v48, %v17147_v57  ;;  %v7657_v3 = vmul.f32 %v17240_v22, %v7637_v11  ;;  %v7676_v32 = vadd.f32 %v17245_v17, %v7656_v16 }
0x225c   :  { %12414 = vrsqrt.f32 %v7610_v1  ;;  %v7611_v38 = vadd.f32 1e-05, %v7595_v36 }
0x225d   :  { %v7677_v10 = vadd.f32 %v17245_v17, %v7657_v3  ;;  %v7658_v60 = vmul.f32 %v17240_v22, %v7638_v39 }
0x225e   :  { %v12409_v44 = vpop.eup %12408  ;;  %12416 = vrsqrt.f32 %v7611_v38 }
0x225f   :  { %v7639_v43 = vmul.f32 %v12409_v44, %v17156_v26  ;;  %v7692_v51 = vpack.c.bf16 %v7677_v10, %v7676_v32  ;;  %v7678_v56 = vadd.f32 %v17245_v17, %v7658_v60 }
0x2261   :  { %v7659_v6 = vmul.f32 %v17240_v22, %v7639_v43  ;;  %10619 = vmatprep.mubr.msk.bf16.mxu1 %vm243_vm2, %v7692_v51 }
0x2262   :  { %v12411_v57 = vpop.eup %12410 }
0x2263   :  { %v7679_v2 = vadd.f32 %v17245_v17, %v7659_v6  ;;  %v7640_v41 = vmul.f32 %v12411_v57, %v17162_v53 }
0x2264   :  { %v12413_v4 = vpop.eup %12412 }
0x2265   :  { %v7641_v14 = vmul.f32 %v12413_v4, %v17166_v62  ;;  %v7693_v12 = vpack.c.bf16 %v7679_v2, %v7678_v56  ;;  %v7660_v27 = vmul.f32 %v17240_v22, %v7640_v41 }
0x2266   :  { %v12415_v29 = vpop.eup %12414 }
0x2267   :  { %v7642_v26 = vmul.f32 %v12415_v29, %v17171_v33  ;;  %10620 = vmatmul.mubr.msk.bf16.vlgmr.msra.gmra.mrb[176].mxu1 %vm243_vm2, %v7693_v12  ;;  %v7661_v23 = vmul.f32 %v17240_v22, %v7641_v14  ;;  %v7680_v50 = vadd.f32 %v17245_v17, %v7660_v27 }
0x2268   :  { %v12417_v13 = vpop.eup %12416 }
0x2269   :  { %v7643_v42 = vmul.f32 %v12417_v13, %v17177_v59  ;;  %v7681_v53 = vadd.f32 %v17245_v17, %v7661_v23  ;;  %v7662_v21 = vmul.f32 %v17240_v22, %v7642_v26 }
0x226b   :  { %v7694_v62 = vpack.c.bf16 %v7681_v53, %v7680_v50  ;;  %v7663_v54 = vmul.f32 %v17240_v22, %v7643_v42  ;;  %v7682_v33 = vadd.f32 %v17245_v17, %v7662_v21 }
0x226d   :  { %10623 = vmatprep.mubr.msk.bf16.mxu1 %vm243_vm2, %v7694_v62  ;;  %v7683_v8 = vadd.f32 %v17245_v17, %v7663_v54 }
0x226f   :  { %v7695_v19 = vpack.c.bf16 %v7683_v8, %v7682_v33 }
0x2271   :  { %10624 = vmatmul.mubr.msk.bf16.gmra.mrb[180].mxu1 %vm243_vm2, %v7695_v19 }
0x2283   :  { %v7566_v11 = vpop.xlane.xlu0 %7565 }
0x2284   :  { %v7596_v59 = vmul.f32 0.03125, %v7566_v11 }
0x2285   :  { %v7569_v58 = vpop.xlane.xlu1 %7568 }
0x2286   :  { %v7612_v16 = vadd.f32 1e-05, %v7596_v59  ;;  %v7597_v48 = vmul.f32 0.03125, %v7569_v58 }
0x2287   :  { %v7572_v1 = vpop.xlane.xlu0 %7571 }
0x2288   :  { %12418 = vrsqrt.f32 %v7612_v16  ;;  %v7613_v36 = vadd.f32 1e-05, %v7597_v48  ;;  %v7598_v39 = vmul.f32 0.03125, %v7572_v1 }
0x2289   :  { %v7575_v3 = vpop.xlane.xlu1 %7574 }
0x228a   :  { %12420 = vrsqrt.f32 %v7613_v36  ;;  %v7614_v38 = vadd.f32 1e-05, %v7598_v39  ;;  %v7599_v32 = vmul.f32 0.03125, %v7575_v3 }
0x228c   :  { %12422 = vrsqrt.f32 %v7614_v38  ;;  %v7615_v10 = vadd.f32 1e-05, %v7599_v32 }
0x228e   :  { %12424 = vrsqrt.f32 %v7615_v10 }
0x228f   :  { %v7578_v44 = vpop.xlane.xlu0 %7577 }
0x2290   :  { %v7600_v60 = vmul.f32 0.03125, %v7578_v44 }
0x2291   :  { %v7581_v43 = vpop.xlane.xlu1 %7580 }
0x2292   :  { %v12419_v51 = vpop.eup %12418  ;;  %v7616_v6 = vadd.f32 1e-05, %v7600_v60  ;;  %v7601_v57 = vmul.f32 0.03125, %v7581_v43 }
0x2293   :  { %v7644_v56 = vmul.f32 %v12419_v51, %v17193_v5  ;;  %v7584_v2 = vpop.xlane.xlu0 %7583  ;;  %v11723_v51 = vld [vmem:[%s17920_s10 + $0x48] sm:$0xff]  }
0x2294   :  { %v12421_v41 = vpop.eup %12420  ;;  %12426 = vrsqrt.f32 %v7616_v6  ;;  %v7617_v4 = vadd.f32 1e-05, %v7601_v57  ;;  %v7602_v14 = vmul.f32 0.03125, %v7584_v2  ;;  %v11726_v6 = vld [vmem:[%s17920_s10 + $0x60] sm:$0xff]   ;;  %v11727_v57 = vld [vmem:[%s17920_s10 + $0x68] sm:$0xff]   ;;  %v11729_v2 = vld [vmem:[%s17920_s10 + $0x78] sm:$0xff]  }
0x2295   :  { %v7645_v12 = vmul.f32 %v12421_v41, %v17196_v34  ;;  %v7587_v27 = vpop.xlane.xlu1 %7586  ;;  %v7664_v29 = vmul.f32 %v17240_v22, %v7644_v56  ;;  %v11728_v56 = vld [vmem:[%s17920_s10 + $0x70] sm:$0xff]   ;;  %v17327_v41 = vld [vmem:[%s17919_s9 + $0x1] ss:$0 sm:$0xff]  ;;  %s12623_s9 = smov [#allocation7]  }
0x2296   :  { %v12423_v26 = vpop.eup %12422  ;;  %12428 = vrsqrt.f32 %v7617_v4  ;;  %v7618_v23 = vadd.f32 1e-05, %v7602_v14  ;;  %v7603_v13 = vmul.f32 0.03125, %v7587_v27 }
0x2297   :  { %v7646_v42 = vmul.f32 %v12423_v26, %v17201_v18  ;;  %v7665_v50 = vmul.f32 %v17240_v22, %v7645_v12  ;;  %v7684_v62 = vadd.f32 %v17245_v17, %v7664_v29 }
0x2298   :  { %v12425_v53 = vpop.eup %12424  ;;  %12430 = vrsqrt.f32 %v7618_v23  ;;  %v7619_v5 = vadd.f32 1e-05, %v7603_v13 }
0x2299   :  { %v7647_v21 = vmul.f32 %v12425_v53, %v17207_v49  ;;  %v7685_v34 = vadd.f32 %v17245_v17, %v7665_v50  ;;  %v7666_v54 = vmul.f32 %v17240_v22, %v7646_v42 }
0x229a   :  { %12432 = vrsqrt.f32 %v7619_v5 }
0x229b   :  { %v7696_v33 = vpack.c.bf16 %v7685_v34, %v7684_v62  ;;  %v7667_v8 = vmul.f32 %v17240_v22, %v7647_v21  ;;  %v7686_v18 = vadd.f32 %v17245_v17, %v7666_v54 }
0x229d   :  { %10627 = vmatprep.mubr.msk.bf16.mxu1 %vm243_vm2, %v7696_v33  ;;  %v7687_v19 = vadd.f32 %v17245_v17, %v7667_v8 }
0x229e   :  { %v12427_v11 = vpop.eup %12426 }
0x229f   :  { %v7648_v59 = vmul.f32 %v12427_v11, %v17217_v37  ;;  %v7697_v49 = vpack.c.bf16 %v7687_v19, %v7686_v18 }
0x22a0   :  { %v12429_v58 = vpop.eup %12428 }
0x22a1   :  { %v7649_v16 = vmul.f32 %v12429_v58, %v17220_v35  ;;  %10628 = vmatmul.mubr.msk.bf16.gmra.mrb[184].mxu1 %vm243_vm2, %v7697_v49  ;;  %v7668_v48 = vmul.f32 %v17240_v22, %v7648_v59 }
0x22a2   :  { %v12431_v1 = vpop.eup %12430 }
0x22a3   :  { %v7650_v36 = vmul.f32 %v12431_v1, %v17225_v0  ;;  %v7669_v39 = vmul.f32 %v17240_v22, %v7649_v16  ;;  %v7688_v32 = vadd.f32 %v17245_v17, %v7668_v48 }
0x22a4   :  { %v12433_v3 = vpop.eup %12432 }
0x22a5   :  { %v7651_v38 = vmul.f32 %v12433_v3, %v17231_v9  ;;  %v7689_v37 = vadd.f32 %v17245_v17, %v7669_v39  ;;  %v7670_v10 = vmul.f32 %v17240_v22, %v7650_v36  ;;  %v11722_v9 = vld [vmem:[%s17920_s10 + $0x40] sm:$0xff]  }
0x22a6   :  { %10635 = vmatprep.subr.bf16.mxu0 %v11722_v9 }
0x22a7   :  { %v7698_v44 = vpack.c.bf16 %v7689_v37, %v7688_v32  ;;  %v7671_v35 = vmul.f32 %v17240_v22, %v7651_v38  ;;  %v7690_v60 = vadd.f32 %v17245_v17, %v7670_v10  ;;  %10636 = vmatpush3.bf16.msra.mxu0 %v11722_v9  ;;  %v11724_v22 = vld [vmem:[%s17920_s10 + $0x50] sm:$0xff]  }
0x22a8   :  { %10637 = vmatprep.subr.bf16.mxu0 %v11723_v51 }
0x22a9   :  { %10631 = vmatprep.mubr.msk.bf16.mxu1 %vm243_vm2, %v7698_v44  ;;  %v7691_v0 = vadd.f32 %v17245_v17, %v7671_v35  ;;  %v11725_v17 = vld [vmem:[%s17920_s10 + $0x58] sm:$0xff]   ;;  %s8845_s10 = sshll.u32 %s12623_s9, 4  ;;  %s8846_s10 = int_to_ptr.vmem [resolvable:$true] %s8845_s10 }
0x22aa   :  { %s12574_s5 = scalar_lea.vmem %s8846_s10, 16  ;;  %s12578_s30 = scalar_lea.vmem %s8846_s10, 32 }
0x22ab   :  { %v7699_v43 = vpack.c.bf16 %v7691_v0, %v7690_v60  ;;  %10638 = vmatpush3.bf16.msra.mxu0 %v11723_v51  ;;  %p12575_p2 = scmp.ne.s32.totalorder %s8846_s10, %s12574_s5  ;;  %p12579_p3 = scmp.lt.s32.totalorder %s8846_s10, %s8846_s10 }
0x22ac   :  { %10639 = vmatprep.subr.bf16.mxu0 %v11724_v22  ;;  %p12580_p4 = scmp.lt.s32.totalorder %s12578_s30, %s12574_s5 }
0x22ad   :  { %10632 = vmatmul.mubr.msk.bf16.gmra.mrb[188].mxu1 %vm243_vm2, %v7699_v43 }
0x22ae   :  { %p12581_p5 = por %p12580_p4, %p12579_p3 }
0x22af   :  { %10640 = vmatpush3.bf16.msra.mxu0 %v11724_v22 }
0x22b0   :  { %10641 = vmatprep.subr.bf16.mxu0 %v11725_v17  ;;  %p12582_p6 = pnand %p12581_p5, %p12575_p2 }
0x22b3   :  { %10642 = vmatpush3.bf16.msra.mxu0 %v11725_v17 }
0x22b4   :  { %10643 = vmatprep.subr.bf16.mxu0 %v11726_v6 }
0x22b7   :  { %10644 = vmatpush3.bf16.msra.mxu0 %v11726_v6 }
0x22b8   :  { %10645 = vmatprep.subr.bf16.mxu0 %v11727_v57 }
0x22bb   :  { %10646 = vmatpush3.bf16.msra.mxu0 %v11727_v57 }
0x22bc   :  { %10647 = vmatprep.subr.bf16.mxu0 %v11728_v56 }
0x22bf   :  { %10648 = vmatpush3.bf16.msra.mxu0 %v11728_v56 }
0x22c0   :  { %10649 = vmatprep.subr.bf16.mxu0 %v11729_v2 }
0x22c3   :  { %10650 = vmatpush3.bf16.msra.mxu0 %v11729_v2 }
0x233a   :  { %v10621_v4 = vpop.f32.mrb[176].mxu1 }
0x233b   :  { %v7789_v14 = vadd.f32 %v10621_v4, %v17327_v41  ;;  %v7780_v12 = vpop.f32.mrb[177].mxu1 }
0x233c   :  { %v17331_v27 = vadd.f32 %v17327_v41, %v7780_v12  ;;  %v10622_v29 = vpop.f32.mrb[178].mxu1 }
0x233d   :  { %v17333_v26 = vmul.f32 0.70710677, %v7789_v14  ;;  %v17336_v23 = vadd.f32 %v10622_v29, %v17327_v41  ;;  %v7783_v13 = vpop.f32.mrb[179].mxu1  ;;  %v17381_v57 = vmul.f32 0.5, %v7789_v14 }
0x233e   :  { %v17339_v42 = vmul.f32 0.70710677, %v17331_v27  ;;  %v17342_v50 = vadd.f32 %v17327_v41, %v7783_v13 }
0x233f   :  { %v7877_v53 = vand.u32 2147483647, %v17333_v26  ;;  %v17346_v5 = vmul.f32 0.70710677, %v17336_v23  ;;  %vm8197_vm3 = vcmp.ge.f32.partialorder %v17333_v26, 0.0 }
0x2340   :  { %v7875_v21 = vand.u32 2147483647, %v17339_v42  ;;  %v17350_v62 = vmul.f32 0.70710677, %v17342_v50  ;;  %vm8195_vm4 = vcmp.ge.f32.partialorder %v17339_v42, 0.0 }
0x2341   :  { %v7893_v34 = vmul.f32 0.3275911, %v7877_v53  ;;  %v7878_v54 = vand.u32 2147483647, %v17346_v5  ;;  %v8101_v10 = vsub.f32 0.0, %v7877_v53  ;;  %vm8198_vm5 = vcmp.ge.f32.partialorder %v17346_v5, 0.0 }
0x2342   :  { %v7891_v33 = vmul.f32 0.3275911, %v7875_v21  ;;  %v7876_v8 = vand.u32 2147483647, %v17350_v62  ;;  %v8099_v60 = vsub.f32 0.0, %v7875_v21  ;;  %vm8196_vm6 = vcmp.ge.f32.partialorder %v17350_v62, 0.0 }
0x2343   :  { %v7909_v18 = vadd.f32 1.0, %v7893_v34  ;;  %v7894_v19 = vmul.f32 0.3275911, %v7878_v54  ;;  %v8102_v43 = vsub.f32 0.0, %v7878_v54  ;;  %v8117_v56 = vmul.f32 %v8101_v10, %v7877_v53 }
0x2344   :  { %v7907_v11 = vadd.f32 1.0, %v7891_v33  ;;  %v7892_v59 = vmul.f32 0.3275911, %v7876_v8  ;;  %v10625_v49 = vpop.f32.mrb[180].mxu1  ;;  %v8100_v9 = vsub.f32 0.0, %v7876_v8  ;;  %v8115_v29 = vmul.f32 %v8099_v60, %v7875_v21 }
0x2345   :  { %12434 = vrcp.f32 %v7909_v18  ;;  %v7910_v58 = vadd.f32 1.0, %v7894_v19  ;;  %v7796_v16 = vpop.f32.mrb[181].mxu1  ;;  %v17355_v36 = vadd.f32 %v10625_v49, %v17327_v41 }
0x2346   :  { %12436 = vrcp.f32 %v7907_v11  ;;  %v10626_v48 = vpop.f32.mrb[182].mxu1  ;;  %v7908_v1 = vadd.f32 1.0, %v7892_v59  ;;  %v17358_v39 = vadd.f32 %v17327_v41, %v7796_v16  ;;  %v8118_v11 = vmul.f32 %v8102_v43, %v7878_v54 }
0x2347   :  { %v7799_v3 = vpop.f32.mrb[183].mxu1  ;;  %v17361_v38 = vadd.f32 %v10626_v48, %v17327_v41  ;;  %12438 = vrcp.f32 %v7910_v58  ;;  %v17364_v32 = vmul.f32 0.70710677, %v17355_v36  ;;  %v8116_v59 = vmul.f32 %v8100_v9, %v7876_v8 }
0x2348   :  { %v17367_v37 = vadd.f32 %v17327_v41, %v7799_v3  ;;  %v17370_v44 = vmul.f32 0.70710677, %v17358_v39  ;;  %12440 = vrcp.f32 %v7908_v1  ;;  %v8135_v48 = vmul.f32 1.442695, %v8117_v56 }
0x2349   :  { %v17373_v35 = vmul.f32 0.70710677, %v17361_v38  ;;  %v7881_v0 = vand.u32 2147483647, %v17364_v32  ;;  %v8131_v10 = vmul.f32 1.442695, %v8115_v29 }
0x234a   :  { %v7879_v51 = vand.u32 2147483647, %v17370_v44  ;;  %v17379_v6 = vmul.f32 0.70710677, %v17367_v37  ;;  %v8137_v8 = vmul.f32 1.442695, %v8118_v11 }
0x234b   :  { %v7882_v22 = vand.u32 2147483647, %v17373_v35  ;;  %v7897_v17 = vmul.f32 0.3275911, %v7881_v0  ;;  %v8105_v34 = vsub.f32 0.0, %v7881_v0  ;;  %vm8201_vm12 = vcmp.ge.f32.partialorder %v17364_v32, 0.0 }
0x234c   :  { %v7895_v2 = vmul.f32 0.3275911, %v7879_v51  ;;  %v7880_v33 = vand.u32 2147483647, %v17379_v6  ;;  %v8103_v53 = vsub.f32 0.0, %v7879_v51  ;;  %vm8199_vm13 = vcmp.ge.f32.partialorder %v17370_v44, 0.0 }
0x234d   :  { %v7898_v4 = vmul.f32 0.3275911, %v7882_v22  ;;  %v7913_v13 = vadd.f32 1.0, %v7897_v17  ;;  %v8121_v60 = vmul.f32 %v8105_v34, %v7881_v0  ;;  %v8106_v17 = vsub.f32 0.0, %v7882_v22 }
0x234e   :  { %v7911_v49 = vadd.f32 1.0, %v7895_v2  ;;  %v7896_v21 = vmul.f32 0.3275911, %v7880_v33  ;;  %v8119_v56 = vmul.f32 %v8103_v53, %v7879_v51  ;;  %vm8202_vm14 = vcmp.ge.f32.partialorder %v17373_v35, 0.0 }
0x234f   :  { %v17383_v12 = vpop.eup %12434  ;;  %12442 = vrcp.f32 %v7913_v13  ;;  %v7914_v58 = vadd.f32 1.0, %v7898_v4  ;;  %v8133_v4 = vmul.f32 1.442695, %v8116_v59  ;;  %v8143_v34 = vmul.f32 1.442695, %v8121_v60 }
0x2350   :  { %v17386_v18 = vpop.eup %12436  ;;  %v7957_v19 = vmul.f32 1.0614054, %v17383_v12  ;;  %12444 = vrcp.f32 %v7911_v49  ;;  %v7912_v43 = vadd.f32 1.0, %v7896_v21  ;;  %v8122_v49 = vmul.f32 %v8106_v17, %v7882_v22 }
0x2351   :  { %v7955_v14 = vmul.f32 1.0614054, %v17386_v18  ;;  %v17390_v1 = vpop.eup %12438  ;;  %12446 = vrcp.f32 %v7914_v58  ;;  %v8139_v51 = vmul.f32 1.442695, %v8119_v56  ;;  %v8104_v59 = vsub.f32 0.0, %v7880_v33 }
0x2352   :  { %v7973_v16 = vadd.f32 -1.4531521, %v7957_v19  ;;  %v7958_v54 = vmul.f32 1.0614054, %v17390_v1  ;;  %v17394_v9 = vpop.eup %12440  ;;  %12448 = vpow2.f32 %v8135_v48  ;;  %v17405_v22 = vmul.f32 0.5, %v17331_v27 }
0x2353   :  { %v7971_v3 = vadd.f32 -1.4531521, %v7955_v14  ;;  %v7956_v29 = vmul.f32 1.0614054, %v17394_v9  ;;  %12450 = vrcp.f32 %v7912_v43  ;;  %v8120_v56 = vmul.f32 %v8104_v59, %v7880_v33 }
0x2354   :  { %v7989_v40 = vmul.f32 %v17383_v12, %v7973_v16  ;;  %v7974_v19 = vadd.f32 -1.4531521, %v7958_v54  ;;  %12452 = vpow2.f32 %v8131_v10  ;;  %v8145_v10 = vmul.f32 1.442695, %v8122_v49 }
0x2355   :  { %v7987_v2 = vmul.f32 %v17386_v18, %v7971_v3  ;;  %v7972_v16 = vadd.f32 -1.4531521, %v7956_v29  ;;  %12454 = vpow2.f32 %v8137_v8  ;;  %v17419_v49 = vmul.f32 0.5, %v17336_v23 }
0x2356   :  { %v8005_v13 = vadd.f32 1.4214138, %v7989_v40  ;;  %v7990_v11 = vmul.f32 %v17390_v1, %v7974_v19  ;;  %12456 = vpow2.f32 %v8133_v4  ;;  %vm8200_vm15 = vcmp.ge.f32.partialorder %v17379_v6, 0.0 }
0x2357   :  { %v8003_v0 = vadd.f32 1.4214138, %v7987_v2  ;;  %v7988_v58 = vmul.f32 %v17394_v9, %v7972_v16  ;;  %12458 = vpow2.f32 %v8143_v34 }
0x2358   :  { %v8021_v14 = vmul.f32 %v17383_v12, %v8005_v13  ;;  %v8006_v53 = vadd.f32 1.4214138, %v7990_v11  ;;  %12460 = vpow2.f32 %v8139_v51 }
0x2359   :  { %v8019_v21 = vmul.f32 %v17386_v18, %v8003_v0  ;;  %v17402_v48 = vpop.eup %12442  ;;  %v8004_v8 = vadd.f32 1.4214138, %v7988_v58  ;;  %12462 = vpow2.f32 %v8145_v10  ;;  %v8141_v58 = vmul.f32 1.442695, %v8120_v56 }
0x235a   :  { %v8037_v40 = vadd.f32 -0.28449672, %v8021_v14  ;;  %v17407_v60 = vpop.eup %12444  ;;  %v8022_v54 = vmul.f32 %v17390_v1, %v8006_v53  ;;  %v7961_v43 = vmul.f32 1.0614054, %v17402_v48 }
0x235b   :  { %v8035_v3 = vadd.f32 -0.28449672, %v8019_v21  ;;  %v7959_v4 = vmul.f32 1.0614054, %v17407_v60  ;;  %v8020_v19 = vmul.f32 %v17394_v9, %v8004_v8  ;;  %v17415_v0 = vpop.eup %12446  ;;  %12464 = vpow2.f32 %v8141_v58 }
0x235c   :  { %v8053_v17 = vmul.f32 %v17383_v12, %v8037_v40  ;;  %v8038_v13 = vadd.f32 -0.28449672, %v8022_v54  ;;  %v7977_v29 = vadd.f32 -1.4531521, %v7961_v43  ;;  %v12449_v11 = vpop.eup %12448  ;;  %v7962_v23 = vmul.f32 1.0614054, %v17415_v0 }
0x235d   :  { %v8051_v2 = vmul.f32 %v17386_v18, %v8035_v3  ;;  %v7975_v14 = vadd.f32 -1.4531521, %v7959_v4  ;;  %v8036_v21 = vadd.f32 -0.28449672, %v8020_v19  ;;  %v17425_v59 = vpop.eup %12450 }
0x235e   :  { %v8069_v27 = vadd.f32 0.2548296, %v8053_v17  ;;  %v8054_v33 = vmul.f32 %v17390_v1, %v8038_v13  ;;  %v7993_v51 = vmul.f32 %v17402_v48, %v7977_v29  ;;  %v12453_v3 = vpop.eup %12452  ;;  %v7978_v4 = vadd.f32 -1.4531521, %v7962_v23 }
0x235f   :  { %v8067_v34 = vadd.f32 0.2548296, %v8051_v2  ;;  %v7991_v53 = vmul.f32 %v17407_v60, %v7975_v14  ;;  %v12455_v8 = vpop.eup %12454 }
0x2360   :  { %v8085_v16 = vmul.f32 %v17383_v12, %v8069_v27  ;;  %v8070_v17 = vadd.f32 0.2548296, %v8054_v33  ;;  %v8052_v12 = vmul.f32 %v17394_v9, %v8036_v21  ;;  %v8009_v54 = vadd.f32 1.4214138, %v7993_v51 }
0x2361   :  { %v8083_v40 = vmul.f32 %v17386_v18, %v8067_v34  ;;  %v8007_v2 = vadd.f32 1.4214138, %v7991_v53  ;;  %v7960_v27 = vmul.f32 1.0614054, %v17425_v59  ;;  %v12457_v18 = vpop.eup %12456 }
0x2362   :  { %v8165_v10 = vmul.f32 %v12449_v11, %v8085_v16  ;;  %v8086_v19 = vmul.f32 %v17390_v1, %v8070_v17  ;;  %v8068_v29 = vadd.f32 0.2548296, %v8052_v12  ;;  %v8025_v56 = vmul.f32 %v17402_v48, %v8009_v54  ;;  %v12459_v34 = vpop.eup %12458 }
0x2363   :  { %v8163_v43 = vmul.f32 %v12453_v3, %v8083_v40  ;;  %v8023_v11 = vmul.f32 %v17407_v60, %v8007_v2  ;;  %v7994_v16 = vmul.f32 %v17415_v0, %v7978_v4  ;;  %v7976_v33 = vadd.f32 -1.4531521, %v7960_v27  ;;  %v12461_v23 = vpop.eup %12460 }
0x2364   :  { %v8181_v13 = vsub.f32 1.0, %v8165_v10  ;;  %v8166_v51 = vmul.f32 %v12455_v8, %v8086_v19  ;;  %v8084_v40 = vmul.f32 %v17394_v9, %v8068_v29  ;;  %v8041_v53 = vadd.f32 -0.28449672, %v8025_v56  ;;  %v12463_v2 = vpop.eup %12462 }
0x2365   :  { %v8179_v14 = vsub.f32 1.0, %v8163_v43  ;;  %v8039_v10 = vadd.f32 -0.28449672, %v8023_v11  ;;  %v8010_v25 = vadd.f32 1.4214138, %v7994_v16  ;;  %v7992_v1 = vmul.f32 %v17425_v59, %v7976_v33 }
0x2366   :  { %v8213_v21 = vsub.f32 0.0, %v8181_v13  ;;  %v8182_v12 = vsub.f32 1.0, %v8166_v51  ;;  %v8164_v54 = vmul.f32 %v12457_v18, %v8084_v40  ;;  %v8057_v43 = vmul.f32 %v17402_v48, %v8041_v53 }
0x2367   :  { %v8211_v3 = vsub.f32 0.0, %v8179_v14  ;;  %v8055_v9 = vmul.f32 %v17407_v60, %v8039_v10  ;;  %v8026_v4 = vmul.f32 %v17415_v0, %v8010_v25  ;;  %v8008_v11 = vadd.f32 1.4214138, %v7992_v1 }
0x2368   :  { %v8229_v17 = vsel %vm8197_vm3, %v8181_v13, %v8213_v21  ;;  %v8214_v19 = vsub.f32 0.0, %v8182_v12  ;;  %v8180_v29 = vsub.f32 1.0, %v8164_v54  ;;  %v8073_v56 = vadd.f32 0.2548296, %v8057_v43 }
0x2369   :  { %v8227_v8 = vsel %vm8195_vm4, %v8179_v14, %v8211_v3  ;;  %v8245_v27 = vadd.f32 1.0, %v8229_v17  ;;  %v8071_v26 = vadd.f32 0.2548296, %v8055_v9  ;;  %v8042_v13 = vadd.f32 -0.28449672, %v8026_v4 }
0x236a   :  { %v8243_v18 = vadd.f32 1.0, %v8227_v8  ;;  %v8230_v16 = vsel %vm8198_vm5, %v8182_v12, %v8214_v19  ;;  %v8212_v42 = vsub.f32 0.0, %v8180_v29  ;;  %v8089_v14 = vmul.f32 %v17402_v48, %v8073_v56  ;;  %vm17830_vm5 = vmpackc.low %vm243_vm2, %vm243_vm2 }
0x236b   :  { %v8246_v33 = vadd.f32 1.0, %v8230_v16  ;;  %v8087_v21 = vmul.f32 %v17407_v60, %v8071_v26  ;;  %v8058_v25 = vmul.f32 %v17415_v0, %v8042_v13  ;;  %v8024_v51 = vmul.f32 %v17425_v59, %v8008_v11 }
0x236c   :  { %v8261_v40 = vmul.f32 %v8245_v27, %v17381_v57  ;;  %v7844_v53 = vmul.f32 0.5, %v17342_v50  ;;  %v8228_v58 = vsel %vm8196_vm6, %v8180_v29, %v8212_v42  ;;  %v8169_v3 = vmul.f32 %v12459_v34, %v8089_v14 }
0x236d   :  { %v8262_v5 = vmul.f32 %v8246_v33, %v17419_v49  ;;  %v8244_v10 = vadd.f32 1.0, %v8228_v58  ;;  %v8167_v1 = vmul.f32 %v12461_v23, %v8087_v21  ;;  %v8074_v48 = vadd.f32 0.2548296, %v8058_v25  ;;  %v12465_v49 = vpop.eup %12464 }
0x236e   :  { %v8259_v17 = vmul.f32 %v8243_v18, %v17405_v22  ;;  %v8185_v60 = vsub.f32 1.0, %v8169_v3  ;;  %v8040_v12 = vadd.f32 -0.28449672, %v8024_v51  ;;  %v7849_v51 = vmul.f32 0.5, %v17355_v36 }
0x236f   :  { %v8276_v54 = vpack.c.bf16 %v8262_v5, %v8261_v40  ;;  %v8260_v43 = vmul.f32 %v8244_v10, %v7844_v53  ;;  %v8183_v8 = vsub.f32 1.0, %v8167_v1  ;;  %v8090_v57 = vmul.f32 %v17415_v0, %v8074_v48 }
0x2370   :  { %v8056_v50 = vmul.f32 %v17425_v59, %v8040_v12  ;;  %v8217_v4 = vsub.f32 0.0, %v8185_v60  ;;  %v7850_v40 = vmul.f32 0.5, %v17361_v38  ;;  %v7847_v1 = vmul.f32 0.5, %v17358_v39 }
0x2371   :  { %v8170_v9 = vmul.f32 %v12463_v2, %v8090_v57  ;;  %v8275_v62 = vpack.c.bf16 %v8260_v43, %v8259_v17  ;;  %v8215_v19 = vsub.f32 0.0, %v8183_v8  ;;  %vm12621_vm4 = vmmov 0  }
0x2372   :  { %v8072_v34 = vadd.f32 0.2548296, %v8056_v50  ;;  %v8233_v18 = vsel %vm8201_vm12, %v8185_v60, %v8217_v4 }
0x2373   :  { %v8186_v23 = vsub.f32 1.0, %v8170_v9  ;;  %10651 = vmatprep.mubr.bf16.mxu0 %v8275_v62  ;;  %v8231_v42 = vsel %vm8199_vm13, %v8183_v8, %v8215_v19  ;;  %v8249_v58 = vadd.f32 1.0, %v8233_v18 }
0x2374   :  { %v10629_v27 = vpop.f32.mrb[184].mxu1  ;;  %v8088_v56 = vmul.f32 %v17425_v59, %v8072_v34  ;;  %10652 = vmatmul.mubr.bf16.vlgmr.msra.gmra.mrb[192].mxu0 %v8276_v54  ;;  %v8247_v3 = vadd.f32 1.0, %v8231_v42  ;;  %v7848_v54 = vmul.f32 0.5, %v17367_v37 }
0x2375   :  { %v17462_v22 = vadd.f32 %v10629_v27, %v17327_v41  ;;  %v7812_v29 = vpop.f32.mrb[185].mxu1  ;;  %v8218_v2 = vsub.f32 0.0, %v8186_v23  ;;  %v8265_v57 = vmul.f32 %v8249_v58, %v7849_v51 }
0x2376   :  { %v17466_v0 = vadd.f32 %v17327_v41, %v7812_v29  ;;  %v10630_v26 = vpop.f32.mrb[186].mxu1  ;;  %v8168_v16 = vmul.f32 %v12465_v49, %v8088_v56  ;;  %v8263_v50 = vmul.f32 %v8247_v3, %v7847_v1 }
0x2377   :  { %v17471_v13 = vmul.f32 0.70710677, %v17462_v22  ;;  %v7815_v11 = vpop.f32.mrb[187].mxu1  ;;  %v8234_v14 = vsel %vm8202_vm14, %v8186_v23, %v8218_v2  ;;  %v17479_v32 = vadd.f32 %v10630_v26, %v17327_v41 }
0x2378   :  { %v17475_v59 = vmul.f32 0.70710677, %v17466_v0  ;;  %v8250_v44 = vadd.f32 1.0, %v8234_v14  ;;  %v8184_v21 = vsub.f32 1.0, %v8168_v16  ;;  %v17491_v38 = vadd.f32 %v17327_v41, %v7815_v11 }
0x2379   :  { %v7885_v33 = vand.u32 2147483647, %v17471_v13  ;;  %v17485_v53 = vmul.f32 0.70710677, %v17479_v32  ;;  %vm8205_vm0 = vcmp.ge.f32.partialorder %v17471_v13, 0.0 }
0x237a   :  { %v7883_v25 = vand.u32 2147483647, %v17475_v59  ;;  %v8216_v5 = vsub.f32 0.0, %v8184_v21  ;;  %v8266_v60 = vmul.f32 %v8250_v44, %v7850_v40  ;;  %v17495_v4 = vmul.f32 0.70710677, %v17491_v38 }
0x237b   :  { %v7901_v35 = vmul.f32 0.3275911, %v7885_v33  ;;  %v7886_v17 = vand.u32 2147483647, %v17485_v53  ;;  %v8109_v6 = vsub.f32 0.0, %v7885_v33  ;;  %vm8203_vm1 = vcmp.ge.f32.partialorder %v17475_v59, 0.0 }
0x237c   :  { %v7899_v10 = vmul.f32 0.3275911, %v7883_v25  ;;  %v8232_v12 = vsel %vm8200_vm15, %v8184_v21, %v8216_v5  ;;  %v8278_v27 = vpack.c.bf16 %v8266_v60, %v8265_v57  ;;  %v7884_v37 = vand.u32 2147483647, %v17495_v4 }
0x237d   :  { %v7917_v48 = vadd.f32 1.0, %v7901_v35  ;;  %v8248_v43 = vadd.f32 1.0, %v8232_v12  ;;  %v7902_v8 = vmul.f32 0.3275911, %v7886_v17  ;;  %v8107_v56 = vsub.f32 0.0, %v7883_v25 }
0x237e   :  { %v7915_v36 = vadd.f32 1.0, %v7899_v10  ;;  %v8125_v11 = vmul.f32 %v8109_v6, %v7885_v33  ;;  %v7900_v18 = vmul.f32 0.3275911, %v7884_v37  ;;  %v17515_v21 = vmul.f32 0.5, %v17462_v22 }
0x237f   :  { %12466 = vrcp.f32 %v7917_v48  ;;  %v8264_v9 = vmul.f32 %v8248_v43, %v7848_v54  ;;  %v7918_v62 = vadd.f32 1.0, %v7902_v8  ;;  %v8123_v51 = vmul.f32 %v8107_v56, %v7883_v25 }
0x2380   :  { %12468 = vrcp.f32 %v7915_v36  ;;  %v10633_v39 = vpop.f32.mrb[188].mxu1  ;;  %v7916_v14 = vadd.f32 1.0, %v7900_v18  ;;  %v8151_v58 = vmul.f32 1.442695, %v8125_v11  ;;  %v8110_v3 = vsub.f32 0.0, %v7886_v17 }
0x2381   :  { %v7828_v34 = vpop.f32.mrb[189].mxu1  ;;  %v17498_v49 = vadd.f32 %v10633_v39, %v17327_v41  ;;  %12470 = vrcp.f32 %v7918_v62  ;;  %v8277_v23 = vpack.c.bf16 %v8264_v9, %v8263_v50  ;;  %v8108_v48 = vsub.f32 0.0, %v7884_v37 }
0x2382   :  { %v10634_v19 = vpop.f32.mrb[190].mxu1  ;;  %v17505_v2 = vadd.f32 %v17327_v41, %v7828_v34  ;;  %12472 = vrcp.f32 %v7916_v14  ;;  %v17530_v25 = vmul.f32 0.5, %v17466_v0  ;;  %v8147_v8 = vmul.f32 1.442695, %v8123_v51 }
0x2383   :  { %v7831_v29 = vpop.f32.mrb[191].mxu1  ;;  %v17502_v26 = vmul.f32 0.70710677, %v17498_v49  ;;  %10655 = vmatprep.mubr.bf16.mxu0 %v8277_v23  ;;  %v17508_v16 = vadd.f32 %v10634_v19, %v17327_v41  ;;  %v8126_v9 = vmul.f32 %v8110_v3, %v7886_v17  ;;  %v17543_v14 = vmul.f32 0.5, %v17479_v32 }
0x2384   :  { %10656 = vmatmul.mubr.bf16.gmra.mrb[196].mxu0 %v8278_v27  ;;  %v17512_v44 = vmul.f32 0.70710677, %v17505_v2  ;;  %v17537_v62 = vadd.f32 %v17327_v41, %v7831_v29  ;;  %v8124_v27 = vmul.f32 %v8108_v48, %v7884_v37  ;;  %vm8206_vm7 = vcmp.ge.f32.partialorder %v17485_v53, 0.0 }
0x2385   :  { %v7889_v42 = vand.u32 2147483647, %v17502_v26  ;;  %v17518_v35 = vmul.f32 0.70710677, %v17508_v16  ;;  %v8153_v29 = vmul.f32 1.442695, %v8126_v9 }
0x2386   :  { %v7887_v5 = vand.u32 2147483647, %v17512_v44  ;;  %v17546_v51 = vmul.f32 0.70710677, %v17537_v62  ;;  %vm8204_vm8 = vcmp.ge.f32.partialorder %v17495_v4, 0.0  ;;  %vm8209_vm9 = vcmp.ge.f32.partialorder %v17502_v26, 0.0 }
0x2387   :  { %v7905_v40 = vmul.f32 0.3275911, %v7889_v42  ;;  %v17527_v22 = vand.u32 2147483647, %v17518_v35  ;;  %v8113_v36 = vsub.f32 0.0, %v7889_v42  ;;  %vm8210_vm10 = vcmp.ge.f32.partialorder %v17518_v35, 0.0 }
0x2388   :  { %v7903_v54 = vmul.f32 0.3275911, %v7887_v5  ;;  %v8111_v11 = vsub.f32 0.0, %v7887_v5  ;;  %vm8207_vm11 = vcmp.ge.f32.partialorder %v17512_v44, 0.0  ;;  %vm8208_vm3 = vcmp.ge.f32.partialorder %v17546_v51, 0.0 }
0x2389   :  { %v17520_v33 = vpop.eup %12466  ;;  %v7921_v60 = vadd.f32 1.0, %v7905_v40  ;;  %v7906_v57 = vmul.f32 0.3275911, %v17527_v22  ;;  %v8129_v56 = vmul.f32 %v8113_v36, %v7889_v42  ;;  %v8149_v42 = vmul.f32 1.442695, %v8124_v27 }
0x238a   :  { %v17523_v10 = vpop.eup %12468  ;;  %v7965_v1 = vmul.f32 1.0614054, %v17520_v33  ;;  %v7919_v6 = vadd.f32 1.0, %v7903_v54  ;;  %v8127_v48 = vmul.f32 %v8111_v11, %v7887_v5 }
0x238b   :  { %v7963_v12 = vmul.f32 1.0614054, %v17523_v10  ;;  %12474 = vrcp.f32 %v7921_v60  ;;  %v17534_v50 = vpop.eup %12470  ;;  %v7922_v19 = vadd.f32 1.0, %v7906_v57  ;;  %v8159_v32 = vmul.f32 1.442695, %v8129_v56 }
0x238c   :  { %v7981_v43 = vadd.f32 -1.4531521, %v7965_v1  ;;  %v7966_v34 = vmul.f32 1.0614054, %v17534_v50  ;;  %12476 = vrcp.f32 %v7919_v6  ;;  %v17550_v3 = vpop.eup %12472  ;;  %v17554_v60 = vand.u32 2147483647, %v17546_v51 }
0x238d   :  { %v7979_v39 = vadd.f32 -1.4531521, %v7963_v12  ;;  %12478 = vrcp.f32 %v7922_v19  ;;  %v7964_v36 = vmul.f32 1.0614054, %v17550_v3 }
0x238e   :  { %v7997_v0 = vmul.f32 %v17520_v33, %v7981_v43  ;;  %v7982_v17 = vadd.f32 -1.4531521, %v7966_v34  ;;  %12480 = vpow2.f32 %v8151_v58  ;;  %v8114_v43 = vsub.f32 0.0, %v17527_v22 }
0x238f   :  { %v7995_v23 = vmul.f32 %v17523_v10, %v7979_v39  ;;  %12482 = vpow2.f32 %v8147_v8  ;;  %v7904_v8 = vmul.f32 0.3275911, %v17554_v60  ;;  %v7980_v5 = vadd.f32 -1.4531521, %v7964_v36 }
0x2390   :  { %v8013_v18 = vadd.f32 1.4214138, %v7997_v0  ;;  %v7998_v40 = vmul.f32 %v17534_v50, %v7982_v17  ;;  %12484 = vpow2.f32 %v8153_v29  ;;  %v8155_v34 = vmul.f32 1.442695, %v8127_v48 }
0x2391   :  { %v8011_v41 = vadd.f32 1.4214138, %v7995_v23  ;;  %12486 = vpow2.f32 %v8149_v42  ;;  %v7920_v27 = vadd.f32 1.0, %v7904_v8  ;;  %v7996_v56 = vmul.f32 %v17550_v3, %v7980_v5 }
0x2392   :  { %v8029_v37 = vmul.f32 %v17520_v33, %v8013_v18  ;;  %v8014_v12 = vadd.f32 1.4214138, %v7998_v40  ;;  %12488 = vpow2.f32 %v8159_v32 }
0x2393   :  { %v8027_v1 = vmul.f32 %v17523_v10, %v8011_v41  ;;  %v8130_v41 = vmul.f32 %v8114_v43, %v17527_v22  ;;  %12490 = vrcp.f32 %v7920_v27  ;;  %v8012_v42 = vadd.f32 1.4214138, %v7996_v56 }
0x2394   :  { %v8045_v58 = vadd.f32 -0.28449672, %v8029_v37  ;;  %v8030_v9 = vmul.f32 %v17534_v50, %v8014_v12  ;;  %12492 = vpow2.f32 %v8155_v34 }
0x2395   :  { %v8043_v54 = vadd.f32 -0.28449672, %v8027_v1  ;;  %v17559_v57 = vpop.eup %12474  ;;  %v8028_v43 = vmul.f32 %v17550_v3, %v8012_v42  ;;  %v8161_v5 = vmul.f32 1.442695, %v8130_v41 }
0x2396   :  { %v8061_v39 = vmul.f32 %v17520_v33, %v8045_v58  ;;  %v7969_v0 = vmul.f32 1.0614054, %v17559_v57  ;;  %v8046_v23 = vadd.f32 -0.28449672, %v8030_v9  ;;  %v17566_v11 = vpop.eup %12476 }
0x2397   :  { %v8059_v6 = vmul.f32 %v17523_v10, %v8043_v54  ;;  %v17570_v29 = vpop.eup %12478  ;;  %v7967_v1 = vmul.f32 1.0614054, %v17566_v11  ;;  %12494 = vpow2.f32 %v8161_v5 }
0x2398   :  { %v8077_v19 = vadd.f32 0.2548296, %v8061_v39  ;;  %v7985_v17 = vadd.f32 -1.4531521, %v7969_v0  ;;  %v8062_v40 = vmul.f32 %v17534_v50, %v8046_v23  ;;  %v12481_v48 = vpop.eup %12480  ;;  %v7970_v12 = vmul.f32 1.0614054, %v17570_v29 }
0x2399   :  { %v8075_v18 = vadd.f32 0.2548296, %v8059_v6  ;;  %v12483_v36 = vpop.eup %12482  ;;  %v7983_v8 = vadd.f32 -1.4531521, %v7967_v1  ;;  %v8044_v0 = vadd.f32 -0.28449672, %v8028_v43 }
0x239a   :  { %v8093_v37 = vmul.f32 %v17520_v33, %v8077_v19  ;;  %v8001_v58 = vmul.f32 %v17559_v57, %v7985_v17  ;;  %v8078_v54 = vadd.f32 0.2548296, %v8062_v40  ;;  %v7986_v9 = vadd.f32 -1.4531521, %v7970_v12  ;;  %v12485_v27 = vpop.eup %12484 }
0x239b   :  { %v8091_v32 = vmul.f32 %v17523_v10, %v8075_v18  ;;  %v7999_v34 = vmul.f32 %v17566_v11, %v7983_v8  ;;  %v8112_v18 = vsub.f32 0.0, %v17554_v60  ;;  %v12487_v17 = vpop.eup %12486  ;;  %v8060_v42 = vmul.f32 %v17550_v3, %v8044_v0 }
0x239c   :  { %v8173_v22 = vmul.f32 %v12481_v48, %v8093_v37  ;;  %v8017_v39 = vadd.f32 1.4214138, %v8001_v58  ;;  %v8094_v10 = vmul.f32 %v17534_v50, %v8078_v54  ;;  %v8002_v56 = vmul.f32 %v17570_v29, %v7986_v9 }
0x239d   :  { %v8171_v33 = vmul.f32 %v12483_v36, %v8091_v32  ;;  %v8015_v41 = vadd.f32 1.4214138, %v7999_v34  ;;  %v12489_v32 = vpop.eup %12488  ;;  %v8076_v36 = vadd.f32 0.2548296, %v8060_v42 }
0x239e   :  { %v8189_v6 = vsub.f32 1.0, %v8173_v22  ;;  %v8033_v23 = vmul.f32 %v17559_v57, %v8017_v39  ;;  %v8174_v40 = vmul.f32 %v12485_v27, %v8094_v10  ;;  %v8018_v50 = vadd.f32 1.4214138, %v8002_v56  ;;  %v17589_v54 = vpop.eup %12490 }
0x239f   :  { %v8187_v19 = vsub.f32 1.0, %v8171_v33  ;;  %v8031_v22 = vmul.f32 %v17566_v11, %v8015_v41  ;;  %v8128_v33 = vmul.f32 %v8112_v18, %v17554_v60  ;;  %v8092_v5 = vmul.f32 %v17550_v3, %v8076_v36 }
0x23a0   :  { %v8221_v37 = vsub.f32 0.0, %v8189_v6  ;;  %v8049_v48 = vadd.f32 -0.28449672, %v8033_v23  ;;  %v8190_v12 = vsub.f32 1.0, %v8174_v40  ;;  %v8034_v8 = vmul.f32 %v17570_v29, %v8018_v50 }
0x23a1   :  { %v8219_v1 = vsub.f32 0.0, %v8187_v19  ;;  %v8047_v13 = vadd.f32 -0.28449672, %v8031_v22  ;;  %v7968_v34 = vmul.f32 1.0614054, %v17589_v54  ;;  %v8172_v23 = vmul.f32 %v12487_v17, %v8092_v5 }
0x23a2   :  { %v8237_v58 = vsel %vm8205_vm0, %v8189_v6, %v8221_v37  ;;  %v8065_v43 = vmul.f32 %v17559_v57, %v8049_v48  ;;  %v8222_v9 = vsub.f32 0.0, %v8190_v12  ;;  %v12493_v6 = vpop.eup %12492  ;;  %v8050_v0 = vadd.f32 -0.28449672, %v8034_v8 }
0x23a3   :  { %v8253_v39 = vadd.f32 1.0, %v8237_v58  ;;  %v8235_v27 = vsel %vm8203_vm1, %v8187_v19, %v8219_v1  ;;  %v8063_v56 = vmul.f32 %v17566_v11, %v8047_v13  ;;  %v7984_v40 = vadd.f32 -1.4531521, %v7968_v34 }
0x23a4   :  { %v8081_v10 = vadd.f32 0.2548296, %v8065_v43  ;;  %v8238_v53 = vsel %vm8206_vm7, %v8190_v12, %v8222_v9  ;;  %v8066_v18 = vmul.f32 %v17570_v29, %v8050_v0  ;;  %v8188_v42 = vsub.f32 1.0, %v8172_v23  ;;  %v12495_v12 = vpop.eup %12494 }
0x23a5   :  { %v8254_v37 = vadd.f32 1.0, %v8238_v53  ;;  %v8269_v3 = vmul.f32 %v8253_v39, %v17515_v21  ;;  %v8079_v41 = vadd.f32 0.2548296, %v8063_v56  ;;  %v8157_v48 = vmul.f32 1.442695, %v8128_v33 }
0x23a6   :  { %v8097_v60 = vmul.f32 %v17559_v57, %v8081_v10  ;;  %v8082_v59 = vadd.f32 0.2548296, %v8066_v18  ;;  %v8000_v19 = vmul.f32 %v17589_v54, %v7984_v40  ;;  %v8251_v17 = vadd.f32 1.0, %v8235_v27 }
0x23a7   :  { %v8270_v50 = vmul.f32 %v8254_v37, %v17543_v14  ;;  %v8220_v1 = vsub.f32 0.0, %v8188_v42  ;;  %v8095_v57 = vmul.f32 %v17566_v11, %v8079_v41  ;;  %v7852_v8 = vmul.f32 0.5, %v17491_v38 }
0x23a8   :  { %v8177_v58 = vmul.f32 %v12489_v32, %v8097_v60  ;;  %v8098_v22 = vmul.f32 %v17570_v29, %v8082_v59  ;;  %v8016_v21 = vadd.f32 1.4214138, %v8000_v19  ;;  %12496 = vpow2.f32 %v8157_v48 }
0x23a9   :  { %v8280_v43 = vpack.c.bf16 %v8270_v50, %v8269_v3  ;;  %v8236_v33 = vsel %vm8204_vm8, %v8188_v42, %v8220_v1  ;;  %v8175_v14 = vmul.f32 %v12493_v6, %v8095_v57  ;;  %v8267_v4 = vmul.f32 %v8251_v17, %v17530_v25  ;;  %v17621_v57 = vld [vmem:[#allocation5 + $0xb] ss:$0 sm:$0xff] }
0x23aa   :  { %v8193_v36 = vsub.f32 1.0, %v8177_v58  ;;  %v8252_v32 = vadd.f32 1.0, %v8236_v33  ;;  %v8178_v9 = vmul.f32 %v12495_v12, %v8098_v22  ;;  %v8032_v5 = vmul.f32 %v17589_v54, %v8016_v21 }
0x23ab   :  { %v8191_v0 = vsub.f32 1.0, %v8175_v14  ;;  %v7857_v56 = vmul.f32 0.5, %v17498_v49  ;;  %v7858_v25 = vmul.f32 0.5, %v17508_v16  ;;  %v7855_v16 = vmul.f32 0.5, %v17505_v2 }
0x23ac   :  { %v8225_v39 = vsub.f32 0.0, %v8193_v36  ;;  %v8268_v11 = vmul.f32 %v8252_v32, %v7852_v8  ;;  %v8194_v10 = vsub.f32 1.0, %v8178_v9  ;;  %v8048_v29 = vadd.f32 -0.28449672, %v8032_v5 }
0x23ad   :  { %v8223_v37 = vsub.f32 0.0, %v8191_v0  ;;  %v7856_v59 = vmul.f32 0.5, %v17537_v62 }
0x23ae   :  { %v8241_v13 = vsel %vm8209_vm9, %v8193_v36, %v8225_v39  ;;  %v8226_v34 = vsub.f32 0.0, %v8194_v10  ;;  %v8064_v38 = vmul.f32 %v17589_v54, %v8048_v29  ;;  %v8279_v27 = vpack.c.bf16 %v8268_v11, %v8267_v4 }
0x23af   :  { %v8257_v6 = vadd.f32 1.0, %v8241_v13  ;;  %v8239_v35 = vsel %vm8207_vm11, %v8191_v0, %v8223_v37 }
0x23b0   :  { %v8242_v53 = vsel %vm8210_vm10, %v8194_v10, %v8226_v34  ;;  %v8080_v23 = vadd.f32 0.2548296, %v8064_v38  ;;  %10659 = vmatprep.mubr.bf16.mxu0 %v8279_v27  ;;  %v8255_v58 = vadd.f32 1.0, %v8239_v35 }
0x23b1   :  { %v8258_v26 = vadd.f32 1.0, %v8242_v53  ;;  %10660 = vmatmul.mubr.bf16.gmra.mrb[200].mxu0 %v8280_v43  ;;  %v8273_v40 = vmul.f32 %v8257_v6, %v7857_v56 }
0x23b2   :  { %v8096_v60 = vmul.f32 %v17589_v54, %v8080_v23  ;;  %v12497_v18 = vpop.eup %12496  ;;  %v8271_v54 = vmul.f32 %v8255_v58, %v7855_v16 }
0x23b3   :  { %v8274_v3 = vmul.f32 %v8258_v26, %v7858_v25 }
0x23b4   :  { %v8176_v42 = vmul.f32 %v12497_v18, %v8096_v60 }
0x23b5   :  { %v8282_v41 = vpack.c.bf16 %v8274_v3, %v8273_v40 }
0x23b6   :  { %v8192_v48 = vsub.f32 1.0, %v8176_v42 }
0x23b8   :  { %v8224_v50 = vsub.f32 0.0, %v8192_v48 }
0x23ba   :  { %v8240_v49 = vsel %vm8208_vm3, %v8192_v48, %v8224_v50 }
0x23bb   :  { %v8256_v19 = vadd.f32 1.0, %v8240_v49 }
0x23bd   :  { %v8272_v17 = vmul.f32 %v8256_v19, %v7856_v59 }
0x23bf   :  { %v8281_v1 = vpack.c.bf16 %v8272_v17, %v8271_v54  ;;  %v18442_v54 = vld [vmem:[#allocation39_spill] sm:$0xff] }
0x23c1   :  { %10663 = vmatprep.mubr.bf16.mxu0 %v8281_v1 }
0x23c2   :  { %10664 = vmatmul.mubr.bf16.gmra.mrb[204].mxu0 %v8282_v41 }
0x2447   :  { %v10653_v44 = vpop.f32.mrb[192].mxu0 }
0x2448   :  { %v8387_v12 = vpop.f32.mrb[193].mxu0  ;;  %v8396_v36 = vadd.f32 %v10653_v44, %v17621_v57  ;;  %v18443_v44 = vld [vmem:[#allocation45_spill] sm:$0xff] }
0x2449   :  { %v8388_v22 = vadd.f32 %v17621_v57, %v8387_v12  ;;  %v10654_v51 = vpop.f32.mrb[194].mxu0 }
0x244a   :  { %v8390_v21 = vpop.f32.mrb[195].mxu0  ;;  %v8399_v62 = vadd.f32 %v10654_v51, %v17621_v57  ;;  %v17631_v8 = vadd.f32 %v8396_v36, %v17049_v15 }
0x244b   :  { %v17626_v2 = vadd.f32 %v8388_v22, %v17045_v24  ;;  %v8391_v43 = vadd.f32 %v17621_v57, %v8390_v21 }
0x244c   :  { %v17639_v32 = vadd.f32 %v8399_v62, %v17060_v61  ;;  %v8474_v39 = vsel %vm243_vm2, %v17631_v8, 0.0 }
0x244d   :  { %v17634_v33 = vadd.f32 %v8391_v43, %v17053_v46  ;;  %v8468_v14 = vsel %vm243_vm2, %v17626_v2, 0.0 }
0x244e   :  { %8469 = vadd.xlane.f32.xlu0 %v8468_v14  ;;  %v8477_v15 = vsel %vm243_vm2, %v17639_v32, 0.0 }
0x244f   :  { %v8471_v24 = vsel %vm243_vm2, %v17634_v33, 0.0 }
0x2450   :  { %8472 = vadd.xlane.f32.xlu1 %v8471_v24 }
0x2452   :  { %8475 = vadd.xlane.f32.xlu0 %v8474_v39 }
0x2454   :  { %8478 = vadd.xlane.f32.xlu1 %v8477_v15 }
0x2457   :  { %v10657_v46 = vpop.f32.mrb[196].mxu0 }
0x2458   :  { %v8403_v9 = vpop.f32.mrb[197].mxu0  ;;  %v8412_v5 = vadd.f32 %v10657_v46, %v17621_v57 }
0x2459   :  { %v8404_v4 = vadd.f32 %v17621_v57, %v8403_v9  ;;  %v10658_v61 = vpop.f32.mrb[198].mxu0 }
0x245a   :  { %v8406_v11 = vpop.f32.mrb[199].mxu0  ;;  %v8415_v10 = vadd.f32 %v10658_v61, %v17621_v57  ;;  %v17655_v0 = vadd.f32 %v8412_v5, %v17074_v47 }
0x245b   :  { %v17650_v13 = vadd.f32 %v8404_v4, %v17069_v55  ;;  %v8407_v29 = vadd.f32 %v17621_v57, %v8406_v11 }
0x245c   :  { %v17663_v27 = vadd.f32 %v8415_v10, %v17082_v63  ;;  %v8486_v6 = vsel %vm243_vm2, %v17655_v0, 0.0 }
0x245d   :  { %v17658_v34 = vadd.f32 %v8407_v29, %v17077_v30  ;;  %v8480_v38 = vsel %vm243_vm2, %v17650_v13, 0.0 }
0x245e   :  { %8481 = vadd.xlane.f32.xlu0 %v8480_v38  ;;  %v8489_v47 = vsel %vm243_vm2, %v17663_v27, 0.0 }
0x245f   :  { %v8483_v55 = vsel %vm243_vm2, %v17658_v34, 0.0 }
0x2460   :  { %8484 = vadd.xlane.f32.xlu1 %v8483_v55 }
0x2462   :  { %8487 = vadd.xlane.f32.xlu0 %v8486_v6 }
0x2464   :  { %8490 = vadd.xlane.f32.xlu1 %v8489_v47 }
0x2484   :  { %v10661_v30 = vpop.f32.mrb[200].mxu0 }
0x2485   :  { %v8419_v53 = vpop.f32.mrb[201].mxu0  ;;  %v8428_v23 = vadd.f32 %v10661_v30, %v17621_v57 }
0x2486   :  { %v8420_v56 = vadd.f32 %v17621_v57, %v8419_v53  ;;  %v10662_v63 = vpop.f32.mrb[202].mxu0 }
0x2487   :  { %v8422_v25 = vpop.f32.mrb[203].mxu0  ;;  %v8431_v37 = vadd.f32 %v10662_v63, %v17621_v57  ;;  %v17679_v18 = vadd.f32 %v8428_v23, %v17098_v45 }
0x2488   :  { %v17674_v26 = vadd.f32 %v8420_v56, %v17093_v31  ;;  %v8423_v60 = vadd.f32 %v17621_v57, %v8422_v25 }
0x2489   :  { %v17687_v42 = vadd.f32 %v8431_v37, %v17106_v20  ;;  %v8498_v41 = vsel %vm243_vm2, %v17679_v18, 0.0 }
0x248a   :  { %v17682_v40 = vadd.f32 %v8423_v60, %v17101_v7  ;;  %v8492_v3 = vsel %vm243_vm2, %v17674_v26, 0.0 }
0x248b   :  { %8493 = vadd.xlane.f32.xlu0 %v8492_v3  ;;  %v8501_v45 = vsel %vm243_vm2, %v17687_v42, 0.0 }
0x248c   :  { %v8495_v31 = vsel %vm243_vm2, %v17682_v40, 0.0 }
0x248d   :  { %8496 = vadd.xlane.f32.xlu1 %v8495_v31 }
0x248f   :  { %8499 = vadd.xlane.f32.xlu0 %v8498_v41 }
0x2491   :  { %8502 = vadd.xlane.f32.xlu1 %v8501_v45  ;;  %v12620_v45 = vmov 0.0|0.0  }
0x2492   :  { %11086 = vmatprep.subr.bf16.mxu1 %v12620_v45 }
0x2495   :  { %v10665_v7 = vpop.f32.mrb[204].mxu0 }
0x2496   :  { %v8435_v35 = vpop.f32.mrb[205].mxu0  ;;  %v8444_v48 = vadd.f32 %v10665_v7, %v17621_v57 }
0x2497   :  { %v8436_v50 = vadd.f32 %v17621_v57, %v8435_v35  ;;  %v10666_v20 = vpop.f32.mrb[206].mxu0 }
0x2498   :  { %v8438_v58 = vpop.f32.mrb[207].mxu0  ;;  %v8447_v16 = vadd.f32 %v10666_v20, %v17621_v57  ;;  %v17703_v19 = vadd.f32 %v8444_v48, %v17122_v52 }
0x2499   :  { %v17698_v49 = vadd.f32 %v8436_v50, %v17117_v28  ;;  %v8439_v59 = vadd.f32 %v17621_v57, %v8438_v58 }
0x249a   :  { %v17711_v12 = vadd.f32 %v8447_v16, %v18443_v44  ;;  %v8510_v57 = vsel %vm243_vm2, %v17703_v19, 0.0 }
0x249b   :  { %v17706_v17 = vadd.f32 %v8439_v59, %v18442_v54  ;;  %v8504_v1 = vsel %vm243_vm2, %v17698_v49, 0.0 }
0x249c   :  { %8505 = vadd.xlane.f32.xlu0 %v8504_v1  ;;  %v8513_v52 = vsel %vm243_vm2, %v17711_v12, 0.0 }
0x249d   :  { %v8507_v28 = vsel %vm243_vm2, %v17706_v17, 0.0 }
0x249e   :  { %8508 = vadd.xlane.f32.xlu1 %v8507_v28 }
0x24a0   :  { %8511 = vadd.xlane.f32.xlu0 %v8510_v57 }
0x24a2   :  { %8514 = vadd.xlane.f32.xlu1 %v8513_v52 }
0x24db   :  { %v8470_v36 = vpop.xlane.xlu0 %8469 }
0x24dc   :  { %v8516_v22 = vmul.f32 0.03125, %v8470_v36 }
0x24dd   :  { %v8473_v51 = vpop.xlane.xlu1 %8472 }
0x24de   :  { %v17720_v21 = vsub.f32 %v17626_v2, %v8516_v22  ;;  %v8517_v62 = vmul.f32 0.03125, %v8473_v51 }
0x24df   :  { %v8476_v43 = vpop.xlane.xlu0 %8475 }
0x24e0   :  { %v17723_v14 = vsub.f32 %v17634_v33, %v8517_v62  ;;  %v8518_v24 = vmul.f32 0.03125, %v8476_v43  ;;  %v8548_v39 = vmul.f32 %v17720_v21, %v17720_v21 }
0x24e1   :  { %v8479_v15 = vpop.xlane.xlu1 %8478 }
0x24e2   :  { %v17728_v46 = vsub.f32 %v17631_v8, %v8518_v24  ;;  %v8519_v9 = vmul.f32 0.03125, %v8479_v15  ;;  %v8564_v5 = vsel %vm243_vm2, %v8548_v39, 0.0  ;;  %v8549_v2 = vmul.f32 %v17723_v14, %v17723_v14 }
0x24e3   :  { %8565 = vadd.xlane.f32.xlu0 %v8564_v5 }
0x24e4   :  { %v17734_v4 = vsub.f32 %v17639_v32, %v8519_v9  ;;  %v8567_v33 = vsel %vm243_vm2, %v8549_v2, 0.0  ;;  %v8550_v61 = vmul.f32 %v17728_v46, %v17728_v46 }
0x24e5   :  { %8568 = vadd.xlane.f32.xlu1 %v8567_v33 }
0x24e6   :  { %v8570_v11 = vsel %vm243_vm2, %v8550_v61, 0.0  ;;  %v8551_v8 = vmul.f32 %v17734_v4, %v17734_v4 }
0x24e7   :  { %8571 = vadd.xlane.f32.xlu0 %v8570_v11 }
0x24e8   :  { %v8573_v10 = vsel %vm243_vm2, %v8551_v8, 0.0 }
0x24e9   :  { %8574 = vadd.xlane.f32.xlu1 %v8573_v10 }
0x24eb   :  { %v8482_v29 = vpop.xlane.xlu0 %8481 }
0x24ec   :  { %v8520_v38 = vmul.f32 0.03125, %v8482_v29 }
0x24ed   :  { %v8485_v55 = vpop.xlane.xlu1 %8484 }
0x24ee   :  { %v17744_v32 = vsub.f32 %v17650_v13, %v8520_v38  ;;  %v8521_v6 = vmul.f32 0.03125, %v8485_v55  ;;  %v12622_v55 = vmov 0.0  }
0x24ef   :  { %v8488_v47 = vpop.xlane.xlu0 %8487  ;;  %10699 = vmatprep.mubr.msk.f32.mxu1 %vm12621_vm4, %v12622_v55 }
0x24f0   :  { %v17747_v30 = vsub.f32 %v17658_v34, %v8521_v6  ;;  %v8522_v53 = vmul.f32 0.03125, %v8488_v47  ;;  %v8552_v23 = vmul.f32 %v17744_v32, %v17744_v32 }
0x24f1   :  { %v8491_v56 = vpop.xlane.xlu1 %8490 }
0x24f2   :  { %v17752_v63 = vsub.f32 %v17655_v0, %v8522_v53  ;;  %v8523_v25 = vmul.f32 0.03125, %v8491_v56  ;;  %v8576_v37 = vsel %vm243_vm2, %v8552_v23, 0.0  ;;  %v8553_v13 = vmul.f32 %v17747_v30, %v17747_v30 }
0x24f3   :  { %8577 = vadd.xlane.f32.xlu0 %v8576_v37 }
0x24f4   :  { %v17758_v60 = vsub.f32 %v17663_v27, %v8523_v25  ;;  %v8579_v34 = vsel %vm243_vm2, %v8553_v13, 0.0  ;;  %v8554_v3 = vmul.f32 %v17752_v63, %v17752_v63 }
0x24f5   :  { %8580 = vadd.xlane.f32.xlu1 %v8579_v34 }
0x24f6   :  { %v8582_v31 = vsel %vm243_vm2, %v8554_v3, 0.0  ;;  %v8555_v0 = vmul.f32 %v17758_v60, %v17758_v60 }
0x24f7   :  { %8583 = vadd.xlane.f32.xlu0 %v8582_v31 }
0x24f8   :  { %v8585_v41 = vsel %vm243_vm2, %v8555_v0, 0.0 }
0x24f9   :  { %8586 = vadd.xlane.f32.xlu1 %v8585_v41  ;;  %v17816_v41 = vld [vmem:[#allocation5 + $0xc] ss:$0 sm:$0xff] }
0x2518   :  { %v8494_v27 = vpop.xlane.xlu0 %8493 }
0x2519   :  { %v8524_v7 = vmul.f32 0.03125, %v8494_v27 }
0x251a   :  { %v8497_v35 = vpop.xlane.xlu1 %8496 }
0x251b   :  { %v17769_v48 = vsub.f32 %v17674_v26, %v8524_v7  ;;  %v8525_v50 = vmul.f32 0.03125, %v8497_v35 }
0x251c   :  { %v8500_v20 = vpop.xlane.xlu0 %8499 }
0x251d   :  { %v17772_v58 = vsub.f32 %v17682_v40, %v8525_v50  ;;  %v8526_v16 = vmul.f32 0.03125, %v8500_v20  ;;  %v8556_v59 = vmul.f32 %v17769_v48, %v17769_v48 }
0x251e   :  { %v8503_v54 = vpop.xlane.xlu1 %8502 }
0x251f   :  { %v17777_v1 = vsub.f32 %v17679_v18, %v8526_v16  ;;  %v8527_v44 = vmul.f32 0.03125, %v8503_v54  ;;  %v8588_v28 = vsel %vm243_vm2, %v8556_v59, 0.0  ;;  %v8557_v26 = vmul.f32 %v17772_v58, %v17772_v58 }
0x2520   :  { %8589 = vadd.xlane.f32.xlu0 %v8588_v28 }
0x2521   :  { %v17783_v57 = vsub.f32 %v17687_v42, %v8527_v44  ;;  %v8591_v40 = vsel %vm243_vm2, %v8557_v26, 0.0  ;;  %v8558_v52 = vmul.f32 %v17777_v1, %v17777_v1  ;;  %v17821_v26 = vld [vmem:[#allocation5 + $0xd] ss:$0 sm:$0xff] }
0x2522   :  { %8592 = vadd.xlane.f32.xlu1 %v8591_v40 }
0x2523   :  { %v8594_v36 = vsel %vm243_vm2, %v8558_v52, 0.0  ;;  %v8559_v18 = vmul.f32 %v17783_v57, %v17783_v57 }
0x2524   :  { %8595 = vadd.xlane.f32.xlu0 %v8594_v36 }
0x2525   :  { %v8597_v22 = vsel %vm243_vm2, %v8559_v18, 0.0 }
0x2526   :  { %8598 = vadd.xlane.f32.xlu1 %v8597_v22 }
0x2529   :  { %v8506_v51 = vpop.xlane.xlu0 %8505 }
0x252a   :  { %v8528_v62 = vmul.f32 0.03125, %v8506_v51 }
0x252b   :  { %v8509_v43 = vpop.xlane.xlu1 %8508 }
0x252c   :  { %v17793_v42 = vsub.f32 %v17698_v49, %v8528_v62  ;;  %v8529_v24 = vmul.f32 0.03125, %v8509_v43 }
0x252d   :  { %v8512_v39 = vpop.xlane.xlu0 %8511 }
0x252e   :  { %v17796_v15 = vsub.f32 %v17706_v17, %v8529_v24  ;;  %v8530_v9 = vmul.f32 0.03125, %v8512_v39  ;;  %v8560_v5 = vmul.f32 %v17793_v42, %v17793_v42 }
0x252f   :  { %v8515_v2 = vpop.xlane.xlu1 %8514 }
0x2530   :  { %v17801_v33 = vsub.f32 %v17703_v19, %v8530_v9  ;;  %v8531_v61 = vmul.f32 0.03125, %v8515_v2  ;;  %v8600_v11 = vsel %vm243_vm2, %v8560_v5, 0.0  ;;  %v8561_v49 = vmul.f32 %v17796_v15, %v17796_v15 }
0x2531   :  { %8601 = vadd.xlane.f32.xlu0 %v8600_v11 }
0x2532   :  { %v17807_v8 = vsub.f32 %v17711_v12, %v8531_v61  ;;  %v8603_v17 = vsel %vm243_vm2, %v8561_v49, 0.0  ;;  %v8562_v10 = vmul.f32 %v17801_v33, %v17801_v33 }
0x2533   :  { %8604 = vadd.xlane.f32.xlu1 %v8603_v17 }
0x2534   :  { %v8606_v29 = vsel %vm243_vm2, %v8562_v10, 0.0  ;;  %v8563_v19 = vmul.f32 %v17807_v8, %v17807_v8 }
0x2535   :  { %8607 = vadd.xlane.f32.xlu0 %v8606_v29 }
0x2536   :  { %v8609_v38 = vsel %vm243_vm2, %v8563_v19, 0.0 }
0x2537   :  { %8610 = vadd.xlane.f32.xlu1 %v8609_v38 }
0x2570   :  { %v8566_v12 = vpop.xlane.xlu0 %8565 }
0x2571   :  { %v8612_v6 = vmul.f32 0.03125, %v8566_v12 }
0x2572   :  { %v8569_v47 = vpop.xlane.xlu1 %8568 }
0x2573   :  { %v8628_v53 = vadd.f32 1e-05, %v8612_v6  ;;  %v8613_v23 = vmul.f32 0.03125, %v8569_v47 }
0x2574   :  { %v8572_v56 = vpop.xlane.xlu0 %8571 }
0x2575   :  { %12498 = vrsqrt.f32 %v8628_v53  ;;  %v8629_v25 = vadd.f32 1e-05, %v8613_v23  ;;  %v8614_v37 = vmul.f32 0.03125, %v8572_v56 }
0x2576   :  { %v8575_v13 = vpop.xlane.xlu1 %8574 }
0x2577   :  { %12500 = vrsqrt.f32 %v8629_v25  ;;  %v8630_v34 = vadd.f32 1e-05, %v8614_v37  ;;  %v8615_v3 = vmul.f32 0.03125, %v8575_v13 }
0x2579   :  { %12502 = vrsqrt.f32 %v8630_v34  ;;  %v8631_v31 = vadd.f32 1e-05, %v8615_v3 }
0x257b   :  { %12504 = vrsqrt.f32 %v8631_v31 }
0x257f   :  { %v12499_v0 = vpop.eup %12498 }
0x2580   :  { %v8660_v27 = vmul.f32 %v12499_v0, %v17720_v21  ;;  %v8578_v7 = vpop.xlane.xlu0 %8577 }
0x2581   :  { %v12501_v35 = vpop.eup %12500  ;;  %v8616_v50 = vmul.f32 0.03125, %v8578_v7 }
0x2582   :  { %v8680_v20 = vmul.f32 %v17816_v41, %v8660_v27  ;;  %v8661_v16 = vmul.f32 %v12501_v35, %v17723_v14  ;;  %v8581_v59 = vpop.xlane.xlu1 %8580 }
0x2583   :  { %v12503_v54 = vpop.eup %12502  ;;  %v8632_v44 = vadd.f32 1e-05, %v8616_v50  ;;  %v8617_v28 = vmul.f32 0.03125, %v8581_v59 }
0x2584   :  { %v8681_v40 = vmul.f32 %v17816_v41, %v8661_v16  ;;  %v8584_v52 = vpop.xlane.xlu0 %8583  ;;  %v8662_v22 = vmul.f32 %v12503_v54, %v17728_v46  ;;  %v8700_v14 = vadd.f32 %v17821_v26, %v8680_v20 }
0x2585   :  { %v12505_v36 = vpop.eup %12504  ;;  %12506 = vrsqrt.f32 %v8632_v44  ;;  %v8633_v18 = vadd.f32 1e-05, %v8617_v28  ;;  %v8618_v21 = vmul.f32 0.03125, %v8584_v52 }
0x2586   :  { %v8663_v51 = vmul.f32 %v12505_v36, %v17734_v4  ;;  %v8587_v62 = vpop.xlane.xlu1 %8586  ;;  %v8701_v43 = vadd.f32 %v17821_v26, %v8681_v40  ;;  %v8682_v4 = vmul.f32 %v17816_v41, %v8662_v22 }
0x2587   :  { %12508 = vrsqrt.f32 %v8633_v18  ;;  %v8634_v24 = vadd.f32 1e-05, %v8618_v21  ;;  %v8619_v39 = vmul.f32 0.03125, %v8587_v62 }
0x2588   :  { %v8683_v5 = vmul.f32 %v17816_v41, %v8663_v51  ;;  %v11087_v2 = vpack.c.bf16 %v8701_v43, %v8700_v14  ;;  %v8702_v11 = vadd.f32 %v17821_v26, %v8682_v4 }
0x2589   :  { %12510 = vrsqrt.f32 %v8634_v24  ;;  %v8635_v46 = vadd.f32 1e-05, %v8619_v39 }
0x258a   :  { %11089 = vmatpush3.bf16.xpose.msk.msra.mxu1 %vm17830_vm5, %v11087_v2  ;;  %v8703_v61 = vadd.f32 %v17821_v26, %v8683_v5 }
0x258b   :  { %12512 = vrsqrt.f32 %v8635_v46  ;;  %11090 = vmatprep.subr.bf16.mxu1 %v12620_v45 }
0x258c   :  { %v11091_v10 = vpack.c.bf16 %v8703_v61, %v8702_v11 }
0x258f   :  { %v12507_v49 = vpop.eup %12506 }
0x2590   :  { %v8664_v17 = vmul.f32 %v12507_v49, %v17744_v32 }
0x2591   :  { %v12509_v29 = vpop.eup %12508 }
0x2592   :  { %v8684_v19 = vmul.f32 %v17816_v41, %v8664_v17  ;;  %v8665_v38 = vmul.f32 %v12509_v29, %v17747_v30  ;;  %11093 = vmatpush3.bf16.xpose.msk.msra.mxu1 %vm17830_vm5, %v11091_v10 }
0x2593   :  { %v12511_v55 = vpop.eup %12510  ;;  %11094 = vmatprep.subr.bf16.mxu1 %v12620_v45 }
0x2594   :  { %v8685_v12 = vmul.f32 %v17816_v41, %v8665_v38  ;;  %v8666_v47 = vmul.f32 %v12511_v55, %v17752_v63  ;;  %v8704_v32 = vadd.f32 %v17821_v26, %v8684_v19 }
0x2595   :  { %v12513_v6 = vpop.eup %12512 }
0x2596   :  { %v8667_v53 = vmul.f32 %v12513_v6, %v17758_v60  ;;  %v8705_v23 = vadd.f32 %v17821_v26, %v8685_v12  ;;  %v8686_v25 = vmul.f32 %v17816_v41, %v8666_v47 }
0x2598   :  { %v8687_v56 = vmul.f32 %v17816_v41, %v8667_v53  ;;  %v11095_v30 = vpack.c.bf16 %v8705_v23, %v8704_v32  ;;  %v8706_v63 = vadd.f32 %v17821_v26, %v8686_v25 }
0x259a   :  { %11097 = vmatpush3.bf16.xpose.msk.msra.mxu1 %vm17830_vm5, %v11095_v30  ;;  %v8707_v37 = vadd.f32 %v17821_v26, %v8687_v56 }
0x259b   :  { %11098 = vmatprep.subr.bf16.mxu1 %v12620_v45 }
0x259c   :  { %v11099_v13 = vpack.c.bf16 %v8707_v37, %v8706_v63 }
0x25a2   :  { %11101 = vmatpush3.bf16.xpose.msk.msra.mxu1 %vm17830_vm5, %v11099_v13 }
0x25a3   :  { %11102 = vmatprep.subr.bf16.mxu1 %v12620_v45 }
0x25ad   :  { %v8590_v60 = vpop.xlane.xlu0 %8589 }
0x25ae   :  { %v8620_v34 = vmul.f32 0.03125, %v8590_v60 }
0x25af   :  { %v8593_v3 = vpop.xlane.xlu1 %8592 }
0x25b0   :  { %v8636_v31 = vadd.f32 1e-05, %v8620_v34  ;;  %v8621_v0 = vmul.f32 0.03125, %v8593_v3 }
0x25b1   :  { %v8596_v27 = vpop.xlane.xlu0 %8595 }
0x25b2   :  { %12514 = vrsqrt.f32 %v8636_v31  ;;  %v8637_v7 = vadd.f32 1e-05, %v8621_v0  ;;  %v8622_v35 = vmul.f32 0.03125, %v8596_v27 }
0x25b3   :  { %v8599_v50 = vpop.xlane.xlu1 %8598 }
0x25b4   :  { %12516 = vrsqrt.f32 %v8637_v7  ;;  %v8638_v20 = vadd.f32 1e-05, %v8622_v35  ;;  %v8623_v16 = vmul.f32 0.03125, %v8599_v50 }
0x25b6   :  { %v8639_v59 = vadd.f32 1e-05, %v8623_v16  ;;  %12518 = vrsqrt.f32 %v8638_v20 }
0x25b8   :  { %12520 = vrsqrt.f32 %v8639_v59 }
0x25bc   :  { %v12515_v54 = vpop.eup %12514 }
0x25bd   :  { %v8668_v44 = vmul.f32 %v12515_v54, %v17769_v48 }
0x25be   :  { %v12517_v28 = vpop.eup %12516  ;;  %v8602_v40 = vpop.xlane.xlu0 %8601 }
0x25bf   :  { %v8669_v52 = vmul.f32 %v12517_v28, %v17772_v58  ;;  %v8624_v36 = vmul.f32 0.03125, %v8602_v40  ;;  %v8688_v18 = vmul.f32 %v17816_v41, %v8668_v44 }
0x25c0   :  { %v8605_v21 = vpop.xlane.xlu1 %8604  ;;  %v12519_v22 = vpop.eup %12518 }
0x25c1   :  { %v8689_v51 = vmul.f32 %v17816_v41, %v8669_v52  ;;  %v8640_v62 = vadd.f32 1e-05, %v8624_v36  ;;  %v8625_v14 = vmul.f32 0.03125, %v8605_v21  ;;  %v8670_v48 = vmul.f32 %v12519_v22, %v17777_v1 }
0x25c2   :  { %v12521_v43 = vpop.eup %12520  ;;  %v8608_v24 = vpop.xlane.xlu0 %8607  ;;  %v8708_v58 = vadd.f32 %v17821_v26, %v8688_v18 }
0x25c3   :  { %v8671_v39 = vmul.f32 %v12521_v43, %v17783_v57  ;;  %12522 = vrsqrt.f32 %v8640_v62  ;;  %v8641_v5 = vadd.f32 1e-05, %v8625_v14  ;;  %v8626_v2 = vmul.f32 0.03125, %v8608_v24 }
0x25c4   :  { %v8611_v46 = vpop.xlane.xlu1 %8610  ;;  %v8709_v4 = vadd.f32 %v17821_v26, %v8689_v51  ;;  %v8690_v29 = vmul.f32 %v17816_v41, %v8670_v48 }
0x25c5   :  { %12524 = vrsqrt.f32 %v8641_v5  ;;  %v8627_v61 = vmul.f32 0.03125, %v8611_v46  ;;  %v8691_v11 = vmul.f32 %v17816_v41, %v8671_v39  ;;  %v8642_v49 = vadd.f32 1e-05, %v8626_v2 }
0x25c6   :  { %v11103_v17 = vpack.c.bf16 %v8709_v4, %v8708_v58  ;;  %v8710_v57 = vadd.f32 %v17821_v26, %v8690_v29 }
0x25c7   :  { %v8643_v10 = vadd.f32 1e-05, %v8627_v61  ;;  %12526 = vrsqrt.f32 %v8642_v49  ;;  %v8711_v1 = vadd.f32 %v17821_v26, %v8691_v11 }
0x25c8   :  { %11105 = vmatpush3.bf16.xpose.msk.msra.mxu1 %vm17830_vm5, %v11103_v17 }
0x25c9   :  { %12528 = vrsqrt.f32 %v8643_v10  ;;  %11106 = vmatprep.subr.bf16.mxu1 %v12620_v45  ;;  %v11107_v55 = vpack.c.bf16 %v8711_v1, %v8710_v57 }
0x25cd   :  { %v12523_v19 = vpop.eup %12522 }
0x25ce   :  { %v8672_v38 = vmul.f32 %v12523_v19, %v17793_v42 }
0x25cf   :  { %v12525_v12 = vpop.eup %12524 }
0x25d0   :  { %v8692_v6 = vmul.f32 %v17816_v41, %v8672_v38  ;;  %v8673_v47 = vmul.f32 %v12525_v12, %v17796_v15  ;;  %11109 = vmatpush3.bf16.xpose.msk.msra.mxu1 %vm17830_vm5, %v11107_v55 }
0x25d1   :  { %11110 = vmatprep.subr.bf16.mxu1 %v12620_v45  ;;  %v12527_v53 = vpop.eup %12526 }
0x25d2   :  { %v8693_v32 = vmul.f32 %v17816_v41, %v8673_v47  ;;  %v8674_v56 = vmul.f32 %v12527_v53, %v17801_v33  ;;  %v8712_v42 = vadd.f32 %v17821_v26, %v8692_v6 }
0x25d3   :  { %v12529_v23 = vpop.eup %12528 }
0x25d4   :  { %v8675_v30 = vmul.f32 %v12529_v23, %v17807_v8  ;;  %v8713_v25 = vadd.f32 %v17821_v26, %v8693_v32  ;;  %v8694_v63 = vmul.f32 %v17816_v41, %v8674_v56  ;;  %v8716_v8 = vld [vmem:[#allocation5 + $0xe] sm:$0x1] }
0x25d6   :  { %v8695_v37 = vmul.f32 %v17816_v41, %v8675_v30  ;;  %v11111_v15 = vpack.c.bf16 %v8713_v25, %v8712_v42  ;;  %v8714_v33 = vadd.f32 %v17821_v26, %v8694_v63 }
0x25d8   :  { %11113 = vmatpush3.bf16.xpose.msk.msra.mxu1 %vm17830_vm5, %v11111_v15  ;;  %v8715_v13 = vadd.f32 %v17821_v26, %v8695_v37 }
0x25d9   :  { %11114 = vmatprep.subr.bf16.mxu1 %v12620_v45 }
0x25da   :  { %v11115_v60 = vpack.c.bf16 %v8715_v13, %v8714_v33 }
0x25e0   :  { %11117 = vmatpush3.bf16.xpose.msk.msra.mxu1 %vm17830_vm5, %v11115_v60 }
0x25e7   :  { %10700 = vmatmul.mubr.msk.f32.vlgmr.msra.gmra.mrb[192].mxu1 %vm243_vm2, %v8716_v8 }
0x26ba   :  { %v8834_v41 = vpop.f32.mrb[192].mxu1 }
0x26bb   :  { %8838 = vst [vmem:[#allocation7] sm:$0x1] %v8834_v41  ;;  %v10701_v34 = vpop.f32.mrb[193].mxu1 }
0x26bc   :  { %12585 = shalt.err (!%p12582_p6)
}
0x26bd   :  { %s12586_s24 = scalar_lea.hbm %s17921_s11, 16 }
0x26be   :  { %p12587_p7 = scmp.ne.s32.totalorder %s17921_s11, %s12586_s24  ;;  %p12590_p8 = scmp.lt.u32.totalorder %s12586_s24, %s17921_s11 }
0x26c0   :  { %p12592_p9 = pnand %p12590_p8, %p12587_p7 }
0x26c2   :  { %12595 = shalt.err (!%p12592_p9)
}
0x26c3   :  { %8848 = dma.vmem_to_hbm [thread:$0]  %s8846_s10, 16, %s17921_s11, [#allocation4]  }
0x26c4   :  { %12600 = dma.done.wait [#allocation4], 16  }
0x26c5   :  { %12601 = vsyncadd [#allocation4], 4294967280 }
0x26c6   :  { %8852 = vsyncpa [#allocation3], 1 }
0x26c7   :  { %8853 = vsyncpa [#allocation6], 1 }
0x26c8   :  { %8854 = vsyncpa [#allocation4], 1 }

</bundles_post_ra>
